<compile_context>
chip_gen: v7x
topology: tpu7x:2x2x1
jax: 0.10.0
libtpu: 0.0.40
codegen_flags: <defaults>
</compile_context>

<pallas_src>
import functools

import jax
import jax.numpy as jnp
from jax.experimental import pallas as pl
from jax.experimental.pallas import tpu as pltpu


def _rup(x, m):
    return (x + m - 1) // m * m


# ------------------------------------------------------------------
# Single-block GEMM kernel:
#   Y = act_out(A @ B + bias)   (bf16/f32 out, f32 MXU accumulation)
# plus optional per-column sum / sum-of-squares of the pre-activation result
# (rows masked against M padding) for fused BatchNorm batch statistics.
# ------------------------------------------------------------------
def _gemm_kernel(a_ref, b_ref, bias_ref, *out_refs, m_real, out_act, want_stats):
    if want_stats:
        y_ref, sum_ref, sq_ref = out_refs
    else:
        (y_ref,) = out_refs

    y = jnp.dot(a_ref[...], b_ref[...], preferred_element_type=jnp.float32)
    y = y + bias_ref[...]

    if want_stats:
        if m_real < y.shape[0]:            # mask only if M was padded (static)
            rows = jax.lax.broadcasted_iota(jnp.int32, y.shape, 0)
            ym = jnp.where(rows < m_real, y, 0.0)
        else:
            ym = y
        sum_ref[...] = jnp.sum(ym, axis=0, keepdims=True)
        sq_ref[...] = jnp.sum(ym * ym, axis=0, keepdims=True)

    if out_act == "tanh":
        y = jnp.tanh(y)
    y_ref[...] = y.astype(y_ref.dtype)


def gemm_bias(A, B, bias, *, out_act="none", want_stats=True,
              out_dtype=jnp.bfloat16):
    """A: (M, K), B: (K, N), bias: (N,).  Returns Y (and col stats if asked)."""
    M, K = A.shape
    N = B.shape[1]
    Mp = max(8, _rup(M, 8))
    Kp = max(128, _rup(K, 128))
    Np = max(128, _rup(N, 128))

    A = A.astype(jnp.bfloat16)
    B = B.astype(jnp.bfloat16)
    if (Mp, Kp) != (M, K):
        A = jnp.pad(A, ((0, Mp - M), (0, Kp - K)))
    if (Kp, Np) != (K, N):
        B = jnp.pad(B, ((0, Kp - K), (0, Np - N)))
    bias_p = bias.astype(jnp.float32).reshape(1, N)
    if Np != N:
        bias_p = jnp.pad(bias_p, ((0, 0), (0, Np - N)))

    if want_stats:
        out_shape = (jax.ShapeDtypeStruct((Mp, Np), out_dtype),
                     jax.ShapeDtypeStruct((1, Np), jnp.float32),
                     jax.ShapeDtypeStruct((1, Np), jnp.float32))
        out_specs = (pl.BlockSpec((Mp, Np), lambda i: (0, 0)),
                     pl.BlockSpec((1, Np), lambda i: (0, 0)),
                     pl.BlockSpec((1, Np), lambda i: (0, 0)))
    else:
        out_shape = jax.ShapeDtypeStruct((Mp, Np), out_dtype)
        out_specs = pl.BlockSpec((Mp, Np), lambda i: (0, 0))

    res = pl.pallas_call(
        functools.partial(_gemm_kernel, m_real=M, out_act=out_act,
                          want_stats=want_stats),
        out_shape=out_shape,
        grid=(1,),
        in_specs=[pl.BlockSpec((Mp, Kp), lambda i: (0, 0)),
                  pl.BlockSpec((Kp, Np), lambda i: (0, 0)),
                  pl.BlockSpec((1, Np), lambda i: (0, 0))],
        out_specs=out_specs,
        compiler_params=pltpu.CompilerParams(
            dimension_semantics=("arbitrary",)),
    )(A, B, bias_p)

    if want_stats:
        y, s, sq = res
        return y[:M, :N], s[0, :N], sq[0, :N]
    return res[:M, :N]


# ------------------------------------------------------------------
# Convolution lowerings (im2col + pre-activation fused in XLA glue;
# all matrix math in the Pallas GEMM above).
# ------------------------------------------------------------------
def conv2d(x, w, b, ksize, stride, pad, *, want_stats=True):
    """x: NHWC (already pre-activated, f32/bf16). w: (Cout, Cin, k, k) PyTorch."""
    N, H, W, C = x.shape
    Cout = w.shape[0]
    OH = (H + 2 * pad - ksize) // stride + 1
    OW = (W + 2 * pad - ksize) // stride + 1
    xb = x.astype(jnp.bfloat16)
    xp = jnp.pad(xb, ((0, 0), (pad, pad), (pad, pad), (0, 0))) if pad else xb
    taps = [xp[:, ky:ky + stride * OH:stride, kx:kx + stride * OW:stride, :]
            for ky in range(ksize) for kx in range(ksize)]
    patches = jnp.stack(taps, axis=3)                       # (N,OH,OW,k*k,C)
    A = patches.reshape(N * OH * OW, ksize * ksize * C)
    Bm = jnp.transpose(w, (2, 3, 1, 0)).reshape(ksize * ksize * C, Cout)
    if want_stats:
        y, s, sq = gemm_bias(A, Bm, b, want_stats=True)
        return y.reshape(N, OH, OW, Cout), s, sq, N * OH * OW
    y = gemm_bias(A, Bm, b, want_stats=False)
    return y.reshape(N, OH, OW, Cout)


# (py, dy) -> ky mapping for ConvTranspose2d(k=4, s=2, p=1); dy is the offset
# into the 1-padded input.  Unmapped (py, dy) pairs contribute zero weights.
_CT4_KY = {0: {0: 3, 1: 1}, 1: {1: 2, 2: 0}}


def _convT4_weight_matrix(w):
    """w: (Cin, Cout, 4, 4) -> (9*Cin, 4*Cout) for the superset-tap GEMM."""
    Cin, Cout = w.shape[0], w.shape[1]
    cols = []
    for py in (0, 1):
        for px in (0, 1):
            taps = []
            for dy in range(3):
                for dx in range(3):
                    ky = _CT4_KY[py].get(dy)
                    kx = _CT4_KY[px].get(dx)
                    if ky is None or kx is None:
                        taps.append(jnp.zeros((Cin, Cout), w.dtype))
                    else:
                        taps.append(w[:, :, ky, kx])
            cols.append(jnp.stack(taps, axis=0).reshape(9 * Cin, Cout))
    return jnp.concatenate(cols, axis=1)                    # (9*Cin, 4*Cout)


def conv_transpose4x4(x, w, b):
    """ConvTranspose2d(k=4, s=2, p=1).  x: NHWC (already ReLU'd concat).
    Shared 3x3-superset im2col; the 4 sub-pixel phases are packed into N."""
    N, H, W, C = x.shape
    Cin, Cout = w.shape[0], w.shape[1]
    xb = x.astype(jnp.bfloat16)
    xp = jnp.pad(xb, ((0, 0), (1, 1), (1, 1), (0, 0)))
    taps = [xp[:, dy:dy + H, dx:dx + W, :] for dy in range(3) for dx in range(3)]
    patches = jnp.stack(taps, axis=3)                       # (N,H,W,9,C)
    A = patches.reshape(N * H * W, 9 * C)
    Bm = _convT4_weight_matrix(w)                           # (9*Cin, 4*Cout)
    bias4 = jnp.tile(b, 4)
    y, s, sq = gemm_bias(A, Bm, bias4, want_stats=True)     # (M, 4*Cout)
    # interleave phases (py, px) into the spatial dims
    y = y.reshape(N, H, W, 2, 2, Cout)
    y = jnp.transpose(y, (0, 1, 3, 2, 4, 5)).reshape(N, 2 * H, 2 * W, Cout)
    s = s.reshape(4, Cout).sum(axis=0)
    sq = sq.reshape(4, Cout).sum(axis=0)
    return y, s, sq, N * 2 * H * 2 * W


def conv_transpose2x2(x, w, b, *, out_act="none"):
    """ConvTranspose2d(k=2, s=2, p=0): one pixel-shuffle GEMM (Cin x 4*Cout)."""
    N, H, W, C = x.shape
    Cin, Cout = w.shape[0], w.shape[1]
    A = x.astype(jnp.bfloat16).reshape(N * H * W, C)
    Bm = jnp.transpose(w, (0, 2, 3, 1)).reshape(Cin, 4 * Cout)
    bias4 = jnp.tile(b, 4)
    y = gemm_bias(A, Bm, bias4, out_act=out_act, want_stats=False,
                  out_dtype=jnp.float32)
    y = y.reshape(N, H, W, 2, 2, Cout)
    y = jnp.transpose(y, (0, 1, 3, 2, 4, 5)).reshape(N, 2 * H, 2 * W, Cout)
    return y


def bn_scale_shift(col_sum, col_sq, m_total, gamma, beta, eps=1e-5):
    mean = col_sum / m_total
    var = jnp.maximum(col_sq / m_total - mean * mean, 0.0)   # biased, clamped
    scale = gamma * jax.lax.rsqrt(var + eps)
    shift = beta - mean * scale
    return scale, shift


# ------------------------------------------------------------------
# pix2pixG_32
# ------------------------------------------------------------------
def init_params(key):
    p = {}
    keys = iter(jax.random.split(key, 32))

    def conv_layer(name, cin, cout, k):
        fan_out = cout * k * k
        p[name + "_w"] = jax.random.normal(next(keys), (cout, cin, k, k),
                                           jnp.float32) * jnp.sqrt(2.0 / fan_out)
        p[name + "_b"] = jnp.zeros((cout,), jnp.float32)

    def convT_layer(name, cin, cout, k):
        fan_in = cout * k * k   # PyTorch fan_in for (Cin, Cout, k, k) layout
        p[name + "_w"] = jax.random.normal(next(keys), (cin, cout, k, k),
                                           jnp.float32) * jnp.sqrt(2.0 / fan_in)
        bound = 1.0 / jnp.sqrt(fan_in)
        p[name + "_b"] = jax.random.uniform(next(keys), (cout,), jnp.float32,
                                            -bound, bound)

    def bn_layer(name, c):
        p[name + "_g"] = jnp.ones((c,), jnp.float32)
        p[name + "_be"] = jnp.zeros((c,), jnp.float32)

    conv_layer("d1", 3, 16, 2)
    for name, cin, cout in [("d2", 16, 32), ("d3", 32, 64),
                            ("d4", 64, 128), ("d8", 128, 128)]:
        conv_layer(name, cin, cout, 4)
        bn_layer(name, cout)
    for name, cin, cout in [("u1", 128, 128), ("u2", 256, 64),
                            ("u3", 128, 32), ("u4", 64, 16)]:
        convT_layer(name, cin, cout, 4)
        bn_layer(name, cout)
    convT_layer("last", 32, 3, 2)
    return p


def pix2pix_forward(params, x_nchw):
    p = params
    x = jnp.transpose(x_nchw, (0, 2, 3, 1)).astype(jnp.float32)   # NCHW -> NHWC

    # Each feature map is carried as (raw conv output bf16, BN scale, BN shift);
    # the affine + the consumer's activation are applied in f32 as part of the
    # next layer's im2col construction (exact: padding happens after, act(0)=0).
    def pre(src, act):
        y, scale, shift = src
        v = y.astype(jnp.float32) * scale + shift
        if act == "lrelu":
            v = jnp.where(v >= 0, v, 0.2 * v)
        elif act == "relu":
            v = jnp.maximum(v, 0.0)
        return v

    def ident(c):
        return (jnp.ones((c,), jnp.float32), jnp.zeros((c,), jnp.float32))

    def down(src, name):
        xin = pre(src, "lrelu")
        y, s, sq, m = conv2d(xin, p[name + "_w"], p[name + "_b"], 4, 2, 1)
        sc, sh = bn_scale_shift(s, sq, m, p[name + "_g"], p[name + "_be"])
        return (y, sc, sh)

    def up(srcs, name):
        # TODO(synk): Dropout(0.5) in up_2/up_3 treated as identity (see header).
        xin = jnp.concatenate([pre(s, "relu") for s in srcs], axis=-1)
        y, s, sq, m = conv_transpose4x4(xin, p[name + "_w"], p[name + "_b"])
        sc, sh = bn_scale_shift(s, sq, m, p[name + "_g"], p[name + "_be"])
        return (y, sc, sh)

    # down_1: plain Conv2d(3, 16, 2, 2) — no preceding activation, no BN.
    d1_y = conv2d(x, p["d1_w"], p["d1_b"], 2, 2, 0, want_stats=False)
    d1 = (d1_y,) + ident(16)

    d2 = down(d1, "d2")
    d3 = down(d2, "d3")
    d4 = down(d3, "d4")
    d8 = down(d4, "d8")

    u1 = up([d8], "u1")
    u2 = up([u1, d4], "u2")
    u3 = up([u2, d3], "u3")
    u4 = up([u3, d2], "u4")

    # last_Conv: ConvTranspose2d(32, 3, 2, 2) + Tanh on cat([up_4, down_1]);
    # no activation before it in the reference; tanh fused in the GEMM epilogue.
    xin = jnp.concatenate([pre(u4, "none"), pre(d1, "none")], axis=-1)
    out = conv_transpose2x2(xin, p["last_w"], p["last_b"], out_act="tanh")
    return jnp.transpose(out, (0, 3, 1, 2))                       # NHWC -> NCHW


if __name__ == "__main__":
    root = jax.random.PRNGKey(0)
    kx, kp = jax.random.split(root)
    x = jax.random.normal(kx, (2, 3, 32, 32), jnp.float32)
    params = init_params(kp)

    fwd = jax.jit(pix2pix_forward)
    y = jax.block_until_ready(fwd(params, x))

    assert y.shape == (2, 3, 32, 32)
    assert bool(jnp.all(jnp.isfinite(y)))
    assert bool(jnp.all(jnp.abs(y) <= 1.0 + 1e-5))   # tanh output range
    print("KERNEL_OK")
</pallas_src>

<mosaic_0001>
module attributes {stable_mosaic.version = 11 : i64} {
  func.func @_gemm_kernel(%arg0: i32, %arg1: memref<512x128xbf16, #tpu.memory_space<vmem>>, %arg2: memref<128x128xbf16, #tpu.memory_space<vmem>>, %arg3: memref<1x128xf32, #tpu.memory_space<vmem>>, %arg4: memref<512x128xbf16, #tpu.memory_space<vmem>>) attributes {dimension_semantics = [#tpu.dimension_semantics<arbitrary>], iteration_bounds = array<i64: 1>, scalar_prefetch = 0 : i64, scratch_operands = 0 : i64, tpu.core_type = #tpu.core_type<tc>, window_params = [{pipeline_mode = #tpu.pipeline_mode<synchronous>, transform_indices = @transform_0, window_bounds = array<i64: 512, 128>}, {pipeline_mode = #tpu.pipeline_mode<synchronous>, transform_indices = @transform_1, window_bounds = array<i64: 128, 128>}, {pipeline_mode = #tpu.pipeline_mode<synchronous>, transform_indices = @transform_2, window_bounds = array<i64: 1, 128>}, {pipeline_mode = #tpu.pipeline_mode<synchronous>, transform_indices = @transform_3, window_bounds = array<i64: 512, 128>}]} {
    %c0 = arith.constant 0 : index
    %c0_0 = arith.constant 0 : index
    %0 = vector.load %arg1[%c0, %c0_0] : memref<512x128xbf16, #tpu.memory_space<vmem>>, vector<512x128xbf16>
    %c0_1 = arith.constant 0 : index
    %c0_2 = arith.constant 0 : index
    %1 = vector.load %arg2[%c0_1, %c0_2] : memref<128x128xbf16, #tpu.memory_space<vmem>>, vector<128x128xbf16>
    %cst = arith.constant dense<0.000000e+00> : vector<512x128xf32>
    %2 = tpu.matmul %0, %1, %cst {dimension_numbers = #tpu.dot_dimension_numbers<[1], [0], [0], [1], [0, 0, 1, 1], [], []>} : vector<512x128xbf16>, vector<128x128xbf16>, vector<512x128xf32> -> vector<512x128xf32>
    %c0_3 = arith.constant 0 : index
    %c0_4 = arith.constant 0 : index
    %3 = vector.load %arg3[%c0_3, %c0_4] : memref<1x128xf32, #tpu.memory_space<vmem>>, vector<1x128xf32>
    %4 = vector.broadcast %3 : vector<1x128xf32> to vector<512x128xf32>
    %5 = arith.addf %2, %4 : vector<512x128xf32>
    %6 = arith.truncf %5 : vector<512x128xf32> to vector<512x128xbf16>
    %c0_5 = arith.constant 0 : index
    %c0_6 = arith.constant 0 : index
    %7 = vector.load %arg4[%c0_5, %c0_6] : memref<512x128xbf16, #tpu.memory_space<vmem>>, vector<512x128xbf16>
    tpu.vector_store %arg4[%c0_5, %c0_6], %6 {strides = array<i32>} : memref<512x128xbf16, #tpu.memory_space<vmem>>, vector<512x128xbf16>,
    return
  }
  func.func @transform_0(%arg0: i32) -> (i32, i32) {
    %c0_i32 = arith.constant 0 : i32
    %c0_i32_0 = arith.constant 0 : i32
    %c0_i32_1 = arith.constant 0 : i32
    return %c0_i32, %c0_i32_0 : i32, i32
  }
  func.func @transform_1(%arg0: i32) -> (i32, i32) {
    %c0_i32 = arith.constant 0 : i32
    %c0_i32_0 = arith.constant 0 : i32
    %c0_i32_1 = arith.constant 0 : i32
    return %c0_i32, %c0_i32_0 : i32, i32
  }
  func.func @transform_2(%arg0: i32) -> (i32, i32) {
    %c0_i32 = arith.constant 0 : i32
    %c0_i32_0 = arith.constant 0 : i32
    %c0_i32_1 = arith.constant 0 : i32
    return %c0_i32, %c0_i32_0 : i32, i32
  }
  func.func @transform_3(%arg0: i32) -> (i32, i32) {
    %c0_i32 = arith.constant 0 : i32
    %c0_i32_0 = arith.constant 0 : i32
    %c0_i32_1 = arith.constant 0 : i32
    return %c0_i32, %c0_i32_0 : i32, i32
  }
}

module attributes {stable_mosaic.version = 11 : i64} {
  func.func @_gemm_kernel(%arg0: i32, %arg1: memref<128x256xbf16, #tpu.memory_space<vmem>>, %arg2: memref<256x128xbf16, #tpu.memory_space<vmem>>, %arg3: memref<1x128xf32, #tpu.memory_space<vmem>>, %arg4: memref<128x128xbf16, #tpu.memory_space<vmem>>, %arg5: memref<1x128xf32, #tpu.memory_space<vmem>>, %arg6: memref<1x128xf32, #tpu.memory_space<vmem>>) attributes {dimension_semantics = [#tpu.dimension_semantics<arbitrary>], iteration_bounds = array<i64: 1>, scalar_prefetch = 0 : i64, scratch_operands = 0 : i64, tpu.core_type = #tpu.core_type<tc>, window_params = [{pipeline_mode = #tpu.pipeline_mode<synchronous>, transform_indices = @transform_0, window_bounds = array<i64: 128, 256>}, {pipeline_mode = #tpu.pipeline_mode<synchronous>, transform_indices = @transform_1, window_bounds = array<i64: 256, 128>}, {pipeline_mode = #tpu.pipeline_mode<synchronous>, transform_indices = @transform_2, window_bounds = array<i64: 1, 128>}, {pipeline_mode = #tpu.pipeline_mode<synchronous>, transform_indices = @transform_3, window_bounds = array<i64: 128, 128>}, {pipeline_mode = #tpu.pipeline_mode<synchronous>, transform_indices = @transform_4, window_bounds = array<i64: 1, 128>}, {pipeline_mode = #tpu.pipeline_mode<synchronous>, transform_indices = @transform_5, window_bounds = array<i64: 1, 128>}]} {
    %c0 = arith.constant 0 : index
    %c0_0 = arith.constant 0 : index
    %0 = vector.load %arg1[%c0, %c0_0] : memref<128x256xbf16, #tpu.memory_space<vmem>>, vector<128x256xbf16>
    %c0_1 = arith.constant 0 : index
    %c0_2 = arith.constant 0 : index
    %1 = vector.load %arg2[%c0_1, %c0_2] : memref<256x128xbf16, #tpu.memory_space<vmem>>, vector<256x128xbf16>
    %cst = arith.constant dense<0.000000e+00> : vector<128x128xf32>
    %2 = tpu.matmul %0, %1, %cst {dimension_numbers = #tpu.dot_dimension_numbers<[1], [0], [0], [1], [0, 0, 1, 1], [], []>} : vector<128x256xbf16>, vector<256x128xbf16>, vector<128x128xf32> -> vector<128x128xf32>
    %c0_3 = arith.constant 0 : index
    %c0_4 = arith.constant 0 : index
    %3 = vector.load %arg3[%c0_3, %c0_4] : memref<1x128xf32, #tpu.memory_space<vmem>>, vector<1x128xf32>
    %4 = vector.broadcast %3 : vector<1x128xf32> to vector<128x128xf32>
    %5 = arith.addf %2, %4 : vector<128x128xf32>
    %cst_5 = arith.constant dense<0.000000e+00> : vector<128xf32>
    %6 = vector.multi_reduction <add>, %5, %cst_5 [0] : vector<128x128xf32> to vector<128xf32>
    %7 = vector.shape_cast %6 : vector<128xf32> to vector<1x128xf32>
    %c0_6 = arith.constant 0 : index
    %c0_7 = arith.constant 0 : index
    %8 = vector.load %arg5[%c0_6, %c0_7] : memref<1x128xf32, #tpu.memory_space<vmem>>, vector<1x128xf32>
    tpu.vector_store %arg5[%c0_6, %c0_7], %7 {strides = array<i32>} : memref<1x128xf32, #tpu.memory_space<vmem>>, vector<1x128xf32>,
    %9 = arith.mulf %5, %5 : vector<128x128xf32>
    %cst_8 = arith.constant dense<0.000000e+00> : vector<128xf32>
    %10 = vector.multi_reduction <add>, %9, %cst_8 [0] : vector<128x128xf32> to vector<128xf32>
    %11 = vector.shape_cast %10 : vector<128xf32> to vector<1x128xf32>
    %c0_9 = arith.constant 0 : index
    %c0_10 = arith.constant 0 : index
    %12 = vector.load %arg6[%c0_9, %c0_10] : memref<1x128xf32, #tpu.memory_space<vmem>>, vector<1x128xf32>
    tpu.vector_store %arg6[%c0_9, %c0_10], %11 {strides = array<i32>} : memref<1x128xf32, #tpu.memory_space<vmem>>, vector<1x128xf32>,
    %13 = arith.truncf %5 : vector<128x128xf32> to vector<128x128xbf16>
    %c0_11 = arith.constant 0 : index
    %c0_12 = arith.constant 0 : index
    %14 = vector.load %arg4[%c0_11, %c0_12] : memref<128x128xbf16, #tpu.memory_space<vmem>>, vector<128x128xbf16>
    tpu.vector_store %arg4[%c0_11, %c0_12], %13 {strides = array<i32>} : memref<128x128xbf16, #tpu.memory_space<vmem>>, vector<128x128xbf16>,
    return
  }
  func.func @transform_0(%arg0: i32) -> (i32, i32) {
    %c0_i32 = arith.constant 0 : i32
    %c0_i32_0 = arith.constant 0 : i32
    %c0_i32_1 = arith.constant 0 : i32
    return %c0_i32, %c0_i32_0 : i32, i32
  }
  func.func @transform_1(%arg0: i32) -> (i32, i32) {
    %c0_i32 = arith.constant 0 : i32
    %c0_i32_0 = arith.constant 0 : i32
    %c0_i32_1 = arith.constant 0 : i32
    return %c0_i32, %c0_i32_0 : i32, i32
  }
  func.func @transform_2(%arg0: i32) -> (i32, i32) {
    %c0_i32 = arith.constant 0 : i32
    %c0_i32_0 = arith.constant 0 : i32
    %c0_i32_1 = arith.constant 0 : i32
    return %c0_i32, %c0_i32_0 : i32, i32
  }
  func.func @transform_3(%arg0: i32) -> (i32, i32) {
    %c0_i32 = arith.constant 0 : i32
    %c0_i32_0 = arith.constant 0 : i32
    %c0_i32_1 = arith.constant 0 : i32
    return %c0_i32, %c0_i32_0 : i32, i32
  }
  func.func @transform_4(%arg0: i32) -> (i32, i32) {
    %c0_i32 = arith.constant 0 : i32
    %c0_i32_0 = arith.constant 0 : i32
    %c0_i32_1 = arith.constant 0 : i32
    return %c0_i32, %c0_i32_0 : i32, i32
  }
  func.func @transform_5(%arg0: i32) -> (i32, i32) {
    %c0_i32 = arith.constant 0 : i32
    %c0_i32_0 = arith.constant 0 : i32
    %c0_i32_1 = arith.constant 0 : i32
    return %c0_i32, %c0_i32_0 : i32, i32
  }
}

module attributes {stable_mosaic.version = 11 : i64} {
  func.func @_gemm_kernel(%arg0: i32, %arg1: memref<32x512xbf16, #tpu.memory_space<vmem>>, %arg2: memref<512x128xbf16, #tpu.memory_space<vmem>>, %arg3: memref<1x128xf32, #tpu.memory_space<vmem>>, %arg4: memref<32x128xbf16, #tpu.memory_space<vmem>>, %arg5: memref<1x128xf32, #tpu.memory_space<vmem>>, %arg6: memref<1x128xf32, #tpu.memory_space<vmem>>) attributes {dimension_semantics = [#tpu.dimension_semantics<arbitrary>], iteration_bounds = array<i64: 1>, scalar_prefetch = 0 : i64, scratch_operands = 0 : i64, tpu.core_type = #tpu.core_type<tc>, window_params = [{pipeline_mode = #tpu.pipeline_mode<synchronous>, transform_indices = @transform_0, window_bounds = array<i64: 32, 512>}, {pipeline_mode = #tpu.pipeline_mode<synchronous>, transform_indices = @transform_1, window_bounds = array<i64: 512, 128>}, {pipeline_mode = #tpu.pipeline_mode<synchronous>, transform_indices = @transform_2, window_bounds = array<i64: 1, 128>}, {pipeline_mode = #tpu.pipeline_mode<synchronous>, transform_indices = @transform_3, window_bounds = array<i64: 32, 128>}, {pipeline_mode = #tpu.pipeline_mode<synchronous>, transform_indices = @transform_4, window_bounds = array<i64: 1, 128>}, {pipeline_mode = #tpu.pipeline_mode<synchronous>, transform_indices = @transform_5, window_bounds = array<i64: 1, 128>}]} {
    %c0 = arith.constant 0 : index
    %c0_0 = arith.constant 0 : index
    %0 = vector.load %arg1[%c0, %c0_0] : memref<32x512xbf16, #tpu.memory_space<vmem>>, vector<32x512xbf16>
    %c0_1 = arith.constant 0 : index
    %c0_2 = arith.constant 0 : index
    %1 = vector.load %arg2[%c0_1, %c0_2] : memref<512x128xbf16, #tpu.memory_space<vmem>>, vector<512x128xbf16>
    %cst = arith.constant dense<0.000000e+00> : vector<32x128xf32>
    %2 = tpu.matmul %0, %1, %cst {dimension_numbers = #tpu.dot_dimension_numbers<[1], [0], [0], [1], [0, 0, 1, 1], [], []>} : vector<32x512xbf16>, vector<512x128xbf16>, vector<32x128xf32> -> vector<32x128xf32>
    %c0_3 = arith.constant 0 : index
    %c0_4 = arith.constant 0 : index
    %3 = vector.load %arg3[%c0_3, %c0_4] : memref<1x128xf32, #tpu.memory_space<vmem>>, vector<1x128xf32>
    %4 = vector.broadcast %3 : vector<1x128xf32> to vector<32x128xf32>
    %5 = arith.addf %2, %4 : vector<32x128xf32>
    %cst_5 = arith.constant dense<0.000000e+00> : vector<128xf32>
    %6 = vector.multi_reduction <add>, %5, %cst_5 [0] : vector<32x128xf32> to vector<128xf32>
    %7 = vector.shape_cast %6 : vector<128xf32> to vector<1x128xf32>
    %c0_6 = arith.constant 0 : index
    %c0_7 = arith.constant 0 : index
    %8 = vector.load %arg5[%c0_6, %c0_7] : memref<1x128xf32, #tpu.memory_space<vmem>>, vector<1x128xf32>
    tpu.vector_store %arg5[%c0_6, %c0_7], %7 {strides = array<i32>} : memref<1x128xf32, #tpu.memory_space<vmem>>, vector<1x128xf32>,
    %9 = arith.mulf %5, %5 : vector<32x128xf32>
    %cst_8 = arith.constant dense<0.000000e+00> : vector<128xf32>
    %10 = vector.multi_reduction <add>, %9, %cst_8 [0] : vector<32x128xf32> to vector<128xf32>
    %11 = vector.shape_cast %10 : vector<128xf32> to vector<1x128xf32>
    %c0_9 = arith.constant 0 : index
    %c0_10 = arith.constant 0 : index
    %12 = vector.load %arg6[%c0_9, %c0_10] : memref<1x128xf32, #tpu.memory_space<vmem>>, vector<1x128xf32>
    tpu.vector_store %arg6[%c0_9, %c0_10], %11 {strides = array<i32>} : memref<1x128xf32, #tpu.memory_space<vmem>>, vector<1x128xf32>,
    %13 = arith.truncf %5 : vector<32x128xf32> to vector<32x128xbf16>
    %c0_11 = arith.constant 0 : index
    %c0_12 = arith.constant 0 : index
    %14 = vector.load %arg4[%c0_11, %c0_12] : memref<32x128xbf16, #tpu.memory_space<vmem>>, vector<32x128xbf16>
    tpu.vector_store %arg4[%c0_11, %c0_12], %13 {strides = array<i32>} : memref<32x128xbf16, #tpu.memory_space<vmem>>, vector<32x128xbf16>,
    return
  }
  func.func @transform_0(%arg0: i32) -> (i32, i32) {
    %c0_i32 = arith.constant 0 : i32
    %c0_i32_0 = arith.constant 0 : i32
    %c0_i32_1 = arith.constant 0 : i32
    return %c0_i32, %c0_i32_0 : i32, i32
  }
  func.func @transform_1(%arg0: i32) -> (i32, i32) {
    %c0_i32 = arith.constant 0 : i32
    %c0_i32_0 = arith.constant 0 : i32
    %c0_i32_1 = arith.constant 0 : i32
    return %c0_i32, %c0_i32_0 : i32, i32
  }
  func.func @transform_2(%arg0: i32) -> (i32, i32) {
    %c0_i32 = arith.constant 0 : i32
    %c0_i32_0 = arith.constant 0 : i32
    %c0_i32_1 = arith.constant 0 : i32
    return %c0_i32, %c0_i32_0 : i32, i32
  }
  func.func @transform_3(%arg0: i32) -> (i32, i32) {
    %c0_i32 = arith.constant 0 : i32
    %c0_i32_0 = arith.constant 0 : i32
    %c0_i32_1 = arith.constant 0 : i32
    return %c0_i32, %c0_i32_0 : i32, i32
  }
  func.func @transform_4(%arg0: i32) -> (i32, i32) {
    %c0_i32 = arith.constant 0 : i32
    %c0_i32_0 = arith.constant 0 : i32
    %c0_i32_1 = arith.constant 0 : i32
    return %c0_i32, %c0_i32_0 : i32, i32
  }
  func.func @transform_5(%arg0: i32) -> (i32, i32) {
    %c0_i32 = arith.constant 0 : i32
    %c0_i32_0 = arith.constant 0 : i32
    %c0_i32_1 = arith.constant 0 : i32
    return %c0_i32, %c0_i32_0 : i32, i32
  }
}

module attributes {stable_mosaic.version = 11 : i64} {
  func.func @_gemm_kernel(%arg0: i32, %arg1: memref<8x1024xbf16, #tpu.memory_space<vmem>>, %arg2: memref<1024x128xbf16, #tpu.memory_space<vmem>>, %arg3: memref<1x128xf32, #tpu.memory_space<vmem>>, %arg4: memref<8x128xbf16, #tpu.memory_space<vmem>>, %arg5: memref<1x128xf32, #tpu.memory_space<vmem>>, %arg6: memref<1x128xf32, #tpu.memory_space<vmem>>) attributes {dimension_semantics = [#tpu.dimension_semantics<arbitrary>], iteration_bounds = array<i64: 1>, scalar_prefetch = 0 : i64, scratch_operands = 0 : i64, tpu.core_type = #tpu.core_type<tc>, window_params = [{pipeline_mode = #tpu.pipeline_mode<synchronous>, transform_indices = @transform_0, window_bounds = array<i64: 8, 1024>}, {pipeline_mode = #tpu.pipeline_mode<synchronous>, transform_indices = @transform_1, window_bounds = array<i64: 1024, 128>}, {pipeline_mode = #tpu.pipeline_mode<synchronous>, transform_indices = @transform_2, window_bounds = array<i64: 1, 128>}, {pipeline_mode = #tpu.pipeline_mode<synchronous>, transform_indices = @transform_3, window_bounds = array<i64: 8, 128>}, {pipeline_mode = #tpu.pipeline_mode<synchronous>, transform_indices = @transform_4, window_bounds = array<i64: 1, 128>}, {pipeline_mode = #tpu.pipeline_mode<synchronous>, transform_indices = @transform_5, window_bounds = array<i64: 1, 128>}]} {
    %c0 = arith.constant 0 : index
    %c0_0 = arith.constant 0 : index
    %0 = vector.load %arg1[%c0, %c0_0] : memref<8x1024xbf16, #tpu.memory_space<vmem>>, vector<8x1024xbf16>
    %c0_1 = arith.constant 0 : index
    %c0_2 = arith.constant 0 : index
    %1 = vector.load %arg2[%c0_1, %c0_2] : memref<1024x128xbf16, #tpu.memory_space<vmem>>, vector<1024x128xbf16>
    %cst = arith.constant dense<0.000000e+00> : vector<8x128xf32>
    %2 = tpu.matmul %0, %1, %cst {dimension_numbers = #tpu.dot_dimension_numbers<[1], [0], [0], [1], [0, 0, 1, 1], [], []>} : vector<8x1024xbf16>, vector<1024x128xbf16>, vector<8x128xf32> -> vector<8x128xf32>
    %c0_3 = arith.constant 0 : index
    %c0_4 = arith.constant 0 : index
    %3 = vector.load %arg3[%c0_3, %c0_4] : memref<1x128xf32, #tpu.memory_space<vmem>>, vector<1x128xf32>
    %4 = vector.broadcast %3 : vector<1x128xf32> to vector<8x128xf32>
    %5 = arith.addf %2, %4 : vector<8x128xf32>
    %cst_5 = arith.constant dense<0.000000e+00> : vector<128xf32>
    %6 = vector.multi_reduction <add>, %5, %cst_5 [0] : vector<8x128xf32> to vector<128xf32>
    %7 = vector.shape_cast %6 : vector<128xf32> to vector<1x128xf32>
    %c0_6 = arith.constant 0 : index
    %c0_7 = arith.constant 0 : index
    %8 = vector.load %arg5[%c0_6, %c0_7] : memref<1x128xf32, #tpu.memory_space<vmem>>, vector<1x128xf32>
    tpu.vector_store %arg5[%c0_6, %c0_7], %7 {strides = array<i32>} : memref<1x128xf32, #tpu.memory_space<vmem>>, vector<1x128xf32>,
    %9 = arith.mulf %5, %5 : vector<8x128xf32>
    %cst_8 = arith.constant dense<0.000000e+00> : vector<128xf32>
    %10 = vector.multi_reduction <add>, %9, %cst_8 [0] : vector<8x128xf32> to vector<128xf32>
    %11 = vector.shape_cast %10 : vector<128xf32> to vector<1x128xf32>
    %c0_9 = arith.constant 0 : index
    %c0_10 = arith.constant 0 : index
    %12 = vector.load %arg6[%c0_9, %c0_10] : memref<1x128xf32, #tpu.memory_space<vmem>>, vector<1x128xf32>
    tpu.vector_store %arg6[%c0_9, %c0_10], %11 {strides = array<i32>} : memref<1x128xf32, #tpu.memory_space<vmem>>, vector<1x128xf32>,
    %13 = arith.truncf %5 : vector<8x128xf32> to vector<8x128xbf16>
    %c0_11 = arith.constant 0 : index
    %c0_12 = arith.constant 0 : index
    %14 = vector.load %arg4[%c0_11, %c0_12] : memref<8x128xbf16, #tpu.memory_space<vmem>>, vector<8x128xbf16>
    tpu.vector_store %arg4[%c0_11, %c0_12], %13 {strides = array<i32>} : memref<8x128xbf16, #tpu.memory_space<vmem>>, vector<8x128xbf16>,
    return
  }
  func.func @transform_0(%arg0: i32) -> (i32, i32) {
    %c0_i32 = arith.constant 0 : i32
    %c0_i32_0 = arith.constant 0 : i32
    %c0_i32_1 = arith.constant 0 : i32
    return %c0_i32, %c0_i32_0 : i32, i32
  }
  func.func @transform_1(%arg0: i32) -> (i32, i32) {
    %c0_i32 = arith.constant 0 : i32
    %c0_i32_0 = arith.constant 0 : i32
    %c0_i32_1 = arith.constant 0 : i32
    return %c0_i32, %c0_i32_0 : i32, i32
  }
  func.func @transform_2(%arg0: i32) -> (i32, i32) {
    %c0_i32 = arith.constant 0 : i32
    %c0_i32_0 = arith.constant 0 : i32
    %c0_i32_1 = arith.constant 0 : i32
    return %c0_i32, %c0_i32_0 : i32, i32
  }
  func.func @transform_3(%arg0: i32) -> (i32, i32) {
    %c0_i32 = arith.constant 0 : i32
    %c0_i32_0 = arith.constant 0 : i32
    %c0_i32_1 = arith.constant 0 : i32
    return %c0_i32, %c0_i32_0 : i32, i32
  }
  func.func @transform_4(%arg0: i32) -> (i32, i32) {
    %c0_i32 = arith.constant 0 : i32
    %c0_i32_0 = arith.constant 0 : i32
    %c0_i32_1 = arith.constant 0 : i32
    return %c0_i32, %c0_i32_0 : i32, i32
  }
  func.func @transform_5(%arg0: i32) -> (i32, i32) {
    %c0_i32 = arith.constant 0 : i32
    %c0_i32_0 = arith.constant 0 : i32
    %c0_i32_1 = arith.constant 0 : i32
    return %c0_i32, %c0_i32_0 : i32, i32
  }
}

module attributes {stable_mosaic.version = 11 : i64} {
  func.func @_gemm_kernel(%arg0: i32, %arg1: memref<8x2048xbf16, #tpu.memory_space<vmem>>, %arg2: memref<2048x128xbf16, #tpu.memory_space<vmem>>, %arg3: memref<1x128xf32, #tpu.memory_space<vmem>>, %arg4: memref<8x128xbf16, #tpu.memory_space<vmem>>, %arg5: memref<1x128xf32, #tpu.memory_space<vmem>>, %arg6: memref<1x128xf32, #tpu.memory_space<vmem>>) attributes {dimension_semantics = [#tpu.dimension_semantics<arbitrary>], iteration_bounds = array<i64: 1>, scalar_prefetch = 0 : i64, scratch_operands = 0 : i64, tpu.core_type = #tpu.core_type<tc>, window_params = [{pipeline_mode = #tpu.pipeline_mode<synchronous>, transform_indices = @transform_0, window_bounds = array<i64: 8, 2048>}, {pipeline_mode = #tpu.pipeline_mode<synchronous>, transform_indices = @transform_1, window_bounds = array<i64: 2048, 128>}, {pipeline_mode = #tpu.pipeline_mode<synchronous>, transform_indices = @transform_2, window_bounds = array<i64: 1, 128>}, {pipeline_mode = #tpu.pipeline_mode<synchronous>, transform_indices = @transform_3, window_bounds = array<i64: 8, 128>}, {pipeline_mode = #tpu.pipeline_mode<synchronous>, transform_indices = @transform_4, window_bounds = array<i64: 1, 128>}, {pipeline_mode = #tpu.pipeline_mode<synchronous>, transform_indices = @transform_5, window_bounds = array<i64: 1, 128>}]} {
    %c0 = arith.constant 0 : index
    %c0_0 = arith.constant 0 : index
    %0 = vector.load %arg1[%c0, %c0_0] : memref<8x2048xbf16, #tpu.memory_space<vmem>>, vector<8x2048xbf16>
    %c0_1 = arith.constant 0 : index
    %c0_2 = arith.constant 0 : index
    %1 = vector.load %arg2[%c0_1, %c0_2] : memref<2048x128xbf16, #tpu.memory_space<vmem>>, vector<2048x128xbf16>
    %cst = arith.constant dense<0.000000e+00> : vector<8x128xf32>
    %2 = tpu.matmul %0, %1, %cst {dimension_numbers = #tpu.dot_dimension_numbers<[1], [0], [0], [1], [0, 0, 1, 1], [], []>} : vector<8x2048xbf16>, vector<2048x128xbf16>, vector<8x128xf32> -> vector<8x128xf32>
    %c0_3 = arith.constant 0 : index
    %c0_4 = arith.constant 0 : index
    %3 = vector.load %arg3[%c0_3, %c0_4] : memref<1x128xf32, #tpu.memory_space<vmem>>, vector<1x128xf32>
    %4 = vector.broadcast %3 : vector<1x128xf32> to vector<8x128xf32>
    %5 = arith.addf %2, %4 : vector<8x128xf32>
    %6 = tpu.iota {dimensions = array<i32: 0>} : vector<8x128xi32>
    %c2_i32 = arith.constant 2 : i32
    %7 = vector.broadcast %c2_i32 : i32 to vector<8x128xi32>
    %8 = arith.cmpi slt, %6, %7 : vector<8x128xi32>
    %cst_5 = arith.constant 0.000000e+00 : f32
    %9 = vector.broadcast %cst_5 : f32 to vector<8x128xf32>
    %10 = arith.select %8, %5, %9 : vector<8x128xi1>, vector<8x128xf32>
    %cst_6 = arith.constant dense<0.000000e+00> : vector<128xf32>
    %11 = vector.multi_reduction <add>, %10, %cst_6 [0] : vector<8x128xf32> to vector<128xf32>
    %12 = vector.shape_cast %11 : vector<128xf32> to vector<1x128xf32>
    %c0_7 = arith.constant 0 : index
    %c0_8 = arith.constant 0 : index
    %13 = vector.load %arg5[%c0_7, %c0_8] : memref<1x128xf32, #tpu.memory_space<vmem>>, vector<1x128xf32>
    tpu.vector_store %arg5[%c0_7, %c0_8], %12 {strides = array<i32>} : memref<1x128xf32, #tpu.memory_space<vmem>>, vector<1x128xf32>,
    %14 = arith.mulf %10, %10 : vector<8x128xf32>
    %cst_9 = arith.constant dense<0.000000e+00> : vector<128xf32>
    %15 = vector.multi_reduction <add>, %14, %cst_9 [0] : vector<8x128xf32> to vector<128xf32>
    %16 = vector.shape_cast %15 : vector<128xf32> to vector<1x128xf32>
    %c0_10 = arith.constant 0 : index
    %c0_11 = arith.constant 0 : index
    %17 = vector.load %arg6[%c0_10, %c0_11] : memref<1x128xf32, #tpu.memory_space<vmem>>, vector<1x128xf32>
    tpu.vector_store %arg6[%c0_10, %c0_11], %16 {strides = array<i32>} : memref<1x128xf32, #tpu.memory_space<vmem>>, vector<1x128xf32>,
    %18 = arith.truncf %5 : vector<8x128xf32> to vector<8x128xbf16>
    %c0_12 = arith.constant 0 : index
    %c0_13 = arith.constant 0 : index
    %19 = vector.load %arg4[%c0_12, %c0_13] : memref<8x128xbf16, #tpu.memory_space<vmem>>, vector<8x128xbf16>
    tpu.vector_store %arg4[%c0_12, %c0_13], %18 {strides = array<i32>} : memref<8x128xbf16, #tpu.memory_space<vmem>>, vector<8x128xbf16>,
    return
  }
  func.func @transform_0(%arg0: i32) -> (i32, i32) {
    %c0_i32 = arith.constant 0 : i32
    %c0_i32_0 = arith.constant 0 : i32
    %c0_i32_1 = arith.constant 0 : i32
    return %c0_i32, %c0_i32_0 : i32, i32
  }
  func.func @transform_1(%arg0: i32) -> (i32, i32) {
    %c0_i32 = arith.constant 0 : i32
    %c0_i32_0 = arith.constant 0 : i32
    %c0_i32_1 = arith.constant 0 : i32
    return %c0_i32, %c0_i32_0 : i32, i32
  }
  func.func @transform_2(%arg0: i32) -> (i32, i32) {
    %c0_i32 = arith.constant 0 : i32
    %c0_i32_0 = arith.constant 0 : i32
    %c0_i32_1 = arith.constant 0 : i32
    return %c0_i32, %c0_i32_0 : i32, i32
  }
  func.func @transform_3(%arg0: i32) -> (i32, i32) {
    %c0_i32 = arith.constant 0 : i32
    %c0_i32_0 = arith.constant 0 : i32
    %c0_i32_1 = arith.constant 0 : i32
    return %c0_i32, %c0_i32_0 : i32, i32
  }
  func.func @transform_4(%arg0: i32) -> (i32, i32) {
    %c0_i32 = arith.constant 0 : i32
    %c0_i32_0 = arith.constant 0 : i32
    %c0_i32_1 = arith.constant 0 : i32
    return %c0_i32, %c0_i32_0 : i32, i32
  }
  func.func @transform_5(%arg0: i32) -> (i32, i32) {
    %c0_i32 = arith.constant 0 : i32
    %c0_i32_0 = arith.constant 0 : i32
    %c0_i32_1 = arith.constant 0 : i32
    return %c0_i32, %c0_i32_0 : i32, i32
  }
}

module attributes {stable_mosaic.version = 11 : i64} {
  func.func @_gemm_kernel(%arg0: i32, %arg1: memref<8x1152xbf16, #tpu.memory_space<vmem>>, %arg2: memref<1152x512xbf16, #tpu.memory_space<vmem>>, %arg3: memref<1x512xf32, #tpu.memory_space<vmem>>, %arg4: memref<8x512xbf16, #tpu.memory_space<vmem>>, %arg5: memref<1x512xf32, #tpu.memory_space<vmem>>, %arg6: memref<1x512xf32, #tpu.memory_space<vmem>>) attributes {dimension_semantics = [#tpu.dimension_semantics<arbitrary>], iteration_bounds = array<i64: 1>, scalar_prefetch = 0 : i64, scratch_operands = 0 : i64, tpu.core_type = #tpu.core_type<tc>, window_params = [{pipeline_mode = #tpu.pipeline_mode<synchronous>, transform_indices = @transform_0, window_bounds = array<i64: 8, 1152>}, {pipeline_mode = #tpu.pipeline_mode<synchronous>, transform_indices = @transform_1, window_bounds = array<i64: 1152, 512>}, {pipeline_mode = #tpu.pipeline_mode<synchronous>, transform_indices = @transform_2, window_bounds = array<i64: 1, 512>}, {pipeline_mode = #tpu.pipeline_mode<synchronous>, transform_indices = @transform_3, window_bounds = array<i64: 8, 512>}, {pipeline_mode = #tpu.pipeline_mode<synchronous>, transform_indices = @transform_4, window_bounds = array<i64: 1, 512>}, {pipeline_mode = #tpu.pipeline_mode<synchronous>, transform_indices = @transform_5, window_bounds = array<i64: 1, 512>}]} {
    %c0 = arith.constant 0 : index
    %c0_0 = arith.constant 0 : index
    %0 = vector.load %arg1[%c0, %c0_0] : memref<8x1152xbf16, #tpu.memory_space<vmem>>, vector<8x1152xbf16>
    %c0_1 = arith.constant 0 : index
    %c0_2 = arith.constant 0 : index
    %1 = vector.load %arg2[%c0_1, %c0_2] : memref<1152x512xbf16, #tpu.memory_space<vmem>>, vector<1152x512xbf16>
    %cst = arith.constant dense<0.000000e+00> : vector<8x512xf32>
    %2 = tpu.matmul %0, %1, %cst {dimension_numbers = #tpu.dot_dimension_numbers<[1], [0], [0], [1], [0, 0, 1, 1], [], []>} : vector<8x1152xbf16>, vector<1152x512xbf16>, vector<8x512xf32> -> vector<8x512xf32>
    %c0_3 = arith.constant 0 : index
    %c0_4 = arith.constant 0 : index
    %3 = vector.load %arg3[%c0_3, %c0_4] : memref<1x512xf32, #tpu.memory_space<vmem>>, vector<1x512xf32>
    %4 = vector.broadcast %3 : vector<1x512xf32> to vector<8x512xf32>
    %5 = arith.addf %2, %4 : vector<8x512xf32>
    %6 = tpu.iota {dimensions = array<i32: 0>} : vector<8x512xi32>
    %c2_i32 = arith.constant 2 : i32
    %7 = vector.broadcast %c2_i32 : i32 to vector<8x512xi32>
    %8 = arith.cmpi slt, %6, %7 : vector<8x512xi32>
    %cst_5 = arith.constant 0.000000e+00 : f32
    %9 = vector.broadcast %cst_5 : f32 to vector<8x512xf32>
    %10 = arith.select %8, %5, %9 : vector<8x512xi1>, vector<8x512xf32>
    %cst_6 = arith.constant dense<0.000000e+00> : vector<512xf32>
    %11 = vector.multi_reduction <add>, %10, %cst_6 [0] : vector<8x512xf32> to vector<512xf32>
    %12 = vector.shape_cast %11 : vector<512xf32> to vector<1x512xf32>
    %c0_7 = arith.constant 0 : index
    %c0_8 = arith.constant 0 : index
    %13 = vector.load %arg5[%c0_7, %c0_8] : memref<1x512xf32, #tpu.memory_space<vmem>>, vector<1x512xf32>
    tpu.vector_store %arg5[%c0_7, %c0_8], %12 {strides = array<i32>} : memref<1x512xf32, #tpu.memory_space<vmem>>, vector<1x512xf32>,
    %14 = arith.mulf %10, %10 : vector<8x512xf32>
    %cst_9 = arith.constant dense<0.000000e+00> : vector<512xf32>
    %15 = vector.multi_reduction <add>, %14, %cst_9 [0] : vector<8x512xf32> to vector<512xf32>
    %16 = vector.shape_cast %15 : vector<512xf32> to vector<1x512xf32>
    %c0_10 = arith.constant 0 : index
    %c0_11 = arith.constant 0 : index
    %17 = vector.load %arg6[%c0_10, %c0_11] : memref<1x512xf32, #tpu.memory_space<vmem>>, vector<1x512xf32>
    tpu.vector_store %arg6[%c0_10, %c0_11], %16 {strides = array<i32>} : memref<1x512xf32, #tpu.memory_space<vmem>>, vector<1x512xf32>,
    %18 = arith.truncf %5 : vector<8x512xf32> to vector<8x512xbf16>
    %c0_12 = arith.constant 0 : index
    %c0_13 = arith.constant 0 : index
    %19 = vector.load %arg4[%c0_12, %c0_13] : memref<8x512xbf16, #tpu.memory_space<vmem>>, vector<8x512xbf16>
    tpu.vector_store %arg4[%c0_12, %c0_13], %18 {strides = array<i32>} : memref<8x512xbf16, #tpu.memory_space<vmem>>, vector<8x512xbf16>,
    return
  }
  func.func @transform_0(%arg0: i32) -> (i32, i32) {
    %c0_i32 = arith.constant 0 : i32
    %c0_i32_0 = arith.constant 0 : i32
    %c0_i32_1 = arith.constant 0 : i32
    return %c0_i32, %c0_i32_0 : i32, i32
  }
  func.func @transform_1(%arg0: i32) -> (i32, i32) {
    %c0_i32 = arith.constant 0 : i32
    %c0_i32_0 = arith.constant 0 : i32
    %c0_i32_1 = arith.constant 0 : i32
    return %c0_i32, %c0_i32_0 : i32, i32
  }
  func.func @transform_2(%arg0: i32) -> (i32, i32) {
    %c0_i32 = arith.constant 0 : i32
    %c0_i32_0 = arith.constant 0 : i32
    %c0_i32_1 = arith.constant 0 : i32
    return %c0_i32, %c0_i32_0 : i32, i32
  }
  func.func @transform_3(%arg0: i32) -> (i32, i32) {
    %c0_i32 = arith.constant 0 : i32
    %c0_i32_0 = arith.constant 0 : i32
    %c0_i32_1 = arith.constant 0 : i32
    return %c0_i32, %c0_i32_0 : i32, i32
  }
  func.func @transform_4(%arg0: i32) -> (i32, i32) {
    %c0_i32 = arith.constant 0 : i32
    %c0_i32_0 = arith.constant 0 : i32
    %c0_i32_1 = arith.constant 0 : i32
    return %c0_i32, %c0_i32_0 : i32, i32
  }
  func.func @transform_5(%arg0: i32) -> (i32, i32) {
    %c0_i32 = arith.constant 0 : i32
    %c0_i32_0 = arith.constant 0 : i32
    %c0_i32_1 = arith.constant 0 : i32
    return %c0_i32, %c0_i32_0 : i32, i32
  }
}

module attributes {stable_mosaic.version = 11 : i64} {
  func.func @_gemm_kernel(%arg0: i32, %arg1: memref<8x2304xbf16, #tpu.memory_space<vmem>>, %arg2: memref<2304x256xbf16, #tpu.memory_space<vmem>>, %arg3: memref<1x256xf32, #tpu.memory_space<vmem>>, %arg4: memref<8x256xbf16, #tpu.memory_space<vmem>>, %arg5: memref<1x256xf32, #tpu.memory_space<vmem>>, %arg6: memref<1x256xf32, #tpu.memory_space<vmem>>) attributes {dimension_semantics = [#tpu.dimension_semantics<arbitrary>], iteration_bounds = array<i64: 1>, scalar_prefetch = 0 : i64, scratch_operands = 0 : i64, tpu.core_type = #tpu.core_type<tc>, window_params = [{pipeline_mode = #tpu.pipeline_mode<synchronous>, transform_indices = @transform_0, window_bounds = array<i64: 8, 2304>}, {pipeline_mode = #tpu.pipeline_mode<synchronous>, transform_indices = @transform_1, window_bounds = array<i64: 2304, 256>}, {pipeline_mode = #tpu.pipeline_mode<synchronous>, transform_indices = @transform_2, window_bounds = array<i64: 1, 256>}, {pipeline_mode = #tpu.pipeline_mode<synchronous>, transform_indices = @transform_3, window_bounds = array<i64: 8, 256>}, {pipeline_mode = #tpu.pipeline_mode<synchronous>, transform_indices = @transform_4, window_bounds = array<i64: 1, 256>}, {pipeline_mode = #tpu.pipeline_mode<synchronous>, transform_indices = @transform_5, window_bounds = array<i64: 1, 256>}]} {
    %c0 = arith.constant 0 : index
    %c0_0 = arith.constant 0 : index
    %0 = vector.load %arg1[%c0, %c0_0] : memref<8x2304xbf16, #tpu.memory_space<vmem>>, vector<8x2304xbf16>
    %c0_1 = arith.constant 0 : index
    %c0_2 = arith.constant 0 : index
    %1 = vector.load %arg2[%c0_1, %c0_2] : memref<2304x256xbf16, #tpu.memory_space<vmem>>, vector<2304x256xbf16>
    %cst = arith.constant dense<0.000000e+00> : vector<8x256xf32>
    %2 = tpu.matmul %0, %1, %cst {dimension_numbers = #tpu.dot_dimension_numbers<[1], [0], [0], [1], [0, 0, 1, 1], [], []>} : vector<8x2304xbf16>, vector<2304x256xbf16>, vector<8x256xf32> -> vector<8x256xf32>
    %c0_3 = arith.constant 0 : index
    %c0_4 = arith.constant 0 : index
    %3 = vector.load %arg3[%c0_3, %c0_4] : memref<1x256xf32, #tpu.memory_space<vmem>>, vector<1x256xf32>
    %4 = vector.broadcast %3 : vector<1x256xf32> to vector<8x256xf32>
    %5 = arith.addf %2, %4 : vector<8x256xf32>
    %cst_5 = arith.constant dense<0.000000e+00> : vector<256xf32>
    %6 = vector.multi_reduction <add>, %5, %cst_5 [0] : vector<8x256xf32> to vector<256xf32>
    %7 = vector.shape_cast %6 : vector<256xf32> to vector<1x256xf32>
    %c0_6 = arith.constant 0 : index
    %c0_7 = arith.constant 0 : index
    %8 = vector.load %arg5[%c0_6, %c0_7] : memref<1x256xf32, #tpu.memory_space<vmem>>, vector<1x256xf32>
    tpu.vector_store %arg5[%c0_6, %c0_7], %7 {strides = array<i32>} : memref<1x256xf32, #tpu.memory_space<vmem>>, vector<1x256xf32>,
    %9 = arith.mulf %5, %5 : vector<8x256xf32>
    %cst_8 = arith.constant dense<0.000000e+00> : vector<256xf32>
    %10 = vector.multi_reduction <add>, %9, %cst_8 [0] : vector<8x256xf32> to vector<256xf32>
    %11 = vector.shape_cast %10 : vector<256xf32> to vector<1x256xf32>
    %c0_9 = arith.constant 0 : index
    %c0_10 = arith.constant 0 : index
    %12 = vector.load %arg6[%c0_9, %c0_10] : memref<1x256xf32, #tpu.memory_space<vmem>>, vector<1x256xf32>
    tpu.vector_store %arg6[%c0_9, %c0_10], %11 {strides = array<i32>} : memref<1x256xf32, #tpu.memory_space<vmem>>, vector<1x256xf32>,
    %13 = arith.truncf %5 : vector<8x256xf32> to vector<8x256xbf16>
    %c0_11 = arith.constant 0 : index
    %c0_12 = arith.constant 0 : index
    %14 = vector.load %arg4[%c0_11, %c0_12] : memref<8x256xbf16, #tpu.memory_space<vmem>>, vector<8x256xbf16>
    tpu.vector_store %arg4[%c0_11, %c0_12], %13 {strides = array<i32>} : memref<8x256xbf16, #tpu.memory_space<vmem>>, vector<8x256xbf16>,
    return
  }
  func.func @transform_0(%arg0: i32) -> (i32, i32) {
    %c0_i32 = arith.constant 0 : i32
    %c0_i32_0 = arith.constant 0 : i32
    %c0_i32_1 = arith.constant 0 : i32
    return %c0_i32, %c0_i32_0 : i32, i32
  }
  func.func @transform_1(%arg0: i32) -> (i32, i32) {
    %c0_i32 = arith.constant 0 : i32
    %c0_i32_0 = arith.constant 0 : i32
    %c0_i32_1 = arith.constant 0 : i32
    return %c0_i32, %c0_i32_0 : i32, i32
  }
  func.func @transform_2(%arg0: i32) -> (i32, i32) {
    %c0_i32 = arith.constant 0 : i32
    %c0_i32_0 = arith.constant 0 : i32
    %c0_i32_1 = arith.constant 0 : i32
    return %c0_i32, %c0_i32_0 : i32, i32
  }
  func.func @transform_3(%arg0: i32) -> (i32, i32) {
    %c0_i32 = arith.constant 0 : i32
    %c0_i32_0 = arith.constant 0 : i32
    %c0_i32_1 = arith.constant 0 : i32
    return %c0_i32, %c0_i32_0 : i32, i32
  }
  func.func @transform_4(%arg0: i32) -> (i32, i32) {
    %c0_i32 = arith.constant 0 : i32
    %c0_i32_0 = arith.constant 0 : i32
    %c0_i32_1 = arith.constant 0 : i32
    return %c0_i32, %c0_i32_0 : i32, i32
  }
  func.func @transform_5(%arg0: i32) -> (i32, i32) {
    %c0_i32 = arith.constant 0 : i32
    %c0_i32_0 = arith.constant 0 : i32
    %c0_i32_1 = arith.constant 0 : i32
    return %c0_i32, %c0_i32_0 : i32, i32
  }
}

module attributes {stable_mosaic.version = 11 : i64} {
  func.func @_gemm_kernel(%arg0: i32, %arg1: memref<32x1152xbf16, #tpu.memory_space<vmem>>, %arg2: memref<1152x128xbf16, #tpu.memory_space<vmem>>, %arg3: memref<1x128xf32, #tpu.memory_space<vmem>>, %arg4: memref<32x128xbf16, #tpu.memory_space<vmem>>, %arg5: memref<1x128xf32, #tpu.memory_space<vmem>>, %arg6: memref<1x128xf32, #tpu.memory_space<vmem>>) attributes {dimension_semantics = [#tpu.dimension_semantics<arbitrary>], iteration_bounds = array<i64: 1>, scalar_prefetch = 0 : i64, scratch_operands = 0 : i64, tpu.core_type = #tpu.core_type<tc>, window_params = [{pipeline_mode = #tpu.pipeline_mode<synchronous>, transform_indices = @transform_0, window_bounds = array<i64: 32, 1152>}, {pipeline_mode = #tpu.pipeline_mode<synchronous>, transform_indices = @transform_1, window_bounds = array<i64: 1152, 128>}, {pipeline_mode = #tpu.pipeline_mode<synchronous>, transform_indices = @transform_2, window_bounds = array<i64: 1, 128>}, {pipeline_mode = #tpu.pipeline_mode<synchronous>, transform_indices = @transform_3, window_bounds = array<i64: 32, 128>}, {pipeline_mode = #tpu.pipeline_mode<synchronous>, transform_indices = @transform_4, window_bounds = array<i64: 1, 128>}, {pipeline_mode = #tpu.pipeline_mode<synchronous>, transform_indices = @transform_5, window_bounds = array<i64: 1, 128>}]} {
    %c0 = arith.constant 0 : index
    %c0_0 = arith.constant 0 : index
    %0 = vector.load %arg1[%c0, %c0_0] : memref<32x1152xbf16, #tpu.memory_space<vmem>>, vector<32x1152xbf16>
    %c0_1 = arith.constant 0 : index
    %c0_2 = arith.constant 0 : index
    %1 = vector.load %arg2[%c0_1, %c0_2] : memref<1152x128xbf16, #tpu.memory_space<vmem>>, vector<1152x128xbf16>
    %cst = arith.constant dense<0.000000e+00> : vector<32x128xf32>
    %2 = tpu.matmul %0, %1, %cst {dimension_numbers = #tpu.dot_dimension_numbers<[1], [0], [0], [1], [0, 0, 1, 1], [], []>} : vector<32x1152xbf16>, vector<1152x128xbf16>, vector<32x128xf32> -> vector<32x128xf32>
    %c0_3 = arith.constant 0 : index
    %c0_4 = arith.constant 0 : index
    %3 = vector.load %arg3[%c0_3, %c0_4] : memref<1x128xf32, #tpu.memory_space<vmem>>, vector<1x128xf32>
    %4 = vector.broadcast %3 : vector<1x128xf32> to vector<32x128xf32>
    %5 = arith.addf %2, %4 : vector<32x128xf32>
    %cst_5 = arith.constant dense<0.000000e+00> : vector<128xf32>
    %6 = vector.multi_reduction <add>, %5, %cst_5 [0] : vector<32x128xf32> to vector<128xf32>
    %7 = vector.shape_cast %6 : vector<128xf32> to vector<1x128xf32>
    %c0_6 = arith.constant 0 : index
    %c0_7 = arith.constant 0 : index
    %8 = vector.load %arg5[%c0_6, %c0_7] : memref<1x128xf32, #tpu.memory_space<vmem>>, vector<1x128xf32>
    tpu.vector_store %arg5[%c0_6, %c0_7], %7 {strides = array<i32>} : memref<1x128xf32, #tpu.memory_space<vmem>>, vector<1x128xf32>,
    %9 = arith.mulf %5, %5 : vector<32x128xf32>
    %cst_8 = arith.constant dense<0.000000e+00> : vector<128xf32>
    %10 = vector.multi_reduction <add>, %9, %cst_8 [0] : vector<32x128xf32> to vector<128xf32>
    %11 = vector.shape_cast %10 : vector<128xf32> to vector<1x128xf32>
    %c0_9 = arith.constant 0 : index
    %c0_10 = arith.constant 0 : index
    %12 = vector.load %arg6[%c0_9, %c0_10] : memref<1x128xf32, #tpu.memory_space<vmem>>, vector<1x128xf32>
    tpu.vector_store %arg6[%c0_9, %c0_10], %11 {strides = array<i32>} : memref<1x128xf32, #tpu.memory_space<vmem>>, vector<1x128xf32>,
    %13 = arith.truncf %5 : vector<32x128xf32> to vector<32x128xbf16>
    %c0_11 = arith.constant 0 : index
    %c0_12 = arith.constant 0 : index
    %14 = vector.load %arg4[%c0_11, %c0_12] : memref<32x128xbf16, #tpu.memory_space<vmem>>, vector<32x128xbf16>
    tpu.vector_store %arg4[%c0_11, %c0_12], %13 {strides = array<i32>} : memref<32x128xbf16, #tpu.memory_space<vmem>>, vector<32x128xbf16>,
    return
  }
  func.func @transform_0(%arg0: i32) -> (i32, i32) {
    %c0_i32 = arith.constant 0 : i32
    %c0_i32_0 = arith.constant 0 : i32
    %c0_i32_1 = arith.constant 0 : i32
    return %c0_i32, %c0_i32_0 : i32, i32
  }
  func.func @transform_1(%arg0: i32) -> (i32, i32) {
    %c0_i32 = arith.constant 0 : i32
    %c0_i32_0 = arith.constant 0 : i32
    %c0_i32_1 = arith.constant 0 : i32
    return %c0_i32, %c0_i32_0 : i32, i32
  }
  func.func @transform_2(%arg0: i32) -> (i32, i32) {
    %c0_i32 = arith.constant 0 : i32
    %c0_i32_0 = arith.constant 0 : i32
    %c0_i32_1 = arith.constant 0 : i32
    return %c0_i32, %c0_i32_0 : i32, i32
  }
  func.func @transform_3(%arg0: i32) -> (i32, i32) {
    %c0_i32 = arith.constant 0 : i32
    %c0_i32_0 = arith.constant 0 : i32
    %c0_i32_1 = arith.constant 0 : i32
    return %c0_i32, %c0_i32_0 : i32, i32
  }
  func.func @transform_4(%arg0: i32) -> (i32, i32) {
    %c0_i32 = arith.constant 0 : i32
    %c0_i32_0 = arith.constant 0 : i32
    %c0_i32_1 = arith.constant 0 : i32
    return %c0_i32, %c0_i32_0 : i32, i32
  }
  func.func @transform_5(%arg0: i32) -> (i32, i32) {
    %c0_i32 = arith.constant 0 : i32
    %c0_i32_0 = arith.constant 0 : i32
    %c0_i32_1 = arith.constant 0 : i32
    return %c0_i32, %c0_i32_0 : i32, i32
  }
}

module attributes {stable_mosaic.version = 11 : i64} {
  func.func @_gemm_kernel(%arg0: i32, %arg1: memref<128x640xbf16, #tpu.memory_space<vmem>>, %arg2: memref<640x128xbf16, #tpu.memory_space<vmem>>, %arg3: memref<1x128xf32, #tpu.memory_space<vmem>>, %arg4: memref<128x128xbf16, #tpu.memory_space<vmem>>, %arg5: memref<1x128xf32, #tpu.memory_space<vmem>>, %arg6: memref<1x128xf32, #tpu.memory_space<vmem>>) attributes {dimension_semantics = [#tpu.dimension_semantics<arbitrary>], iteration_bounds = array<i64: 1>, scalar_prefetch = 0 : i64, scratch_operands = 0 : i64, tpu.core_type = #tpu.core_type<tc>, window_params = [{pipeline_mode = #tpu.pipeline_mode<synchronous>, transform_indices = @transform_0, window_bounds = array<i64: 128, 640>}, {pipeline_mode = #tpu.pipeline_mode<synchronous>, transform_indices = @transform_1, window_bounds = array<i64: 640, 128>}, {pipeline_mode = #tpu.pipeline_mode<synchronous>, transform_indices = @transform_2, window_bounds = array<i64: 1, 128>}, {pipeline_mode = #tpu.pipeline_mode<synchronous>, transform_indices = @transform_3, window_bounds = array<i64: 128, 128>}, {pipeline_mode = #tpu.pipeline_mode<synchronous>, transform_indices = @transform_4, window_bounds = array<i64: 1, 128>}, {pipeline_mode = #tpu.pipeline_mode<synchronous>, transform_indices = @transform_5, window_bounds = array<i64: 1, 128>}]} {
    %c0 = arith.constant 0 : index
    %c0_0 = arith.constant 0 : index
    %0 = vector.load %arg1[%c0, %c0_0] : memref<128x640xbf16, #tpu.memory_space<vmem>>, vector<128x640xbf16>
    %c0_1 = arith.constant 0 : index
    %c0_2 = arith.constant 0 : index
    %1 = vector.load %arg2[%c0_1, %c0_2] : memref<640x128xbf16, #tpu.memory_space<vmem>>, vector<640x128xbf16>
    %cst = arith.constant dense<0.000000e+00> : vector<128x128xf32>
    %2 = tpu.matmul %0, %1, %cst {dimension_numbers = #tpu.dot_dimension_numbers<[1], [0], [0], [1], [0, 0, 1, 1], [], []>} : vector<128x640xbf16>, vector<640x128xbf16>, vector<128x128xf32> -> vector<128x128xf32>
    %c0_3 = arith.constant 0 : index
    %c0_4 = arith.constant 0 : index
    %3 = vector.load %arg3[%c0_3, %c0_4] : memref<1x128xf32, #tpu.memory_space<vmem>>, vector<1x128xf32>
    %4 = vector.broadcast %3 : vector<1x128xf32> to vector<128x128xf32>
    %5 = arith.addf %2, %4 : vector<128x128xf32>
    %cst_5 = arith.constant dense<0.000000e+00> : vector<128xf32>
    %6 = vector.multi_reduction <add>, %5, %cst_5 [0] : vector<128x128xf32> to vector<128xf32>
    %7 = vector.shape_cast %6 : vector<128xf32> to vector<1x128xf32>
    %c0_6 = arith.constant 0 : index
    %c0_7 = arith.constant 0 : index
    %8 = vector.load %arg5[%c0_6, %c0_7] : memref<1x128xf32, #tpu.memory_space<vmem>>, vector<1x128xf32>
    tpu.vector_store %arg5[%c0_6, %c0_7], %7 {strides = array<i32>} : memref<1x128xf32, #tpu.memory_space<vmem>>, vector<1x128xf32>,
    %9 = arith.mulf %5, %5 : vector<128x128xf32>
    %cst_8 = arith.constant dense<0.000000e+00> : vector<128xf32>
    %10 = vector.multi_reduction <add>, %9, %cst_8 [0] : vector<128x128xf32> to vector<128xf32>
    %11 = vector.shape_cast %10 : vector<128xf32> to vector<1x128xf32>
    %c0_9 = arith.constant 0 : index
    %c0_10 = arith.constant 0 : index
    %12 = vector.load %arg6[%c0_9, %c0_10] : memref<1x128xf32, #tpu.memory_space<vmem>>, vector<1x128xf32>
    tpu.vector_store %arg6[%c0_9, %c0_10], %11 {strides = array<i32>} : memref<1x128xf32, #tpu.memory_space<vmem>>, vector<1x128xf32>,
    %13 = arith.truncf %5 : vector<128x128xf32> to vector<128x128xbf16>
    %c0_11 = arith.constant 0 : index
    %c0_12 = arith.constant 0 : index
    %14 = vector.load %arg4[%c0_11, %c0_12] : memref<128x128xbf16, #tpu.memory_space<vmem>>, vector<128x128xbf16>
    tpu.vector_store %arg4[%c0_11, %c0_12], %13 {strides = array<i32>} : memref<128x128xbf16, #tpu.memory_space<vmem>>, vector<128x128xbf16>,
    return
  }
  func.func @transform_0(%arg0: i32) -> (i32, i32) {
    %c0_i32 = arith.constant 0 : i32
    %c0_i32_0 = arith.constant 0 : i32
    %c0_i32_1 = arith.constant 0 : i32
    return %c0_i32, %c0_i32_0 : i32, i32
  }
  func.func @transform_1(%arg0: i32) -> (i32, i32) {
    %c0_i32 = arith.constant 0 : i32
    %c0_i32_0 = arith.constant 0 : i32
    %c0_i32_1 = arith.constant 0 : i32
    return %c0_i32, %c0_i32_0 : i32, i32
  }
  func.func @transform_2(%arg0: i32) -> (i32, i32) {
    %c0_i32 = arith.constant 0 : i32
    %c0_i32_0 = arith.constant 0 : i32
    %c0_i32_1 = arith.constant 0 : i32
    return %c0_i32, %c0_i32_0 : i32, i32
  }
  func.func @transform_3(%arg0: i32) -> (i32, i32) {
    %c0_i32 = arith.constant 0 : i32
    %c0_i32_0 = arith.constant 0 : i32
    %c0_i32_1 = arith.constant 0 : i32
    return %c0_i32, %c0_i32_0 : i32, i32
  }
  func.func @transform_4(%arg0: i32) -> (i32, i32) {
    %c0_i32 = arith.constant 0 : i32
    %c0_i32_0 = arith.constant 0 : i32
    %c0_i32_1 = arith.constant 0 : i32
    return %c0_i32, %c0_i32_0 : i32, i32
  }
  func.func @transform_5(%arg0: i32) -> (i32, i32) {
    %c0_i32 = arith.constant 0 : i32
    %c0_i32_0 = arith.constant 0 : i32
    %c0_i32_1 = arith.constant 0 : i32
    return %c0_i32, %c0_i32_0 : i32, i32
  }
}

module attributes {stable_mosaic.version = 11 : i64} {
  func.func @_gemm_kernel(%arg0: i32, %arg1: memref<512x128xbf16, #tpu.memory_space<vmem>>, %arg2: memref<128x128xbf16, #tpu.memory_space<vmem>>, %arg3: memref<1x128xf32, #tpu.memory_space<vmem>>, %arg4: memref<512x128xf32, #tpu.memory_space<vmem>>) attributes {dimension_semantics = [#tpu.dimension_semantics<arbitrary>], iteration_bounds = array<i64: 1>, scalar_prefetch = 0 : i64, scratch_operands = 0 : i64, tpu.core_type = #tpu.core_type<tc>, window_params = [{pipeline_mode = #tpu.pipeline_mode<synchronous>, transform_indices = @transform_0, window_bounds = array<i64: 512, 128>}, {pipeline_mode = #tpu.pipeline_mode<synchronous>, transform_indices = @transform_1, window_bounds = array<i64: 128, 128>}, {pipeline_mode = #tpu.pipeline_mode<synchronous>, transform_indices = @transform_2, window_bounds = array<i64: 1, 128>}, {pipeline_mode = #tpu.pipeline_mode<synchronous>, transform_indices = @transform_3, window_bounds = array<i64: 512, 128>}]} {
    %c0 = arith.constant 0 : index
    %c0_0 = arith.constant 0 : index
    %0 = vector.load %arg1[%c0, %c0_0] : memref<512x128xbf16, #tpu.memory_space<vmem>>, vector<512x128xbf16>
    %c0_1 = arith.constant 0 : index
    %c0_2 = arith.constant 0 : index
    %1 = vector.load %arg2[%c0_1, %c0_2] : memref<128x128xbf16, #tpu.memory_space<vmem>>, vector<128x128xbf16>
    %cst = arith.constant dense<0.000000e+00> : vector<512x128xf32>
    %2 = tpu.matmul %0, %1, %cst {dimension_numbers = #tpu.dot_dimension_numbers<[1], [0], [0], [1], [0, 0, 1, 1], [], []>} : vector<512x128xbf16>, vector<128x128xbf16>, vector<512x128xf32> -> vector<512x128xf32>
    %c0_3 = arith.constant 0 : index
    %c0_4 = arith.constant 0 : index
    %3 = vector.load %arg3[%c0_3, %c0_4] : memref<1x128xf32, #tpu.memory_space<vmem>>, vector<1x128xf32>
    %4 = vector.broadcast %3 : vector<1x128xf32> to vector<512x128xf32>
    %5 = arith.addf %2, %4 : vector<512x128xf32>
    %6 = math.tanh %5 : vector<512x128xf32>
    %c0_5 = arith.constant 0 : index
    %c0_6 = arith.constant 0 : index
    %7 = vector.load %arg4[%c0_5, %c0_6] : memref<512x128xf32, #tpu.memory_space<vmem>>, vector<512x128xf32>
    tpu.vector_store %arg4[%c0_5, %c0_6], %6 {strides = array<i32>} : memref<512x128xf32, #tpu.memory_space<vmem>>, vector<512x128xf32>,
    return
  }
  func.func @transform_0(%arg0: i32) -> (i32, i32) {
    %c0_i32 = arith.constant 0 : i32
    %c0_i32_0 = arith.constant 0 : i32
    %c0_i32_1 = arith.constant 0 : i32
    return %c0_i32, %c0_i32_0 : i32, i32
  }
  func.func @transform_1(%arg0: i32) -> (i32, i32) {
    %c0_i32 = arith.constant 0 : i32
    %c0_i32_0 = arith.constant 0 : i32
    %c0_i32_1 = arith.constant 0 : i32
    return %c0_i32, %c0_i32_0 : i32, i32
  }
  func.func @transform_2(%arg0: i32) -> (i32, i32) {
    %c0_i32 = arith.constant 0 : i32
    %c0_i32_0 = arith.constant 0 : i32
    %c0_i32_1 = arith.constant 0 : i32
    return %c0_i32, %c0_i32_0 : i32, i32
  }
  func.func @transform_3(%arg0: i32) -> (i32, i32) {
    %c0_i32 = arith.constant 0 : i32
    %c0_i32_0 = arith.constant 0 : i32
    %c0_i32_1 = arith.constant 0 : i32
    return %c0_i32, %c0_i32_0 : i32, i32
  }
}

</mosaic_0001>

<bundles_post_ra>
// kernel: pix2pix_forward.10
= control target key start
LH: loop header
LB: loop body
LE: loop exit
PB: predicated region body
PF: predicated region fallthrough
CT: control target
= control target key end

     0   :  { %s1796_s1 = inlined_call_operand.vmem [shape: bf16[128,128], index: 1, kind: input, shape index: {}]   ;;  %s1797_s0 = inlined_call_operand.vmem [shape: bf16[512,128], index: 0, kind: input, shape index: {}]   ;;  %s1798_s2 = inlined_call_operand.vmem [shape: f32[1,128], index: 2, kind: input, shape index: {}]   ;;  %s1799_s3 = inlined_call_operand.vmem [shape: bf16[512,128], index: 3, kind: output, shape index: {}]  }
   0x1   :  { %v1451_v0 = vld [vmem:[%s1796_s1] sm:$0xff]   ;;  %v1452_v1 = vld [vmem:[%s1796_s1 + $0x8] sm:$0xff]   ;;  %v1453_v2 = vld [vmem:[%s1796_s1 + $0x10] sm:$0xff]  }
   0x2   :  { %1355 = vmatprep.subr.bf16.mxu0 %v1451_v0  ;;  %1435 = vmatprep.subr.bf16.mxu1 %v1451_v0  ;;  %v1454_v3 = vld [vmem:[%s1796_s1 + $0x18] sm:$0xff]   ;;  %v1459_v4 = vld [vmem:[%s1797_s0] sm:$0xff]   ;;  %v1456_v7 = vld [vmem:[%s1796_s1 + $0x28] sm:$0xff]  }
   0x3   :  { %1356 = vmatpush3.bf16.msra.mxu0 %v1451_v0  ;;  %1443 = vmatpush3.bf16.msra.mxu1 %v1451_v0  ;;  %v1460_v5 = vld [vmem:[%s1797_s0 + $0x80] sm:$0xff]   ;;  %v1457_v8 = vld [vmem:[%s1796_s1 + $0x30] sm:$0xff]   ;;  %v1458_v9 = vld [vmem:[%s1796_s1 + $0x38] sm:$0xff]  }
   0x4   :  { %1357 = vmatprep.subr.bf16.mxu0 %v1452_v1  ;;  %1436 = vmatprep.subr.bf16.mxu1 %v1452_v1  ;;  %v1455_v6 = vld [vmem:[%s1796_s1 + $0x20] sm:$0xff]   ;;  %v1461_v10 = vld [vmem:[%s1797_s0 + $0x8] sm:$0xff]   ;;  %v1463_v12 = vld [vmem:[%s1797_s0 + $0x10] sm:$0xff]  }
   0x5   :  { %1371 = vmatprep.mubr.bf16.mxu0 %v1459_v4  ;;  %1403 = vmatprep.mubr.bf16.mxu1 %v1460_v5  ;;  %v1462_v11 = vld [vmem:[%s1797_s0 + $0x88] sm:$0xff]   ;;  %v1464_v13 = vld [vmem:[%s1797_s0 + $0x90] sm:$0xff]   ;;  %v1465_v14 = vld [vmem:[%s1797_s0 + $0x18] sm:$0xff]  }
   0x6   :  { %v1466_v15 = vld [vmem:[%s1797_s0 + $0x98] sm:$0xff]   ;;  %v1467_v16 = vld [vmem:[%s1797_s0 + $0x20] sm:$0xff]   ;;  %v1469_v18 = vld [vmem:[%s1797_s0 + $0x28] sm:$0xff]  }
   0x7   :  { %1358 = vmatpush3.bf16.msra.mxu0 %v1452_v1  ;;  %1444 = vmatpush3.bf16.msra.mxu1 %v1452_v1  ;;  %v1468_v17 = vld [vmem:[%s1797_s0 + $0xa0] sm:$0xff]   ;;  %v1470_v19 = vld [vmem:[%s1797_s0 + $0xa8] sm:$0xff]   ;;  %v1471_v20 = vld [vmem:[%s1797_s0 + $0x30] sm:$0xff]  }
   0x8   :  { %1359 = vmatprep.subr.bf16.mxu0 %v1453_v2  ;;  %1437 = vmatprep.subr.bf16.mxu1 %v1453_v2  ;;  %v1472_v21 = vld [vmem:[%s1797_s0 + $0xb0] sm:$0xff]   ;;  %v1473_v22 = vld [vmem:[%s1797_s0 + $0x38] sm:$0xff]   ;;  %v1475_v24 = vld [vmem:[%s1797_s0 + $0x40] sm:$0xff]  }
   0x9   :  { %v1474_v23 = vld [vmem:[%s1797_s0 + $0xb8] sm:$0xff]   ;;  %v1476_v25 = vld [vmem:[%s1797_s0 + $0xc0] sm:$0xff]   ;;  %v1477_v26 = vld [vmem:[%s1797_s0 + $0x48] sm:$0xff]  }
   0xa   :  { %v1478_v27 = vld [vmem:[%s1797_s0 + $0xc8] sm:$0xff]   ;;  %v1479_v28 = vld [vmem:[%s1797_s0 + $0x50] sm:$0xff]   ;;  %v1481_v30 = vld [vmem:[%s1797_s0 + $0x58] sm:$0xff]  }
   0xb   :  { %1360 = vmatpush3.bf16.msra.mxu0 %v1453_v2  ;;  %1445 = vmatpush3.bf16.msra.mxu1 %v1453_v2  ;;  %v1480_v29 = vld [vmem:[%s1797_s0 + $0xd0] sm:$0xff]   ;;  %v1482_v31 = vld [vmem:[%s1797_s0 + $0xd8] sm:$0xff]   ;;  %v1483_v32 = vld [vmem:[%s1797_s0 + $0x60] sm:$0xff]  }
   0xc   :  { %1361 = vmatprep.subr.bf16.mxu0 %v1454_v3  ;;  %1438 = vmatprep.subr.bf16.mxu1 %v1454_v3  ;;  %v1484_v33 = vld [vmem:[%s1797_s0 + $0xe0] sm:$0xff]   ;;  %v1485_v34 = vld [vmem:[%s1797_s0 + $0x68] sm:$0xff]   ;;  %v1487_v36 = vld [vmem:[%s1797_s0 + $0x70] sm:$0xff]  }
   0xd   :  { %v1486_v35 = vld [vmem:[%s1797_s0 + $0xe8] sm:$0xff]   ;;  %v1488_v37 = vld [vmem:[%s1797_s0 + $0xf0] sm:$0xff]   ;;  %v1489_v38 = vld [vmem:[%s1797_s0 + $0x78] sm:$0xff]  }
   0xe   :  { %v1490_v39 = vld [vmem:[%s1797_s0 + $0xf8] sm:$0xff]   ;;  %v1634_v41 = vld [vmem:[%s1798_s2] ss:$0 sm:$0xff] }
   0xf   :  { %1362 = vmatpush3.bf16.msra.mxu0 %v1454_v3  ;;  %1446 = vmatpush3.bf16.msra.mxu1 %v1454_v3 }
  0x10   :  { %1363 = vmatprep.subr.bf16.mxu0 %v1455_v6  ;;  %1439 = vmatprep.subr.bf16.mxu1 %v1455_v6 }
  0x13   :  { %1364 = vmatpush3.bf16.msra.mxu0 %v1455_v6  ;;  %1447 = vmatpush3.bf16.msra.mxu1 %v1455_v6 }
  0x14   :  { %1365 = vmatprep.subr.bf16.mxu0 %v1456_v7  ;;  %1440 = vmatprep.subr.bf16.mxu1 %v1456_v7 }
  0x17   :  { %1366 = vmatpush3.bf16.msra.mxu0 %v1456_v7  ;;  %1448 = vmatpush3.bf16.msra.mxu1 %v1456_v7 }
  0x18   :  { %1367 = vmatprep.subr.bf16.mxu0 %v1457_v8  ;;  %1441 = vmatprep.subr.bf16.mxu1 %v1457_v8 }
  0x1b   :  { %1368 = vmatpush3.bf16.msra.mxu0 %v1457_v8  ;;  %1449 = vmatpush3.bf16.msra.mxu1 %v1457_v8 }
  0x1c   :  { %1369 = vmatprep.subr.bf16.mxu0 %v1458_v9  ;;  %1442 = vmatprep.subr.bf16.mxu1 %v1458_v9 }
  0x1f   :  { %1370 = vmatpush3.bf16.msra.mxu0 %v1458_v9  ;;  %1450 = vmatpush3.bf16.msra.mxu1 %v1458_v9 }
  0x22   :  { %1372 = vmatmul.mubr.bf16.vlgmr.msra.gmra.mrb[0].mxu0 %v1461_v10  ;;  %1404 = vmatmul.mubr.bf16.vlgmr.msra.gmra.mrb[0].mxu1 %v1462_v11 }
  0x23   :  { %1375 = vmatprep.mubr.bf16.mxu0 %v1463_v12  ;;  %1407 = vmatprep.mubr.bf16.mxu1 %v1464_v13 }
  0x2a   :  { %1376 = vmatmul.mubr.bf16.gmra.mrb[4].mxu0 %v1465_v14  ;;  %1408 = vmatmul.mubr.bf16.gmra.mrb[4].mxu1 %v1466_v15 }
  0x2b   :  { %1379 = vmatprep.mubr.bf16.mxu0 %v1467_v16  ;;  %1411 = vmatprep.mubr.bf16.mxu1 %v1468_v17 }
  0x32   :  { %1380 = vmatmul.mubr.bf16.gmra.mrb[8].mxu0 %v1469_v18  ;;  %1412 = vmatmul.mubr.bf16.gmra.mrb[8].mxu1 %v1470_v19 }
  0x33   :  { %1383 = vmatprep.mubr.bf16.mxu0 %v1471_v20  ;;  %1415 = vmatprep.mubr.bf16.mxu1 %v1472_v21 }
  0x3a   :  { %1384 = vmatmul.mubr.bf16.gmra.mrb[12].mxu0 %v1473_v22  ;;  %1416 = vmatmul.mubr.bf16.gmra.mrb[12].mxu1 %v1474_v23 }
  0x3b   :  { %1387 = vmatprep.mubr.bf16.mxu0 %v1475_v24  ;;  %1419 = vmatprep.mubr.bf16.mxu1 %v1476_v25 }
  0x42   :  { %1388 = vmatmul.mubr.bf16.gmra.mrb[16].mxu0 %v1477_v26  ;;  %1420 = vmatmul.mubr.bf16.gmra.mrb[16].mxu1 %v1478_v27 }
  0x43   :  { %1391 = vmatprep.mubr.bf16.mxu0 %v1479_v28  ;;  %1423 = vmatprep.mubr.bf16.mxu1 %v1480_v29 }
  0x4a   :  { %1392 = vmatmul.mubr.bf16.gmra.mrb[20].mxu0 %v1481_v30  ;;  %1424 = vmatmul.mubr.bf16.gmra.mrb[20].mxu1 %v1482_v31 }
  0x4b   :  { %1395 = vmatprep.mubr.bf16.mxu0 %v1483_v32  ;;  %1427 = vmatprep.mubr.bf16.mxu1 %v1484_v33 }
  0x52   :  { %1396 = vmatmul.mubr.bf16.gmra.mrb[24].mxu0 %v1485_v34  ;;  %1428 = vmatmul.mubr.bf16.gmra.mrb[24].mxu1 %v1486_v35 }
  0x53   :  { %1399 = vmatprep.mubr.bf16.mxu0 %v1487_v36  ;;  %1431 = vmatprep.mubr.bf16.mxu1 %v1488_v37 }
  0x5a   :  { %1400 = vmatmul.mubr.bf16.gmra.mrb[28].mxu0 %v1489_v38  ;;  %1432 = vmatmul.mubr.bf16.gmra.mrb[28].mxu1 %v1490_v39 }
  0xf5   :  { %v1373_v40 = vpop.f32.mrb[0].mxu0  ;;  %v1405_v42 = vpop.f32.mrb[0].mxu1 }
  0xf6   :  { %v376_v43 = vpop.f32.mrb[1].mxu0  ;;  %v504_v44 = vpop.f32.mrb[1].mxu1  ;;  %v385_v47 = vadd.f32 %v1373_v40, %v1634_v41  ;;  %v513_v48 = vadd.f32 %v1405_v42, %v1634_v41 }
  0xf7   :  { %v1374_v45 = vpop.f32.mrb[2].mxu0  ;;  %v1406_v46 = vpop.f32.mrb[2].mxu1  ;;  %v377_v53 = vadd.f32 %v1634_v41, %v376_v43  ;;  %v505_v54 = vadd.f32 %v1634_v41, %v504_v44 }
  0xf8   :  { %v388_v49 = vadd.f32 %v1374_v45, %v1634_v41  ;;  %v516_v50 = vadd.f32 %v1406_v46, %v1634_v41  ;;  %v379_v51 = vpop.f32.mrb[3].mxu0  ;;  %v507_v52 = vpop.f32.mrb[3].mxu1 }
  0xf9   :  { %v380_v55 = vadd.f32 %v1634_v41, %v379_v51  ;;  %v508_v56 = vadd.f32 %v1634_v41, %v507_v52 }
  0xfa   :  { %v1132_v57 = vpack.c.bf16 %v388_v49, %v385_v47  ;;  %v1212_v58 = vpack.c.bf16 %v516_v50, %v513_v48 }
  0xfb   :  { %v1127_v59 = vpack.c.bf16 %v380_v55, %v377_v53  ;;  %v1207_v60 = vpack.c.bf16 %v508_v56, %v505_v54 }
  0xfc   :  { %1284 = vst [vmem:[%s1799_s3 + $0x8] sm:$0xff] %v1132_v57   ;;  %1300 = vst [vmem:[%s1799_s3 + $0x88] sm:$0xff] %v1212_v58  }
  0xfd   :  { %1128 = vst [vmem:[%s1799_s3] sm:$0xff] %v1127_v59   ;;  %1299 = vst [vmem:[%s1799_s3 + $0x80] sm:$0xff] %v1207_v60   ;;  %v1377_v61 = vpop.f32.mrb[4].mxu0  ;;  %v1409_v62 = vpop.f32.mrb[4].mxu1 }
  0xfe   :  { %v392_v63 = vpop.f32.mrb[5].mxu0  ;;  %v520_v0 = vpop.f32.mrb[5].mxu1  ;;  %v401_v3 = vadd.f32 %v1377_v61, %v1634_v41  ;;  %v529_v4 = vadd.f32 %v1409_v62, %v1634_v41 }
  0xff   :  { %v1378_v1 = vpop.f32.mrb[6].mxu0  ;;  %v1410_v2 = vpop.f32.mrb[6].mxu1  ;;  %v393_v9 = vadd.f32 %v1634_v41, %v392_v63  ;;  %v521_v10 = vadd.f32 %v1634_v41, %v520_v0 }
 0x100   :  { %v404_v5 = vadd.f32 %v1378_v1, %v1634_v41  ;;  %v532_v6 = vadd.f32 %v1410_v2, %v1634_v41  ;;  %v395_v7 = vpop.f32.mrb[7].mxu0  ;;  %v523_v8 = vpop.f32.mrb[7].mxu1 }
 0x101   :  { %v396_v11 = vadd.f32 %v1634_v41, %v395_v7  ;;  %v524_v12 = vadd.f32 %v1634_v41, %v523_v8 }
 0x102   :  { %v1142_v13 = vpack.c.bf16 %v404_v5, %v401_v3  ;;  %v1222_v14 = vpack.c.bf16 %v532_v6, %v529_v4 }
 0x103   :  { %v1137_v15 = vpack.c.bf16 %v396_v11, %v393_v9  ;;  %v1217_v16 = vpack.c.bf16 %v524_v12, %v521_v10 }
 0x104   :  { %1286 = vst [vmem:[%s1799_s3 + $0x18] sm:$0xff] %v1142_v13   ;;  %1302 = vst [vmem:[%s1799_s3 + $0x98] sm:$0xff] %v1222_v14  }
 0x105   :  { %1285 = vst [vmem:[%s1799_s3 + $0x10] sm:$0xff] %v1137_v15   ;;  %1301 = vst [vmem:[%s1799_s3 + $0x90] sm:$0xff] %v1217_v16   ;;  %v1381_v17 = vpop.f32.mrb[8].mxu0  ;;  %v1413_v18 = vpop.f32.mrb[8].mxu1 }
 0x106   :  { %v408_v19 = vpop.f32.mrb[9].mxu0  ;;  %v536_v20 = vpop.f32.mrb[9].mxu1  ;;  %v417_v23 = vadd.f32 %v1381_v17, %v1634_v41  ;;  %v545_v24 = vadd.f32 %v1413_v18, %v1634_v41 }
 0x107   :  { %v1382_v21 = vpop.f32.mrb[10].mxu0  ;;  %v1414_v22 = vpop.f32.mrb[10].mxu1  ;;  %v409_v29 = vadd.f32 %v1634_v41, %v408_v19  ;;  %v537_v30 = vadd.f32 %v1634_v41, %v536_v20 }
 0x108   :  { %v420_v25 = vadd.f32 %v1382_v21, %v1634_v41  ;;  %v548_v26 = vadd.f32 %v1414_v22, %v1634_v41  ;;  %v411_v27 = vpop.f32.mrb[11].mxu0  ;;  %v539_v28 = vpop.f32.mrb[11].mxu1 }
 0x109   :  { %v412_v31 = vadd.f32 %v1634_v41, %v411_v27  ;;  %v540_v32 = vadd.f32 %v1634_v41, %v539_v28 }
 0x10a   :  { %v1152_v33 = vpack.c.bf16 %v420_v25, %v417_v23  ;;  %v1232_v34 = vpack.c.bf16 %v548_v26, %v545_v24 }
 0x10b   :  { %v1147_v35 = vpack.c.bf16 %v412_v31, %v409_v29  ;;  %v1227_v36 = vpack.c.bf16 %v540_v32, %v537_v30 }
 0x10c   :  { %1288 = vst [vmem:[%s1799_s3 + $0x28] sm:$0xff] %v1152_v33   ;;  %1304 = vst [vmem:[%s1799_s3 + $0xa8] sm:$0xff] %v1232_v34  }
 0x10d   :  { %1287 = vst [vmem:[%s1799_s3 + $0x20] sm:$0xff] %v1147_v35   ;;  %1303 = vst [vmem:[%s1799_s3 + $0xa0] sm:$0xff] %v1227_v36   ;;  %v1385_v37 = vpop.f32.mrb[12].mxu0  ;;  %v1417_v38 = vpop.f32.mrb[12].mxu1 }
 0x10e   :  { %v424_v39 = vpop.f32.mrb[13].mxu0  ;;  %v552_v40 = vpop.f32.mrb[13].mxu1  ;;  %v433_v44 = vadd.f32 %v1385_v37, %v1634_v41  ;;  %v561_v45 = vadd.f32 %v1417_v38, %v1634_v41 }
 0x10f   :  { %v1386_v42 = vpop.f32.mrb[14].mxu0  ;;  %v1418_v43 = vpop.f32.mrb[14].mxu1  ;;  %v425_v50 = vadd.f32 %v1634_v41, %v424_v39  ;;  %v553_v51 = vadd.f32 %v1634_v41, %v552_v40 }
 0x110   :  { %v436_v46 = vadd.f32 %v1386_v42, %v1634_v41  ;;  %v564_v47 = vadd.f32 %v1418_v43, %v1634_v41  ;;  %v427_v48 = vpop.f32.mrb[15].mxu0  ;;  %v555_v49 = vpop.f32.mrb[15].mxu1 }
 0x111   :  { %v428_v52 = vadd.f32 %v1634_v41, %v427_v48  ;;  %v556_v53 = vadd.f32 %v1634_v41, %v555_v49 }
 0x112   :  { %v1162_v54 = vpack.c.bf16 %v436_v46, %v433_v44  ;;  %v1242_v55 = vpack.c.bf16 %v564_v47, %v561_v45 }
 0x113   :  { %v1157_v56 = vpack.c.bf16 %v428_v52, %v425_v50  ;;  %v1237_v57 = vpack.c.bf16 %v556_v53, %v553_v51 }
 0x114   :  { %1290 = vst [vmem:[%s1799_s3 + $0x38] sm:$0xff] %v1162_v54   ;;  %1306 = vst [vmem:[%s1799_s3 + $0xb8] sm:$0xff] %v1242_v55  }
 0x115   :  { %1289 = vst [vmem:[%s1799_s3 + $0x30] sm:$0xff] %v1157_v56   ;;  %1305 = vst [vmem:[%s1799_s3 + $0xb0] sm:$0xff] %v1237_v57   ;;  %v1389_v58 = vpop.f32.mrb[16].mxu0  ;;  %v1421_v59 = vpop.f32.mrb[16].mxu1 }
 0x116   :  { %v440_v60 = vpop.f32.mrb[17].mxu0  ;;  %v568_v61 = vpop.f32.mrb[17].mxu1  ;;  %v449_v0 = vadd.f32 %v1389_v58, %v1634_v41  ;;  %v577_v1 = vadd.f32 %v1421_v59, %v1634_v41 }
 0x117   :  { %v1390_v62 = vpop.f32.mrb[18].mxu0  ;;  %v1422_v63 = vpop.f32.mrb[18].mxu1  ;;  %v441_v6 = vadd.f32 %v1634_v41, %v440_v60  ;;  %v569_v7 = vadd.f32 %v1634_v41, %v568_v61 }
 0x118   :  { %v452_v2 = vadd.f32 %v1390_v62, %v1634_v41  ;;  %v580_v3 = vadd.f32 %v1422_v63, %v1634_v41  ;;  %v443_v4 = vpop.f32.mrb[19].mxu0  ;;  %v571_v5 = vpop.f32.mrb[19].mxu1 }
 0x119   :  { %v444_v8 = vadd.f32 %v1634_v41, %v443_v4  ;;  %v572_v9 = vadd.f32 %v1634_v41, %v571_v5 }
 0x11a   :  { %v1172_v10 = vpack.c.bf16 %v452_v2, %v449_v0  ;;  %v1252_v11 = vpack.c.bf16 %v580_v3, %v577_v1 }
 0x11b   :  { %v1167_v12 = vpack.c.bf16 %v444_v8, %v441_v6  ;;  %v1247_v13 = vpack.c.bf16 %v572_v9, %v569_v7 }
 0x11c   :  { %1292 = vst [vmem:[%s1799_s3 + $0x48] sm:$0xff] %v1172_v10   ;;  %1308 = vst [vmem:[%s1799_s3 + $0xc8] sm:$0xff] %v1252_v11  }
 0x11d   :  { %1291 = vst [vmem:[%s1799_s3 + $0x40] sm:$0xff] %v1167_v12   ;;  %1307 = vst [vmem:[%s1799_s3 + $0xc0] sm:$0xff] %v1247_v13   ;;  %v1393_v14 = vpop.f32.mrb[20].mxu0  ;;  %v1425_v15 = vpop.f32.mrb[20].mxu1 }
 0x11e   :  { %v456_v16 = vpop.f32.mrb[21].mxu0  ;;  %v584_v17 = vpop.f32.mrb[21].mxu1  ;;  %v465_v20 = vadd.f32 %v1393_v14, %v1634_v41  ;;  %v593_v21 = vadd.f32 %v1425_v15, %v1634_v41 }
 0x11f   :  { %v1394_v18 = vpop.f32.mrb[22].mxu0  ;;  %v1426_v19 = vpop.f32.mrb[22].mxu1  ;;  %v457_v26 = vadd.f32 %v1634_v41, %v456_v16  ;;  %v585_v27 = vadd.f32 %v1634_v41, %v584_v17 }
 0x120   :  { %v468_v22 = vadd.f32 %v1394_v18, %v1634_v41  ;;  %v596_v23 = vadd.f32 %v1426_v19, %v1634_v41  ;;  %v459_v24 = vpop.f32.mrb[23].mxu0  ;;  %v587_v25 = vpop.f32.mrb[23].mxu1 }
 0x121   :  { %v460_v28 = vadd.f32 %v1634_v41, %v459_v24  ;;  %v588_v29 = vadd.f32 %v1634_v41, %v587_v25 }
 0x122   :  { %v1182_v30 = vpack.c.bf16 %v468_v22, %v465_v20  ;;  %v1262_v31 = vpack.c.bf16 %v596_v23, %v593_v21 }
 0x123   :  { %v1177_v32 = vpack.c.bf16 %v460_v28, %v457_v26  ;;  %v1257_v33 = vpack.c.bf16 %v588_v29, %v585_v27 }
 0x124   :  { %1294 = vst [vmem:[%s1799_s3 + $0x58] sm:$0xff] %v1182_v30   ;;  %1310 = vst [vmem:[%s1799_s3 + $0xd8] sm:$0xff] %v1262_v31  }
 0x125   :  { %1293 = vst [vmem:[%s1799_s3 + $0x50] sm:$0xff] %v1177_v32   ;;  %1309 = vst [vmem:[%s1799_s3 + $0xd0] sm:$0xff] %v1257_v33   ;;  %v1397_v34 = vpop.f32.mrb[24].mxu0  ;;  %v1429_v35 = vpop.f32.mrb[24].mxu1 }
 0x126   :  { %v472_v36 = vpop.f32.mrb[25].mxu0  ;;  %v600_v37 = vpop.f32.mrb[25].mxu1  ;;  %v481_v40 = vadd.f32 %v1397_v34, %v1634_v41  ;;  %v609_v42 = vadd.f32 %v1429_v35, %v1634_v41 }
 0x127   :  { %v1398_v38 = vpop.f32.mrb[26].mxu0  ;;  %v1430_v39 = vpop.f32.mrb[26].mxu1  ;;  %v473_v47 = vadd.f32 %v1634_v41, %v472_v36  ;;  %v601_v48 = vadd.f32 %v1634_v41, %v600_v37 }
 0x128   :  { %v484_v43 = vadd.f32 %v1398_v38, %v1634_v41  ;;  %v612_v44 = vadd.f32 %v1430_v39, %v1634_v41  ;;  %v475_v45 = vpop.f32.mrb[27].mxu0  ;;  %v603_v46 = vpop.f32.mrb[27].mxu1 }
 0x129   :  { %v476_v49 = vadd.f32 %v1634_v41, %v475_v45  ;;  %v604_v50 = vadd.f32 %v1634_v41, %v603_v46 }
 0x12a   :  { %v1192_v51 = vpack.c.bf16 %v484_v43, %v481_v40  ;;  %v1272_v52 = vpack.c.bf16 %v612_v44, %v609_v42 }
 0x12b   :  { %v1187_v53 = vpack.c.bf16 %v476_v49, %v473_v47  ;;  %v1267_v54 = vpack.c.bf16 %v604_v50, %v601_v48 }
 0x12c   :  { %1296 = vst [vmem:[%s1799_s3 + $0x68] sm:$0xff] %v1192_v51   ;;  %1312 = vst [vmem:[%s1799_s3 + $0xe8] sm:$0xff] %v1272_v52  }
 0x12d   :  { %1295 = vst [vmem:[%s1799_s3 + $0x60] sm:$0xff] %v1187_v53   ;;  %1311 = vst [vmem:[%s1799_s3 + $0xe0] sm:$0xff] %v1267_v54   ;;  %v1401_v55 = vpop.f32.mrb[28].mxu0  ;;  %v1433_v56 = vpop.f32.mrb[28].mxu1 }
 0x12e   :  { %v488_v57 = vpop.f32.mrb[29].mxu0  ;;  %v616_v58 = vpop.f32.mrb[29].mxu1  ;;  %v497_v61 = vadd.f32 %v1401_v55, %v1634_v41  ;;  %v625_v62 = vadd.f32 %v1433_v56, %v1634_v41 }
 0x12f   :  { %v1402_v59 = vpop.f32.mrb[30].mxu0  ;;  %v1434_v60 = vpop.f32.mrb[30].mxu1  ;;  %v489_v3 = vadd.f32 %v1634_v41, %v488_v57  ;;  %v617_v4 = vadd.f32 %v1634_v41, %v616_v58 }
 0x130   :  { %v500_v63 = vadd.f32 %v1402_v59, %v1634_v41  ;;  %v628_v0 = vadd.f32 %v1434_v60, %v1634_v41  ;;  %v491_v1 = vpop.f32.mrb[31].mxu0  ;;  %v619_v2 = vpop.f32.mrb[31].mxu1 }
 0x131   :  { %v492_v5 = vadd.f32 %v1634_v41, %v491_v1  ;;  %v620_v6 = vadd.f32 %v1634_v41, %v619_v2 }
 0x132   :  { %v1202_v7 = vpack.c.bf16 %v500_v63, %v497_v61  ;;  %v1282_v8 = vpack.c.bf16 %v628_v0, %v625_v62 }
 0x133   :  { %v1197_v9 = vpack.c.bf16 %v492_v5, %v489_v3  ;;  %v1277_v10 = vpack.c.bf16 %v620_v6, %v617_v4 }
 0x134   :  { %1298 = vst [vmem:[%s1799_s3 + $0x78] sm:$0xff] %v1202_v7   ;;  %1314 = vst [vmem:[%s1799_s3 + $0xf8] sm:$0xff] %v1282_v8  }
 0x135   :  { %1297 = vst [vmem:[%s1799_s3 + $0x70] sm:$0xff] %v1197_v9   ;;  %1313 = vst [vmem:[%s1799_s3 + $0xf0] sm:$0xff] %v1277_v10  }

// kernel: pix2pix_forward.11
= control target key start
LH: loop header
LB: loop body
LE: loop exit
PB: predicated region body
PF: predicated region fallthrough
CT: control target
= control target key end

     0   :  { %s931_s1 = inlined_call_operand.vmem [shape: bf16[256,128], index: 1, kind: input, shape index: {}]   ;;  %s932_s0 = inlined_call_operand.vmem [shape: bf16[128,256], index: 0, kind: input, shape index: {}]   ;;  %s933_s2 = inlined_call_operand.vmem [shape: f32[1,128], index: 2, kind: input, shape index: {}]   ;;  %s934_s3 = inlined_call_operand.vmem [shape: bf16[128,128], index: 3, kind: output, shape index: {0}]   ;;  %s935_s4 = inlined_call_operand.vmem [shape: f32[1,128], index: 4, kind: output, shape index: {1}]   ;;  %s936_s5 = inlined_call_operand.vmem [shape: f32[1,128], index: 5, kind: output, shape index: {2}]  }
   0x1   :  { %v690_v0 = vld [vmem:[%s931_s1 + $0x40] sm:$0xff]   ;;  %v692_v2 = vld [vmem:[%s931_s1 + $0x48] sm:$0xff]   ;;  %v694_v4 = vld [vmem:[%s931_s1 + $0x50] sm:$0xff]  }
   0x2   :  { %v691_v1 = vld [vmem:[%s931_s1] sm:$0xff]   ;;  %610 = vmatprep.subr.bf16.mxu0 %v690_v0  ;;  %674 = vmatprep.subr.bf16.mxu1 %v690_v0  ;;  %v693_v3 = vld [vmem:[%s931_s1 + $0x8] sm:$0xff]   ;;  %v695_v5 = vld [vmem:[%s931_s1 + $0x10] sm:$0xff]  }
   0x3   :  { %611 = vmatpush3.bf16.msra.mxu0 %v691_v1  ;;  %682 = vmatpush3.bf16.msra.mxu1 %v691_v1  ;;  %v696_v6 = vld [vmem:[%s931_s1 + $0x58] sm:$0xff]   ;;  %v698_v8 = vld [vmem:[%s931_s1 + $0x60] sm:$0xff]   ;;  %v700_v10 = vld [vmem:[%s931_s1 + $0x68] sm:$0xff]  }
   0x4   :  { %612 = vmatprep.subr.bf16.mxu0 %v692_v2  ;;  %675 = vmatprep.subr.bf16.mxu1 %v692_v2  ;;  %v697_v7 = vld [vmem:[%s931_s1 + $0x18] sm:$0xff]   ;;  %v699_v9 = vld [vmem:[%s931_s1 + $0x20] sm:$0xff]   ;;  %v701_v12 = vld [vmem:[%s931_s1 + $0x28] sm:$0xff]  }
   0x5   :  { %v708_v11 = vld [vmem:[%s932_s0 + $0x4] ss:$8 sps:$4 sm:$0xff]   ;;  %v702_v14 = vld [vmem:[%s931_s1 + $0x70] sm:$0xff]   ;;  %v704_v16 = vld [vmem:[%s931_s1 + $0x78] sm:$0xff]  }
   0x6   :  { %v714_v13 = vld [vmem:[%s932_s0 + $0x44] ss:$8 sps:$4 sm:$0xff]   ;;  %281 = vmatprep.mubr.bf16.mxu0 %v708_v11  ;;  %v703_v15 = vld [vmem:[%s931_s1 + $0x30] sm:$0xff]   ;;  %v705_v17 = vld [vmem:[%s931_s1 + $0x38] sm:$0xff]  }
   0x7   :  { %613 = vmatpush3.bf16.msra.mxu0 %v693_v3  ;;  %683 = vmatpush3.bf16.msra.mxu1 %v693_v3  ;;  %v706_v18 = vld [vmem:[%s932_s0] ss:$8 sps:$4 sm:$0xff]   ;;  %v709_v20 = vld [vmem:[%s932_s0 + $0x14] ss:$8 sps:$4 sm:$0xff]   ;;  %v711_v22 = vld [vmem:[%s932_s0 + $0x10] ss:$8 sps:$4 sm:$0xff]  }
   0x8   :  { %614 = vmatprep.subr.bf16.mxu0 %v694_v4  ;;  %676 = vmatprep.subr.bf16.mxu1 %v694_v4  ;;  %v712_v19 = vld [vmem:[%s932_s0 + $0x40] ss:$8 sps:$4 sm:$0xff]   ;;  %v718_v21 = vld [vmem:[%s932_s0 + $0x54] ss:$8 sps:$4 sm:$0xff]   ;;  %v720_v23 = vld [vmem:[%s932_s0 + $0x50] ss:$8 sps:$4 sm:$0xff]  }
   0x9   :  { %313 = vmatprep.mubr.bf16.mxu1 %v714_v13  ;;  %v715_v24 = vld [vmem:[%s932_s0 + $0x24] ss:$8 sps:$4 sm:$0xff]   ;;  %v717_v26 = vld [vmem:[%s932_s0 + $0x20] ss:$8 sps:$4 sm:$0xff]   ;;  %v721_v28 = vld [vmem:[%s932_s0 + $0x34] ss:$8 sps:$4 sm:$0xff]  }
   0xa   :  { %v724_v25 = vld [vmem:[%s932_s0 + $0x64] ss:$8 sps:$4 sm:$0xff]   ;;  %v726_v27 = vld [vmem:[%s932_s0 + $0x60] ss:$8 sps:$4 sm:$0xff]   ;;  %v727_v29 = vld [vmem:[%s932_s0 + $0x74] ss:$8 sps:$4 sm:$0xff]  }
   0xb   :  { %615 = vmatpush3.bf16.msra.mxu0 %v695_v5  ;;  %684 = vmatpush3.bf16.msra.mxu1 %v695_v5  ;;  %v723_v30 = vld [vmem:[%s932_s0 + $0x30] ss:$8 sps:$4 sm:$0xff]   ;;  %v859_v34 = vld [vmem:[%s933_s2] ss:$0 sm:$0xff] }
   0xc   :  { %616 = vmatprep.subr.bf16.mxu0 %v696_v6  ;;  %677 = vmatprep.subr.bf16.mxu1 %v696_v6  ;;  %v729_v31 = vld [vmem:[%s932_s0 + $0x70] ss:$8 sps:$4 sm:$0xff]  }
   0xf   :  { %617 = vmatpush3.bf16.msra.mxu0 %v697_v7  ;;  %685 = vmatpush3.bf16.msra.mxu1 %v697_v7 }
  0x10   :  { %618 = vmatprep.subr.bf16.mxu0 %v698_v8  ;;  %678 = vmatprep.subr.bf16.mxu1 %v698_v8 }
  0x13   :  { %619 = vmatpush3.bf16.msra.mxu0 %v699_v9  ;;  %686 = vmatpush3.bf16.msra.mxu1 %v699_v9 }
  0x14   :  { %620 = vmatprep.subr.bf16.mxu0 %v700_v10  ;;  %679 = vmatprep.subr.bf16.mxu1 %v700_v10 }
  0x17   :  { %621 = vmatpush3.bf16.msra.mxu0 %v701_v12  ;;  %687 = vmatpush3.bf16.msra.mxu1 %v701_v12 }
  0x18   :  { %622 = vmatprep.subr.bf16.mxu0 %v702_v14  ;;  %680 = vmatprep.subr.bf16.mxu1 %v702_v14 }
  0x1b   :  { %623 = vmatpush3.bf16.msra.mxu0 %v703_v15  ;;  %688 = vmatpush3.bf16.msra.mxu1 %v703_v15 }
  0x1c   :  { %624 = vmatprep.subr.bf16.mxu0 %v704_v16  ;;  %681 = vmatprep.subr.bf16.mxu1 %v704_v16 }
  0x1f   :  { %625 = vmatpush3.bf16.msra.mxu0 %v705_v17  ;;  %689 = vmatpush3.bf16.msra.mxu1 %v705_v17 }
  0x22   :  { %282 = vmatmul.mubr.bf16.vlgmr.msra.gmra.mrb[0].mxu0 %v706_v18  ;;  %314 = vmatmul.mubr.bf16.vlgmr.msra.gmra.mrb[0].mxu1 %v712_v19 }
  0x23   :  { %289 = vmatprep.mubr.bf16.mxu0 %v709_v20  ;;  %321 = vmatprep.mubr.bf16.mxu1 %v718_v21 }
  0x2a   :  { %290 = vmatmul.mubr.bf16.gmra.mrb[4].mxu0 %v711_v22  ;;  %322 = vmatmul.mubr.bf16.gmra.mrb[4].mxu1 %v720_v23 }
  0x2b   :  { %297 = vmatprep.mubr.bf16.mxu0 %v715_v24  ;;  %329 = vmatprep.mubr.bf16.mxu1 %v724_v25 }
  0x32   :  { %298 = vmatmul.mubr.bf16.gmra.mrb[8].mxu0 %v717_v26  ;;  %330 = vmatmul.mubr.bf16.gmra.mrb[8].mxu1 %v726_v27 }
  0x33   :  { %305 = vmatprep.mubr.bf16.mxu0 %v721_v28  ;;  %337 = vmatprep.mubr.bf16.mxu1 %v727_v29 }
  0x3a   :  { %306 = vmatmul.mubr.bf16.gmra.mrb[12].mxu0 %v723_v30  ;;  %338 = vmatmul.mubr.bf16.gmra.mrb[12].mxu1 %v729_v31 }
  0xf5   :  { %v626_v32 = vpop.f32.mrb[0].mxu0  ;;  %v650_v33 = vpop.f32.mrb[0].mxu1 }
  0xf6   :  { %v627_v35 = vpop.f32.mrb[1].mxu0  ;;  %v651_v36 = vpop.f32.mrb[1].mxu1 }
  0xf7   :  { %v628_v37 = vadd.f32 %v627_v35, %v626_v32  ;;  %v629_v38 = vpop.f32.mrb[2].mxu0  ;;  %v652_v39 = vadd.f32 %v651_v36, %v650_v33  ;;  %v653_v40 = vpop.f32.mrb[2].mxu1 }
  0xf8   :  { %v630_v41 = vpop.f32.mrb[3].mxu0  ;;  %v654_v42 = vpop.f32.mrb[3].mxu1 }
  0xf9   :  { %v284_v43 = vadd.f32 %v628_v37, %v859_v34  ;;  %v631_v44 = vadd.f32 %v630_v41, %v629_v38  ;;  %v655_v45 = vadd.f32 %v654_v42, %v653_v40  ;;  %v863_v46 = vadd.f32 %v652_v39, %v859_v34 }
  0xfb   :  { %v287_v47 = vadd.f32 %v631_v44, %v859_v34  ;;  %v867_v48 = vadd.f32 %v655_v45, %v859_v34  ;;  %v368_v49 = vmul.f32 %v284_v43, %v284_v43 }
  0xfd   :  { %v346_v50 = vadd.f32 %v287_v47, %v284_v43  ;;  %v369_v51 = vmul.f32 %v287_v47, %v287_v47  ;;  %v566_v52 = vpack.c.bf16 %v287_v47, %v284_v43  ;;  %v632_v53 = vpop.f32.mrb[4].mxu0  ;;  %v656_v54 = vpop.f32.mrb[4].mxu1  ;;  %v586_v56 = vpack.c.bf16 %v867_v48, %v863_v46 }
  0xfe   :  { %v633_v55 = vpop.f32.mrb[5].mxu0  ;;  %v657_v57 = vpop.f32.mrb[5].mxu1 }
  0xff   :  { %v384_v58 = vadd.f32 %v369_v51, %v368_v49  ;;  %567 = vst [vmem:[%s934_s3] sm:$0xff] %v566_v52   ;;  %v634_v59 = vadd.f32 %v633_v55, %v632_v53  ;;  %v635_v60 = vpop.f32.mrb[6].mxu0  ;;  %v658_v61 = vadd.f32 %v657_v57, %v656_v54  ;;  %v659_v62 = vpop.f32.mrb[6].mxu1  ;;  %606 = vst [vmem:[%s934_s3 + $0x20] sm:$0xff] %v586_v56  }
 0x100   :  { %v636_v63 = vpop.f32.mrb[7].mxu0  ;;  %v660_v0 = vpop.f32.mrb[7].mxu1 }
 0x101   :  { %v292_v1 = vadd.f32 %v634_v59, %v859_v34  ;;  %v637_v2 = vadd.f32 %v636_v63, %v635_v60  ;;  %v661_v3 = vadd.f32 %v660_v0, %v659_v62  ;;  %v879_v4 = vadd.f32 %v658_v61, %v859_v34 }
 0x103   :  { %v347_v5 = vadd.f32 %v346_v50, %v292_v1  ;;  %v370_v6 = vmul.f32 %v292_v1, %v292_v1  ;;  %v295_v7 = vadd.f32 %v637_v2, %v859_v34  ;;  %v883_v8 = vadd.f32 %v661_v3, %v859_v34 }
 0x105   :  { %v385_v9 = vadd.f32 %v384_v58, %v370_v6  ;;  %v348_v10 = vadd.f32 %v347_v5, %v295_v7  ;;  %v371_v11 = vmul.f32 %v295_v7, %v295_v7  ;;  %v571_v12 = vpack.c.bf16 %v295_v7, %v292_v1  ;;  %v638_v13 = vpop.f32.mrb[8].mxu0  ;;  %v662_v14 = vpop.f32.mrb[8].mxu1 }
 0x106   :  { %v639_v15 = vpop.f32.mrb[9].mxu0  ;;  %v591_v16 = vpack.c.bf16 %v883_v8, %v879_v4  ;;  %v663_v17 = vpop.f32.mrb[9].mxu1  ;;  %v376_v1 = vmul.f32 %v863_v46, %v863_v46  ;;  %v378_v7 = vmul.f32 %v879_v4, %v879_v4 }
 0x107   :  { %v386_v18 = vadd.f32 %v385_v9, %v371_v11  ;;  %603 = vst [vmem:[%s934_s3 + $0x8] sm:$0xff] %v571_v12   ;;  %v640_v19 = vadd.f32 %v639_v15, %v638_v13  ;;  %v641_v20 = vpop.f32.mrb[10].mxu0  ;;  %v664_v21 = vadd.f32 %v663_v17, %v662_v14  ;;  %v665_v22 = vpop.f32.mrb[10].mxu1 }
 0x108   :  { %v642_v23 = vpop.f32.mrb[11].mxu0  ;;  %607 = vst [vmem:[%s934_s3 + $0x28] sm:$0xff] %v591_v16   ;;  %v666_v24 = vpop.f32.mrb[11].mxu1 }
 0x109   :  { %v300_v25 = vadd.f32 %v640_v19, %v859_v34  ;;  %v643_v26 = vadd.f32 %v642_v23, %v641_v20  ;;  %v667_v27 = vadd.f32 %v666_v24, %v665_v22  ;;  %v332_v28 = vadd.f32 %v664_v21, %v859_v34 }
 0x10b   :  { %v349_v29 = vadd.f32 %v348_v10, %v300_v25  ;;  %v372_v30 = vmul.f32 %v300_v25, %v300_v25  ;;  %v303_v31 = vadd.f32 %v643_v26, %v859_v34  ;;  %v335_v32 = vadd.f32 %v667_v27, %v859_v34 }
 0x10c   :  { %v379_v10 = vmul.f32 %v883_v8, %v883_v8  ;;  %v380_v14 = vmul.f32 %v332_v28, %v332_v28 }
 0x10d   :  { %v387_v33 = vadd.f32 %v386_v18, %v372_v30  ;;  %v350_v35 = vadd.f32 %v349_v29, %v303_v31  ;;  %v373_v36 = vmul.f32 %v303_v31, %v303_v31  ;;  %v576_v37 = vpack.c.bf16 %v303_v31, %v300_v25  ;;  %v644_v38 = vpop.f32.mrb[12].mxu0  ;;  %v668_v39 = vpop.f32.mrb[12].mxu1 }
 0x10e   :  { %v645_v40 = vpop.f32.mrb[13].mxu0  ;;  %v596_v41 = vpack.c.bf16 %v335_v32, %v332_v28  ;;  %v669_v42 = vpop.f32.mrb[13].mxu1  ;;  %v381_v18 = vmul.f32 %v335_v32, %v335_v32 }
 0x10f   :  { %v388_v43 = vadd.f32 %v387_v33, %v373_v36  ;;  %604 = vst [vmem:[%s934_s3 + $0x10] sm:$0xff] %v576_v37   ;;  %v646_v44 = vadd.f32 %v645_v40, %v644_v38  ;;  %v647_v45 = vpop.f32.mrb[14].mxu0  ;;  %v670_v47 = vadd.f32 %v669_v42, %v668_v39  ;;  %v671_v49 = vpop.f32.mrb[14].mxu1 }
 0x110   :  { %v648_v50 = vpop.f32.mrb[15].mxu0  ;;  %608 = vst [vmem:[%s934_s3 + $0x30] sm:$0xff] %v596_v41   ;;  %v672_v51 = vpop.f32.mrb[15].mxu1 }
 0x111   :  { %v308_v52 = vadd.f32 %v646_v44, %v859_v34  ;;  %v649_v53 = vadd.f32 %v648_v50, %v647_v45  ;;  %v673_v54 = vadd.f32 %v672_v51, %v671_v49  ;;  %v340_v55 = vadd.f32 %v670_v47, %v859_v34 }
 0x113   :  { %v351_v56 = vadd.f32 %v350_v35, %v308_v52  ;;  %v374_v57 = vmul.f32 %v308_v52, %v308_v52  ;;  %v311_v58 = vadd.f32 %v649_v53, %v859_v34  ;;  %v343_v59 = vadd.f32 %v673_v54, %v859_v34 }
 0x114   :  { %v377_v34 = vmul.f32 %v867_v48, %v867_v48 }
 0x115   :  { %v389_v60 = vadd.f32 %v388_v43, %v374_v57  ;;  %v352_v61 = vadd.f32 %v351_v56, %v311_v58  ;;  %v375_v62 = vmul.f32 %v311_v58, %v311_v58  ;;  %v581_v63 = vpack.c.bf16 %v311_v58, %v308_v52 }
 0x116   :  { %v601_v0 = vpack.c.bf16 %v343_v59, %v340_v55  ;;  %v383_v23 = vmul.f32 %v343_v59, %v343_v59 }
 0x117   :  { %v353_v2 = vadd.f32 %v352_v61, %v863_v46  ;;  %v390_v3 = vadd.f32 %v389_v60, %v375_v62  ;;  %605 = vst [vmem:[%s934_s3 + $0x18] sm:$0xff] %v581_v63  }
 0x118   :  { %609 = vst [vmem:[%s934_s3 + $0x38] sm:$0xff] %v601_v0  }
 0x119   :  { %v354_v5 = vadd.f32 %v353_v2, %v867_v48  ;;  %v391_v6 = vadd.f32 %v390_v3, %v376_v1  ;;  %v382_v48 = vmul.f32 %v340_v55, %v340_v55 }
 0x11b   :  { %v392_v9 = vadd.f32 %v391_v6, %v377_v34  ;;  %v355_v46 = vadd.f32 %v354_v5, %v879_v4 }
 0x11d   :  { %v356_v11 = vadd.f32 %v355_v46, %v883_v8  ;;  %v393_v12 = vadd.f32 %v392_v9, %v378_v7 }
 0x11f   :  { %v357_v13 = vadd.f32 %v356_v11, %v332_v28  ;;  %v394_v15 = vadd.f32 %v393_v12, %v379_v10 }
 0x121   :  { %v395_v16 = vadd.f32 %v394_v15, %v380_v14  ;;  %v358_v17 = vadd.f32 %v357_v13, %v335_v32 }
 0x123   :  { %v396_v19 = vadd.f32 %v395_v16, %v381_v18  ;;  %v359_v20 = vadd.f32 %v358_v17, %v340_v55 }
 0x125   :  { %v397_v21 = vadd.f32 %v396_v19, %v382_v48  ;;  %v360_v22 = vadd.f32 %v359_v20, %v343_v59 }
 0x127   :  { %v361_v24 = vrot.slane %v360_v22, 4  ;;  %v398_v4 = vadd.f32 %v397_v21, %v383_v23 }
 0x129   :  { %v362_v25 = vadd.f32 %v361_v24, %v360_v22  ;;  %v399_v26 = vrot.slane %v398_v4, 4 }
 0x12b   :  { %v363_v27 = vrot.slane %v362_v25, 2  ;;  %v400_v29 = vadd.f32 %v399_v26, %v398_v4 }
 0x12d   :  { %v364_v8 = vadd.f32 %v363_v27, %v362_v25  ;;  %v401_v30 = vrot.slane %v400_v29, 2 }
 0x12f   :  { %v365_v31 = vrot.slane %v364_v8, 1  ;;  %v402_v28 = vadd.f32 %v401_v30, %v400_v29 }
 0x131   :  { %v366_v33 = vadd.f32 %v365_v31, %v364_v8  ;;  %v403_v35 = vrot.slane %v402_v28, 1 }
 0x133   :  { %367 = vst [vmem:[%s935_s4] sm:$0x1] %v366_v33  ;;  %v404_v32 = vadd.f32 %v403_v35, %v402_v28 }
 0x135   :  { %405 = vst [vmem:[%s936_s5] sm:$0x1] %v404_v32 }

// kernel: pix2pix_forward.12
= control target key start
LH: loop header
LB: loop body
LE: loop exit
PB: predicated region body
PF: predicated region fallthrough
CT: control target
= control target key end

     0   :  { %s808_s1 = inlined_call_operand.vmem [shape: bf16[512,128], index: 1, kind: input, shape index: {}]   ;;  %s809_s0 = inlined_call_operand.vmem [shape: bf16[32,512], index: 0, kind: input, shape index: {}]   ;;  %s810_s2 = inlined_call_operand.vmem [shape: f32[1,128], index: 2, kind: input, shape index: {}]   ;;  %s811_s3 = inlined_call_operand.vmem [shape: bf16[32,128], index: 3, kind: output, shape index: {0}]   ;;  %s812_s4 = inlined_call_operand.vmem [shape: f32[1,128], index: 4, kind: output, shape index: {1}]   ;;  %s813_s5 = inlined_call_operand.vmem [shape: f32[1,128], index: 5, kind: output, shape index: {2}]  }
   0x1   :  { %v599_v0 = vld [vmem:[%s808_s1 + $0x40] sm:$0xff]   ;;  %v603_v4 = vld [vmem:[%s808_s1 + $0x48] sm:$0xff]   ;;  %v607_v8 = vld [vmem:[%s808_s1 + $0x50] sm:$0xff]  }
   0x2   :  { %v600_v1 = vld [vmem:[%s808_s1 + $0xc0] sm:$0xff]   ;;  %543 = vmatprep.subr.bf16.mxu0 %v599_v0  ;;  %v604_v5 = vld [vmem:[%s808_s1 + $0xc8] sm:$0xff]   ;;  %v608_v9 = vld [vmem:[%s808_s1 + $0xd0] sm:$0xff]  }
   0x3   :  { %v601_v2 = vld [vmem:[%s808_s1] sm:$0xff]   ;;  %571 = vmatprep.subr.bf16.mxu1 %v600_v1  ;;  %v605_v6 = vld [vmem:[%s808_s1 + $0x8] sm:$0xff]   ;;  %v609_v10 = vld [vmem:[%s808_s1 + $0x10] sm:$0xff]  }
   0x4   :  { %v602_v3 = vld [vmem:[%s808_s1 + $0x80] sm:$0xff]   ;;  %544 = vmatpush3.bf16.msra.mxu0 %v601_v2  ;;  %v606_v7 = vld [vmem:[%s808_s1 + $0x88] sm:$0xff]   ;;  %v610_v11 = vld [vmem:[%s808_s1 + $0x90] sm:$0xff]  }
   0x5   :  { %572 = vmatpush3.bf16.msra.mxu1 %v602_v3  ;;  %545 = vmatprep.subr.bf16.mxu0 %v603_v4  ;;  %v611_v12 = vld [vmem:[%s808_s1 + $0x58] sm:$0xff]   ;;  %v615_v16 = vld [vmem:[%s808_s1 + $0x60] sm:$0xff]   ;;  %v619_v20 = vld [vmem:[%s808_s1 + $0x68] sm:$0xff]  }
   0x6   :  { %573 = vmatprep.subr.bf16.mxu1 %v604_v5  ;;  %v612_v13 = vld [vmem:[%s808_s1 + $0xd8] sm:$0xff]   ;;  %v616_v17 = vld [vmem:[%s808_s1 + $0xe0] sm:$0xff]   ;;  %v620_v21 = vld [vmem:[%s808_s1 + $0xe8] sm:$0xff]  }
   0x7   :  { %v613_v14 = vld [vmem:[%s808_s1 + $0x18] sm:$0xff]   ;;  %v617_v18 = vld [vmem:[%s808_s1 + $0x20] sm:$0xff]   ;;  %v621_v22 = vld [vmem:[%s808_s1 + $0x28] sm:$0xff]  }
   0x8   :  { %546 = vmatpush3.bf16.msra.mxu0 %v605_v6  ;;  %v614_v15 = vld [vmem:[%s808_s1 + $0x98] sm:$0xff]   ;;  %v618_v19 = vld [vmem:[%s808_s1 + $0xa0] sm:$0xff]   ;;  %v622_v23 = vld [vmem:[%s808_s1 + $0xa8] sm:$0xff]  }
   0x9   :  { %574 = vmatpush3.bf16.msra.mxu1 %v606_v7  ;;  %547 = vmatprep.subr.bf16.mxu0 %v607_v8  ;;  %v623_v24 = vld [vmem:[%s808_s1 + $0x70] sm:$0xff]   ;;  %v627_v28 = vld [vmem:[%s808_s1 + $0x78] sm:$0xff]   ;;  %v483_v42 = vld [vmem:[%s810_s2] ss:$0 sm:$0xff] }
   0xa   :  { %575 = vmatprep.subr.bf16.mxu1 %v608_v9  ;;  %v624_v25 = vld [vmem:[%s808_s1 + $0xf0] sm:$0xff]   ;;  %v628_v29 = vld [vmem:[%s808_s1 + $0xf8] sm:$0xff]  }
   0xb   :  { %v625_v26 = vld [vmem:[%s808_s1 + $0x30] sm:$0xff]   ;;  %v629_v30 = vld [vmem:[%s808_s1 + $0x38] sm:$0xff]  }
   0xc   :  { %548 = vmatpush3.bf16.msra.mxu0 %v609_v10  ;;  %v626_v27 = vld [vmem:[%s808_s1 + $0xb0] sm:$0xff]   ;;  %v630_v31 = vld [vmem:[%s808_s1 + $0xb8] sm:$0xff]  }
   0xd   :  { %576 = vmatpush3.bf16.msra.mxu1 %v610_v11  ;;  %549 = vmatprep.subr.bf16.mxu0 %v611_v12  ;;  %v631_v32 = vld [vmem:[%s809_s0] ss:$16 sps:$4 sm:$0xff]   ;;  %v633_v33 = vld [vmem:[%s809_s0 + $0x4] ss:$16 sps:$4 sm:$0xff]   ;;  %v634_v34 = vld [vmem:[%s809_s0 + $0x8] ss:$16 sps:$4 sm:$0xff]  }
   0xe   :  { %577 = vmatprep.subr.bf16.mxu1 %v612_v13  ;;  %v636_v35 = vld [vmem:[%s809_s0 + $0xc] ss:$16 sps:$4 sm:$0xff]   ;;  %361 = vmatprep.mubr.bf16.mxu0 %v633_v33  ;;  %v637_v36 = vld [vmem:[%s809_s0 + $0x24] ss:$16 sps:$4 sm:$0xff]   ;;  %v641_v38 = vld [vmem:[%s809_s0 + $0x20] ss:$16 sps:$4 sm:$0xff]  }
   0xf   :  { %410 = vmatprep.mubr.bf16.mxu1 %v636_v35  ;;  %v639_v37 = vld [vmem:[%s809_s0 + $0x2c] ss:$16 sps:$4 sm:$0xff]   ;;  %v642_v39 = vld [vmem:[%s809_s0 + $0x28] ss:$16 sps:$4 sm:$0xff]  }
  0x10   :  { %550 = vmatpush3.bf16.msra.mxu0 %v613_v14 }
  0x11   :  { %578 = vmatpush3.bf16.msra.mxu1 %v614_v15  ;;  %551 = vmatprep.subr.bf16.mxu0 %v615_v16 }
  0x12   :  { %579 = vmatprep.subr.bf16.mxu1 %v616_v17 }
  0x14   :  { %552 = vmatpush3.bf16.msra.mxu0 %v617_v18 }
  0x15   :  { %580 = vmatpush3.bf16.msra.mxu1 %v618_v19  ;;  %553 = vmatprep.subr.bf16.mxu0 %v619_v20 }
  0x16   :  { %581 = vmatprep.subr.bf16.mxu1 %v620_v21 }
  0x18   :  { %554 = vmatpush3.bf16.msra.mxu0 %v621_v22 }
  0x19   :  { %582 = vmatpush3.bf16.msra.mxu1 %v622_v23  ;;  %555 = vmatprep.subr.bf16.mxu0 %v623_v24 }
  0x1a   :  { %583 = vmatprep.subr.bf16.mxu1 %v624_v25 }
  0x1c   :  { %556 = vmatpush3.bf16.msra.mxu0 %v625_v26 }
  0x1d   :  { %584 = vmatpush3.bf16.msra.mxu1 %v626_v27  ;;  %557 = vmatprep.subr.bf16.mxu0 %v627_v28 }
  0x1e   :  { %585 = vmatprep.subr.bf16.mxu1 %v628_v29 }
  0x20   :  { %558 = vmatpush3.bf16.msra.mxu0 %v629_v30 }
  0x21   :  { %586 = vmatpush3.bf16.msra.mxu1 %v630_v31 }
  0x23   :  { %362 = vmatmul.mubr.bf16.vlgmr.msra.gmra.mrb[0].mxu0 %v631_v32 }
  0x24   :  { %411 = vmatmul.mubr.bf16.vlgmr.msra.gmra.mrb[0].mxu1 %v634_v34  ;;  %369 = vmatprep.mubr.bf16.mxu0 %v637_v36 }
  0x25   :  { %418 = vmatprep.mubr.bf16.mxu1 %v639_v37 }
  0x2b   :  { %370 = vmatmul.mubr.bf16.gmra.mrb[4].mxu0 %v641_v38 }
  0x2c   :  { %419 = vmatmul.mubr.bf16.gmra.mrb[4].mxu1 %v642_v39 }
  0xf6   :  { %v559_v40 = vpop.f32.mrb[0].mxu0 }
  0xf7   :  { %v587_v41 = vpop.f32.mrb[0].mxu1  ;;  %v560_v43 = vpop.f32.mrb[1].mxu0 }
  0xf8   :  { %v561_v44 = vadd.f32 %v560_v43, %v559_v40  ;;  %v588_v45 = vpop.f32.mrb[1].mxu1  ;;  %v562_v46 = vpop.f32.mrb[2].mxu0 }
  0xf9   :  { %v589_v47 = vadd.f32 %v588_v45, %v587_v41  ;;  %v590_v48 = vpop.f32.mrb[2].mxu1  ;;  %v563_v49 = vpop.f32.mrb[3].mxu0 }
  0xfa   :  { %v364_v50 = vadd.f32 %v561_v44, %v483_v42  ;;  %v564_v51 = vadd.f32 %v563_v49, %v562_v46  ;;  %v591_v52 = vpop.f32.mrb[3].mxu1 }
  0xfb   :  { %v592_v53 = vadd.f32 %v591_v52, %v590_v48 }
  0xfc   :  { %v413_v54 = vadd.f32 %v589_v47, %v364_v50  ;;  %v367_v55 = vadd.f32 %v564_v51, %v483_v42 }
  0xfe   :  { %v416_v56 = vadd.f32 %v592_v53, %v367_v55  ;;  %v565_v57 = vpop.f32.mrb[4].mxu0  ;;  %v437_v58 = vmul.f32 %v413_v54, %v413_v54 }
  0xff   :  { %v593_v59 = vpop.f32.mrb[4].mxu1  ;;  %v566_v60 = vpop.f32.mrb[5].mxu0 }
 0x100   :  { %v427_v61 = vadd.f32 %v416_v56, %v413_v54  ;;  %v438_v62 = vmul.f32 %v416_v56, %v416_v56  ;;  %v535_v63 = vpack.c.bf16 %v416_v56, %v413_v54  ;;  %v567_v0 = vadd.f32 %v566_v60, %v565_v57  ;;  %v594_v1 = vpop.f32.mrb[5].mxu1  ;;  %v568_v2 = vpop.f32.mrb[6].mxu0 }
 0x101   :  { %v595_v3 = vadd.f32 %v594_v1, %v593_v59  ;;  %v596_v4 = vpop.f32.mrb[6].mxu1  ;;  %v569_v5 = vpop.f32.mrb[7].mxu0 }
 0x102   :  { %v441_v6 = vadd.f32 %v438_v62, %v437_v58  ;;  %536 = vst [vmem:[%s811_s3] sm:$0xff] %v535_v63   ;;  %v372_v7 = vadd.f32 %v567_v0, %v483_v42  ;;  %v570_v8 = vadd.f32 %v569_v5, %v568_v2  ;;  %v597_v9 = vpop.f32.mrb[7].mxu1 }
 0x103   :  { %v598_v10 = vadd.f32 %v597_v9, %v596_v4 }
 0x104   :  { %v421_v11 = vadd.f32 %v595_v3, %v372_v7  ;;  %v375_v12 = vadd.f32 %v570_v8, %v483_v42 }
 0x106   :  { %v428_v13 = vadd.f32 %v427_v61, %v421_v11  ;;  %v439_v14 = vmul.f32 %v421_v11, %v421_v11  ;;  %v424_v15 = vadd.f32 %v598_v10, %v375_v12 }
 0x108   :  { %v442_v16 = vadd.f32 %v441_v6, %v439_v14  ;;  %v429_v17 = vadd.f32 %v428_v13, %v424_v15  ;;  %v440_v18 = vmul.f32 %v424_v15, %v424_v15  ;;  %v540_v19 = vpack.c.bf16 %v424_v15, %v421_v11 }
 0x10a   :  { %v430_v20 = vrot.slane %v429_v17, 4  ;;  %v443_v21 = vadd.f32 %v442_v16, %v440_v18  ;;  %542 = vst [vmem:[%s811_s3 + $0x8] sm:$0xff] %v540_v19  }
 0x10c   :  { %v431_v22 = vadd.f32 %v430_v20, %v429_v17  ;;  %v444_v23 = vrot.slane %v443_v21, 4 }
 0x10e   :  { %v432_v24 = vrot.slane %v431_v22, 2  ;;  %v445_v25 = vadd.f32 %v444_v23, %v443_v21 }
 0x110   :  { %v433_v26 = vadd.f32 %v432_v24, %v431_v22  ;;  %v446_v27 = vrot.slane %v445_v25, 2 }
 0x112   :  { %v434_v28 = vrot.slane %v433_v26, 1  ;;  %v447_v29 = vadd.f32 %v446_v27, %v445_v25 }
 0x114   :  { %v435_v30 = vadd.f32 %v434_v28, %v433_v26  ;;  %v448_v31 = vrot.slane %v447_v29, 1 }
 0x116   :  { %436 = vst [vmem:[%s812_s4] sm:$0x1] %v435_v30  ;;  %v449_v32 = vadd.f32 %v448_v31, %v447_v29 }
 0x118   :  { %450 = vst [vmem:[%s813_s5] sm:$0x1] %v449_v32 }

// kernel: pix2pix_forward.13
= control target key start
LH: loop header
LB: loop body
LE: loop exit
PB: predicated region body
PF: predicated region fallthrough
CT: control target
= control target key end

     0   :  { %s1237_s1 = inlined_call_operand.vmem [shape: bf16[1024,128], index: 1, kind: input, shape index: {}]   ;;  %s1238_s0 = inlined_call_operand.vmem [shape: bf16[8,1024], index: 0, kind: input, shape index: {}]   ;;  %s1239_s2 = inlined_call_operand.vmem [shape: f32[1,128], index: 2, kind: input, shape index: {}]   ;;  %s1240_s3 = inlined_call_operand.vmem [shape: bf16[8,128], index: 3, kind: output, shape index: {0}]   ;;  %s1241_s4 = inlined_call_operand.vmem [shape: f32[1,128], index: 4, kind: output, shape index: {1}]   ;;  %s1242_s5 = inlined_call_operand.vmem [shape: f32[1,128], index: 5, kind: output, shape index: {2}]  }
   0x1   :  { %v919_v0 = vld [vmem:[%s1237_s1 + $0x40] sm:$0xff]   ;;  %v923_v4 = vld [vmem:[%s1237_s1 + $0x48] sm:$0xff]   ;;  %v927_v8 = vld [vmem:[%s1237_s1 + $0x50] sm:$0xff]  }
   0x2   :  { %v920_v1 = vld [vmem:[%s1237_s1 + $0xc0] sm:$0xff]   ;;  %831 = vmatprep.subr.bf16.mxu0 %v919_v0  ;;  %v924_v5 = vld [vmem:[%s1237_s1 + $0xc8] sm:$0xff]   ;;  %v928_v9 = vld [vmem:[%s1237_s1 + $0xd0] sm:$0xff]  }
   0x3   :  { %v921_v2 = vld [vmem:[%s1237_s1] sm:$0xff]   ;;  %853 = vmatprep.subr.bf16.mxu1 %v920_v1  ;;  %v925_v6 = vld [vmem:[%s1237_s1 + $0x8] sm:$0xff]   ;;  %v929_v10 = vld [vmem:[%s1237_s1 + $0x10] sm:$0xff]  }
   0x4   :  { %v922_v3 = vld [vmem:[%s1237_s1 + $0x80] sm:$0xff]   ;;  %832 = vmatpush3.bf16.msra.mxu0 %v921_v2  ;;  %v926_v7 = vld [vmem:[%s1237_s1 + $0x88] sm:$0xff]   ;;  %v930_v11 = vld [vmem:[%s1237_s1 + $0x90] sm:$0xff]  }
   0x5   :  { %854 = vmatpush3.bf16.msra.mxu1 %v922_v3  ;;  %833 = vmatprep.subr.bf16.mxu0 %v923_v4  ;;  %v931_v12 = vld [vmem:[%s1237_s1 + $0x58] sm:$0xff]   ;;  %v935_v16 = vld [vmem:[%s1237_s1 + $0x60] sm:$0xff]   ;;  %v939_v20 = vld [vmem:[%s1237_s1 + $0x68] sm:$0xff]  }
   0x6   :  { %855 = vmatprep.subr.bf16.mxu1 %v924_v5  ;;  %v932_v13 = vld [vmem:[%s1237_s1 + $0xd8] sm:$0xff]   ;;  %v936_v17 = vld [vmem:[%s1237_s1 + $0xe0] sm:$0xff]   ;;  %v940_v21 = vld [vmem:[%s1237_s1 + $0xe8] sm:$0xff]  }
   0x7   :  { %v933_v14 = vld [vmem:[%s1237_s1 + $0x18] sm:$0xff]   ;;  %v937_v18 = vld [vmem:[%s1237_s1 + $0x20] sm:$0xff]   ;;  %v941_v22 = vld [vmem:[%s1237_s1 + $0x28] sm:$0xff]  }
   0x8   :  { %834 = vmatpush3.bf16.msra.mxu0 %v925_v6  ;;  %v934_v15 = vld [vmem:[%s1237_s1 + $0x98] sm:$0xff]   ;;  %v938_v19 = vld [vmem:[%s1237_s1 + $0xa0] sm:$0xff]   ;;  %v942_v23 = vld [vmem:[%s1237_s1 + $0xa8] sm:$0xff]  }
   0x9   :  { %856 = vmatpush3.bf16.msra.mxu1 %v926_v7  ;;  %835 = vmatprep.subr.bf16.mxu0 %v927_v8  ;;  %v943_v24 = vld [vmem:[%s1237_s1 + $0x70] sm:$0xff]   ;;  %v947_v28 = vld [vmem:[%s1237_s1 + $0x78] sm:$0xff]   ;;  %v18_v32 = vld [vmem:[%s1238_s0] sm:$0xff] }
   0xa   :  { %857 = vmatprep.subr.bf16.mxu1 %v928_v9  ;;  %v944_v25 = vld [vmem:[%s1237_s1 + $0xf0] sm:$0xff]   ;;  %v948_v29 = vld [vmem:[%s1237_s1 + $0xf8] sm:$0xff]   ;;  %v19_v33 = vld [vmem:[%s1238_s0 + $0x8] sm:$0xff]  ;;  %v759_v34 = vcombine.low %v18_v32, %v18_v32  ;;  %v760_v35 = vcombine.high %v18_v32, %v18_v32 }
   0xb   :  { %v945_v26 = vld [vmem:[%s1237_s1 + $0x30] sm:$0xff]   ;;  %v949_v30 = vld [vmem:[%s1237_s1 + $0x38] sm:$0xff]   ;;  %v761_v36 = vcombine.low %v19_v33, %v19_v33  ;;  %v762_v37 = vcombine.high %v19_v33, %v19_v33  ;;  %v955_v38 = vld [vmem:[%s1237_s1 + $0x140] sm:$0xff]  }
   0xc   :  { %836 = vmatpush3.bf16.msra.mxu0 %v929_v10  ;;  %v946_v27 = vld [vmem:[%s1237_s1 + $0xb0] sm:$0xff]   ;;  %v950_v31 = vld [vmem:[%s1237_s1 + $0xb8] sm:$0xff]   ;;  %v956_v39 = vld [vmem:[%s1237_s1 + $0x1c0] sm:$0xff]   ;;  %601 = vmatprep.mubr.bf16.mxu0 %v760_v35 }
   0xd   :  { %858 = vmatpush3.bf16.msra.mxu1 %v930_v11  ;;  %837 = vmatprep.subr.bf16.mxu0 %v931_v12  ;;  %v957_v40 = vld [vmem:[%s1237_s1 + $0x100] sm:$0xff]   ;;  %v959_v42 = vld [vmem:[%s1237_s1 + $0x148] sm:$0xff]   ;;  %v963_v46 = vld [vmem:[%s1237_s1 + $0x150] sm:$0xff]  }
   0xe   :  { %859 = vmatprep.subr.bf16.mxu1 %v932_v13  ;;  %641 = vmatprep.mubr.bf16.mxu1 %v762_v37  ;;  %v958_v41 = vld [vmem:[%s1237_s1 + $0x180] sm:$0xff]   ;;  %v960_v43 = vld [vmem:[%s1237_s1 + $0x1c8] sm:$0xff]   ;;  %v964_v47 = vld [vmem:[%s1237_s1 + $0x1d0] sm:$0xff]  }
   0xf   :  { %v961_v44 = vld [vmem:[%s1237_s1 + $0x108] sm:$0xff]   ;;  %v965_v48 = vld [vmem:[%s1237_s1 + $0x110] sm:$0xff]   ;;  %v967_v50 = vld [vmem:[%s1237_s1 + $0x158] sm:$0xff]  }
  0x10   :  { %838 = vmatpush3.bf16.msra.mxu0 %v933_v14  ;;  %v962_v45 = vld [vmem:[%s1237_s1 + $0x188] sm:$0xff]   ;;  %v966_v49 = vld [vmem:[%s1237_s1 + $0x190] sm:$0xff]   ;;  %v968_v51 = vld [vmem:[%s1237_s1 + $0x1d8] sm:$0xff]  }
  0x11   :  { %860 = vmatpush3.bf16.msra.mxu1 %v934_v15  ;;  %839 = vmatprep.subr.bf16.mxu0 %v935_v16  ;;  %v969_v52 = vld [vmem:[%s1237_s1 + $0x118] sm:$0xff]   ;;  %v971_v54 = vld [vmem:[%s1237_s1 + $0x160] sm:$0xff]   ;;  %v975_v58 = vld [vmem:[%s1237_s1 + $0x168] sm:$0xff]  }
  0x12   :  { %861 = vmatprep.subr.bf16.mxu1 %v936_v17  ;;  %v970_v53 = vld [vmem:[%s1237_s1 + $0x198] sm:$0xff]   ;;  %v972_v55 = vld [vmem:[%s1237_s1 + $0x1e0] sm:$0xff]   ;;  %v976_v59 = vld [vmem:[%s1237_s1 + $0x1e8] sm:$0xff]  }
  0x13   :  { %v973_v56 = vld [vmem:[%s1237_s1 + $0x120] sm:$0xff]   ;;  %v977_v60 = vld [vmem:[%s1237_s1 + $0x128] sm:$0xff]   ;;  %v979_v62 = vld [vmem:[%s1237_s1 + $0x170] sm:$0xff]  }
  0x14   :  { %840 = vmatpush3.bf16.msra.mxu0 %v937_v18  ;;  %v974_v57 = vld [vmem:[%s1237_s1 + $0x1a0] sm:$0xff]   ;;  %v978_v61 = vld [vmem:[%s1237_s1 + $0x1a8] sm:$0xff]   ;;  %v980_v63 = vld [vmem:[%s1237_s1 + $0x1f0] sm:$0xff]  }
  0x15   :  { %862 = vmatpush3.bf16.msra.mxu1 %v938_v19  ;;  %841 = vmatprep.subr.bf16.mxu0 %v939_v20  ;;  %v981_v0 = vld [vmem:[%s1237_s1 + $0x130] sm:$0xff]   ;;  %v983_v2 = vld [vmem:[%s1237_s1 + $0x178] sm:$0xff]   ;;  %v758_v14 = vld [vmem:[%s1239_s2] ss:$0 sm:$0xff] }
  0x16   :  { %863 = vmatprep.subr.bf16.mxu1 %v940_v21  ;;  %v982_v1 = vld [vmem:[%s1237_s1 + $0x1b0] sm:$0xff]   ;;  %v984_v3 = vld [vmem:[%s1237_s1 + $0x1f8] sm:$0xff]  }
  0x17   :  { %v985_v4 = vld [vmem:[%s1237_s1 + $0x138] sm:$0xff]   ;;  %v20_v6 = vld [vmem:[%s1238_s0 + $0x10] sm:$0xff] }
  0x18   :  { %842 = vmatpush3.bf16.msra.mxu0 %v941_v22  ;;  %v986_v5 = vld [vmem:[%s1237_s1 + $0x1b8] sm:$0xff]   ;;  %v763_v7 = vcombine.low %v20_v6, %v20_v6  ;;  %v764_v8 = vcombine.high %v20_v6, %v20_v6 }
  0x19   :  { %864 = vmatpush3.bf16.msra.mxu1 %v942_v23  ;;  %843 = vmatprep.subr.bf16.mxu0 %v943_v24  ;;  %v21_v9 = vld [vmem:[%s1238_s0 + $0x18] sm:$0xff] }
  0x1a   :  { %865 = vmatprep.subr.bf16.mxu1 %v944_v25  ;;  %v765_v10 = vcombine.low %v21_v9, %v21_v9  ;;  %v766_v11 = vcombine.high %v21_v9, %v21_v9 }
  0x1c   :  { %844 = vmatpush3.bf16.msra.mxu0 %v945_v26 }
  0x1d   :  { %866 = vmatpush3.bf16.msra.mxu1 %v946_v27  ;;  %845 = vmatprep.subr.bf16.mxu0 %v947_v28 }
  0x1e   :  { %867 = vmatprep.subr.bf16.mxu1 %v948_v29 }
  0x20   :  { %846 = vmatpush3.bf16.msra.mxu0 %v949_v30 }
  0x21   :  { %868 = vmatpush3.bf16.msra.mxu1 %v950_v31  ;;  %875 = vmatprep.subr.bf16.mxu0 %v955_v38 }
  0x22   :  { %897 = vmatprep.subr.bf16.mxu1 %v956_v39 }
  0x23   :  { %602 = vmatmul.mubr.bf16.vlgmr.msra.gmra.mrb[0].mxu0 %v759_v34 }
  0x24   :  { %642 = vmatmul.mubr.bf16.vlgmr.msra.gmra.mrb[0].mxu1 %v761_v36  ;;  %876 = vmatpush3.bf16.msra.mxu0 %v957_v40 }
  0x25   :  { %898 = vmatpush3.bf16.msra.mxu1 %v958_v41  ;;  %877 = vmatprep.subr.bf16.mxu0 %v959_v42 }
  0x26   :  { %899 = vmatprep.subr.bf16.mxu1 %v960_v43  ;;  %681 = vmatprep.mubr.bf16.mxu0 %v764_v8 }
  0x27   :  { %721 = vmatprep.mubr.bf16.mxu1 %v766_v11 }
  0x28   :  { %878 = vmatpush3.bf16.msra.mxu0 %v961_v44 }
  0x29   :  { %900 = vmatpush3.bf16.msra.mxu1 %v962_v45  ;;  %879 = vmatprep.subr.bf16.mxu0 %v963_v46 }
  0x2a   :  { %901 = vmatprep.subr.bf16.mxu1 %v964_v47 }
  0x2c   :  { %880 = vmatpush3.bf16.msra.mxu0 %v965_v48 }
  0x2d   :  { %902 = vmatpush3.bf16.msra.mxu1 %v966_v49  ;;  %881 = vmatprep.subr.bf16.mxu0 %v967_v50 }
  0x2e   :  { %903 = vmatprep.subr.bf16.mxu1 %v968_v51 }
  0x30   :  { %882 = vmatpush3.bf16.msra.mxu0 %v969_v52 }
  0x31   :  { %904 = vmatpush3.bf16.msra.mxu1 %v970_v53  ;;  %883 = vmatprep.subr.bf16.mxu0 %v971_v54 }
  0x32   :  { %905 = vmatprep.subr.bf16.mxu1 %v972_v55 }
  0x34   :  { %884 = vmatpush3.bf16.msra.mxu0 %v973_v56 }
  0x35   :  { %906 = vmatpush3.bf16.msra.mxu1 %v974_v57  ;;  %885 = vmatprep.subr.bf16.mxu0 %v975_v58 }
  0x36   :  { %907 = vmatprep.subr.bf16.mxu1 %v976_v59 }
  0x38   :  { %886 = vmatpush3.bf16.msra.mxu0 %v977_v60 }
  0x39   :  { %908 = vmatpush3.bf16.msra.mxu1 %v978_v61  ;;  %887 = vmatprep.subr.bf16.mxu0 %v979_v62 }
  0x3a   :  { %909 = vmatprep.subr.bf16.mxu1 %v980_v63 }
  0x3c   :  { %888 = vmatpush3.bf16.msra.mxu0 %v981_v0 }
  0x3d   :  { %910 = vmatpush3.bf16.msra.mxu1 %v982_v1  ;;  %889 = vmatprep.subr.bf16.mxu0 %v983_v2 }
  0x3e   :  { %911 = vmatprep.subr.bf16.mxu1 %v984_v3 }
  0x40   :  { %890 = vmatpush3.bf16.msra.mxu0 %v985_v4 }
  0x41   :  { %912 = vmatpush3.bf16.msra.mxu1 %v986_v5 }
  0x43   :  { %682 = vmatmul.mubr.bf16.vlgmr.msra.gmra.mrb[4].mxu0 %v763_v7 }
  0x44   :  { %722 = vmatmul.mubr.bf16.vlgmr.msra.gmra.mrb[4].mxu1 %v765_v10 }
  0xf6   :  { %v847_v12 = vpop.f32.mrb[0].mxu0 }
  0xf7   :  { %v869_v13 = vpop.f32.mrb[0].mxu1  ;;  %v848_v15 = vpop.f32.mrb[1].mxu0 }
  0xf8   :  { %v870_v16 = vpop.f32.mrb[1].mxu1  ;;  %v849_v17 = vadd.f32 %v848_v15, %v847_v12  ;;  %v850_v19 = vpop.f32.mrb[2].mxu0 }
  0xf9   :  { %v871_v18 = vadd.f32 %v870_v16, %v869_v13  ;;  %v872_v20 = vpop.f32.mrb[2].mxu1  ;;  %v851_v21 = vpop.f32.mrb[3].mxu0 }
  0xfa   :  { %v873_v22 = vpop.f32.mrb[3].mxu1  ;;  %v604_v23 = vadd.f32 %v849_v17, %v758_v14 }
  0xfc   :  { %v644_v24 = vadd.f32 %v871_v18, %v604_v23 }
 0x116   :  { %v891_v25 = vpop.f32.mrb[4].mxu0 }
 0x117   :  { %v913_v26 = vpop.f32.mrb[4].mxu1  ;;  %v892_v27 = vpop.f32.mrb[5].mxu0 }
 0x118   :  { %v914_v28 = vpop.f32.mrb[5].mxu1  ;;  %v893_v29 = vadd.f32 %v892_v27, %v891_v25  ;;  %v894_v31 = vpop.f32.mrb[6].mxu0 }
 0x119   :  { %v915_v30 = vadd.f32 %v914_v28, %v913_v26  ;;  %v916_v32 = vpop.f32.mrb[6].mxu1  ;;  %v895_v33 = vpop.f32.mrb[7].mxu0 }
 0x11a   :  { %v917_v34 = vpop.f32.mrb[7].mxu1  ;;  %v684_v35 = vadd.f32 %v893_v29, %v644_v24 }
 0x11c   :  { %v724_v36 = vadd.f32 %v915_v30, %v684_v35 }
 0x11e   :  { %v729_v37 = vrot.slane %v724_v36, 4  ;;  %v736_v38 = vmul.f32 %v724_v36, %v724_v36  ;;  %v744_v39 = vpack.c.bf16 %v724_v36, %v724_v36 }
 0x120   :  { %v730_v40 = vadd.f32 %v729_v37, %v724_v36  ;;  %v737_v41 = vrot.slane %v736_v38, 4  ;;  %745 = vst [vmem:[%s1240_s3] sm:$0xf] %v744_v39 }
 0x122   :  { %v731_v42 = vrot.slane %v730_v40, 2  ;;  %v738_v43 = vadd.f32 %v737_v41, %v736_v38 }
 0x124   :  { %v732_v44 = vadd.f32 %v731_v42, %v730_v40  ;;  %v739_v45 = vrot.slane %v738_v43, 2 }
 0x126   :  { %v733_v46 = vrot.slane %v732_v44, 1  ;;  %v740_v47 = vadd.f32 %v739_v45, %v738_v43 }
 0x128   :  { %v734_v48 = vadd.f32 %v733_v46, %v732_v44  ;;  %v741_v49 = vrot.slane %v740_v47, 1 }
 0x12a   :  { %735 = vst [vmem:[%s1241_s4] sm:$0x1] %v734_v48  ;;  %v742_v50 = vadd.f32 %v741_v49, %v740_v47 }
 0x12c   :  { %743 = vst [vmem:[%s1242_s5] sm:$0x1] %v742_v50 }

// kernel: pix2pix_forward.14
= control target key start
LH: loop header
LB: loop body
LE: loop exit
PB: predicated region body
PF: predicated region fallthrough
CT: control target
= control target key end

     0   :  { %s2381_s1 = inlined_call_operand.vmem [shape: bf16[2048,128], index: 1, kind: input, shape index: {}]   ;;  %s2382_s0 = inlined_call_operand.vmem [shape: bf16[8,2048], index: 0, kind: input, shape index: {}]   ;;  %s2383_s2 = inlined_call_operand.vmem [shape: f32[1,128], index: 2, kind: input, shape index: {}]   ;;  %s2384_s3 = inlined_call_operand.vmem [shape: bf16[8,128], index: 3, kind: output, shape index: {0}]   ;;  %s2385_s4 = inlined_call_operand.vmem [shape: f32[1,128], index: 4, kind: output, shape index: {1}]   ;;  %s2386_s5 = inlined_call_operand.vmem [shape: f32[1,128], index: 5, kind: output, shape index: {2}]  }
   0x1   :  { %v1787_v0 = vld [vmem:[%s2381_s1 + $0x40] sm:$0xff]   ;;  %v1791_v4 = vld [vmem:[%s2381_s1 + $0x48] sm:$0xff]   ;;  %v1795_v8 = vld [vmem:[%s2381_s1 + $0x50] sm:$0xff]  }
   0x2   :  { %v1788_v1 = vld [vmem:[%s2381_s1 + $0xc0] sm:$0xff]   ;;  %1611 = vmatprep.subr.bf16.mxu0 %v1787_v0  ;;  %v1792_v5 = vld [vmem:[%s2381_s1 + $0xc8] sm:$0xff]   ;;  %v1796_v9 = vld [vmem:[%s2381_s1 + $0xd0] sm:$0xff]  }
   0x3   :  { %v1789_v2 = vld [vmem:[%s2381_s1] sm:$0xff]   ;;  %1633 = vmatprep.subr.bf16.mxu1 %v1788_v1  ;;  %v1793_v6 = vld [vmem:[%s2381_s1 + $0x8] sm:$0xff]   ;;  %v1797_v10 = vld [vmem:[%s2381_s1 + $0x10] sm:$0xff]  }
   0x4   :  { %v1790_v3 = vld [vmem:[%s2381_s1 + $0x80] sm:$0xff]   ;;  %1612 = vmatpush3.bf16.msra.mxu0 %v1789_v2  ;;  %v1794_v7 = vld [vmem:[%s2381_s1 + $0x88] sm:$0xff]   ;;  %v1798_v11 = vld [vmem:[%s2381_s1 + $0x90] sm:$0xff]  }
   0x5   :  { %1634 = vmatpush3.bf16.msra.mxu1 %v1790_v3  ;;  %1613 = vmatprep.subr.bf16.mxu0 %v1791_v4  ;;  %v1799_v12 = vld [vmem:[%s2381_s1 + $0x58] sm:$0xff]   ;;  %v1803_v16 = vld [vmem:[%s2381_s1 + $0x60] sm:$0xff]   ;;  %v1807_v20 = vld [vmem:[%s2381_s1 + $0x68] sm:$0xff]  }
   0x6   :  { %1635 = vmatprep.subr.bf16.mxu1 %v1792_v5  ;;  %v1800_v13 = vld [vmem:[%s2381_s1 + $0xd8] sm:$0xff]   ;;  %v1804_v17 = vld [vmem:[%s2381_s1 + $0xe0] sm:$0xff]   ;;  %v1808_v21 = vld [vmem:[%s2381_s1 + $0xe8] sm:$0xff]  }
   0x7   :  { %v1801_v14 = vld [vmem:[%s2381_s1 + $0x18] sm:$0xff]   ;;  %v1805_v18 = vld [vmem:[%s2381_s1 + $0x20] sm:$0xff]   ;;  %v1809_v22 = vld [vmem:[%s2381_s1 + $0x28] sm:$0xff]  }
   0x8   :  { %1614 = vmatpush3.bf16.msra.mxu0 %v1793_v6  ;;  %v1802_v15 = vld [vmem:[%s2381_s1 + $0x98] sm:$0xff]   ;;  %v1806_v19 = vld [vmem:[%s2381_s1 + $0xa0] sm:$0xff]   ;;  %v1810_v23 = vld [vmem:[%s2381_s1 + $0xa8] sm:$0xff]  }
   0x9   :  { %1636 = vmatpush3.bf16.msra.mxu1 %v1794_v7  ;;  %1615 = vmatprep.subr.bf16.mxu0 %v1795_v8  ;;  %v1811_v24 = vld [vmem:[%s2381_s1 + $0x70] sm:$0xff]   ;;  %v1815_v28 = vld [vmem:[%s2381_s1 + $0x78] sm:$0xff]   ;;  %v18_v32 = vld [vmem:[%s2382_s0] sm:$0xff] }
   0xa   :  { %1637 = vmatprep.subr.bf16.mxu1 %v1796_v9  ;;  %v1812_v25 = vld [vmem:[%s2381_s1 + $0xf0] sm:$0xff]   ;;  %v1816_v29 = vld [vmem:[%s2381_s1 + $0xf8] sm:$0xff]   ;;  %v19_v33 = vld [vmem:[%s2382_s0 + $0x8] sm:$0xff]  ;;  %v1467_v34 = vcombine.low %v18_v32, %v18_v32  ;;  %v1468_v35 = vcombine.high %v18_v32, %v18_v32 }
   0xb   :  { %v1813_v26 = vld [vmem:[%s2381_s1 + $0x30] sm:$0xff]   ;;  %v1817_v30 = vld [vmem:[%s2381_s1 + $0x38] sm:$0xff]   ;;  %v1469_v36 = vcombine.low %v19_v33, %v19_v33  ;;  %v1470_v37 = vcombine.high %v19_v33, %v19_v33  ;;  %v1823_v38 = vld [vmem:[%s2381_s1 + $0x140] sm:$0xff]  }
   0xc   :  { %1616 = vmatpush3.bf16.msra.mxu0 %v1797_v10  ;;  %v1814_v27 = vld [vmem:[%s2381_s1 + $0xb0] sm:$0xff]   ;;  %v1818_v31 = vld [vmem:[%s2381_s1 + $0xb8] sm:$0xff]   ;;  %v1824_v39 = vld [vmem:[%s2381_s1 + $0x1c0] sm:$0xff]   ;;  %1145 = vmatprep.mubr.bf16.mxu0 %v1468_v35 }
   0xd   :  { %1638 = vmatpush3.bf16.msra.mxu1 %v1798_v11  ;;  %1617 = vmatprep.subr.bf16.mxu0 %v1799_v12  ;;  %v1825_v40 = vld [vmem:[%s2381_s1 + $0x100] sm:$0xff]   ;;  %v1827_v42 = vld [vmem:[%s2381_s1 + $0x148] sm:$0xff]   ;;  %v1831_v46 = vld [vmem:[%s2381_s1 + $0x150] sm:$0xff]  }
   0xe   :  { %1639 = vmatprep.subr.bf16.mxu1 %v1800_v13  ;;  %1185 = vmatprep.mubr.bf16.mxu1 %v1470_v37  ;;  %v1826_v41 = vld [vmem:[%s2381_s1 + $0x180] sm:$0xff]   ;;  %v1828_v43 = vld [vmem:[%s2381_s1 + $0x1c8] sm:$0xff]   ;;  %v1832_v47 = vld [vmem:[%s2381_s1 + $0x1d0] sm:$0xff]  }
   0xf   :  { %v1829_v44 = vld [vmem:[%s2381_s1 + $0x108] sm:$0xff]   ;;  %v1833_v48 = vld [vmem:[%s2381_s1 + $0x110] sm:$0xff]   ;;  %v1835_v50 = vld [vmem:[%s2381_s1 + $0x158] sm:$0xff]  }
  0x10   :  { %1618 = vmatpush3.bf16.msra.mxu0 %v1801_v14  ;;  %v1830_v45 = vld [vmem:[%s2381_s1 + $0x188] sm:$0xff]   ;;  %v1834_v49 = vld [vmem:[%s2381_s1 + $0x190] sm:$0xff]   ;;  %v1836_v51 = vld [vmem:[%s2381_s1 + $0x1d8] sm:$0xff]  }
  0x11   :  { %1640 = vmatpush3.bf16.msra.mxu1 %v1802_v15  ;;  %1619 = vmatprep.subr.bf16.mxu0 %v1803_v16  ;;  %v1837_v52 = vld [vmem:[%s2381_s1 + $0x118] sm:$0xff]   ;;  %v1839_v54 = vld [vmem:[%s2381_s1 + $0x160] sm:$0xff]   ;;  %v1843_v58 = vld [vmem:[%s2381_s1 + $0x168] sm:$0xff]  }
  0x12   :  { %1641 = vmatprep.subr.bf16.mxu1 %v1804_v17  ;;  %v1838_v53 = vld [vmem:[%s2381_s1 + $0x198] sm:$0xff]   ;;  %v1840_v55 = vld [vmem:[%s2381_s1 + $0x1e0] sm:$0xff]   ;;  %v1844_v59 = vld [vmem:[%s2381_s1 + $0x1e8] sm:$0xff]  }
  0x13   :  { %v1841_v56 = vld [vmem:[%s2381_s1 + $0x120] sm:$0xff]   ;;  %v1845_v60 = vld [vmem:[%s2381_s1 + $0x128] sm:$0xff]   ;;  %v1847_v62 = vld [vmem:[%s2381_s1 + $0x170] sm:$0xff]  }
  0x14   :  { %1620 = vmatpush3.bf16.msra.mxu0 %v1805_v18  ;;  %v1842_v57 = vld [vmem:[%s2381_s1 + $0x1a0] sm:$0xff]   ;;  %v1846_v61 = vld [vmem:[%s2381_s1 + $0x1a8] sm:$0xff]   ;;  %v1848_v63 = vld [vmem:[%s2381_s1 + $0x1f0] sm:$0xff]  }
  0x15   :  { %1642 = vmatpush3.bf16.msra.mxu1 %v1806_v19  ;;  %1621 = vmatprep.subr.bf16.mxu0 %v1807_v20  ;;  %v1849_v0 = vld [vmem:[%s2381_s1 + $0x130] sm:$0xff]   ;;  %v1851_v2 = vld [vmem:[%s2381_s1 + $0x178] sm:$0xff]   ;;  %v1859_v12 = vld [vmem:[%s2381_s1 + $0x240] sm:$0xff]  }
  0x16   :  { %1643 = vmatprep.subr.bf16.mxu1 %v1808_v21  ;;  %v1850_v1 = vld [vmem:[%s2381_s1 + $0x1b0] sm:$0xff]   ;;  %v1852_v3 = vld [vmem:[%s2381_s1 + $0x1f8] sm:$0xff]   ;;  %v1860_v13 = vld [vmem:[%s2381_s1 + $0x2c0] sm:$0xff]  }
  0x17   :  { %v1853_v4 = vld [vmem:[%s2381_s1 + $0x138] sm:$0xff]   ;;  %v20_v6 = vld [vmem:[%s2382_s0 + $0x10] sm:$0xff]  ;;  %v1861_v14 = vld [vmem:[%s2381_s1 + $0x200] sm:$0xff]  }
  0x18   :  { %1622 = vmatpush3.bf16.msra.mxu0 %v1809_v22  ;;  %v1854_v5 = vld [vmem:[%s2381_s1 + $0x1b8] sm:$0xff]   ;;  %v1471_v7 = vcombine.low %v20_v6, %v20_v6  ;;  %v1472_v8 = vcombine.high %v20_v6, %v20_v6  ;;  %v1862_v15 = vld [vmem:[%s2381_s1 + $0x280] sm:$0xff]   ;;  %v1863_v16 = vld [vmem:[%s2381_s1 + $0x248] sm:$0xff]  }
  0x19   :  { %1644 = vmatpush3.bf16.msra.mxu1 %v1810_v23  ;;  %1623 = vmatprep.subr.bf16.mxu0 %v1811_v24  ;;  %v21_v9 = vld [vmem:[%s2382_s0 + $0x18] sm:$0xff]  ;;  %v1864_v17 = vld [vmem:[%s2381_s1 + $0x2c8] sm:$0xff]   ;;  %v1867_v20 = vld [vmem:[%s2381_s1 + $0x250] sm:$0xff]  }
  0x1a   :  { %1645 = vmatprep.subr.bf16.mxu1 %v1812_v25  ;;  %v1473_v10 = vcombine.low %v21_v9, %v21_v9  ;;  %v1474_v11 = vcombine.high %v21_v9, %v21_v9  ;;  %v1865_v18 = vld [vmem:[%s2381_s1 + $0x208] sm:$0xff]   ;;  %v1868_v21 = vld [vmem:[%s2381_s1 + $0x2d0] sm:$0xff]   ;;  %v1871_v24 = vld [vmem:[%s2381_s1 + $0x258] sm:$0xff]  }
  0x1b   :  { %v1866_v19 = vld [vmem:[%s2381_s1 + $0x288] sm:$0xff]   ;;  %v1869_v22 = vld [vmem:[%s2381_s1 + $0x210] sm:$0xff]   ;;  %v1872_v25 = vld [vmem:[%s2381_s1 + $0x2d8] sm:$0xff]  }
  0x1c   :  { %1624 = vmatpush3.bf16.msra.mxu0 %v1813_v26  ;;  %v1870_v23 = vld [vmem:[%s2381_s1 + $0x290] sm:$0xff]   ;;  %v1873_v26 = vld [vmem:[%s2381_s1 + $0x218] sm:$0xff]   ;;  %v1879_v32 = vld [vmem:[%s2381_s1 + $0x268] sm:$0xff]  }
  0x1d   :  { %1646 = vmatpush3.bf16.msra.mxu1 %v1814_v27  ;;  %1625 = vmatprep.subr.bf16.mxu0 %v1815_v28  ;;  %v1874_v27 = vld [vmem:[%s2381_s1 + $0x298] sm:$0xff]   ;;  %v1875_v28 = vld [vmem:[%s2381_s1 + $0x260] sm:$0xff]   ;;  %v1880_v33 = vld [vmem:[%s2381_s1 + $0x2e8] sm:$0xff]  }
  0x1e   :  { %1647 = vmatprep.subr.bf16.mxu1 %v1816_v29  ;;  %v1876_v29 = vld [vmem:[%s2381_s1 + $0x2e0] sm:$0xff]   ;;  %v1882_v35 = vld [vmem:[%s2381_s1 + $0x2a8] sm:$0xff]   ;;  %v1884_v37 = vld [vmem:[%s2381_s1 + $0x2f0] sm:$0xff]  }
  0x1f   :  { %v1915_v6 = vld [vmem:[%s2381_s1 + $0x368] sm:$0xff]  }
  0x20   :  { %1626 = vmatpush3.bf16.msra.mxu0 %v1817_v30  ;;  %v1877_v30 = vld [vmem:[%s2381_s1 + $0x220] sm:$0xff]   ;;  %v1918_v9 = vld [vmem:[%s2381_s1 + $0x3a8] sm:$0xff]  }
  0x21   :  { %1648 = vmatpush3.bf16.msra.mxu1 %v1818_v31  ;;  %1655 = vmatprep.subr.bf16.mxu0 %v1823_v38  ;;  %v1878_v31 = vld [vmem:[%s2381_s1 + $0x2a0] sm:$0xff]   ;;  %v1885_v38 = vld [vmem:[%s2381_s1 + $0x230] sm:$0xff]  }
  0x22   :  { %1677 = vmatprep.subr.bf16.mxu1 %v1824_v39  ;;  %v1886_v39 = vld [vmem:[%s2381_s1 + $0x2b0] sm:$0xff]  }
  0x23   :  { %1146 = vmatmul.mubr.bf16.vlgmr.msra.gmra.mrb[0].mxu0 %v1467_v34  ;;  %v1881_v34 = vld [vmem:[%s2381_s1 + $0x228] sm:$0xff]  }
  0x24   :  { %1186 = vmatmul.mubr.bf16.vlgmr.msra.gmra.mrb[0].mxu1 %v1469_v36  ;;  %1656 = vmatpush3.bf16.msra.mxu0 %v1825_v40  ;;  %v1883_v36 = vld [vmem:[%s2381_s1 + $0x270] sm:$0xff]   ;;  %v1887_v40 = vld [vmem:[%s2381_s1 + $0x278] sm:$0xff]  }
  0x25   :  { %1678 = vmatpush3.bf16.msra.mxu1 %v1826_v41  ;;  %1657 = vmatprep.subr.bf16.mxu0 %v1827_v42  ;;  %v1888_v41 = vld [vmem:[%s2381_s1 + $0x2f8] sm:$0xff]  }
  0x26   :  { %1679 = vmatprep.subr.bf16.mxu1 %v1828_v43  ;;  %1225 = vmatprep.mubr.bf16.mxu0 %v1472_v8  ;;  %v1889_v42 = vld [vmem:[%s2381_s1 + $0x238] sm:$0xff]   ;;  %v1917_v8 = vld [vmem:[%s2381_s1 + $0x328] sm:$0xff]  }
  0x27   :  { %1265 = vmatprep.mubr.bf16.mxu1 %v1474_v11  ;;  %v1890_v43 = vld [vmem:[%s2381_s1 + $0x2b8] sm:$0xff]   ;;  %v1920_v11 = vld [vmem:[%s2381_s1 + $0x3f0] sm:$0xff]  }
  0x28   :  { %1658 = vmatpush3.bf16.msra.mxu0 %v1829_v44  ;;  %v22_v44 = vld [vmem:[%s2382_s0 + $0x20] sm:$0xff] }
  0x29   :  { %1680 = vmatpush3.bf16.msra.mxu1 %v1830_v45  ;;  %1659 = vmatprep.subr.bf16.mxu0 %v1831_v46  ;;  %v23_v45 = vld [vmem:[%s2382_s0 + $0x28] sm:$0xff]  ;;  %v1475_v46 = vcombine.low %v22_v44, %v22_v44 }
  0x2a   :  { %1681 = vmatprep.subr.bf16.mxu1 %v1832_v47  ;;  %v1476_v47 = vcombine.high %v22_v44, %v22_v44 }
  0x2c   :  { %1660 = vmatpush3.bf16.msra.mxu0 %v1833_v48  ;;  %v1477_v48 = vcombine.low %v23_v45, %v23_v45 }
  0x2d   :  { %1682 = vmatpush3.bf16.msra.mxu1 %v1834_v49  ;;  %1661 = vmatprep.subr.bf16.mxu0 %v1835_v50  ;;  %v1478_v49 = vcombine.high %v23_v45, %v23_v45  ;;  %v1895_v50 = vld [vmem:[%s2381_s1 + $0x340] sm:$0xff]  }
  0x2e   :  { %1683 = vmatprep.subr.bf16.mxu1 %v1836_v51  ;;  %v1896_v51 = vld [vmem:[%s2381_s1 + $0x3c0] sm:$0xff]  }
  0x30   :  { %1662 = vmatpush3.bf16.msra.mxu0 %v1837_v52  ;;  %v1897_v52 = vld [vmem:[%s2381_s1 + $0x300] sm:$0xff]  }
  0x31   :  { %1684 = vmatpush3.bf16.msra.mxu1 %v1838_v53  ;;  %1663 = vmatprep.subr.bf16.mxu0 %v1839_v54  ;;  %v1898_v53 = vld [vmem:[%s2381_s1 + $0x380] sm:$0xff]   ;;  %v1899_v54 = vld [vmem:[%s2381_s1 + $0x348] sm:$0xff]  }
  0x32   :  { %1685 = vmatprep.subr.bf16.mxu1 %v1840_v55  ;;  %v1900_v55 = vld [vmem:[%s2381_s1 + $0x3c8] sm:$0xff]  }
  0x34   :  { %1664 = vmatpush3.bf16.msra.mxu0 %v1841_v56  ;;  %v1901_v56 = vld [vmem:[%s2381_s1 + $0x308] sm:$0xff]  }
  0x35   :  { %1686 = vmatpush3.bf16.msra.mxu1 %v1842_v57  ;;  %1665 = vmatprep.subr.bf16.mxu0 %v1843_v58  ;;  %v1902_v57 = vld [vmem:[%s2381_s1 + $0x388] sm:$0xff]   ;;  %v1903_v58 = vld [vmem:[%s2381_s1 + $0x350] sm:$0xff]  }
  0x36   :  { %1687 = vmatprep.subr.bf16.mxu1 %v1844_v59  ;;  %v1904_v59 = vld [vmem:[%s2381_s1 + $0x3d0] sm:$0xff]  }
  0x38   :  { %1666 = vmatpush3.bf16.msra.mxu0 %v1845_v60  ;;  %v1905_v60 = vld [vmem:[%s2381_s1 + $0x310] sm:$0xff]  }
  0x39   :  { %1688 = vmatpush3.bf16.msra.mxu1 %v1846_v61  ;;  %1667 = vmatprep.subr.bf16.mxu0 %v1847_v62  ;;  %v1906_v61 = vld [vmem:[%s2381_s1 + $0x390] sm:$0xff]   ;;  %v1907_v62 = vld [vmem:[%s2381_s1 + $0x358] sm:$0xff]  }
  0x3a   :  { %1689 = vmatprep.subr.bf16.mxu1 %v1848_v63  ;;  %v1908_v63 = vld [vmem:[%s2381_s1 + $0x3d8] sm:$0xff]  }
  0x3c   :  { %1668 = vmatpush3.bf16.msra.mxu0 %v1849_v0  ;;  %v1909_v0 = vld [vmem:[%s2381_s1 + $0x318] sm:$0xff]  }
  0x3d   :  { %1690 = vmatpush3.bf16.msra.mxu1 %v1850_v1  ;;  %1669 = vmatprep.subr.bf16.mxu0 %v1851_v2  ;;  %v1910_v1 = vld [vmem:[%s2381_s1 + $0x398] sm:$0xff]   ;;  %v1911_v2 = vld [vmem:[%s2381_s1 + $0x360] sm:$0xff]  }
  0x3e   :  { %1691 = vmatprep.subr.bf16.mxu1 %v1852_v3  ;;  %v1912_v3 = vld [vmem:[%s2381_s1 + $0x3e0] sm:$0xff]  }
  0x40   :  { %1670 = vmatpush3.bf16.msra.mxu0 %v1853_v4  ;;  %v1913_v4 = vld [vmem:[%s2381_s1 + $0x320] sm:$0xff]  }
  0x41   :  { %1692 = vmatpush3.bf16.msra.mxu1 %v1854_v5  ;;  %1699 = vmatprep.subr.bf16.mxu0 %v1859_v12  ;;  %v1914_v5 = vld [vmem:[%s2381_s1 + $0x3a0] sm:$0xff]   ;;  %v1921_v12 = vld [vmem:[%s2381_s1 + $0x330] sm:$0xff]  }
  0x42   :  { %1721 = vmatprep.subr.bf16.mxu1 %v1860_v13  ;;  %v1922_v13 = vld [vmem:[%s2381_s1 + $0x3b0] sm:$0xff]  }
  0x43   :  { %1226 = vmatmul.mubr.bf16.vlgmr.msra.gmra.mrb[4].mxu0 %v1471_v7  ;;  %v1916_v7 = vld [vmem:[%s2381_s1 + $0x3e8] sm:$0xff]  }
  0x44   :  { %1266 = vmatmul.mubr.bf16.vlgmr.msra.gmra.mrb[4].mxu1 %v1473_v10  ;;  %1700 = vmatpush3.bf16.msra.mxu0 %v1861_v14  ;;  %v1919_v10 = vld [vmem:[%s2381_s1 + $0x370] sm:$0xff]   ;;  %v1923_v14 = vld [vmem:[%s2381_s1 + $0x378] sm:$0xff]  }
  0x45   :  { %1722 = vmatpush3.bf16.msra.mxu1 %v1862_v15  ;;  %1701 = vmatprep.subr.bf16.mxu0 %v1863_v16  ;;  %v1924_v15 = vld [vmem:[%s2381_s1 + $0x3f8] sm:$0xff]  }
  0x46   :  { %1723 = vmatprep.subr.bf16.mxu1 %v1864_v17  ;;  %1305 = vmatprep.mubr.bf16.mxu0 %v1476_v47  ;;  %v1925_v16 = vld [vmem:[%s2381_s1 + $0x338] sm:$0xff]  }
  0x47   :  { %1345 = vmatprep.mubr.bf16.mxu1 %v1478_v49  ;;  %v1926_v17 = vld [vmem:[%s2381_s1 + $0x3b8] sm:$0xff]  }
  0x48   :  { %1702 = vmatpush3.bf16.msra.mxu0 %v1865_v18  ;;  %v24_v18 = vld [vmem:[%s2382_s0 + $0x30] sm:$0xff] }
  0x49   :  { %1724 = vmatpush3.bf16.msra.mxu1 %v1866_v19  ;;  %1703 = vmatprep.subr.bf16.mxu0 %v1867_v20  ;;  %v25_v19 = vld [vmem:[%s2382_s0 + $0x38] sm:$0xff]  ;;  %v1479_v20 = vcombine.low %v24_v18, %v24_v18 }
  0x4a   :  { %1725 = vmatprep.subr.bf16.mxu1 %v1868_v21  ;;  %v1480_v21 = vcombine.high %v24_v18, %v24_v18 }
  0x4c   :  { %1704 = vmatpush3.bf16.msra.mxu0 %v1869_v22  ;;  %v1481_v22 = vcombine.low %v25_v19, %v25_v19 }
  0x4d   :  { %1726 = vmatpush3.bf16.msra.mxu1 %v1870_v23  ;;  %1705 = vmatprep.subr.bf16.mxu0 %v1871_v24  ;;  %v1482_v23 = vcombine.high %v25_v19, %v25_v19 }
  0x4e   :  { %1727 = vmatprep.subr.bf16.mxu1 %v1872_v25 }
  0x50   :  { %1706 = vmatpush3.bf16.msra.mxu0 %v1873_v26  ;;  %v1466_v26 = vld [vmem:[%s2383_s2] ss:$0 sm:$0xff] }
  0x51   :  { %1728 = vmatpush3.bf16.msra.mxu1 %v1874_v27  ;;  %1707 = vmatprep.subr.bf16.mxu0 %v1875_v28 }
  0x52   :  { %1729 = vmatprep.subr.bf16.mxu1 %v1876_v29 }
  0x54   :  { %1708 = vmatpush3.bf16.msra.mxu0 %v1877_v30 }
  0x55   :  { %1730 = vmatpush3.bf16.msra.mxu1 %v1878_v31  ;;  %1709 = vmatprep.subr.bf16.mxu0 %v1879_v32 }
  0x56   :  { %1731 = vmatprep.subr.bf16.mxu1 %v1880_v33 }
  0x58   :  { %1710 = vmatpush3.bf16.msra.mxu0 %v1881_v34 }
  0x59   :  { %1732 = vmatpush3.bf16.msra.mxu1 %v1882_v35  ;;  %1711 = vmatprep.subr.bf16.mxu0 %v1883_v36 }
  0x5a   :  { %1733 = vmatprep.subr.bf16.mxu1 %v1884_v37 }
  0x5c   :  { %1712 = vmatpush3.bf16.msra.mxu0 %v1885_v38 }
  0x5d   :  { %1734 = vmatpush3.bf16.msra.mxu1 %v1886_v39  ;;  %1713 = vmatprep.subr.bf16.mxu0 %v1887_v40 }
  0x5e   :  { %1735 = vmatprep.subr.bf16.mxu1 %v1888_v41 }
  0x60   :  { %1714 = vmatpush3.bf16.msra.mxu0 %v1889_v42 }
  0x61   :  { %1736 = vmatpush3.bf16.msra.mxu1 %v1890_v43  ;;  %1743 = vmatprep.subr.bf16.mxu0 %v1895_v50 }
  0x62   :  { %1765 = vmatprep.subr.bf16.mxu1 %v1896_v51 }
  0x63   :  { %1306 = vmatmul.mubr.bf16.vlgmr.msra.gmra.mrb[8].mxu0 %v1475_v46 }
  0x64   :  { %1346 = vmatmul.mubr.bf16.vlgmr.msra.gmra.mrb[8].mxu1 %v1477_v48  ;;  %1744 = vmatpush3.bf16.msra.mxu0 %v1897_v52 }
  0x65   :  { %1766 = vmatpush3.bf16.msra.mxu1 %v1898_v53  ;;  %1745 = vmatprep.subr.bf16.mxu0 %v1899_v54 }
  0x66   :  { %1767 = vmatprep.subr.bf16.mxu1 %v1900_v55  ;;  %1385 = vmatprep.mubr.bf16.mxu0 %v1480_v21 }
  0x67   :  { %1425 = vmatprep.mubr.bf16.mxu1 %v1482_v23 }
  0x68   :  { %1746 = vmatpush3.bf16.msra.mxu0 %v1901_v56 }
  0x69   :  { %1768 = vmatpush3.bf16.msra.mxu1 %v1902_v57  ;;  %1747 = vmatprep.subr.bf16.mxu0 %v1903_v58 }
  0x6a   :  { %1769 = vmatprep.subr.bf16.mxu1 %v1904_v59 }
  0x6c   :  { %1748 = vmatpush3.bf16.msra.mxu0 %v1905_v60 }
  0x6d   :  { %1770 = vmatpush3.bf16.msra.mxu1 %v1906_v61  ;;  %1749 = vmatprep.subr.bf16.mxu0 %v1907_v62  ;;  %v1433_v61 = vlaneseq }
  0x6e   :  { %1771 = vmatprep.subr.bf16.mxu1 %v1908_v63 }
  0x70   :  { %1750 = vmatpush3.bf16.msra.mxu0 %v1909_v0 }
  0x71   :  { %1772 = vmatpush3.bf16.msra.mxu1 %v1910_v1  ;;  %1751 = vmatprep.subr.bf16.mxu0 %v1911_v2  ;;  %v1434_v1 = vshrl.u32 %v1433_v61, 7 }
  0x72   :  { %1773 = vmatprep.subr.bf16.mxu1 %v1912_v3 }
  0x73   :  { %vm1435_vm0 = vcmp.lt.s32.totalorder %v1434_v1, 2 }
  0x74   :  { %1752 = vmatpush3.bf16.msra.mxu0 %v1913_v4 }
  0x75   :  { %1774 = vmatpush3.bf16.msra.mxu1 %v1914_v5  ;;  %1753 = vmatprep.subr.bf16.mxu0 %v1915_v6 }
  0x76   :  { %1775 = vmatprep.subr.bf16.mxu1 %v1916_v7 }
  0x78   :  { %1754 = vmatpush3.bf16.msra.mxu0 %v1917_v8 }
  0x79   :  { %1776 = vmatpush3.bf16.msra.mxu1 %v1918_v9  ;;  %1755 = vmatprep.subr.bf16.mxu0 %v1919_v10 }
  0x7a   :  { %1777 = vmatprep.subr.bf16.mxu1 %v1920_v11 }
  0x7c   :  { %1756 = vmatpush3.bf16.msra.mxu0 %v1921_v12 }
  0x7d   :  { %1778 = vmatpush3.bf16.msra.mxu1 %v1922_v13  ;;  %1757 = vmatprep.subr.bf16.mxu0 %v1923_v14 }
  0x7e   :  { %1779 = vmatprep.subr.bf16.mxu1 %v1924_v15 }
  0x80   :  { %1758 = vmatpush3.bf16.msra.mxu0 %v1925_v16 }
  0x81   :  { %1780 = vmatpush3.bf16.msra.mxu1 %v1926_v17 }
  0x83   :  { %1386 = vmatmul.mubr.bf16.vlgmr.msra.gmra.mrb[12].mxu0 %v1479_v20 }
  0x84   :  { %1426 = vmatmul.mubr.bf16.vlgmr.msra.gmra.mrb[12].mxu1 %v1481_v22 }
  0xf6   :  { %v1627_v24 = vpop.f32.mrb[0].mxu0 }
  0xf7   :  { %v1649_v25 = vpop.f32.mrb[0].mxu1  ;;  %v1628_v27 = vpop.f32.mrb[1].mxu0 }
  0xf8   :  { %v1650_v28 = vpop.f32.mrb[1].mxu1  ;;  %v1629_v29 = vadd.f32 %v1628_v27, %v1627_v24  ;;  %v1630_v31 = vpop.f32.mrb[2].mxu0 }
  0xf9   :  { %v1651_v30 = vadd.f32 %v1650_v28, %v1649_v25  ;;  %v1652_v32 = vpop.f32.mrb[2].mxu1  ;;  %v1631_v33 = vpop.f32.mrb[3].mxu0 }
  0xfa   :  { %v1653_v34 = vpop.f32.mrb[3].mxu1  ;;  %v1148_v35 = vadd.f32 %v1629_v29, %v1466_v26 }
  0xfc   :  { %v1188_v36 = vadd.f32 %v1651_v30, %v1148_v35 }
 0x116   :  { %v1671_v37 = vpop.f32.mrb[4].mxu0 }
 0x117   :  { %v1693_v38 = vpop.f32.mrb[4].mxu1  ;;  %v1672_v39 = vpop.f32.mrb[5].mxu0 }
 0x118   :  { %v1694_v40 = vpop.f32.mrb[5].mxu1  ;;  %v1673_v41 = vadd.f32 %v1672_v39, %v1671_v37  ;;  %v1674_v43 = vpop.f32.mrb[6].mxu0 }
 0x119   :  { %v1695_v42 = vadd.f32 %v1694_v40, %v1693_v38  ;;  %v1696_v44 = vpop.f32.mrb[6].mxu1  ;;  %v1675_v45 = vpop.f32.mrb[7].mxu0 }
 0x11a   :  { %v1697_v46 = vpop.f32.mrb[7].mxu1  ;;  %v1228_v47 = vadd.f32 %v1673_v41, %v1188_v36 }
 0x11c   :  { %v1268_v48 = vadd.f32 %v1695_v42, %v1228_v47 }
 0x136   :  { %v1715_v49 = vpop.f32.mrb[8].mxu0 }
 0x137   :  { %v1737_v50 = vpop.f32.mrb[8].mxu1  ;;  %v1716_v51 = vpop.f32.mrb[9].mxu0 }
 0x138   :  { %v1717_v52 = vadd.f32 %v1716_v51, %v1715_v49  ;;  %v1738_v53 = vpop.f32.mrb[9].mxu1  ;;  %v1718_v54 = vpop.f32.mrb[10].mxu0 }
 0x139   :  { %v1739_v55 = vadd.f32 %v1738_v53, %v1737_v50  ;;  %v1740_v56 = vpop.f32.mrb[10].mxu1  ;;  %v1719_v57 = vpop.f32.mrb[11].mxu0 }
 0x13a   :  { %v1308_v58 = vadd.f32 %v1717_v52, %v1268_v48  ;;  %v1741_v59 = vpop.f32.mrb[11].mxu1 }
 0x13c   :  { %v1348_v60 = vadd.f32 %v1739_v55, %v1308_v58 }
 0x156   :  { %v1759_v62 = vpop.f32.mrb[12].mxu0 }
 0x157   :  { %v1781_v63 = vpop.f32.mrb[12].mxu1  ;;  %v1760_v0 = vpop.f32.mrb[13].mxu0 }
 0x158   :  { %v1761_v2 = vadd.f32 %v1760_v0, %v1759_v62  ;;  %v1782_v3 = vpop.f32.mrb[13].mxu1  ;;  %v1762_v4 = vpop.f32.mrb[14].mxu0 }
 0x159   :  { %v1783_v5 = vadd.f32 %v1782_v3, %v1781_v63  ;;  %v1784_v6 = vpop.f32.mrb[14].mxu1  ;;  %v1763_v7 = vpop.f32.mrb[15].mxu0 }
 0x15a   :  { %v1388_v8 = vadd.f32 %v1761_v2, %v1348_v60  ;;  %v1785_v9 = vpop.f32.mrb[15].mxu1 }
 0x15c   :  { %v1428_v10 = vadd.f32 %v1783_v5, %v1388_v8 }
 0x15e   :  { %v1436_v11 = vsel %vm1435_vm0, %v1428_v10, 0.0  ;;  %v1452_v12 = vpack.c.bf16 %v1428_v10, %v1428_v10 }
 0x15f   :  { %v1437_v13 = vrot.slane %v1436_v11, 4  ;;  %v1444_v14 = vmul.f32 %v1436_v11, %v1436_v11 }
 0x160   :  { %1453 = vst [vmem:[%s2384_s3] sm:$0xf] %v1452_v12 }
 0x161   :  { %v1438_v15 = vadd.f32 %v1437_v13, %v1436_v11  ;;  %v1445_v16 = vrot.slane %v1444_v14, 4 }
 0x163   :  { %v1439_v17 = vrot.slane %v1438_v15, 2  ;;  %v1446_v18 = vadd.f32 %v1445_v16, %v1444_v14 }
 0x165   :  { %v1440_v19 = vadd.f32 %v1439_v17, %v1438_v15  ;;  %v1447_v20 = vrot.slane %v1446_v18, 2 }
 0x167   :  { %v1441_v21 = vrot.slane %v1440_v19, 1  ;;  %v1448_v22 = vadd.f32 %v1447_v20, %v1446_v18 }
 0x169   :  { %v1442_v23 = vadd.f32 %v1441_v21, %v1440_v19  ;;  %v1449_v24 = vrot.slane %v1448_v22, 1 }
 0x16b   :  { %1443 = vst [vmem:[%s2385_s4] sm:$0x1] %v1442_v23  ;;  %v1450_v25 = vadd.f32 %v1449_v24, %v1448_v22 }
 0x16d   :  { %1451 = vst [vmem:[%s2386_s5] sm:$0x1] %v1450_v25 }

// kernel: tile.28
= control target key start
LH: loop header
LB: loop body
LE: loop exit
PB: predicated region body
PF: predicated region fallthrough
CT: control target
= control target key end

     0   :  { %s22_s0 = inlined_call_operand.vmem [shape: f32[128], index: 0, kind: input, shape index: {}]   ;;  %s23_s1 = inlined_call_operand.vmem [shape: f32[4,128], index: 1, kind: output, shape index: {}]  }
   0x1   :  { %v4_v0 = vld [vmem:[%s22_s0] ss:$0 sm:$0xff] }
   0x2   :  { %5 = vst [vmem:[%s23_s1] sm:$0xf] %v4_v0 }

// kernel: pix2pix_forward.15
= control target key start
LH: loop header
LB: loop body
LE: loop exit
PB: predicated region body
PF: predicated region fallthrough
CT: control target
= control target key end

     0   :  { %s4113_s1 = inlined_call_operand.vmem [shape: bf16[1152,512], index: 1, kind: input, shape index: {}]   ;;  %s4114_s0 = inlined_call_operand.vmem [shape: bf16[8,1152], index: 0, kind: input, shape index: {}]   ;;  %s4115_s2 = inlined_call_operand.vmem [shape: f32[1,512], index: 2, kind: input, shape index: {}]   ;;  %s4116_s3 = inlined_call_operand.vmem [shape: bf16[8,512], index: 3, kind: output, shape index: {0}]   ;;  %s4117_s4 = inlined_call_operand.vmem [shape: f32[1,512], index: 4, kind: output, shape index: {1}]   ;;  %s4118_s5 = inlined_call_operand.vmem [shape: f32[1,512], index: 5, kind: output, shape index: {2}]  }
   0x1   :  { %v2707_v0 = vld [vmem:[%s4113_s1 + $0x4] ss:$16 sps:$4 sm:$0xff]   ;;  %v2709_v1 = vld [vmem:[%s4113_s1 + $0xc] ss:$16 sps:$4 sm:$0xff]   ;;  %v2711_v2 = vld [vmem:[%s4113_s1] ss:$16 sps:$4 sm:$0xff]  }
   0x2   :  { %1805 = vmatprep.subr.bf16.mxu0 %v2707_v0  ;;  %v2712_v3 = vld [vmem:[%s4113_s1 + $0x8] ss:$16 sps:$4 sm:$0xff]   ;;  %2010 = vmatprep.subr.bf16.mxu1 %v2709_v1  ;;  %v2713_v4 = vld [vmem:[%s4113_s1 + $0x24] ss:$16 sps:$4 sm:$0xff]   ;;  %v2715_v5 = vld [vmem:[%s4113_s1 + $0x2c] ss:$16 sps:$4 sm:$0xff]  }
   0x3   :  { %1806 = vmatpush1.bf16.msra.mxu0 %v2711_v2  ;;  %2011 = vmatpush1.bf16.msra.mxu1 %v2712_v3  ;;  %v2717_v6 = vld [vmem:[%s4113_s1 + $0x20] ss:$16 sps:$4 sm:$0xff]   ;;  %v2718_v7 = vld [vmem:[%s4113_s1 + $0x28] ss:$16 sps:$4 sm:$0xff]   ;;  %v2719_v8 = vld [vmem:[%s4113_s1 + $0x44] ss:$16 sps:$4 sm:$0xff]  }
   0x4   :  { %1807 = vmatprep.subr.bf16.mxu0 %v2713_v4  ;;  %2012 = vmatprep.subr.bf16.mxu1 %v2715_v5  ;;  %v2721_v9 = vld [vmem:[%s4113_s1 + $0x4c] ss:$16 sps:$4 sm:$0xff]   ;;  %v2723_v10 = vld [vmem:[%s4113_s1 + $0x40] ss:$16 sps:$4 sm:$0xff]   ;;  %v2724_v11 = vld [vmem:[%s4113_s1 + $0x48] ss:$16 sps:$4 sm:$0xff]  }
   0x5   :  { %v2725_v12 = vld [vmem:[%s4113_s1 + $0x64] ss:$16 sps:$4 sm:$0xff]   ;;  %v2727_v13 = vld [vmem:[%s4113_s1 + $0x6c] ss:$16 sps:$4 sm:$0xff]   ;;  %v2729_v14 = vld [vmem:[%s4113_s1 + $0x60] ss:$16 sps:$4 sm:$0xff]  }
   0x6   :  { %v2730_v15 = vld [vmem:[%s4113_s1 + $0x68] ss:$16 sps:$4 sm:$0xff]   ;;  %v2731_v16 = vld [vmem:[%s4113_s1 + $0x84] ss:$16 sps:$4 sm:$0xff]   ;;  %v2733_v17 = vld [vmem:[%s4113_s1 + $0x8c] ss:$16 sps:$4 sm:$0xff]  }
   0x7   :  { %1808 = vmatpush1.bf16.msra.mxu0 %v2717_v6  ;;  %2013 = vmatpush1.bf16.msra.mxu1 %v2718_v7  ;;  %v2735_v18 = vld [vmem:[%s4113_s1 + $0x80] ss:$16 sps:$4 sm:$0xff]   ;;  %v2736_v19 = vld [vmem:[%s4113_s1 + $0x88] ss:$16 sps:$4 sm:$0xff]   ;;  %v2737_v20 = vld [vmem:[%s4113_s1 + $0xa4] ss:$16 sps:$4 sm:$0xff]  }
   0x8   :  { %1809 = vmatprep.subr.bf16.mxu0 %v2719_v8  ;;  %2014 = vmatprep.subr.bf16.mxu1 %v2721_v9  ;;  %v2739_v21 = vld [vmem:[%s4113_s1 + $0xac] ss:$16 sps:$4 sm:$0xff]   ;;  %v2741_v22 = vld [vmem:[%s4113_s1 + $0xa0] ss:$16 sps:$4 sm:$0xff]   ;;  %v2742_v23 = vld [vmem:[%s4113_s1 + $0xa8] ss:$16 sps:$4 sm:$0xff]  }
   0x9   :  { %v2743_v24 = vld [vmem:[%s4113_s1 + $0xc4] ss:$16 sps:$4 sm:$0xff]   ;;  %v2745_v25 = vld [vmem:[%s4113_s1 + $0xcc] ss:$16 sps:$4 sm:$0xff]   ;;  %v2747_v26 = vld [vmem:[%s4113_s1 + $0xc0] ss:$16 sps:$4 sm:$0xff]  }
   0xa   :  { %v2748_v27 = vld [vmem:[%s4113_s1 + $0xc8] ss:$16 sps:$4 sm:$0xff]   ;;  %v2749_v28 = vld [vmem:[%s4113_s1 + $0xe4] ss:$16 sps:$4 sm:$0xff]   ;;  %v2751_v29 = vld [vmem:[%s4113_s1 + $0xec] ss:$16 sps:$4 sm:$0xff]  }
   0xb   :  { %1810 = vmatpush1.bf16.msra.mxu0 %v2723_v10  ;;  %2015 = vmatpush1.bf16.msra.mxu1 %v2724_v11  ;;  %v2753_v30 = vld [vmem:[%s4113_s1 + $0xe0] ss:$16 sps:$4 sm:$0xff]   ;;  %v2754_v31 = vld [vmem:[%s4113_s1 + $0xe8] ss:$16 sps:$4 sm:$0xff]   ;;  %v2755_v32 = vld [vmem:[%s4113_s1 + $0x104] ss:$16 sps:$4 sm:$0xff]  }
   0xc   :  { %1811 = vmatprep.subr.bf16.mxu0 %v2725_v12  ;;  %2016 = vmatprep.subr.bf16.mxu1 %v2727_v13  ;;  %v2757_v33 = vld [vmem:[%s4113_s1 + $0x10c] ss:$16 sps:$4 sm:$0xff]   ;;  %v2759_v34 = vld [vmem:[%s4113_s1 + $0x100] ss:$16 sps:$4 sm:$0xff]   ;;  %v2760_v35 = vld [vmem:[%s4113_s1 + $0x108] ss:$16 sps:$4 sm:$0xff]  }
   0xd   :  { %v2761_v36 = vld [vmem:[%s4113_s1 + $0x124] ss:$16 sps:$4 sm:$0xff]   ;;  %v2763_v37 = vld [vmem:[%s4113_s1 + $0x12c] ss:$16 sps:$4 sm:$0xff]   ;;  %v2765_v38 = vld [vmem:[%s4113_s1 + $0x120] ss:$16 sps:$4 sm:$0xff]  }
   0xe   :  { %v2766_v39 = vld [vmem:[%s4113_s1 + $0x128] ss:$16 sps:$4 sm:$0xff]   ;;  %v2767_v40 = vld [vmem:[%s4113_s1 + $0x144] ss:$16 sps:$4 sm:$0xff]   ;;  %v2769_v41 = vld [vmem:[%s4113_s1 + $0x14c] ss:$16 sps:$4 sm:$0xff]  }
   0xf   :  { %1812 = vmatpush1.bf16.msra.mxu0 %v2729_v14  ;;  %2017 = vmatpush1.bf16.msra.mxu1 %v2730_v15  ;;  %v2771_v42 = vld [vmem:[%s4113_s1 + $0x140] ss:$16 sps:$4 sm:$0xff]   ;;  %v2772_v43 = vld [vmem:[%s4113_s1 + $0x148] ss:$16 sps:$4 sm:$0xff]   ;;  %v2773_v44 = vld [vmem:[%s4113_s1 + $0x164] ss:$16 sps:$4 sm:$0xff]  }
  0x10   :  { %1813 = vmatprep.subr.bf16.mxu0 %v2731_v16  ;;  %2018 = vmatprep.subr.bf16.mxu1 %v2733_v17  ;;  %v2775_v45 = vld [vmem:[%s4113_s1 + $0x16c] ss:$16 sps:$4 sm:$0xff]   ;;  %v18_v46 = vld [vmem:[%s4114_s0] sm:$0xff]  ;;  %v2778_v49 = vld [vmem:[%s4113_s1 + $0x168] ss:$16 sps:$4 sm:$0xff]  }
  0x11   :  { %v2777_v47 = vld [vmem:[%s4113_s1 + $0x160] ss:$16 sps:$4 sm:$0xff]   ;;  %v2369_v48 = vcombine.high %v18_v46, %v18_v46  ;;  %v2779_v50 = vld [vmem:[%s4113_s1 + $0x184] ss:$16 sps:$4 sm:$0xff]   ;;  %v2781_v51 = vld [vmem:[%s4113_s1 + $0x18c] ss:$16 sps:$4 sm:$0xff]   ;;  %v2368_v4 = vcombine.low %v18_v46, %v18_v46 }
  0x12   :  { %v2783_v52 = vld [vmem:[%s4113_s1 + $0x180] ss:$16 sps:$4 sm:$0xff]   ;;  %v2784_v53 = vld [vmem:[%s4113_s1 + $0x188] ss:$16 sps:$4 sm:$0xff]   ;;  %v2785_v54 = vld [vmem:[%s4113_s1 + $0x1a4] ss:$16 sps:$4 sm:$0xff]  }
  0x13   :  { %1814 = vmatpush1.bf16.msra.mxu0 %v2735_v18  ;;  %2019 = vmatpush1.bf16.msra.mxu1 %v2736_v19  ;;  %v2787_v55 = vld [vmem:[%s4113_s1 + $0x1ac] ss:$16 sps:$4 sm:$0xff]   ;;  %v2789_v56 = vld [vmem:[%s4113_s1 + $0x1a0] ss:$16 sps:$4 sm:$0xff]   ;;  %v2790_v57 = vld [vmem:[%s4113_s1 + $0x1a8] ss:$16 sps:$4 sm:$0xff]  }
  0x14   :  { %1815 = vmatprep.subr.bf16.mxu0 %v2737_v20  ;;  %2020 = vmatprep.subr.bf16.mxu1 %v2739_v21  ;;  %v2791_v58 = vld [vmem:[%s4113_s1 + $0x1c4] ss:$16 sps:$4 sm:$0xff]   ;;  %v2793_v59 = vld [vmem:[%s4113_s1 + $0x1cc] ss:$16 sps:$4 sm:$0xff]   ;;  %v2795_v60 = vld [vmem:[%s4113_s1 + $0x1c0] ss:$16 sps:$4 sm:$0xff]  }
  0x15   :  { %1837 = vmatprep.mubr.bf16.mxu0 %v2369_v48  ;;  %2042 = vmatprep.mubr.bf16.mxu1 %v2369_v48  ;;  %v2796_v61 = vld [vmem:[%s4113_s1 + $0x1c8] ss:$16 sps:$4 sm:$0xff]   ;;  %v2797_v62 = vld [vmem:[%s4113_s1 + $0x1e4] ss:$16 sps:$4 sm:$0xff]   ;;  %v2799_v63 = vld [vmem:[%s4113_s1 + $0x1ec] ss:$16 sps:$4 sm:$0xff]  }
  0x16   :  { %v2801_v0 = vld [vmem:[%s4113_s1 + $0x1e0] ss:$16 sps:$4 sm:$0xff]   ;;  %v2802_v1 = vld [vmem:[%s4113_s1 + $0x1e8] ss:$16 sps:$4 sm:$0xff]   ;;  %v2807_v2 = vld [vmem:[%s4113_s1 + $0x204] ss:$16 sps:$4 sm:$0xff]  }
  0x17   :  { %1816 = vmatpush1.bf16.msra.mxu0 %v2741_v22  ;;  %2021 = vmatpush1.bf16.msra.mxu1 %v2742_v23  ;;  %v2810_v3 = vld [vmem:[%s4113_s1 + $0x20c] ss:$16 sps:$4 sm:$0xff]   ;;  %v2805_v5 = vld [vmem:[%s4113_s1 + $0x200] ss:$16 sps:$4 sm:$0xff]   ;;  %v2808_v6 = vld [vmem:[%s4113_s1 + $0x208] ss:$16 sps:$4 sm:$0xff]  }
  0x18   :  { %1817 = vmatprep.subr.bf16.mxu0 %v2743_v24  ;;  %2022 = vmatprep.subr.bf16.mxu1 %v2745_v25  ;;  %v2813_v7 = vld [vmem:[%s4113_s1 + $0x224] ss:$16 sps:$4 sm:$0xff]   ;;  %v2816_v8 = vld [vmem:[%s4113_s1 + $0x22c] ss:$16 sps:$4 sm:$0xff]   ;;  %v2811_v9 = vld [vmem:[%s4113_s1 + $0x220] ss:$16 sps:$4 sm:$0xff]  }
  0x19   :  { %v2814_v10 = vld [vmem:[%s4113_s1 + $0x228] ss:$16 sps:$4 sm:$0xff]   ;;  %v2819_v11 = vld [vmem:[%s4113_s1 + $0x244] ss:$16 sps:$4 sm:$0xff]   ;;  %v2822_v12 = vld [vmem:[%s4113_s1 + $0x24c] ss:$16 sps:$4 sm:$0xff]  }
  0x1a   :  { %v2817_v13 = vld [vmem:[%s4113_s1 + $0x240] ss:$16 sps:$4 sm:$0xff]   ;;  %v2820_v14 = vld [vmem:[%s4113_s1 + $0x248] ss:$16 sps:$4 sm:$0xff]   ;;  %v2825_v15 = vld [vmem:[%s4113_s1 + $0x264] ss:$16 sps:$4 sm:$0xff]  }
  0x1b   :  { %1818 = vmatpush1.bf16.msra.mxu0 %v2747_v26  ;;  %2023 = vmatpush1.bf16.msra.mxu1 %v2748_v27  ;;  %v2828_v16 = vld [vmem:[%s4113_s1 + $0x26c] ss:$16 sps:$4 sm:$0xff]   ;;  %v2823_v17 = vld [vmem:[%s4113_s1 + $0x260] ss:$16 sps:$4 sm:$0xff]   ;;  %v2826_v18 = vld [vmem:[%s4113_s1 + $0x268] ss:$16 sps:$4 sm:$0xff]  }
  0x1c   :  { %1819 = vmatprep.subr.bf16.mxu0 %v2749_v28  ;;  %2024 = vmatprep.subr.bf16.mxu1 %v2751_v29  ;;  %v2831_v19 = vld [vmem:[%s4113_s1 + $0x284] ss:$16 sps:$4 sm:$0xff]   ;;  %v2834_v20 = vld [vmem:[%s4113_s1 + $0x28c] ss:$16 sps:$4 sm:$0xff]   ;;  %v2829_v21 = vld [vmem:[%s4113_s1 + $0x280] ss:$16 sps:$4 sm:$0xff]  }
  0x1d   :  { %v2832_v22 = vld [vmem:[%s4113_s1 + $0x288] ss:$16 sps:$4 sm:$0xff]   ;;  %v2837_v23 = vld [vmem:[%s4113_s1 + $0x2a4] ss:$16 sps:$4 sm:$0xff]   ;;  %v2840_v24 = vld [vmem:[%s4113_s1 + $0x2ac] ss:$16 sps:$4 sm:$0xff]  }
  0x1e   :  { %v2835_v25 = vld [vmem:[%s4113_s1 + $0x2a0] ss:$16 sps:$4 sm:$0xff]   ;;  %v2838_v26 = vld [vmem:[%s4113_s1 + $0x2a8] ss:$16 sps:$4 sm:$0xff]   ;;  %v2843_v27 = vld [vmem:[%s4113_s1 + $0x2c4] ss:$16 sps:$4 sm:$0xff]  }
  0x1f   :  { %1820 = vmatpush1.bf16.msra.mxu0 %v2753_v30  ;;  %2025 = vmatpush1.bf16.msra.mxu1 %v2754_v31  ;;  %v2846_v28 = vld [vmem:[%s4113_s1 + $0x2cc] ss:$16 sps:$4 sm:$0xff]   ;;  %v2841_v31 = vld [vmem:[%s4113_s1 + $0x2c0] ss:$16 sps:$4 sm:$0xff]   ;;  %v2868_v48 = vld [vmem:[%s4113_s1 + $0x348] ss:$16 sps:$4 sm:$0xff]  }
  0x20   :  { %1821 = vmatprep.subr.bf16.mxu0 %v2755_v32  ;;  %2026 = vmatprep.subr.bf16.mxu1 %v2757_v33  ;;  %v3456_v29 = vld [vmem:[%s4114_s0 + $0x8] sm:$0xff]  ;;  %v2849_v33 = vld [vmem:[%s4113_s1 + $0x2e4] ss:$16 sps:$4 sm:$0xff]  }
  0x21   :  { %v2371_v30 = vcombine.high %v3456_v29, %v3456_v29  ;;  %v2844_v32 = vld [vmem:[%s4113_s1 + $0x2c8] ss:$16 sps:$4 sm:$0xff]   ;;  %v2870_v46 = vld [vmem:[%s4113_s1 + $0x34c] ss:$16 sps:$4 sm:$0xff]  }
  0x23   :  { %1822 = vmatpush1.bf16.msra.mxu0 %v2759_v34  ;;  %2027 = vmatpush1.bf16.msra.mxu1 %v2760_v35  ;;  %v2852_v34 = vld [vmem:[%s4113_s1 + $0x2ec] ss:$16 sps:$4 sm:$0xff]   ;;  %v2847_v35 = vld [vmem:[%s4113_s1 + $0x2e0] ss:$16 sps:$4 sm:$0xff]  }
  0x24   :  { %1823 = vmatprep.subr.bf16.mxu0 %v2761_v36  ;;  %2028 = vmatprep.subr.bf16.mxu1 %v2763_v37  ;;  %v2850_v36 = vld [vmem:[%s4113_s1 + $0x2e8] ss:$16 sps:$4 sm:$0xff]   ;;  %v2855_v37 = vld [vmem:[%s4113_s1 + $0x304] ss:$16 sps:$4 sm:$0xff]  }
  0x27   :  { %1824 = vmatpush1.bf16.msra.mxu0 %v2765_v38  ;;  %2029 = vmatpush1.bf16.msra.mxu1 %v2766_v39  ;;  %v2858_v38 = vld [vmem:[%s4113_s1 + $0x30c] ss:$16 sps:$4 sm:$0xff]   ;;  %v2853_v39 = vld [vmem:[%s4113_s1 + $0x300] ss:$16 sps:$4 sm:$0xff]  }
  0x28   :  { %1825 = vmatprep.subr.bf16.mxu0 %v2767_v40  ;;  %2030 = vmatprep.subr.bf16.mxu1 %v2769_v41  ;;  %v2856_v40 = vld [vmem:[%s4113_s1 + $0x308] ss:$16 sps:$4 sm:$0xff]   ;;  %v2861_v41 = vld [vmem:[%s4113_s1 + $0x324] ss:$16 sps:$4 sm:$0xff]  }
  0x2b   :  { %1826 = vmatpush1.bf16.msra.mxu0 %v2771_v42  ;;  %2031 = vmatpush1.bf16.msra.mxu1 %v2772_v43  ;;  %v2864_v42 = vld [vmem:[%s4113_s1 + $0x32c] ss:$16 sps:$4 sm:$0xff]   ;;  %v2859_v43 = vld [vmem:[%s4113_s1 + $0x320] ss:$16 sps:$4 sm:$0xff]  }
  0x2c   :  { %1827 = vmatprep.subr.bf16.mxu0 %v2773_v44  ;;  %2032 = vmatprep.subr.bf16.mxu1 %v2775_v45  ;;  %v2862_v44 = vld [vmem:[%s4113_s1 + $0x328] ss:$16 sps:$4 sm:$0xff]   ;;  %v2867_v45 = vld [vmem:[%s4113_s1 + $0x344] ss:$16 sps:$4 sm:$0xff]  }
  0x2f   :  { %1828 = vmatpush1.bf16.msra.mxu0 %v2777_v47  ;;  %2033 = vmatpush1.bf16.msra.mxu1 %v2778_v49  ;;  %v2865_v47 = vld [vmem:[%s4113_s1 + $0x340] ss:$16 sps:$4 sm:$0xff]   ;;  %v2873_v49 = vld [vmem:[%s4113_s1 + $0x364] ss:$16 sps:$4 sm:$0xff]  }
  0x30   :  { %1829 = vmatprep.subr.bf16.mxu0 %v2779_v50  ;;  %2034 = vmatprep.subr.bf16.mxu1 %v2781_v51  ;;  %v2876_v50 = vld [vmem:[%s4113_s1 + $0x36c] ss:$16 sps:$4 sm:$0xff]   ;;  %v2871_v51 = vld [vmem:[%s4113_s1 + $0x360] ss:$16 sps:$4 sm:$0xff]  }
  0x33   :  { %1830 = vmatpush1.bf16.msra.mxu0 %v2783_v52  ;;  %2035 = vmatpush1.bf16.msra.mxu1 %v2784_v53  ;;  %v2874_v52 = vld [vmem:[%s4113_s1 + $0x368] ss:$16 sps:$4 sm:$0xff]   ;;  %v2879_v53 = vld [vmem:[%s4113_s1 + $0x384] ss:$16 sps:$4 sm:$0xff]  }
  0x34   :  { %1831 = vmatprep.subr.bf16.mxu0 %v2785_v54  ;;  %2036 = vmatprep.subr.bf16.mxu1 %v2787_v55  ;;  %v2882_v54 = vld [vmem:[%s4113_s1 + $0x38c] ss:$16 sps:$4 sm:$0xff]   ;;  %v2877_v55 = vld [vmem:[%s4113_s1 + $0x380] ss:$16 sps:$4 sm:$0xff]  }
  0x37   :  { %1832 = vmatpush1.bf16.msra.mxu0 %v2789_v56  ;;  %2037 = vmatpush1.bf16.msra.mxu1 %v2790_v57  ;;  %v2880_v56 = vld [vmem:[%s4113_s1 + $0x388] ss:$16 sps:$4 sm:$0xff]   ;;  %v2885_v57 = vld [vmem:[%s4113_s1 + $0x3a4] ss:$16 sps:$4 sm:$0xff]  }
  0x38   :  { %1833 = vmatprep.subr.bf16.mxu0 %v2791_v58  ;;  %2038 = vmatprep.subr.bf16.mxu1 %v2793_v59  ;;  %v2888_v58 = vld [vmem:[%s4113_s1 + $0x3ac] ss:$16 sps:$4 sm:$0xff]   ;;  %v2883_v59 = vld [vmem:[%s4113_s1 + $0x3a0] ss:$16 sps:$4 sm:$0xff]  }
  0x3b   :  { %1834 = vmatpush1.bf16.msra.mxu0 %v2795_v60  ;;  %2039 = vmatpush1.bf16.msra.mxu1 %v2796_v61  ;;  %v2886_v60 = vld [vmem:[%s4113_s1 + $0x3a8] ss:$16 sps:$4 sm:$0xff]   ;;  %v2891_v61 = vld [vmem:[%s4113_s1 + $0x3c4] ss:$16 sps:$4 sm:$0xff]  }
  0x3c   :  { %1835 = vmatprep.subr.bf16.mxu0 %v2797_v62  ;;  %2040 = vmatprep.subr.bf16.mxu1 %v2799_v63  ;;  %v2894_v62 = vld [vmem:[%s4113_s1 + $0x3cc] ss:$16 sps:$4 sm:$0xff]   ;;  %v2889_v63 = vld [vmem:[%s4113_s1 + $0x3c0] ss:$16 sps:$4 sm:$0xff]  }
  0x3f   :  { %1836 = vmatpush1.bf16.msra.mxu0 %v2801_v0  ;;  %2041 = vmatpush1.bf16.msra.mxu1 %v2802_v1  ;;  %v2892_v0 = vld [vmem:[%s4113_s1 + $0x3c8] ss:$16 sps:$4 sm:$0xff]   ;;  %v2897_v1 = vld [vmem:[%s4113_s1 + $0x3e4] ss:$16 sps:$4 sm:$0xff]  }
  0x40   :  { %1846 = vmatprep.subr.bf16.mxu0 %v2807_v2  ;;  %2051 = vmatprep.subr.bf16.mxu1 %v2810_v3  ;;  %v2900_v2 = vld [vmem:[%s4113_s1 + $0x3ec] ss:$16 sps:$4 sm:$0xff]   ;;  %v2895_v3 = vld [vmem:[%s4113_s1 + $0x3e0] ss:$16 sps:$4 sm:$0xff]  }
  0x42   :  { %1838 = vmatmul.mubr.bf16.vlgmr.msra.gmra.mrb[0].mxu0 %v2368_v4  ;;  %2043 = vmatmul.mubr.bf16.vlgmr.msra.gmra.mrb[0].mxu1 %v2368_v4  ;;  %v2898_v4 = vld [vmem:[%s4113_s1 + $0x3e8] ss:$16 sps:$4 sm:$0xff]  }
  0x43   :  { %1847 = vmatpush1.bf16.msra.mxu0 %v2805_v5  ;;  %2052 = vmatpush1.bf16.msra.mxu1 %v2808_v6  ;;  %v2905_v5 = vld [vmem:[%s4113_s1 + $0x404] ss:$16 sps:$4 sm:$0xff]   ;;  %v2908_v6 = vld [vmem:[%s4113_s1 + $0x40c] ss:$16 sps:$4 sm:$0xff]  }
  0x44   :  { %1848 = vmatprep.subr.bf16.mxu0 %v2813_v7  ;;  %2053 = vmatprep.subr.bf16.mxu1 %v2816_v8  ;;  %v2370_v7 = vcombine.low %v3456_v29, %v3456_v29  ;;  %v2903_v8 = vld [vmem:[%s4113_s1 + $0x400] ss:$16 sps:$4 sm:$0xff]   ;;  %v2938_v29 = vld [vmem:[%s4113_s1 + $0x4ac] ss:$16 sps:$4 sm:$0xff]  }
  0x45   :  { %1878 = vmatprep.mubr.bf16.mxu0 %v2371_v30  ;;  %2083 = vmatprep.mubr.bf16.mxu1 %v2371_v30  ;;  %v2933_v30 = vld [vmem:[%s4113_s1 + $0x4a0] ss:$16 sps:$4 sm:$0xff]  }
  0x47   :  { %1849 = vmatpush1.bf16.msra.mxu0 %v2811_v9  ;;  %2054 = vmatpush1.bf16.msra.mxu1 %v2814_v10  ;;  %v2906_v9 = vld [vmem:[%s4113_s1 + $0x408] ss:$16 sps:$4 sm:$0xff]   ;;  %v2911_v10 = vld [vmem:[%s4113_s1 + $0x424] ss:$16 sps:$4 sm:$0xff]  }
  0x48   :  { %1850 = vmatprep.subr.bf16.mxu0 %v2819_v11  ;;  %2055 = vmatprep.subr.bf16.mxu1 %v2822_v12  ;;  %v3594_v11 = vld [vmem:[%s4114_s0 + $0x10] sm:$0xff]  ;;  %v2914_v12 = vld [vmem:[%s4113_s1 + $0x42c] ss:$16 sps:$4 sm:$0xff]  }
  0x4b   :  { %1851 = vmatpush1.bf16.msra.mxu0 %v2817_v13  ;;  %2056 = vmatpush1.bf16.msra.mxu1 %v2820_v14  ;;  %v2373_v13 = vcombine.high %v3594_v11, %v3594_v11  ;;  %v2909_v14 = vld [vmem:[%s4113_s1 + $0x420] ss:$16 sps:$4 sm:$0xff]  }
  0x4c   :  { %1852 = vmatprep.subr.bf16.mxu0 %v2825_v15  ;;  %2057 = vmatprep.subr.bf16.mxu1 %v2828_v16  ;;  %v2912_v15 = vld [vmem:[%s4113_s1 + $0x428] ss:$16 sps:$4 sm:$0xff]   ;;  %v2917_v16 = vld [vmem:[%s4113_s1 + $0x444] ss:$16 sps:$4 sm:$0xff]  }
  0x4f   :  { %1853 = vmatpush1.bf16.msra.mxu0 %v2823_v17  ;;  %2058 = vmatpush1.bf16.msra.mxu1 %v2826_v18  ;;  %v2920_v17 = vld [vmem:[%s4113_s1 + $0x44c] ss:$16 sps:$4 sm:$0xff]   ;;  %v2915_v18 = vld [vmem:[%s4113_s1 + $0x440] ss:$16 sps:$4 sm:$0xff]  }
  0x50   :  { %1854 = vmatprep.subr.bf16.mxu0 %v2831_v19  ;;  %2059 = vmatprep.subr.bf16.mxu1 %v2834_v20  ;;  %v2918_v19 = vld [vmem:[%s4113_s1 + $0x448] ss:$16 sps:$4 sm:$0xff]   ;;  %v2923_v20 = vld [vmem:[%s4113_s1 + $0x464] ss:$16 sps:$4 sm:$0xff]  }
  0x53   :  { %1855 = vmatpush1.bf16.msra.mxu0 %v2829_v21  ;;  %2060 = vmatpush1.bf16.msra.mxu1 %v2832_v22  ;;  %v2926_v21 = vld [vmem:[%s4113_s1 + $0x46c] ss:$16 sps:$4 sm:$0xff]   ;;  %v2921_v22 = vld [vmem:[%s4113_s1 + $0x460] ss:$16 sps:$4 sm:$0xff]  }
  0x54   :  { %1856 = vmatprep.subr.bf16.mxu0 %v2837_v23  ;;  %2061 = vmatprep.subr.bf16.mxu1 %v2840_v24  ;;  %v2924_v23 = vld [vmem:[%s4113_s1 + $0x468] ss:$16 sps:$4 sm:$0xff]   ;;  %v2929_v24 = vld [vmem:[%s4113_s1 + $0x484] ss:$16 sps:$4 sm:$0xff]  }
  0x57   :  { %1857 = vmatpush1.bf16.msra.mxu0 %v2835_v25  ;;  %2062 = vmatpush1.bf16.msra.mxu1 %v2838_v26  ;;  %v2932_v25 = vld [vmem:[%s4113_s1 + $0x48c] ss:$16 sps:$4 sm:$0xff]   ;;  %v2927_v26 = vld [vmem:[%s4113_s1 + $0x480] ss:$16 sps:$4 sm:$0xff]  }
  0x58   :  { %1858 = vmatprep.subr.bf16.mxu0 %v2843_v27  ;;  %2063 = vmatprep.subr.bf16.mxu1 %v2846_v28  ;;  %v2930_v27 = vld [vmem:[%s4113_s1 + $0x488] ss:$16 sps:$4 sm:$0xff]   ;;  %v2935_v28 = vld [vmem:[%s4113_s1 + $0x4a4] ss:$16 sps:$4 sm:$0xff]  }
  0x5b   :  { %1859 = vmatpush1.bf16.msra.mxu0 %v2841_v31  ;;  %2064 = vmatpush1.bf16.msra.mxu1 %v2844_v32  ;;  %v2936_v31 = vld [vmem:[%s4113_s1 + $0x4a8] ss:$16 sps:$4 sm:$0xff]   ;;  %v2941_v32 = vld [vmem:[%s4113_s1 + $0x4c4] ss:$16 sps:$4 sm:$0xff]  }
  0x5c   :  { %1860 = vmatprep.subr.bf16.mxu0 %v2849_v33  ;;  %2065 = vmatprep.subr.bf16.mxu1 %v2852_v34  ;;  %v2944_v33 = vld [vmem:[%s4113_s1 + $0x4cc] ss:$16 sps:$4 sm:$0xff]   ;;  %v2939_v34 = vld [vmem:[%s4113_s1 + $0x4c0] ss:$16 sps:$4 sm:$0xff]  }
  0x5f   :  { %1861 = vmatpush1.bf16.msra.mxu0 %v2847_v35  ;;  %2066 = vmatpush1.bf16.msra.mxu1 %v2850_v36  ;;  %v2942_v35 = vld [vmem:[%s4113_s1 + $0x4c8] ss:$16 sps:$4 sm:$0xff]   ;;  %v2947_v36 = vld [vmem:[%s4113_s1 + $0x4e4] ss:$16 sps:$4 sm:$0xff]  }
  0x60   :  { %1862 = vmatprep.subr.bf16.mxu0 %v2855_v37  ;;  %2067 = vmatprep.subr.bf16.mxu1 %v2858_v38  ;;  %v2950_v37 = vld [vmem:[%s4113_s1 + $0x4ec] ss:$16 sps:$4 sm:$0xff]   ;;  %v2945_v38 = vld [vmem:[%s4113_s1 + $0x4e0] ss:$16 sps:$4 sm:$0xff]  }
  0x63   :  { %1863 = vmatpush1.bf16.msra.mxu0 %v2853_v39  ;;  %2068 = vmatpush1.bf16.msra.mxu1 %v2856_v40  ;;  %v2948_v39 = vld [vmem:[%s4113_s1 + $0x4e8] ss:$16 sps:$4 sm:$0xff]   ;;  %v2953_v40 = vld [vmem:[%s4113_s1 + $0x504] ss:$16 sps:$4 sm:$0xff]  }
  0x64   :  { %1864 = vmatprep.subr.bf16.mxu0 %v2861_v41  ;;  %2069 = vmatprep.subr.bf16.mxu1 %v2864_v42  ;;  %v2956_v41 = vld [vmem:[%s4113_s1 + $0x50c] ss:$16 sps:$4 sm:$0xff]   ;;  %v2951_v42 = vld [vmem:[%s4113_s1 + $0x500] ss:$16 sps:$4 sm:$0xff]  }
  0x67   :  { %1865 = vmatpush1.bf16.msra.mxu0 %v2859_v43  ;;  %2070 = vmatpush1.bf16.msra.mxu1 %v2862_v44  ;;  %v2954_v43 = vld [vmem:[%s4113_s1 + $0x508] ss:$16 sps:$4 sm:$0xff]   ;;  %v2959_v44 = vld [vmem:[%s4113_s1 + $0x524] ss:$16 sps:$4 sm:$0xff]  }
  0x68   :  { %1866 = vmatprep.subr.bf16.mxu0 %v2867_v45  ;;  %2071 = vmatprep.subr.bf16.mxu1 %v2870_v46  ;;  %v2962_v45 = vld [vmem:[%s4113_s1 + $0x52c] ss:$16 sps:$4 sm:$0xff]   ;;  %v2957_v46 = vld [vmem:[%s4113_s1 + $0x520] ss:$16 sps:$4 sm:$0xff]  }
  0x6b   :  { %1867 = vmatpush1.bf16.msra.mxu0 %v2865_v47  ;;  %2072 = vmatpush1.bf16.msra.mxu1 %v2868_v48  ;;  %v2960_v47 = vld [vmem:[%s4113_s1 + $0x528] ss:$16 sps:$4 sm:$0xff]   ;;  %v2965_v48 = vld [vmem:[%s4113_s1 + $0x544] ss:$16 sps:$4 sm:$0xff]  }
  0x6c   :  { %1868 = vmatprep.subr.bf16.mxu0 %v2873_v49  ;;  %2073 = vmatprep.subr.bf16.mxu1 %v2876_v50  ;;  %v2968_v49 = vld [vmem:[%s4113_s1 + $0x54c] ss:$16 sps:$4 sm:$0xff]   ;;  %v2963_v50 = vld [vmem:[%s4113_s1 + $0x540] ss:$16 sps:$4 sm:$0xff]  }
  0x6f   :  { %1869 = vmatpush1.bf16.msra.mxu0 %v2871_v51  ;;  %2074 = vmatpush1.bf16.msra.mxu1 %v2874_v52  ;;  %v2966_v51 = vld [vmem:[%s4113_s1 + $0x548] ss:$16 sps:$4 sm:$0xff]   ;;  %v2971_v52 = vld [vmem:[%s4113_s1 + $0x564] ss:$16 sps:$4 sm:$0xff]  }
  0x70   :  { %1870 = vmatprep.subr.bf16.mxu0 %v2879_v53  ;;  %2075 = vmatprep.subr.bf16.mxu1 %v2882_v54  ;;  %v2974_v53 = vld [vmem:[%s4113_s1 + $0x56c] ss:$16 sps:$4 sm:$0xff]   ;;  %v2969_v54 = vld [vmem:[%s4113_s1 + $0x560] ss:$16 sps:$4 sm:$0xff]  }
  0x73   :  { %1871 = vmatpush1.bf16.msra.mxu0 %v2877_v55  ;;  %2076 = vmatpush1.bf16.msra.mxu1 %v2880_v56  ;;  %v2972_v55 = vld [vmem:[%s4113_s1 + $0x568] ss:$16 sps:$4 sm:$0xff]   ;;  %v2977_v56 = vld [vmem:[%s4113_s1 + $0x584] ss:$16 sps:$4 sm:$0xff]  }
  0x74   :  { %1872 = vmatprep.subr.bf16.mxu0 %v2885_v57  ;;  %2077 = vmatprep.subr.bf16.mxu1 %v2888_v58  ;;  %v2980_v57 = vld [vmem:[%s4113_s1 + $0x58c] ss:$16 sps:$4 sm:$0xff]   ;;  %v2975_v58 = vld [vmem:[%s4113_s1 + $0x580] ss:$16 sps:$4 sm:$0xff]  }
  0x77   :  { %1873 = vmatpush1.bf16.msra.mxu0 %v2883_v59  ;;  %2078 = vmatpush1.bf16.msra.mxu1 %v2886_v60  ;;  %v2978_v59 = vld [vmem:[%s4113_s1 + $0x588] ss:$16 sps:$4 sm:$0xff]   ;;  %v2983_v60 = vld [vmem:[%s4113_s1 + $0x5a4] ss:$16 sps:$4 sm:$0xff]  }
  0x78   :  { %1874 = vmatprep.subr.bf16.mxu0 %v2891_v61  ;;  %2079 = vmatprep.subr.bf16.mxu1 %v2894_v62  ;;  %v2986_v61 = vld [vmem:[%s4113_s1 + $0x5ac] ss:$16 sps:$4 sm:$0xff]   ;;  %v2981_v62 = vld [vmem:[%s4113_s1 + $0x5a0] ss:$16 sps:$4 sm:$0xff]  }
  0x7b   :  { %1875 = vmatpush1.bf16.msra.mxu0 %v2889_v63  ;;  %2080 = vmatpush1.bf16.msra.mxu1 %v2892_v0  ;;  %v2984_v63 = vld [vmem:[%s4113_s1 + $0x5a8] ss:$16 sps:$4 sm:$0xff]   ;;  %v2989_v0 = vld [vmem:[%s4113_s1 + $0x5c4] ss:$16 sps:$4 sm:$0xff]  }
  0x7c   :  { %1876 = vmatprep.subr.bf16.mxu0 %v2897_v1  ;;  %2081 = vmatprep.subr.bf16.mxu1 %v2900_v2  ;;  %v2992_v1 = vld [vmem:[%s4113_s1 + $0x5cc] ss:$16 sps:$4 sm:$0xff]   ;;  %v2987_v2 = vld [vmem:[%s4113_s1 + $0x5c0] ss:$16 sps:$4 sm:$0xff]  }
  0x7f   :  { %1877 = vmatpush1.bf16.msra.mxu0 %v2895_v3  ;;  %2082 = vmatpush1.bf16.msra.mxu1 %v2898_v4  ;;  %v2990_v3 = vld [vmem:[%s4113_s1 + $0x5c8] ss:$16 sps:$4 sm:$0xff]   ;;  %v2995_v4 = vld [vmem:[%s4113_s1 + $0x5e4] ss:$16 sps:$4 sm:$0xff]  }
  0x80   :  { %1887 = vmatprep.subr.bf16.mxu0 %v2905_v5  ;;  %2092 = vmatprep.subr.bf16.mxu1 %v2908_v6  ;;  %v2998_v5 = vld [vmem:[%s4113_s1 + $0x5ec] ss:$16 sps:$4 sm:$0xff]   ;;  %v2993_v6 = vld [vmem:[%s4113_s1 + $0x5e0] ss:$16 sps:$4 sm:$0xff]  }
  0x82   :  { %1879 = vmatmul.mubr.bf16.vlgmr.msra.gmra.mrb[0].mxu0 %v2370_v7  ;;  %2084 = vmatmul.mubr.bf16.vlgmr.msra.gmra.mrb[0].mxu1 %v2370_v7  ;;  %v2996_v7 = vld [vmem:[%s4113_s1 + $0x5e8] ss:$16 sps:$4 sm:$0xff]  }
  0x83   :  { %1888 = vmatpush1.bf16.msra.mxu0 %v2903_v8  ;;  %2093 = vmatpush1.bf16.msra.mxu1 %v2906_v9  ;;  %v3003_v8 = vld [vmem:[%s4113_s1 + $0x604] ss:$16 sps:$4 sm:$0xff]   ;;  %v3006_v9 = vld [vmem:[%s4113_s1 + $0x60c] ss:$16 sps:$4 sm:$0xff]  }
  0x84   :  { %1889 = vmatprep.subr.bf16.mxu0 %v2911_v10  ;;  %2094 = vmatprep.subr.bf16.mxu1 %v2914_v12  ;;  %v2372_v10 = vcombine.low %v3594_v11, %v3594_v11  ;;  %v3001_v12 = vld [vmem:[%s4113_s1 + $0x600] ss:$16 sps:$4 sm:$0xff]   ;;  %v3009_v11 = vld [vmem:[%s4113_s1 + $0x624] ss:$16 sps:$4 sm:$0xff]  }
  0x85   :  { %1919 = vmatprep.mubr.bf16.mxu0 %v2373_v13  ;;  %2124 = vmatprep.mubr.bf16.mxu1 %v2373_v13  ;;  %v3789_v13 = vld [vmem:[%s4114_s0 + $0x18] sm:$0xff] }
  0x87   :  { %1890 = vmatpush1.bf16.msra.mxu0 %v2909_v14  ;;  %2095 = vmatpush1.bf16.msra.mxu1 %v2912_v15  ;;  %v3004_v14 = vld [vmem:[%s4113_s1 + $0x608] ss:$16 sps:$4 sm:$0xff]   ;;  %v3012_v15 = vld [vmem:[%s4113_s1 + $0x62c] ss:$16 sps:$4 sm:$0xff]  }
  0x88   :  { %1891 = vmatprep.subr.bf16.mxu0 %v2917_v16  ;;  %2096 = vmatprep.subr.bf16.mxu1 %v2920_v17  ;;  %v2375_v16 = vcombine.high %v3789_v13, %v3789_v13  ;;  %v3007_v17 = vld [vmem:[%s4113_s1 + $0x620] ss:$16 sps:$4 sm:$0xff]  }
  0x8b   :  { %1892 = vmatpush1.bf16.msra.mxu0 %v2915_v18  ;;  %2097 = vmatpush1.bf16.msra.mxu1 %v2918_v19  ;;  %v3010_v18 = vld [vmem:[%s4113_s1 + $0x628] ss:$16 sps:$4 sm:$0xff]   ;;  %v3015_v19 = vld [vmem:[%s4113_s1 + $0x644] ss:$16 sps:$4 sm:$0xff]  }
  0x8c   :  { %1893 = vmatprep.subr.bf16.mxu0 %v2923_v20  ;;  %2098 = vmatprep.subr.bf16.mxu1 %v2926_v21  ;;  %v3018_v20 = vld [vmem:[%s4113_s1 + $0x64c] ss:$16 sps:$4 sm:$0xff]   ;;  %v3013_v21 = vld [vmem:[%s4113_s1 + $0x640] ss:$16 sps:$4 sm:$0xff]  }
  0x8f   :  { %1894 = vmatpush1.bf16.msra.mxu0 %v2921_v22  ;;  %2099 = vmatpush1.bf16.msra.mxu1 %v2924_v23  ;;  %v3016_v22 = vld [vmem:[%s4113_s1 + $0x648] ss:$16 sps:$4 sm:$0xff]   ;;  %v3021_v23 = vld [vmem:[%s4113_s1 + $0x664] ss:$16 sps:$4 sm:$0xff]  }
  0x90   :  { %1895 = vmatprep.subr.bf16.mxu0 %v2929_v24  ;;  %2100 = vmatprep.subr.bf16.mxu1 %v2932_v25  ;;  %v3024_v24 = vld [vmem:[%s4113_s1 + $0x66c] ss:$16 sps:$4 sm:$0xff]   ;;  %v3019_v25 = vld [vmem:[%s4113_s1 + $0x660] ss:$16 sps:$4 sm:$0xff]  }
  0x93   :  { %1896 = vmatpush1.bf16.msra.mxu0 %v2927_v26  ;;  %2101 = vmatpush1.bf16.msra.mxu1 %v2930_v27  ;;  %v3022_v26 = vld [vmem:[%s4113_s1 + $0x668] ss:$16 sps:$4 sm:$0xff]   ;;  %v3027_v27 = vld [vmem:[%s4113_s1 + $0x684] ss:$16 sps:$4 sm:$0xff]  }
  0x94   :  { %1897 = vmatprep.subr.bf16.mxu0 %v2935_v28  ;;  %2102 = vmatprep.subr.bf16.mxu1 %v2938_v29  ;;  %v3030_v28 = vld [vmem:[%s4113_s1 + $0x68c] ss:$16 sps:$4 sm:$0xff]   ;;  %v3025_v29 = vld [vmem:[%s4113_s1 + $0x680] ss:$16 sps:$4 sm:$0xff]  }
  0x97   :  { %1898 = vmatpush1.bf16.msra.mxu0 %v2933_v30  ;;  %2103 = vmatpush1.bf16.msra.mxu1 %v2936_v31  ;;  %v3028_v30 = vld [vmem:[%s4113_s1 + $0x688] ss:$16 sps:$4 sm:$0xff]   ;;  %v3033_v31 = vld [vmem:[%s4113_s1 + $0x6a4] ss:$16 sps:$4 sm:$0xff]  }
  0x98   :  { %1899 = vmatprep.subr.bf16.mxu0 %v2941_v32  ;;  %2104 = vmatprep.subr.bf16.mxu1 %v2944_v33  ;;  %v3036_v32 = vld [vmem:[%s4113_s1 + $0x6ac] ss:$16 sps:$4 sm:$0xff]   ;;  %v3031_v33 = vld [vmem:[%s4113_s1 + $0x6a0] ss:$16 sps:$4 sm:$0xff]  }
  0x9b   :  { %1900 = vmatpush1.bf16.msra.mxu0 %v2939_v34  ;;  %2105 = vmatpush1.bf16.msra.mxu1 %v2942_v35  ;;  %v3034_v34 = vld [vmem:[%s4113_s1 + $0x6a8] ss:$16 sps:$4 sm:$0xff]   ;;  %v3039_v35 = vld [vmem:[%s4113_s1 + $0x6c4] ss:$16 sps:$4 sm:$0xff]  }
  0x9c   :  { %1901 = vmatprep.subr.bf16.mxu0 %v2947_v36  ;;  %2106 = vmatprep.subr.bf16.mxu1 %v2950_v37  ;;  %v3042_v36 = vld [vmem:[%s4113_s1 + $0x6cc] ss:$16 sps:$4 sm:$0xff]   ;;  %v3037_v37 = vld [vmem:[%s4113_s1 + $0x6c0] ss:$16 sps:$4 sm:$0xff]  }
  0x9f   :  { %1902 = vmatpush1.bf16.msra.mxu0 %v2945_v38  ;;  %2107 = vmatpush1.bf16.msra.mxu1 %v2948_v39  ;;  %v3040_v38 = vld [vmem:[%s4113_s1 + $0x6c8] ss:$16 sps:$4 sm:$0xff]   ;;  %v3045_v39 = vld [vmem:[%s4113_s1 + $0x6e4] ss:$16 sps:$4 sm:$0xff]  }
  0xa0   :  { %1903 = vmatprep.subr.bf16.mxu0 %v2953_v40  ;;  %2108 = vmatprep.subr.bf16.mxu1 %v2956_v41  ;;  %v3048_v40 = vld [vmem:[%s4113_s1 + $0x6ec] ss:$16 sps:$4 sm:$0xff]   ;;  %v3043_v41 = vld [vmem:[%s4113_s1 + $0x6e0] ss:$16 sps:$4 sm:$0xff]  }
  0xa3   :  { %1904 = vmatpush1.bf16.msra.mxu0 %v2951_v42  ;;  %2109 = vmatpush1.bf16.msra.mxu1 %v2954_v43  ;;  %v3046_v42 = vld [vmem:[%s4113_s1 + $0x6e8] ss:$16 sps:$4 sm:$0xff]   ;;  %v3051_v43 = vld [vmem:[%s4113_s1 + $0x704] ss:$16 sps:$4 sm:$0xff]  }
  0xa4   :  { %1905 = vmatprep.subr.bf16.mxu0 %v2959_v44  ;;  %2110 = vmatprep.subr.bf16.mxu1 %v2962_v45  ;;  %v3054_v44 = vld [vmem:[%s4113_s1 + $0x70c] ss:$16 sps:$4 sm:$0xff]   ;;  %v3049_v45 = vld [vmem:[%s4113_s1 + $0x700] ss:$16 sps:$4 sm:$0xff]  }
  0xa7   :  { %1906 = vmatpush1.bf16.msra.mxu0 %v2957_v46  ;;  %2111 = vmatpush1.bf16.msra.mxu1 %v2960_v47  ;;  %v3052_v46 = vld [vmem:[%s4113_s1 + $0x708] ss:$16 sps:$4 sm:$0xff]   ;;  %v3057_v47 = vld [vmem:[%s4113_s1 + $0x724] ss:$16 sps:$4 sm:$0xff]  }
  0xa8   :  { %1907 = vmatprep.subr.bf16.mxu0 %v2965_v48  ;;  %2112 = vmatprep.subr.bf16.mxu1 %v2968_v49  ;;  %v3060_v48 = vld [vmem:[%s4113_s1 + $0x72c] ss:$16 sps:$4 sm:$0xff]   ;;  %v3055_v49 = vld [vmem:[%s4113_s1 + $0x720] ss:$16 sps:$4 sm:$0xff]  }
  0xab   :  { %1908 = vmatpush1.bf16.msra.mxu0 %v2963_v50  ;;  %2113 = vmatpush1.bf16.msra.mxu1 %v2966_v51  ;;  %v3058_v50 = vld [vmem:[%s4113_s1 + $0x728] ss:$16 sps:$4 sm:$0xff]   ;;  %v3063_v51 = vld [vmem:[%s4113_s1 + $0x744] ss:$16 sps:$4 sm:$0xff]  }
  0xac   :  { %1909 = vmatprep.subr.bf16.mxu0 %v2971_v52  ;;  %2114 = vmatprep.subr.bf16.mxu1 %v2974_v53  ;;  %v3066_v52 = vld [vmem:[%s4113_s1 + $0x74c] ss:$16 sps:$4 sm:$0xff]   ;;  %v3061_v53 = vld [vmem:[%s4113_s1 + $0x740] ss:$16 sps:$4 sm:$0xff]  }
  0xaf   :  { %1910 = vmatpush1.bf16.msra.mxu0 %v2969_v54  ;;  %2115 = vmatpush1.bf16.msra.mxu1 %v2972_v55  ;;  %v3064_v54 = vld [vmem:[%s4113_s1 + $0x748] ss:$16 sps:$4 sm:$0xff]   ;;  %v3069_v55 = vld [vmem:[%s4113_s1 + $0x764] ss:$16 sps:$4 sm:$0xff]  }
  0xb0   :  { %1911 = vmatprep.subr.bf16.mxu0 %v2977_v56  ;;  %2116 = vmatprep.subr.bf16.mxu1 %v2980_v57  ;;  %v3072_v56 = vld [vmem:[%s4113_s1 + $0x76c] ss:$16 sps:$4 sm:$0xff]   ;;  %v3067_v57 = vld [vmem:[%s4113_s1 + $0x760] ss:$16 sps:$4 sm:$0xff]  }
  0xb3   :  { %1912 = vmatpush1.bf16.msra.mxu0 %v2975_v58  ;;  %2117 = vmatpush1.bf16.msra.mxu1 %v2978_v59  ;;  %v3070_v58 = vld [vmem:[%s4113_s1 + $0x768] ss:$16 sps:$4 sm:$0xff]   ;;  %v3075_v59 = vld [vmem:[%s4113_s1 + $0x784] ss:$16 sps:$4 sm:$0xff]  }
  0xb4   :  { %1913 = vmatprep.subr.bf16.mxu0 %v2983_v60  ;;  %2118 = vmatprep.subr.bf16.mxu1 %v2986_v61  ;;  %v3078_v60 = vld [vmem:[%s4113_s1 + $0x78c] ss:$16 sps:$4 sm:$0xff]   ;;  %v3073_v61 = vld [vmem:[%s4113_s1 + $0x780] ss:$16 sps:$4 sm:$0xff]  }
  0xb7   :  { %1914 = vmatpush1.bf16.msra.mxu0 %v2981_v62  ;;  %2119 = vmatpush1.bf16.msra.mxu1 %v2984_v63  ;;  %v3076_v62 = vld [vmem:[%s4113_s1 + $0x788] ss:$16 sps:$4 sm:$0xff]   ;;  %v3081_v63 = vld [vmem:[%s4113_s1 + $0x7a4] ss:$16 sps:$4 sm:$0xff]  }
  0xb8   :  { %1915 = vmatprep.subr.bf16.mxu0 %v2989_v0  ;;  %2120 = vmatprep.subr.bf16.mxu1 %v2992_v1  ;;  %v3084_v0 = vld [vmem:[%s4113_s1 + $0x7ac] ss:$16 sps:$4 sm:$0xff]   ;;  %v3079_v1 = vld [vmem:[%s4113_s1 + $0x7a0] ss:$16 sps:$4 sm:$0xff]  }
  0xbb   :  { %1916 = vmatpush1.bf16.msra.mxu0 %v2987_v2  ;;  %2121 = vmatpush1.bf16.msra.mxu1 %v2990_v3  ;;  %v3082_v2 = vld [vmem:[%s4113_s1 + $0x7a8] ss:$16 sps:$4 sm:$0xff]   ;;  %v3087_v3 = vld [vmem:[%s4113_s1 + $0x7c4] ss:$16 sps:$4 sm:$0xff]  }
  0xbc   :  { %1917 = vmatprep.subr.bf16.mxu0 %v2995_v4  ;;  %2122 = vmatprep.subr.bf16.mxu1 %v2998_v5  ;;  %v3090_v4 = vld [vmem:[%s4113_s1 + $0x7cc] ss:$16 sps:$4 sm:$0xff]   ;;  %v3085_v5 = vld [vmem:[%s4113_s1 + $0x7c0] ss:$16 sps:$4 sm:$0xff]  }
  0xbf   :  { %1918 = vmatpush1.bf16.msra.mxu0 %v2993_v6  ;;  %2123 = vmatpush1.bf16.msra.mxu1 %v2996_v7  ;;  %v3088_v6 = vld [vmem:[%s4113_s1 + $0x7c8] ss:$16 sps:$4 sm:$0xff]   ;;  %v3093_v7 = vld [vmem:[%s4113_s1 + $0x7e4] ss:$16 sps:$4 sm:$0xff]  }
  0xc0   :  { %1928 = vmatprep.subr.bf16.mxu0 %v3003_v8  ;;  %2133 = vmatprep.subr.bf16.mxu1 %v3006_v9  ;;  %v3096_v8 = vld [vmem:[%s4113_s1 + $0x7ec] ss:$16 sps:$4 sm:$0xff]   ;;  %v3091_v9 = vld [vmem:[%s4113_s1 + $0x7e0] ss:$16 sps:$4 sm:$0xff]  }
  0xc2   :  { %1920 = vmatmul.mubr.bf16.vlgmr.msra.gmra.mrb[0].mxu0 %v2372_v10  ;;  %2125 = vmatmul.mubr.bf16.vlgmr.msra.gmra.mrb[0].mxu1 %v2372_v10  ;;  %v3094_v10 = vld [vmem:[%s4113_s1 + $0x7e8] ss:$16 sps:$4 sm:$0xff]  }
  0xc3   :  { %1929 = vmatpush1.bf16.msra.mxu0 %v3001_v12  ;;  %2134 = vmatpush1.bf16.msra.mxu1 %v3004_v14  ;;  %v3101_v12 = vld [vmem:[%s4113_s1 + $0x804] ss:$16 sps:$4 sm:$0xff]   ;;  %v3104_v14 = vld [vmem:[%s4113_s1 + $0x80c] ss:$16 sps:$4 sm:$0xff]  }
  0xc4   :  { %1930 = vmatprep.subr.bf16.mxu0 %v3009_v11  ;;  %2135 = vmatprep.subr.bf16.mxu1 %v3012_v15  ;;  %v2374_v11 = vcombine.low %v3789_v13, %v3789_v13  ;;  %v3099_v15 = vld [vmem:[%s4113_s1 + $0x800] ss:$16 sps:$4 sm:$0xff]   ;;  %v3110_v13 = vld [vmem:[%s4113_s1 + $0x82c] ss:$16 sps:$4 sm:$0xff]  }
  0xc5   :  { %1960 = vmatprep.mubr.bf16.mxu0 %v2375_v16  ;;  %2165 = vmatprep.mubr.bf16.mxu1 %v2375_v16  ;;  %v3102_v16 = vld [vmem:[%s4113_s1 + $0x808] ss:$16 sps:$4 sm:$0xff]  }
  0xc7   :  { %1931 = vmatpush1.bf16.msra.mxu0 %v3007_v17  ;;  %2136 = vmatpush1.bf16.msra.mxu1 %v3010_v18  ;;  %v3107_v17 = vld [vmem:[%s4113_s1 + $0x824] ss:$16 sps:$4 sm:$0xff]   ;;  %v3105_v18 = vld [vmem:[%s4113_s1 + $0x820] ss:$16 sps:$4 sm:$0xff]  }
  0xc8   :  { %1932 = vmatprep.subr.bf16.mxu0 %v3015_v19  ;;  %2137 = vmatprep.subr.bf16.mxu1 %v3018_v20  ;;  %v3108_v19 = vld [vmem:[%s4113_s1 + $0x828] ss:$16 sps:$4 sm:$0xff]   ;;  %v3113_v20 = vld [vmem:[%s4113_s1 + $0x844] ss:$16 sps:$4 sm:$0xff]  }
  0xcb   :  { %1933 = vmatpush1.bf16.msra.mxu0 %v3013_v21  ;;  %2138 = vmatpush1.bf16.msra.mxu1 %v3016_v22  ;;  %v3116_v21 = vld [vmem:[%s4113_s1 + $0x84c] ss:$16 sps:$4 sm:$0xff]   ;;  %v3148_v22 = vmov 0  }
  0xcc   :  { %1934 = vmatprep.subr.bf16.mxu0 %v3021_v23  ;;  %2139 = vmatprep.subr.bf16.mxu1 %v3024_v24  ;;  %v3111_v23 = vld [vmem:[%s4113_s1 + $0x840] ss:$16 sps:$4 sm:$0xff]   ;;  %v3114_v24 = vld [vmem:[%s4113_s1 + $0x848] ss:$16 sps:$4 sm:$0xff]  }
  0xcf   :  { %1935 = vmatpush1.bf16.msra.mxu0 %v3019_v25  ;;  %2140 = vmatpush1.bf16.msra.mxu1 %v3022_v26  ;;  %v3119_v25 = vld [vmem:[%s4113_s1 + $0x864] ss:$16 sps:$4 sm:$0xff]   ;;  %v3122_v26 = vld [vmem:[%s4113_s1 + $0x86c] ss:$16 sps:$4 sm:$0xff]  }
  0xd0   :  { %1936 = vmatprep.subr.bf16.mxu0 %v3027_v27  ;;  %2141 = vmatprep.subr.bf16.mxu1 %v3030_v28  ;;  %v3117_v27 = vld [vmem:[%s4113_s1 + $0x860] ss:$16 sps:$4 sm:$0xff]   ;;  %v3120_v28 = vld [vmem:[%s4113_s1 + $0x868] ss:$16 sps:$4 sm:$0xff]  }
  0xd3   :  { %1937 = vmatpush1.bf16.msra.mxu0 %v3025_v29  ;;  %2142 = vmatpush1.bf16.msra.mxu1 %v3028_v30  ;;  %v3125_v29 = vld [vmem:[%s4113_s1 + $0x884] ss:$16 sps:$4 sm:$0xff]   ;;  %v3128_v30 = vld [vmem:[%s4113_s1 + $0x88c] ss:$16 sps:$4 sm:$0xff]  }
  0xd4   :  { %1938 = vmatprep.subr.bf16.mxu0 %v3033_v31  ;;  %2143 = vmatprep.subr.bf16.mxu1 %v3036_v32  ;;  %v3123_v31 = vld [vmem:[%s4113_s1 + $0x880] ss:$16 sps:$4 sm:$0xff]   ;;  %v3126_v32 = vld [vmem:[%s4113_s1 + $0x888] ss:$16 sps:$4 sm:$0xff]  }
  0xd7   :  { %1939 = vmatpush1.bf16.msra.mxu0 %v3031_v33  ;;  %2144 = vmatpush1.bf16.msra.mxu1 %v3034_v34  ;;  %v3131_v33 = vld [vmem:[%s4113_s1 + $0x8a4] ss:$16 sps:$4 sm:$0xff]   ;;  %v3134_v34 = vld [vmem:[%s4113_s1 + $0x8ac] ss:$16 sps:$4 sm:$0xff]  }
  0xd8   :  { %1940 = vmatprep.subr.bf16.mxu0 %v3039_v35  ;;  %2145 = vmatprep.subr.bf16.mxu1 %v3042_v36  ;;  %v3129_v35 = vld [vmem:[%s4113_s1 + $0x8a0] ss:$16 sps:$4 sm:$0xff]   ;;  %v3132_v36 = vld [vmem:[%s4113_s1 + $0x8a8] ss:$16 sps:$4 sm:$0xff]  }
  0xdb   :  { %1941 = vmatpush1.bf16.msra.mxu0 %v3037_v37  ;;  %2146 = vmatpush1.bf16.msra.mxu1 %v3040_v38  ;;  %v3137_v37 = vld [vmem:[%s4113_s1 + $0x8c4] ss:$16 sps:$4 sm:$0xff]   ;;  %v3140_v38 = vld [vmem:[%s4113_s1 + $0x8cc] ss:$16 sps:$4 sm:$0xff]  }
  0xdc   :  { %1942 = vmatprep.subr.bf16.mxu0 %v3045_v39  ;;  %2147 = vmatprep.subr.bf16.mxu1 %v3048_v40  ;;  %v3135_v39 = vld [vmem:[%s4113_s1 + $0x8c0] ss:$16 sps:$4 sm:$0xff]   ;;  %v3138_v40 = vld [vmem:[%s4113_s1 + $0x8c8] ss:$16 sps:$4 sm:$0xff]  }
  0xdf   :  { %1943 = vmatpush1.bf16.msra.mxu0 %v3043_v41  ;;  %2148 = vmatpush1.bf16.msra.mxu1 %v3046_v42  ;;  %v3143_v41 = vld [vmem:[%s4113_s1 + $0x8e4] ss:$16 sps:$4 sm:$0xff]   ;;  %v3146_v42 = vld [vmem:[%s4113_s1 + $0x8ec] ss:$16 sps:$4 sm:$0xff]  }
  0xe0   :  { %1944 = vmatprep.subr.bf16.mxu0 %v3051_v43  ;;  %2149 = vmatprep.subr.bf16.mxu1 %v3054_v44  ;;  %v3141_v43 = vld [vmem:[%s4113_s1 + $0x8e0] ss:$16 sps:$4 sm:$0xff]   ;;  %v3144_v44 = vld [vmem:[%s4113_s1 + $0x8e8] ss:$16 sps:$4 sm:$0xff]  }
  0xe3   :  { %1945 = vmatpush1.bf16.msra.mxu0 %v3049_v45  ;;  %2150 = vmatpush1.bf16.msra.mxu1 %v3052_v46  ;;  %v3147_v45 = vld [vmem:[%s4114_s0 + $0x20] ss:$0 sps:$4 sm:$0xff]   ;;  %v313_v46 = vlaneseq }
  0xe4   :  { %1946 = vmatprep.subr.bf16.mxu0 %v3057_v47  ;;  %2151 = vmatprep.subr.bf16.mxu1 %v3060_v48 }
  0xe5   :  { %v4078_v47 = vshrl.u32 %v313_v46, 7  ;;  %vm2277_vm1 = vcmp.lt.s32.totalorder %v313_v46, 512 }
  0xe7   :  { %1947 = vmatpush1.bf16.msra.mxu0 %v3055_v49  ;;  %2152 = vmatpush1.bf16.msra.mxu1 %v3058_v50  ;;  %v315_v48 = vsub.s32 0, %v4078_v47  ;;  %v323_v49 = vsub.s32 2, %v4078_v47  ;;  %v311_v50 = vld [vmem:[%s4115_s2] sm:$0xf]  ;;  %vm2217_vm0 = vcmp.lt.s32.totalorder %v4078_v47, 2 }
  0xe8   :  { %1948 = vmatprep.subr.bf16.mxu0 %v3063_v51  ;;  %2153 = vmatprep.subr.bf16.mxu1 %v3066_v52  ;;  %v319_v51 = vsub.s32 1, %v4078_v47  ;;  %v327_v52 = vsub.s32 3, %v4078_v47 }
  0xeb   :  { %1949 = vmatpush1.bf16.msra.mxu0 %v3061_v53  ;;  %2154 = vmatpush1.bf16.msra.mxu1 %v3064_v54  ;;  %v316_v53 = vrot.slane %v311_v50, %v315_v48  ;;  %v324_v54 = vrot.slane %v311_v50, %v323_v49 }
  0xec   :  { %1950 = vmatprep.subr.bf16.mxu0 %v3069_v55  ;;  %2155 = vmatprep.subr.bf16.mxu1 %v3072_v56  ;;  %v320_v55 = vrot.slane %v311_v50, %v319_v51  ;;  %v328_v56 = vrot.slane %v311_v50, %v327_v52 }
  0xef   :  { %1951 = vmatpush1.bf16.msra.mxu0 %v3067_v57  ;;  %2156 = vmatpush1.bf16.msra.mxu1 %v3070_v58  ;;  %v3149_v57 = vmov 1966171168  }
  0xf0   :  { %1952 = vmatprep.subr.bf16.mxu0 %v3075_v59  ;;  %2157 = vmatprep.subr.bf16.mxu1 %v3078_v60  ;;  %v4087_v58 = vunpack.c.l.s4 %v3149_v57 }
  0xf3   :  { %1953 = vmatpush1.bf16.msra.mxu0 %v3073_v61  ;;  %2158 = vmatpush1.bf16.msra.mxu1 %v3076_v62 }
  0xf4   :  { %1954 = vmatprep.subr.bf16.mxu0 %v3081_v63  ;;  %2159 = vmatprep.subr.bf16.mxu1 %v3084_v0 }
  0xf7   :  { %1955 = vmatpush1.bf16.msra.mxu0 %v3079_v1  ;;  %2160 = vmatpush1.bf16.msra.mxu1 %v3082_v2 }
  0xf8   :  { %1956 = vmatprep.subr.bf16.mxu0 %v3087_v3  ;;  %2161 = vmatprep.subr.bf16.mxu1 %v3090_v4 }
  0xfb   :  { %1957 = vmatpush1.bf16.msra.mxu0 %v3085_v5  ;;  %2162 = vmatpush1.bf16.msra.mxu1 %v3088_v6 }
  0xfc   :  { %1958 = vmatprep.subr.bf16.mxu0 %v3093_v7  ;;  %2163 = vmatprep.subr.bf16.mxu1 %v3096_v8  ;;  %v2254_v7 = vunpack.c.0.s8 %v4087_v58 }
  0xff   :  { %1959 = vmatpush1.bf16.msra.mxu0 %v3091_v9  ;;  %2164 = vmatpush1.bf16.msra.mxu1 %v3094_v10 }
 0x100   :  { %1969 = vmatprep.subr.bf16.mxu0 %v3101_v12  ;;  %2174 = vmatprep.subr.bf16.mxu1 %v3104_v14 }
 0x102   :  { %1961 = vmatmul.mubr.bf16.vlgmr.msra.gmra.mrb[0].mxu0 %v2374_v11  ;;  %2166 = vmatmul.mubr.bf16.vlgmr.msra.gmra.mrb[0].mxu1 %v2374_v11 }
 0x103   :  { %1970 = vmatpush1.bf16.msra.mxu0 %v3099_v15  ;;  %2175 = vmatpush1.bf16.msra.mxu1 %v3102_v16 }
 0x104   :  { %1971 = vmatprep.subr.bf16.mxu0 %v3107_v17  ;;  %2176 = vmatprep.subr.bf16.mxu1 %v3110_v13 }
 0x105   :  { %2001 = vmatprep.mubr.bf16.mxu0 %v3148_v22  ;;  %2206 = vmatprep.mubr.bf16.mxu1 %v3148_v22 }
 0x107   :  { %1972 = vmatpush1.bf16.msra.mxu0 %v3105_v18  ;;  %2177 = vmatpush1.bf16.msra.mxu1 %v3108_v19 }
 0x108   :  { %1973 = vmatprep.subr.bf16.mxu0 %v3113_v20  ;;  %2178 = vmatprep.subr.bf16.mxu1 %v3116_v21 }
 0x10b   :  { %1974 = vmatpush1.bf16.msra.mxu0 %v3111_v23  ;;  %2179 = vmatpush1.bf16.msra.mxu1 %v3114_v24 }
 0x10c   :  { %1975 = vmatprep.subr.bf16.mxu0 %v3119_v25  ;;  %2180 = vmatprep.subr.bf16.mxu1 %v3122_v26 }
 0x10f   :  { %1976 = vmatpush1.bf16.msra.mxu0 %v3117_v27  ;;  %2181 = vmatpush1.bf16.msra.mxu1 %v3120_v28 }
 0x110   :  { %1977 = vmatprep.subr.bf16.mxu0 %v3125_v29  ;;  %2182 = vmatprep.subr.bf16.mxu1 %v3128_v30 }
 0x113   :  { %1978 = vmatpush1.bf16.msra.mxu0 %v3123_v31  ;;  %2183 = vmatpush1.bf16.msra.mxu1 %v3126_v32 }
 0x114   :  { %1979 = vmatprep.subr.bf16.mxu0 %v3131_v33  ;;  %2184 = vmatprep.subr.bf16.mxu1 %v3134_v34 }
 0x117   :  { %1980 = vmatpush1.bf16.msra.mxu0 %v3129_v35  ;;  %2185 = vmatpush1.bf16.msra.mxu1 %v3132_v36 }
 0x118   :  { %1981 = vmatprep.subr.bf16.mxu0 %v3137_v37  ;;  %2186 = vmatprep.subr.bf16.mxu1 %v3140_v38 }
 0x11b   :  { %1982 = vmatpush1.bf16.msra.mxu0 %v3135_v39  ;;  %2187 = vmatpush1.bf16.msra.mxu1 %v3138_v40 }
 0x11c   :  { %1983 = vmatprep.subr.bf16.mxu0 %v3143_v41  ;;  %2188 = vmatprep.subr.bf16.mxu1 %v3146_v42 }
 0x11f   :  { %1984 = vmatpush1.bf16.msra.mxu0 %v3141_v43  ;;  %2189 = vmatpush1.bf16.msra.mxu1 %v3144_v44 }
 0x122   :  { %2002 = vmatmul.mubr.bf16.vlgmr.msra.gmra.mrb[0].mxu0 %v3147_v45  ;;  %2207 = vmatmul.mubr.bf16.vlgmr.msra.gmra.mrb[0].mxu1 %v3147_v45 }
 0x1f5   :  { %v2003_v59 = vpop.f32.mrb[0].mxu0  ;;  %v2208_v60 = vpop.f32.mrb[0].mxu1 }
 0x1f6   :  { %v2669_v61 = vadd.f32 %v2003_v59, %v316_v53  ;;  %v2671_v62 = vadd.f32 %v2208_v60, %v324_v54  ;;  %v2005_v63 = vpop.f32.mrb[1].mxu0  ;;  %v2210_v0 = vpop.f32.mrb[1].mxu1 }
 0x1f7   :  { %v2670_v1 = vadd.f32 %v2005_v63, %v320_v55  ;;  %v2672_v2 = vadd.f32 %v2210_v0, %v328_v56  ;;  %v2007_v3 = vpop.f32.mrb[2].mxu0  ;;  %v2212_v4 = vpop.f32.mrb[2].mxu1 }
 0x1f8   :  { %v2218_v5 = vsel %vm2217_vm0, %v2669_v61, 0.0  ;;  %v2220_v6 = vsel %vm2217_vm0, %v2671_v62, 0.0  ;;  %v2008_v8 = vpop.f32.mrb[3].mxu0  ;;  %v2213_v9 = vpop.f32.mrb[3].mxu1 }
 0x1f9   :  { %v2222_v10 = vrot.slane %v2218_v5, 4  ;;  %v2280_v12 = vmul.f32 %v2218_v5, %v2218_v5  ;;  %v2234_v14 = vrot.slane %v2220_v6, 4  ;;  %v2282_v11 = vmul.f32 %v2220_v6, %v2220_v6 }
 0x1fa   :  { %v2219_v15 = vsel %vm2217_vm0, %v2670_v1, 0.0  ;;  %v2667_v16 = vpack.c.bf16 %v2670_v1, %v2669_v61  ;;  %v2221_v17 = vsel %vm2217_vm0, %v2672_v2, 0.0  ;;  %v2668_v13 = vpack.c.bf16 %v2672_v2, %v2671_v62 }
 0x1fb   :  { %v2223_v18 = vadd.f32 %v2222_v10, %v2218_v5  ;;  %v2284_v19 = vrot.slane %v2280_v12, 4  ;;  %v2235_v20 = vadd.f32 %v2234_v14, %v2220_v6  ;;  %v2296_v21 = vrot.slane %v2282_v11, 4 }
 0x1fc   :  { %v2228_v22 = vrot.slane %v2219_v15, 4  ;;  %v2281_v23 = vmul.f32 %v2219_v15, %v2219_v15  ;;  %2354 = vst [vmem:[%s4116_s3] sm:$0xff] %v2667_v16  ;;  %v2240_v24 = vrot.slane %v2221_v17, 4  ;;  %v2283_v25 = vmul.f32 %v2221_v17, %v2221_v17  ;;  %2355 = vst [vmem:[%s4116_s3 + $0x8] sm:$0xff] %v2668_v13 }
 0x1fd   :  { %v2224_v26 = vrot.slane %v2223_v18, 2  ;;  %v2285_v27 = vadd.f32 %v2284_v19, %v2280_v12  ;;  %v2236_v28 = vrot.slane %v2235_v20, 2  ;;  %v2297_v29 = vadd.f32 %v2296_v21, %v2282_v11 }
 0x1fe   :  { %v2229_v30 = vadd.f32 %v2228_v22, %v2219_v15  ;;  %v2290_v31 = vrot.slane %v2281_v23, 4  ;;  %v2241_v32 = vadd.f32 %v2240_v24, %v2221_v17  ;;  %v2302_v33 = vrot.slane %v2283_v25, 4 }
 0x1ff   :  { %v2225_v34 = vadd.f32 %v2224_v26, %v2223_v18  ;;  %v2286_v35 = vrot.slane %v2285_v27, 2  ;;  %v2237_v36 = vadd.f32 %v2236_v28, %v2235_v20  ;;  %v2298_v37 = vrot.slane %v2297_v29, 2 }
 0x200   :  { %v2230_v38 = vrot.slane %v2229_v30, 2  ;;  %v2291_v39 = vadd.f32 %v2290_v31, %v2281_v23  ;;  %v2242_v40 = vrot.slane %v2241_v32, 2  ;;  %v2303_v41 = vadd.f32 %v2302_v33, %v2283_v25 }
 0x201   :  { %v2226_v42 = vrot.slane %v2225_v34, 1  ;;  %v2287_v43 = vadd.f32 %v2286_v35, %v2285_v27  ;;  %v2238_v44 = vrot.slane %v2237_v36, 1  ;;  %v2299_v45 = vadd.f32 %v2298_v37, %v2297_v29 }
 0x202   :  { %v2231_v48 = vadd.f32 %v2230_v38, %v2229_v30  ;;  %v2292_v49 = vrot.slane %v2291_v39, 2  ;;  %v2243_v50 = vadd.f32 %v2242_v40, %v2241_v32  ;;  %v2304_v51 = vrot.slane %v2303_v41, 2 }
 0x203   :  { %v2227_v52 = vadd.f32 %v2226_v42, %v2225_v34  ;;  %v2288_v53 = vrot.slane %v2287_v43, 1  ;;  %v2239_v54 = vadd.f32 %v2238_v44, %v2237_v36  ;;  %v2300_v55 = vrot.slane %v2299_v45, 1 }
 0x204   :  { %v2232_v56 = vrot.slane %v2231_v48, 1  ;;  %v2293_v57 = vadd.f32 %v2292_v49, %v2291_v39  ;;  %v2244_v58 = vrot.slane %v2243_v50, 1  ;;  %v2305_v59 = vadd.f32 %v2304_v51, %v2303_v41 }
 0x205   :  { %v2289_v60 = vadd.f32 %v2288_v53, %v2287_v43  ;;  %v2301_v61 = vadd.f32 %v2300_v55, %v2299_v45  ;;  %v2257_v62 = vsub.s32 %v2254_v7, %v4078_v47 }
 0x206   :  { %v2233_v63 = vadd.f32 %v2232_v56, %v2231_v48  ;;  %v2294_v0 = vrot.slane %v2293_v57, 1  ;;  %v2245_v1 = vadd.f32 %v2244_v58, %v2243_v50  ;;  %v2306_v2 = vrot.slane %v2305_v59, 1 }
 0x208   :  { %v2250_v3 = vcombine.low %v2227_v52, %v2233_v63  ;;  %v2295_v4 = vadd.f32 %v2294_v0, %v2293_v57  ;;  %v2251_v5 = vcombine.low %v2239_v54, %v2245_v1  ;;  %v2307_v6 = vadd.f32 %v2306_v2, %v2305_v59 }
 0x20a   :  { %v2258_v8 = vrot.slane %v2250_v3, %v2257_v62  ;;  %v2312_v9 = vcombine.low %v2289_v60, %v2295_v4  ;;  %v2265_v10 = vrot.slane %v2251_v5, %v2257_v62  ;;  %v2313_v12 = vcombine.low %v2301_v61, %v2307_v6 }
 0x20c   :  { %v2320_v14 = vrot.slane %v2312_v9, %v2257_v62  ;;  %v2266_v11 = vcombine.low %v2258_v8, %v2265_v10  ;;  %v2327_v15 = vrot.slane %v2313_v12, %v2257_v62 }
 0x20e   :  { %v2273_v16 = vrot.slane %v2266_v11, %v2257_v62  ;;  %v2328_v17 = vcombine.low %v2320_v14, %v2327_v15 }
 0x210   :  { %2279 = vst.msk [vmem:[%s4117_s4] sm:$0xf] %vm2277_vm1, %v2273_v16  ;;  %v2335_v47 = vrot.slane %v2328_v17, %v2257_v62 }
 0x212   :  { %2337 = vst.msk [vmem:[%s4118_s5] sm:$0xf] %vm2277_vm1, %v2335_v47 }

// kernel: tile.33
= control target key start
LH: loop header
LB: loop body
LE: loop exit
PB: predicated region body
PF: predicated region fallthrough
CT: control target
= control target key end

     0   :  { %s22_s0 = inlined_call_operand.vmem [shape: f32[64], index: 0, kind: input, shape index: {}]   ;;  %s23_s1 = inlined_call_operand.vmem [shape: f32[4,64], index: 1, kind: output, shape index: {}]  }
   0x1   :  { %v4_v0 = vld [vmem:[%s22_s0] ss:$0 sm:$0xff] }
   0x2   :  { %5 = vst [vmem:[%s23_s1] sm:$0xf] %v4_v0 }

// kernel: tile.34
= control target key start
LH: loop header
LB: loop body
LE: loop exit
PB: predicated region body
PF: predicated region fallthrough
CT: control target
= control target key end

     0   :  { %s6_s8 = smov 3  ;;  %vm8_vm0 = vcmask 523264   ;;  %s30_s9 = smov 64   ;;  %vm15_vm1 = vcmask 1048064   ;;  %s50_s0 = inlined_call_operand.vmem [shape: f32[4,64], index: 0, kind: input, shape index: {}]   ;;  %s51_s1 = inlined_call_operand.vmem [shape: f32[1,256], index: 1, kind: output, shape index: {}]  }
   0x1   :  { %v4_v0 = vld [vmem:[%s50_s0] sm:$0xf]  ;;  %s11_s0 = smov 3 }
   0x2   :  { %5 = vst [vmem:[#allocation1] sm:$0xf] %v4_v0 }
   0x9   :  { %v12_v1 = vld [vmem:[#allocation1 + $0x1] ss:$2 sm:%s11_s0]   ;;  %v7_v2 = vld [vmem:[#allocation1] ss:$2 sm:%s6_s8]  }
   0xa   :  { %13 = vrot.lane.b32.xlu0 %v12_v1, %s30_s9  ;;  %9 = vst.msk [vmem:[#allocation0] ss:$8 sm:$0x3] %vm8_vm0, %v7_v2  }
  0x7c   :  { %v14_v3 = vpop.permute.xlu0 %13  }
  0x7d   :  { %16 = vst.msk [vmem:[#allocation0] ss:$8 sm:$0x3] %vm15_vm1, %v14_v3  }
  0x84   :  { %v20_v4 = vld [vmem:[#allocation0] sm:$0x1]  ;;  %v24_v5 = vld [vmem:[#allocation0 + $0x8] sm:$0x1] }
  0x85   :  { %22 = vst [vmem:[%s51_s1] sm:$0x1] %v20_v4  ;;  %28 = vst [vmem:[%s51_s1 + $0x1] sm:$0x1] %v24_v5 }

// kernel: squeeze.122
= control target key start
LH: loop header
LB: loop body
LE: loop exit
PB: predicated region body
PF: predicated region fallthrough
CT: control target
= control target key end

     0   :  { %vm7_vm0 = vcmask 523264   ;;  %s39_s0 = inlined_call_operand.vmem [shape: f32[256], index: 0, kind: input, shape index: {}]   ;;  %s40_s1 = inlined_call_operand.vmem [shape: f32[4,64], index: 1, kind: output, shape index: {}]  }
   0x1   :  { %v4_v0 = vld [vmem:[%s39_s0] sm:$0x3]  ;;  %s22_s0 = smov 64  }
   0x2   :  { %5 = vst [vmem:[#allocation1] sm:$0x3] %v4_v0 }
   0x9   :  { %v9_v1 = vld [vmem:[#allocation1] sm:$0x3]  }
   0xa   :  { %v6_v2 = vld [vmem:[#allocation1] sm:$0x3]   ;;  %10 = vrot.lane.b32.xlu0 %v9_v1, %s22_s0 }
   0xb   :  { %8 = vst.msk [vmem:[#allocation0] ss:$2 sm:$0x3] %vm7_vm0, %v6_v2  }
  0x7c   :  { %v11_v3 = vpop.permute.xlu0 %10  }
  0x7d   :  { %14 = vst.msk [vmem:[#allocation0 + $0x1] ss:$2 sm:$0x3] %vm7_vm0, %v11_v3  }
  0x84   :  { %v18_v4 = vld [vmem:[#allocation0] sm:$0xf] }
  0x85   :  { %20 = vst [vmem:[%s40_s1] sm:$0xf] %v18_v4 }

// kernel: pix2pix_forward.16
= control target key start
LH: loop header
LB: loop body
LE: loop exit
PB: predicated region body
PF: predicated region fallthrough
CT: control target
= control target key end

     0   :  { %s4054_s1 = inlined_call_operand.vmem [shape: bf16[2304,256], index: 1, kind: input, shape index: {}]   ;;  %s4055_s0 = inlined_call_operand.vmem [shape: bf16[8,2304], index: 0, kind: input, shape index: {}]   ;;  %s4056_s2 = inlined_call_operand.vmem [shape: f32[1,256], index: 2, kind: input, shape index: {}]   ;;  %s4057_s3 = inlined_call_operand.vmem [shape: bf16[8,256], index: 3, kind: output, shape index: {0}]   ;;  %s4058_s4 = inlined_call_operand.vmem [shape: f32[1,256], index: 4, kind: output, shape index: {1}]   ;;  %s4059_s5 = inlined_call_operand.vmem [shape: f32[1,256], index: 5, kind: output, shape index: {2}]  }
   0x1   :  { %v2628_v0 = vld [vmem:[%s4054_s1 + $0x4] ss:$8 sps:$4 sm:$0xff]   ;;  %v2632_v2 = vld [vmem:[%s4054_s1] ss:$8 sps:$4 sm:$0xff]   ;;  %v2634_v4 = vld [vmem:[%s4054_s1 + $0x14] ss:$8 sps:$4 sm:$0xff]  }
   0x2   :  { %v2630_v1 = vld [vmem:[%s4054_s1 + $0x404] ss:$8 sps:$4 sm:$0xff]   ;;  %1829 = vmatprep.subr.bf16.mxu1 %v2628_v0  ;;  %v2633_v3 = vld [vmem:[%s4054_s1 + $0x400] ss:$8 sps:$4 sm:$0xff]   ;;  %v2636_v5 = vld [vmem:[%s4054_s1 + $0x414] ss:$8 sps:$4 sm:$0xff]  }
   0x3   :  { %1993 = vmatprep.subr.bf16.mxu0 %v2630_v1  ;;  %1830 = vmatpush1.bf16.msra.mxu1 %v2632_v2  ;;  %v2638_v6 = vld [vmem:[%s4054_s1 + $0x10] ss:$8 sps:$4 sm:$0xff]   ;;  %v2640_v8 = vld [vmem:[%s4054_s1 + $0x24] ss:$8 sps:$4 sm:$0xff]   ;;  %v2644_v10 = vld [vmem:[%s4054_s1 + $0x20] ss:$8 sps:$4 sm:$0xff]  }
   0x4   :  { %1994 = vmatpush1.bf16.msra.mxu0 %v2633_v3  ;;  %1831 = vmatprep.subr.bf16.mxu1 %v2634_v4  ;;  %v2639_v7 = vld [vmem:[%s4054_s1 + $0x410] ss:$8 sps:$4 sm:$0xff]   ;;  %v2642_v9 = vld [vmem:[%s4054_s1 + $0x424] ss:$8 sps:$4 sm:$0xff]   ;;  %v2645_v11 = vld [vmem:[%s4054_s1 + $0x420] ss:$8 sps:$4 sm:$0xff]  }
   0x5   :  { %1995 = vmatprep.subr.bf16.mxu0 %v2636_v5  ;;  %v2646_v12 = vld [vmem:[%s4054_s1 + $0x34] ss:$8 sps:$4 sm:$0xff]   ;;  %v2650_v14 = vld [vmem:[%s4054_s1 + $0x30] ss:$8 sps:$4 sm:$0xff]   ;;  %v2652_v16 = vld [vmem:[%s4054_s1 + $0x44] ss:$8 sps:$4 sm:$0xff]  }
   0x6   :  { %v2648_v13 = vld [vmem:[%s4054_s1 + $0x434] ss:$8 sps:$4 sm:$0xff]   ;;  %v2651_v15 = vld [vmem:[%s4054_s1 + $0x430] ss:$8 sps:$4 sm:$0xff]   ;;  %v2654_v17 = vld [vmem:[%s4054_s1 + $0x444] ss:$8 sps:$4 sm:$0xff]  }
   0x7   :  { %1832 = vmatpush1.bf16.msra.mxu1 %v2638_v6  ;;  %v2656_v18 = vld [vmem:[%s4054_s1 + $0x40] ss:$8 sps:$4 sm:$0xff]   ;;  %v2658_v20 = vld [vmem:[%s4054_s1 + $0x54] ss:$8 sps:$4 sm:$0xff]   ;;  %v2662_v22 = vld [vmem:[%s4054_s1 + $0x50] ss:$8 sps:$4 sm:$0xff]  }
   0x8   :  { %1996 = vmatpush1.bf16.msra.mxu0 %v2639_v7  ;;  %1833 = vmatprep.subr.bf16.mxu1 %v2640_v8  ;;  %v2657_v19 = vld [vmem:[%s4054_s1 + $0x440] ss:$8 sps:$4 sm:$0xff]   ;;  %v2660_v21 = vld [vmem:[%s4054_s1 + $0x454] ss:$8 sps:$4 sm:$0xff]   ;;  %v2663_v23 = vld [vmem:[%s4054_s1 + $0x450] ss:$8 sps:$4 sm:$0xff]  }
   0x9   :  { %1997 = vmatprep.subr.bf16.mxu0 %v2642_v9  ;;  %v2664_v24 = vld [vmem:[%s4054_s1 + $0x64] ss:$8 sps:$4 sm:$0xff]   ;;  %v2668_v26 = vld [vmem:[%s4054_s1 + $0x60] ss:$8 sps:$4 sm:$0xff]   ;;  %v2670_v28 = vld [vmem:[%s4054_s1 + $0x74] ss:$8 sps:$4 sm:$0xff]  }
   0xa   :  { %v2666_v25 = vld [vmem:[%s4054_s1 + $0x464] ss:$8 sps:$4 sm:$0xff]   ;;  %v2669_v27 = vld [vmem:[%s4054_s1 + $0x460] ss:$8 sps:$4 sm:$0xff]   ;;  %v2672_v29 = vld [vmem:[%s4054_s1 + $0x474] ss:$8 sps:$4 sm:$0xff]  }
   0xb   :  { %1834 = vmatpush1.bf16.msra.mxu1 %v2644_v10  ;;  %v2674_v30 = vld [vmem:[%s4054_s1 + $0x70] ss:$8 sps:$4 sm:$0xff]   ;;  %v2676_v32 = vld [vmem:[%s4054_s1 + $0x84] ss:$8 sps:$4 sm:$0xff]   ;;  %v2680_v34 = vld [vmem:[%s4054_s1 + $0x80] ss:$8 sps:$4 sm:$0xff]  }
   0xc   :  { %1998 = vmatpush1.bf16.msra.mxu0 %v2645_v11  ;;  %1835 = vmatprep.subr.bf16.mxu1 %v2646_v12  ;;  %v2675_v31 = vld [vmem:[%s4054_s1 + $0x470] ss:$8 sps:$4 sm:$0xff]   ;;  %v2678_v33 = vld [vmem:[%s4054_s1 + $0x484] ss:$8 sps:$4 sm:$0xff]   ;;  %v2681_v35 = vld [vmem:[%s4054_s1 + $0x480] ss:$8 sps:$4 sm:$0xff]  }
   0xd   :  { %1999 = vmatprep.subr.bf16.mxu0 %v2648_v13  ;;  %v2682_v36 = vld [vmem:[%s4054_s1 + $0x94] ss:$8 sps:$4 sm:$0xff]   ;;  %v2686_v38 = vld [vmem:[%s4054_s1 + $0x90] ss:$8 sps:$4 sm:$0xff]   ;;  %v2688_v40 = vld [vmem:[%s4054_s1 + $0xa4] ss:$8 sps:$4 sm:$0xff]  }
   0xe   :  { %v2684_v37 = vld [vmem:[%s4054_s1 + $0x494] ss:$8 sps:$4 sm:$0xff]   ;;  %v2687_v39 = vld [vmem:[%s4054_s1 + $0x490] ss:$8 sps:$4 sm:$0xff]   ;;  %v2690_v41 = vld [vmem:[%s4054_s1 + $0x4a4] ss:$8 sps:$4 sm:$0xff]  }
   0xf   :  { %1836 = vmatpush1.bf16.msra.mxu1 %v2650_v14  ;;  %v2692_v42 = vld [vmem:[%s4054_s1 + $0xa0] ss:$8 sps:$4 sm:$0xff]   ;;  %v2694_v44 = vld [vmem:[%s4054_s1 + $0xb4] ss:$8 sps:$4 sm:$0xff]   ;;  %v2698_v47 = vld [vmem:[%s4054_s1 + $0xb0] ss:$8 sps:$4 sm:$0xff]  }
  0x10   :  { %2000 = vmatpush1.bf16.msra.mxu0 %v2651_v15  ;;  %1837 = vmatprep.subr.bf16.mxu1 %v2652_v16  ;;  %v2693_v43 = vld [vmem:[%s4054_s1 + $0x4a0] ss:$8 sps:$4 sm:$0xff]   ;;  %v2696_v45 = vld [vmem:[%s4054_s1 + $0x4b4] ss:$8 sps:$4 sm:$0xff]   ;;  %v2699_v49 = vld [vmem:[%s4054_s1 + $0x4b0] ss:$8 sps:$4 sm:$0xff]  }
  0x11   :  { %2001 = vmatprep.subr.bf16.mxu0 %v2654_v17  ;;  %v17_v46 = vld [vmem:[%s4055_s0] sm:$0xff]  ;;  %v2706_v56 = vld [vmem:[%s4054_s1 + $0xd4] ss:$8 sps:$4 sm:$0xff]   ;;  %v2710_v58 = vld [vmem:[%s4054_s1 + $0xd0] ss:$8 sps:$4 sm:$0xff]  }
  0x12   :  { %v2288_v48 = vcombine.high %v17_v46, %v17_v46  ;;  %v21_v50 = vld [vmem:[%s4055_s0 + $0x20] sm:$0xff]  ;;  %v2708_v57 = vld [vmem:[%s4054_s1 + $0x4d4] ss:$8 sps:$4 sm:$0xff]   ;;  %v2711_v59 = vld [vmem:[%s4054_s1 + $0x4d0] ss:$8 sps:$4 sm:$0xff]   ;;  %v2287_v6 = vcombine.low %v17_v46, %v17_v46 }
  0x13   :  { %1838 = vmatpush1.bf16.msra.mxu1 %v2656_v18  ;;  %v2700_v51 = vld [vmem:[%s4054_s1 + $0xc4] ss:$8 sps:$4 sm:$0xff]   ;;  %v2296_v53 = vcombine.high %v21_v50, %v21_v50  ;;  %v2704_v54 = vld [vmem:[%s4054_s1 + $0xc0] ss:$8 sps:$4 sm:$0xff]   ;;  %v2718_v0 = vld [vmem:[%s4054_s1 + $0xf4] ss:$8 sps:$4 sm:$0xff]   ;;  %v2295_v7 = vcombine.low %v21_v50, %v21_v50 }
  0x14   :  { %2002 = vmatpush1.bf16.msra.mxu0 %v2657_v19  ;;  %1839 = vmatprep.subr.bf16.mxu1 %v2658_v20  ;;  %v2702_v52 = vld [vmem:[%s4054_s1 + $0x4c4] ss:$8 sps:$4 sm:$0xff]   ;;  %v2705_v55 = vld [vmem:[%s4054_s1 + $0x4c0] ss:$8 sps:$4 sm:$0xff]   ;;  %v2720_v1 = vld [vmem:[%s4054_s1 + $0x4f4] ss:$8 sps:$4 sm:$0xff]  }
  0x15   :  { %2003 = vmatprep.subr.bf16.mxu0 %v2660_v21  ;;  %1861 = vmatprep.mubr.bf16.mxu1 %v2288_v48  ;;  %v2712_v60 = vld [vmem:[%s4054_s1 + $0xe4] ss:$8 sps:$4 sm:$0xff]   ;;  %v2716_v62 = vld [vmem:[%s4054_s1 + $0xe0] ss:$8 sps:$4 sm:$0xff]   ;;  %v2722_v2 = vld [vmem:[%s4054_s1 + $0xf0] ss:$8 sps:$4 sm:$0xff]  }
  0x16   :  { %2025 = vmatprep.mubr.bf16.mxu0 %v2296_v53  ;;  %v2714_v61 = vld [vmem:[%s4054_s1 + $0x4e4] ss:$8 sps:$4 sm:$0xff]   ;;  %v2717_v63 = vld [vmem:[%s4054_s1 + $0x4e0] ss:$8 sps:$4 sm:$0xff]   ;;  %v2723_v3 = vld [vmem:[%s4054_s1 + $0x4f0] ss:$8 sps:$4 sm:$0xff]  }
  0x17   :  { %1840 = vmatpush1.bf16.msra.mxu1 %v2662_v22  ;;  %v2728_v4 = vld [vmem:[%s4054_s1 + $0x104] ss:$8 sps:$4 sm:$0xff]   ;;  %v2726_v8 = vld [vmem:[%s4054_s1 + $0x100] ss:$8 sps:$4 sm:$0xff]   ;;  %v2736_v10 = vld [vmem:[%s4054_s1 + $0x114] ss:$8 sps:$4 sm:$0xff]  }
  0x18   :  { %2004 = vmatpush1.bf16.msra.mxu0 %v2663_v23  ;;  %1841 = vmatprep.subr.bf16.mxu1 %v2664_v24  ;;  %v2733_v5 = vld [vmem:[%s4054_s1 + $0x504] ss:$8 sps:$4 sm:$0xff]   ;;  %v2731_v9 = vld [vmem:[%s4054_s1 + $0x500] ss:$8 sps:$4 sm:$0xff]   ;;  %v2739_v11 = vld [vmem:[%s4054_s1 + $0x514] ss:$8 sps:$4 sm:$0xff]  }
  0x19   :  { %2005 = vmatprep.subr.bf16.mxu0 %v2666_v25  ;;  %v2734_v12 = vld [vmem:[%s4054_s1 + $0x110] ss:$8 sps:$4 sm:$0xff]   ;;  %v2742_v14 = vld [vmem:[%s4054_s1 + $0x124] ss:$8 sps:$4 sm:$0xff]   ;;  %v2740_v16 = vld [vmem:[%s4054_s1 + $0x120] ss:$8 sps:$4 sm:$0xff]  }
  0x1a   :  { %v2737_v13 = vld [vmem:[%s4054_s1 + $0x510] ss:$8 sps:$4 sm:$0xff]   ;;  %v2745_v15 = vld [vmem:[%s4054_s1 + $0x524] ss:$8 sps:$4 sm:$0xff]   ;;  %v2743_v17 = vld [vmem:[%s4054_s1 + $0x520] ss:$8 sps:$4 sm:$0xff]  }
  0x1b   :  { %1842 = vmatpush1.bf16.msra.mxu1 %v2668_v26  ;;  %v2748_v18 = vld [vmem:[%s4054_s1 + $0x134] ss:$8 sps:$4 sm:$0xff]   ;;  %v2746_v20 = vld [vmem:[%s4054_s1 + $0x130] ss:$8 sps:$4 sm:$0xff]   ;;  %v2754_v22 = vld [vmem:[%s4054_s1 + $0x144] ss:$8 sps:$4 sm:$0xff]  }
  0x1c   :  { %2006 = vmatpush1.bf16.msra.mxu0 %v2669_v27  ;;  %1843 = vmatprep.subr.bf16.mxu1 %v2670_v28  ;;  %v2751_v19 = vld [vmem:[%s4054_s1 + $0x534] ss:$8 sps:$4 sm:$0xff]   ;;  %v2749_v21 = vld [vmem:[%s4054_s1 + $0x530] ss:$8 sps:$4 sm:$0xff]   ;;  %v2757_v23 = vld [vmem:[%s4054_s1 + $0x544] ss:$8 sps:$4 sm:$0xff]  }
  0x1d   :  { %2007 = vmatprep.subr.bf16.mxu0 %v2672_v29  ;;  %v2752_v24 = vld [vmem:[%s4054_s1 + $0x140] ss:$8 sps:$4 sm:$0xff]   ;;  %v2760_v26 = vld [vmem:[%s4054_s1 + $0x154] ss:$8 sps:$4 sm:$0xff]   ;;  %v2758_v28 = vld [vmem:[%s4054_s1 + $0x150] ss:$8 sps:$4 sm:$0xff]  }
  0x1e   :  { %v2755_v25 = vld [vmem:[%s4054_s1 + $0x540] ss:$8 sps:$4 sm:$0xff]   ;;  %v2763_v27 = vld [vmem:[%s4054_s1 + $0x554] ss:$8 sps:$4 sm:$0xff]   ;;  %v2761_v29 = vld [vmem:[%s4054_s1 + $0x550] ss:$8 sps:$4 sm:$0xff]  }
  0x1f   :  { %1844 = vmatpush1.bf16.msra.mxu1 %v2674_v30  ;;  %v2766_v30 = vld [vmem:[%s4054_s1 + $0x164] ss:$8 sps:$4 sm:$0xff]   ;;  %v2784_v46 = vld [vmem:[%s4054_s1 + $0x194] ss:$8 sps:$4 sm:$0xff]   ;;  %v2782_v48 = vld [vmem:[%s4054_s1 + $0x190] ss:$8 sps:$4 sm:$0xff]  }
  0x20   :  { %2008 = vmatpush1.bf16.msra.mxu0 %v2675_v31  ;;  %1845 = vmatprep.subr.bf16.mxu1 %v2676_v32  ;;  %v2769_v31 = vld [vmem:[%s4054_s1 + $0x564] ss:$8 sps:$4 sm:$0xff]   ;;  %v2791_v53 = vld [vmem:[%s4054_s1 + $0x5a0] ss:$8 sps:$4 sm:$0xff]  }
  0x21   :  { %2009 = vmatprep.subr.bf16.mxu0 %v2678_v33  ;;  %v3388_v32 = vld [vmem:[%s4055_s0 + $0x8] sm:$0xff] }
  0x22   :  { %v2764_v33 = vld [vmem:[%s4054_s1 + $0x160] ss:$8 sps:$4 sm:$0xff]   ;;  %v2790_v50 = vld [vmem:[%s4054_s1 + $0x1a4] ss:$8 sps:$4 sm:$0xff]  }
  0x23   :  { %1846 = vmatpush1.bf16.msra.mxu1 %v2680_v34  ;;  %v2767_v34 = vld [vmem:[%s4054_s1 + $0x560] ss:$8 sps:$4 sm:$0xff]  }
  0x24   :  { %2010 = vmatpush1.bf16.msra.mxu0 %v2681_v35  ;;  %1847 = vmatprep.subr.bf16.mxu1 %v2682_v36  ;;  %v2290_v35 = vcombine.high %v3388_v32, %v3388_v32  ;;  %v3401_v36 = vld [vmem:[%s4055_s0 + $0x28] sm:$0xff] }
  0x25   :  { %2011 = vmatprep.subr.bf16.mxu0 %v2684_v37  ;;  %v2772_v37 = vld [vmem:[%s4054_s1 + $0x174] ss:$8 sps:$4 sm:$0xff]  }
  0x27   :  { %1848 = vmatpush1.bf16.msra.mxu1 %v2686_v38  ;;  %v2298_v38 = vcombine.high %v3401_v36, %v3401_v36 }
  0x28   :  { %2012 = vmatpush1.bf16.msra.mxu0 %v2687_v39  ;;  %1849 = vmatprep.subr.bf16.mxu1 %v2688_v40  ;;  %v2775_v39 = vld [vmem:[%s4054_s1 + $0x574] ss:$8 sps:$4 sm:$0xff]   ;;  %v2770_v40 = vld [vmem:[%s4054_s1 + $0x170] ss:$8 sps:$4 sm:$0xff]  }
  0x29   :  { %2013 = vmatprep.subr.bf16.mxu0 %v2690_v41  ;;  %v2773_v41 = vld [vmem:[%s4054_s1 + $0x570] ss:$8 sps:$4 sm:$0xff]  }
  0x2b   :  { %1850 = vmatpush1.bf16.msra.mxu1 %v2692_v42  ;;  %v2778_v42 = vld [vmem:[%s4054_s1 + $0x184] ss:$8 sps:$4 sm:$0xff]  }
  0x2c   :  { %2014 = vmatpush1.bf16.msra.mxu0 %v2693_v43  ;;  %1851 = vmatprep.subr.bf16.mxu1 %v2694_v44  ;;  %v2781_v43 = vld [vmem:[%s4054_s1 + $0x584] ss:$8 sps:$4 sm:$0xff]   ;;  %v2776_v44 = vld [vmem:[%s4054_s1 + $0x180] ss:$8 sps:$4 sm:$0xff]  }
  0x2d   :  { %2015 = vmatprep.subr.bf16.mxu0 %v2696_v45  ;;  %v2779_v45 = vld [vmem:[%s4054_s1 + $0x580] ss:$8 sps:$4 sm:$0xff]  }
  0x2f   :  { %1852 = vmatpush1.bf16.msra.mxu1 %v2698_v47  ;;  %v2787_v47 = vld [vmem:[%s4054_s1 + $0x594] ss:$8 sps:$4 sm:$0xff]  }
  0x30   :  { %2016 = vmatpush1.bf16.msra.mxu0 %v2699_v49  ;;  %1853 = vmatprep.subr.bf16.mxu1 %v2700_v51  ;;  %v2785_v49 = vld [vmem:[%s4054_s1 + $0x590] ss:$8 sps:$4 sm:$0xff]   ;;  %v2793_v51 = vld [vmem:[%s4054_s1 + $0x5a4] ss:$8 sps:$4 sm:$0xff]  }
  0x31   :  { %2017 = vmatprep.subr.bf16.mxu0 %v2702_v52  ;;  %v2788_v52 = vld [vmem:[%s4054_s1 + $0x1a0] ss:$8 sps:$4 sm:$0xff]  }
  0x33   :  { %1854 = vmatpush1.bf16.msra.mxu1 %v2704_v54  ;;  %v2796_v54 = vld [vmem:[%s4054_s1 + $0x1b4] ss:$8 sps:$4 sm:$0xff]  }
  0x34   :  { %2018 = vmatpush1.bf16.msra.mxu0 %v2705_v55  ;;  %1855 = vmatprep.subr.bf16.mxu1 %v2706_v56  ;;  %v2799_v55 = vld [vmem:[%s4054_s1 + $0x5b4] ss:$8 sps:$4 sm:$0xff]   ;;  %v2794_v56 = vld [vmem:[%s4054_s1 + $0x1b0] ss:$8 sps:$4 sm:$0xff]  }
  0x35   :  { %2019 = vmatprep.subr.bf16.mxu0 %v2708_v57  ;;  %v2797_v57 = vld [vmem:[%s4054_s1 + $0x5b0] ss:$8 sps:$4 sm:$0xff]  }
  0x37   :  { %1856 = vmatpush1.bf16.msra.mxu1 %v2710_v58  ;;  %v2802_v58 = vld [vmem:[%s4054_s1 + $0x1c4] ss:$8 sps:$4 sm:$0xff]  }
  0x38   :  { %2020 = vmatpush1.bf16.msra.mxu0 %v2711_v59  ;;  %1857 = vmatprep.subr.bf16.mxu1 %v2712_v60  ;;  %v2805_v59 = vld [vmem:[%s4054_s1 + $0x5c4] ss:$8 sps:$4 sm:$0xff]   ;;  %v2800_v60 = vld [vmem:[%s4054_s1 + $0x1c0] ss:$8 sps:$4 sm:$0xff]  }
  0x39   :  { %2021 = vmatprep.subr.bf16.mxu0 %v2714_v61  ;;  %v2803_v61 = vld [vmem:[%s4054_s1 + $0x5c0] ss:$8 sps:$4 sm:$0xff]  }
  0x3b   :  { %1858 = vmatpush1.bf16.msra.mxu1 %v2716_v62  ;;  %v2808_v62 = vld [vmem:[%s4054_s1 + $0x1d4] ss:$8 sps:$4 sm:$0xff]  }
  0x3c   :  { %2022 = vmatpush1.bf16.msra.mxu0 %v2717_v63  ;;  %1859 = vmatprep.subr.bf16.mxu1 %v2718_v0  ;;  %v2811_v63 = vld [vmem:[%s4054_s1 + $0x5d4] ss:$8 sps:$4 sm:$0xff]   ;;  %v2806_v0 = vld [vmem:[%s4054_s1 + $0x1d0] ss:$8 sps:$4 sm:$0xff]  }
  0x3d   :  { %2023 = vmatprep.subr.bf16.mxu0 %v2720_v1  ;;  %v2809_v1 = vld [vmem:[%s4054_s1 + $0x5d0] ss:$8 sps:$4 sm:$0xff]  }
  0x3f   :  { %1860 = vmatpush1.bf16.msra.mxu1 %v2722_v2  ;;  %v2814_v2 = vld [vmem:[%s4054_s1 + $0x1e4] ss:$8 sps:$4 sm:$0xff]  }
  0x40   :  { %2024 = vmatpush1.bf16.msra.mxu0 %v2723_v3  ;;  %1870 = vmatprep.subr.bf16.mxu1 %v2728_v4  ;;  %v2817_v3 = vld [vmem:[%s4054_s1 + $0x5e4] ss:$8 sps:$4 sm:$0xff]   ;;  %v2812_v4 = vld [vmem:[%s4054_s1 + $0x1e0] ss:$8 sps:$4 sm:$0xff]  }
  0x41   :  { %2034 = vmatprep.subr.bf16.mxu0 %v2733_v5  ;;  %v2815_v5 = vld [vmem:[%s4054_s1 + $0x5e0] ss:$8 sps:$4 sm:$0xff]  }
  0x42   :  { %1862 = vmatmul.mubr.bf16.vlgmr.msra.gmra.mrb[0].mxu1 %v2287_v6  ;;  %v2820_v6 = vld [vmem:[%s4054_s1 + $0x1f4] ss:$8 sps:$4 sm:$0xff]  }
  0x43   :  { %2026 = vmatmul.mubr.bf16.vlgmr.msra.gmra.mrb[0].mxu0 %v2295_v7  ;;  %1871 = vmatpush1.bf16.msra.mxu1 %v2726_v8  ;;  %v2823_v7 = vld [vmem:[%s4054_s1 + $0x5f4] ss:$8 sps:$4 sm:$0xff]   ;;  %v2818_v8 = vld [vmem:[%s4054_s1 + $0x1f0] ss:$8 sps:$4 sm:$0xff]  }
  0x44   :  { %2035 = vmatpush1.bf16.msra.mxu0 %v2731_v9  ;;  %1872 = vmatprep.subr.bf16.mxu1 %v2736_v10  ;;  %v2821_v9 = vld [vmem:[%s4054_s1 + $0x5f0] ss:$8 sps:$4 sm:$0xff]   ;;  %v2828_v10 = vld [vmem:[%s4054_s1 + $0x204] ss:$8 sps:$4 sm:$0xff]  }
  0x45   :  { %2036 = vmatprep.subr.bf16.mxu0 %v2739_v11  ;;  %1902 = vmatprep.mubr.bf16.mxu1 %v2290_v35  ;;  %v2833_v11 = vld [vmem:[%s4054_s1 + $0x604] ss:$8 sps:$4 sm:$0xff]   ;;  %v2855_v35 = vld [vmem:[%s4054_s1 + $0x640] ss:$8 sps:$4 sm:$0xff]  }
  0x46   :  { %2066 = vmatprep.mubr.bf16.mxu0 %v2298_v38  ;;  %v2858_v38 = vld [vmem:[%s4054_s1 + $0x250] ss:$8 sps:$4 sm:$0xff]  }
  0x47   :  { %1873 = vmatpush1.bf16.msra.mxu1 %v2734_v12  ;;  %v2289_v12 = vcombine.low %v3388_v32, %v3388_v32  ;;  %v2854_v32 = vld [vmem:[%s4054_s1 + $0x244] ss:$8 sps:$4 sm:$0xff]  }
  0x48   :  { %2037 = vmatpush1.bf16.msra.mxu0 %v2737_v13  ;;  %1874 = vmatprep.subr.bf16.mxu1 %v2742_v14  ;;  %v2826_v13 = vld [vmem:[%s4054_s1 + $0x200] ss:$8 sps:$4 sm:$0xff]   ;;  %v2297_v14 = vcombine.low %v3401_v36, %v3401_v36  ;;  %v2860_v36 = vld [vmem:[%s4054_s1 + $0x254] ss:$8 sps:$4 sm:$0xff]  }
  0x49   :  { %2038 = vmatprep.subr.bf16.mxu0 %v2745_v15  ;;  %v2831_v15 = vld [vmem:[%s4054_s1 + $0x600] ss:$8 sps:$4 sm:$0xff]  }
  0x4b   :  { %1875 = vmatpush1.bf16.msra.mxu1 %v2740_v16  ;;  %v2836_v16 = vld [vmem:[%s4054_s1 + $0x214] ss:$8 sps:$4 sm:$0xff]  }
  0x4c   :  { %2039 = vmatpush1.bf16.msra.mxu0 %v2743_v17  ;;  %1876 = vmatprep.subr.bf16.mxu1 %v2748_v18  ;;  %v2839_v17 = vld [vmem:[%s4054_s1 + $0x614] ss:$8 sps:$4 sm:$0xff]  }
  0x4d   :  { %2040 = vmatprep.subr.bf16.mxu0 %v2751_v19  ;;  %v3538_v18 = vld [vmem:[%s4055_s0 + $0x10] sm:$0xff] }
  0x4e   :  { %v2292_v19 = vcombine.high %v3538_v18, %v3538_v18 }
  0x4f   :  { %1877 = vmatpush1.bf16.msra.mxu1 %v2746_v20  ;;  %v3545_v20 = vld [vmem:[%s4055_s0 + $0x30] sm:$0xff] }
  0x50   :  { %2041 = vmatpush1.bf16.msra.mxu0 %v2749_v21  ;;  %1878 = vmatprep.subr.bf16.mxu1 %v2754_v22  ;;  %v2834_v21 = vld [vmem:[%s4054_s1 + $0x210] ss:$8 sps:$4 sm:$0xff]  }
  0x51   :  { %2042 = vmatprep.subr.bf16.mxu0 %v2757_v23  ;;  %v2837_v22 = vld [vmem:[%s4054_s1 + $0x610] ss:$8 sps:$4 sm:$0xff]   ;;  %v2300_v23 = vcombine.high %v3545_v20, %v3545_v20 }
  0x53   :  { %1879 = vmatpush1.bf16.msra.mxu1 %v2752_v24  ;;  %v2842_v24 = vld [vmem:[%s4054_s1 + $0x224] ss:$8 sps:$4 sm:$0xff]  }
  0x54   :  { %2043 = vmatpush1.bf16.msra.mxu0 %v2755_v25  ;;  %1880 = vmatprep.subr.bf16.mxu1 %v2760_v26  ;;  %v2845_v25 = vld [vmem:[%s4054_s1 + $0x624] ss:$8 sps:$4 sm:$0xff]   ;;  %v2840_v26 = vld [vmem:[%s4054_s1 + $0x220] ss:$8 sps:$4 sm:$0xff]  }
  0x55   :  { %2044 = vmatprep.subr.bf16.mxu0 %v2763_v27  ;;  %v2843_v27 = vld [vmem:[%s4054_s1 + $0x620] ss:$8 sps:$4 sm:$0xff]  }
  0x57   :  { %1881 = vmatpush1.bf16.msra.mxu1 %v2758_v28  ;;  %v2848_v28 = vld [vmem:[%s4054_s1 + $0x234] ss:$8 sps:$4 sm:$0xff]  }
  0x58   :  { %2045 = vmatpush1.bf16.msra.mxu0 %v2761_v29  ;;  %1882 = vmatprep.subr.bf16.mxu1 %v2766_v30  ;;  %v2851_v29 = vld [vmem:[%s4054_s1 + $0x634] ss:$8 sps:$4 sm:$0xff]   ;;  %v2846_v30 = vld [vmem:[%s4054_s1 + $0x230] ss:$8 sps:$4 sm:$0xff]  }
  0x59   :  { %2046 = vmatprep.subr.bf16.mxu0 %v2769_v31  ;;  %v2849_v31 = vld [vmem:[%s4054_s1 + $0x630] ss:$8 sps:$4 sm:$0xff]  }
  0x5b   :  { %1883 = vmatpush1.bf16.msra.mxu1 %v2764_v33  ;;  %v2857_v33 = vld [vmem:[%s4054_s1 + $0x644] ss:$8 sps:$4 sm:$0xff]  }
  0x5c   :  { %2047 = vmatpush1.bf16.msra.mxu0 %v2767_v34  ;;  %1884 = vmatprep.subr.bf16.mxu1 %v2772_v37  ;;  %v2852_v34 = vld [vmem:[%s4054_s1 + $0x240] ss:$8 sps:$4 sm:$0xff]   ;;  %v2863_v37 = vld [vmem:[%s4054_s1 + $0x654] ss:$8 sps:$4 sm:$0xff]  }
  0x5d   :  { %2048 = vmatprep.subr.bf16.mxu0 %v2775_v39  ;;  %v2861_v39 = vld [vmem:[%s4054_s1 + $0x650] ss:$8 sps:$4 sm:$0xff]  }
  0x5f   :  { %1885 = vmatpush1.bf16.msra.mxu1 %v2770_v40  ;;  %v2866_v40 = vld [vmem:[%s4054_s1 + $0x264] ss:$8 sps:$4 sm:$0xff]  }
  0x60   :  { %2049 = vmatpush1.bf16.msra.mxu0 %v2773_v41  ;;  %1886 = vmatprep.subr.bf16.mxu1 %v2778_v42  ;;  %v2869_v41 = vld [vmem:[%s4054_s1 + $0x664] ss:$8 sps:$4 sm:$0xff]   ;;  %v2864_v42 = vld [vmem:[%s4054_s1 + $0x260] ss:$8 sps:$4 sm:$0xff]  }
  0x61   :  { %2050 = vmatprep.subr.bf16.mxu0 %v2781_v43  ;;  %v2867_v43 = vld [vmem:[%s4054_s1 + $0x660] ss:$8 sps:$4 sm:$0xff]  }
  0x63   :  { %1887 = vmatpush1.bf16.msra.mxu1 %v2776_v44  ;;  %v2872_v44 = vld [vmem:[%s4054_s1 + $0x274] ss:$8 sps:$4 sm:$0xff]  }
  0x64   :  { %2051 = vmatpush1.bf16.msra.mxu0 %v2779_v45  ;;  %1888 = vmatprep.subr.bf16.mxu1 %v2784_v46  ;;  %v2875_v45 = vld [vmem:[%s4054_s1 + $0x674] ss:$8 sps:$4 sm:$0xff]   ;;  %v2870_v46 = vld [vmem:[%s4054_s1 + $0x270] ss:$8 sps:$4 sm:$0xff]  }
  0x65   :  { %2052 = vmatprep.subr.bf16.mxu0 %v2787_v47  ;;  %v2873_v47 = vld [vmem:[%s4054_s1 + $0x670] ss:$8 sps:$4 sm:$0xff]  }
  0x67   :  { %1889 = vmatpush1.bf16.msra.mxu1 %v2782_v48  ;;  %v2878_v48 = vld [vmem:[%s4054_s1 + $0x284] ss:$8 sps:$4 sm:$0xff]  }
  0x68   :  { %2053 = vmatpush1.bf16.msra.mxu0 %v2785_v49  ;;  %1890 = vmatprep.subr.bf16.mxu1 %v2790_v50  ;;  %v2881_v49 = vld [vmem:[%s4054_s1 + $0x684] ss:$8 sps:$4 sm:$0xff]   ;;  %v2876_v50 = vld [vmem:[%s4054_s1 + $0x280] ss:$8 sps:$4 sm:$0xff]  }
  0x69   :  { %2054 = vmatprep.subr.bf16.mxu0 %v2793_v51  ;;  %v2879_v51 = vld [vmem:[%s4054_s1 + $0x680] ss:$8 sps:$4 sm:$0xff]  }
  0x6b   :  { %1891 = vmatpush1.bf16.msra.mxu1 %v2788_v52  ;;  %v2884_v52 = vld [vmem:[%s4054_s1 + $0x294] ss:$8 sps:$4 sm:$0xff]  }
  0x6c   :  { %2055 = vmatpush1.bf16.msra.mxu0 %v2791_v53  ;;  %1892 = vmatprep.subr.bf16.mxu1 %v2796_v54  ;;  %v2887_v53 = vld [vmem:[%s4054_s1 + $0x694] ss:$8 sps:$4 sm:$0xff]   ;;  %v2882_v54 = vld [vmem:[%s4054_s1 + $0x290] ss:$8 sps:$4 sm:$0xff]  }
  0x6d   :  { %2056 = vmatprep.subr.bf16.mxu0 %v2799_v55  ;;  %v2885_v55 = vld [vmem:[%s4054_s1 + $0x690] ss:$8 sps:$4 sm:$0xff]  }
  0x6f   :  { %1893 = vmatpush1.bf16.msra.mxu1 %v2794_v56  ;;  %v2890_v56 = vld [vmem:[%s4054_s1 + $0x2a4] ss:$8 sps:$4 sm:$0xff]  }
  0x70   :  { %2057 = vmatpush1.bf16.msra.mxu0 %v2797_v57  ;;  %1894 = vmatprep.subr.bf16.mxu1 %v2802_v58  ;;  %v2893_v57 = vld [vmem:[%s4054_s1 + $0x6a4] ss:$8 sps:$4 sm:$0xff]   ;;  %v2888_v58 = vld [vmem:[%s4054_s1 + $0x2a0] ss:$8 sps:$4 sm:$0xff]  }
  0x71   :  { %2058 = vmatprep.subr.bf16.mxu0 %v2805_v59  ;;  %v2891_v59 = vld [vmem:[%s4054_s1 + $0x6a0] ss:$8 sps:$4 sm:$0xff]  }
  0x73   :  { %1895 = vmatpush1.bf16.msra.mxu1 %v2800_v60  ;;  %v2896_v60 = vld [vmem:[%s4054_s1 + $0x2b4] ss:$8 sps:$4 sm:$0xff]  }
  0x74   :  { %2059 = vmatpush1.bf16.msra.mxu0 %v2803_v61  ;;  %1896 = vmatprep.subr.bf16.mxu1 %v2808_v62  ;;  %v2899_v61 = vld [vmem:[%s4054_s1 + $0x6b4] ss:$8 sps:$4 sm:$0xff]   ;;  %v2894_v62 = vld [vmem:[%s4054_s1 + $0x2b0] ss:$8 sps:$4 sm:$0xff]  }
  0x75   :  { %2060 = vmatprep.subr.bf16.mxu0 %v2811_v63  ;;  %v2897_v63 = vld [vmem:[%s4054_s1 + $0x6b0] ss:$8 sps:$4 sm:$0xff]  }
  0x77   :  { %1897 = vmatpush1.bf16.msra.mxu1 %v2806_v0  ;;  %v2902_v0 = vld [vmem:[%s4054_s1 + $0x2c4] ss:$8 sps:$4 sm:$0xff]  }
  0x78   :  { %2061 = vmatpush1.bf16.msra.mxu0 %v2809_v1  ;;  %1898 = vmatprep.subr.bf16.mxu1 %v2814_v2  ;;  %v2905_v1 = vld [vmem:[%s4054_s1 + $0x6c4] ss:$8 sps:$4 sm:$0xff]   ;;  %v2900_v2 = vld [vmem:[%s4054_s1 + $0x2c0] ss:$8 sps:$4 sm:$0xff]  }
  0x79   :  { %2062 = vmatprep.subr.bf16.mxu0 %v2817_v3  ;;  %v2903_v3 = vld [vmem:[%s4054_s1 + $0x6c0] ss:$8 sps:$4 sm:$0xff]  }
  0x7b   :  { %1899 = vmatpush1.bf16.msra.mxu1 %v2812_v4  ;;  %v2908_v4 = vld [vmem:[%s4054_s1 + $0x2d4] ss:$8 sps:$4 sm:$0xff]  }
  0x7c   :  { %2063 = vmatpush1.bf16.msra.mxu0 %v2815_v5  ;;  %1900 = vmatprep.subr.bf16.mxu1 %v2820_v6  ;;  %v2911_v5 = vld [vmem:[%s4054_s1 + $0x6d4] ss:$8 sps:$4 sm:$0xff]   ;;  %v2906_v6 = vld [vmem:[%s4054_s1 + $0x2d0] ss:$8 sps:$4 sm:$0xff]  }
  0x7d   :  { %2064 = vmatprep.subr.bf16.mxu0 %v2823_v7  ;;  %v2909_v7 = vld [vmem:[%s4054_s1 + $0x6d0] ss:$8 sps:$4 sm:$0xff]  }
  0x7f   :  { %1901 = vmatpush1.bf16.msra.mxu1 %v2818_v8  ;;  %v2914_v8 = vld [vmem:[%s4054_s1 + $0x2e4] ss:$8 sps:$4 sm:$0xff]  }
  0x80   :  { %2065 = vmatpush1.bf16.msra.mxu0 %v2821_v9  ;;  %1911 = vmatprep.subr.bf16.mxu1 %v2828_v10  ;;  %v2917_v9 = vld [vmem:[%s4054_s1 + $0x6e4] ss:$8 sps:$4 sm:$0xff]   ;;  %v2912_v10 = vld [vmem:[%s4054_s1 + $0x2e0] ss:$8 sps:$4 sm:$0xff]  }
  0x81   :  { %2075 = vmatprep.subr.bf16.mxu0 %v2833_v11  ;;  %v2915_v11 = vld [vmem:[%s4054_s1 + $0x6e0] ss:$8 sps:$4 sm:$0xff]  }
  0x82   :  { %1903 = vmatmul.mubr.bf16.vlgmr.msra.gmra.mrb[0].mxu1 %v2289_v12  ;;  %v2920_v12 = vld [vmem:[%s4054_s1 + $0x2f4] ss:$8 sps:$4 sm:$0xff]  }
  0x83   :  { %2067 = vmatmul.mubr.bf16.vlgmr.msra.gmra.mrb[0].mxu0 %v2297_v14  ;;  %1912 = vmatpush1.bf16.msra.mxu1 %v2826_v13  ;;  %v2923_v13 = vld [vmem:[%s4054_s1 + $0x6f4] ss:$8 sps:$4 sm:$0xff]   ;;  %v2918_v14 = vld [vmem:[%s4054_s1 + $0x2f0] ss:$8 sps:$4 sm:$0xff]  }
  0x84   :  { %2076 = vmatpush1.bf16.msra.mxu0 %v2831_v15  ;;  %1913 = vmatprep.subr.bf16.mxu1 %v2836_v16  ;;  %v2921_v15 = vld [vmem:[%s4054_s1 + $0x6f0] ss:$8 sps:$4 sm:$0xff]   ;;  %v2928_v16 = vld [vmem:[%s4054_s1 + $0x304] ss:$8 sps:$4 sm:$0xff]  }
  0x85   :  { %2077 = vmatprep.subr.bf16.mxu0 %v2839_v17  ;;  %1943 = vmatprep.mubr.bf16.mxu1 %v2292_v19  ;;  %v2933_v17 = vld [vmem:[%s4054_s1 + $0x704] ss:$8 sps:$4 sm:$0xff]   ;;  %v2926_v19 = vld [vmem:[%s4054_s1 + $0x300] ss:$8 sps:$4 sm:$0xff]  }
  0x86   :  { %2107 = vmatprep.mubr.bf16.mxu0 %v2300_v23  ;;  %v2299_v23 = vcombine.low %v3545_v20, %v3545_v20 }
  0x87   :  { %1914 = vmatpush1.bf16.msra.mxu1 %v2834_v21  ;;  %v2931_v21 = vld [vmem:[%s4054_s1 + $0x700] ss:$8 sps:$4 sm:$0xff]  }
  0x88   :  { %2078 = vmatpush1.bf16.msra.mxu0 %v2837_v22  ;;  %1915 = vmatprep.subr.bf16.mxu1 %v2842_v24  ;;  %v2291_v22 = vcombine.low %v3538_v18, %v3538_v18  ;;  %v3742_v24 = vld [vmem:[%s4055_s0 + $0x18] sm:$0xff] }
  0x89   :  { %2079 = vmatprep.subr.bf16.mxu0 %v2845_v25  ;;  %v3747_v25 = vld [vmem:[%s4055_s0 + $0x38] sm:$0xff]  ;;  %v2294_v20 = vcombine.high %v3742_v24, %v3742_v24 }
  0x8a   :  { %v2939_v18 = vld [vmem:[%s4054_s1 + $0x714] ss:$8 sps:$4 sm:$0xff]  }
  0x8b   :  { %1916 = vmatpush1.bf16.msra.mxu1 %v2840_v26  ;;  %v2936_v26 = vld [vmem:[%s4054_s1 + $0x314] ss:$8 sps:$4 sm:$0xff]  }
  0x8c   :  { %2080 = vmatpush1.bf16.msra.mxu0 %v2843_v27  ;;  %1917 = vmatprep.subr.bf16.mxu1 %v2848_v28  ;;  %v2302_v27 = vcombine.high %v3747_v25, %v3747_v25  ;;  %v2934_v28 = vld [vmem:[%s4054_s1 + $0x310] ss:$8 sps:$4 sm:$0xff]  }
  0x8d   :  { %2081 = vmatprep.subr.bf16.mxu0 %v2851_v29  ;;  %v2937_v29 = vld [vmem:[%s4054_s1 + $0x710] ss:$8 sps:$4 sm:$0xff]  }
  0x8f   :  { %1918 = vmatpush1.bf16.msra.mxu1 %v2846_v30  ;;  %v2942_v30 = vld [vmem:[%s4054_s1 + $0x324] ss:$8 sps:$4 sm:$0xff]  }
  0x90   :  { %2082 = vmatpush1.bf16.msra.mxu0 %v2849_v31  ;;  %1919 = vmatprep.subr.bf16.mxu1 %v2854_v32  ;;  %v2945_v31 = vld [vmem:[%s4054_s1 + $0x724] ss:$8 sps:$4 sm:$0xff]   ;;  %v2940_v32 = vld [vmem:[%s4054_s1 + $0x320] ss:$8 sps:$4 sm:$0xff]  }
  0x91   :  { %2083 = vmatprep.subr.bf16.mxu0 %v2857_v33  ;;  %v2943_v33 = vld [vmem:[%s4054_s1 + $0x720] ss:$8 sps:$4 sm:$0xff]  }
  0x93   :  { %1920 = vmatpush1.bf16.msra.mxu1 %v2852_v34  ;;  %v2948_v34 = vld [vmem:[%s4054_s1 + $0x334] ss:$8 sps:$4 sm:$0xff]  }
  0x94   :  { %2084 = vmatpush1.bf16.msra.mxu0 %v2855_v35  ;;  %1921 = vmatprep.subr.bf16.mxu1 %v2860_v36  ;;  %v2951_v35 = vld [vmem:[%s4054_s1 + $0x734] ss:$8 sps:$4 sm:$0xff]   ;;  %v2946_v36 = vld [vmem:[%s4054_s1 + $0x330] ss:$8 sps:$4 sm:$0xff]  }
  0x95   :  { %2085 = vmatprep.subr.bf16.mxu0 %v2863_v37  ;;  %v2949_v37 = vld [vmem:[%s4054_s1 + $0x730] ss:$8 sps:$4 sm:$0xff]  }
  0x97   :  { %1922 = vmatpush1.bf16.msra.mxu1 %v2858_v38  ;;  %v2954_v38 = vld [vmem:[%s4054_s1 + $0x344] ss:$8 sps:$4 sm:$0xff]  }
  0x98   :  { %2086 = vmatpush1.bf16.msra.mxu0 %v2861_v39  ;;  %1923 = vmatprep.subr.bf16.mxu1 %v2866_v40  ;;  %v2957_v39 = vld [vmem:[%s4054_s1 + $0x744] ss:$8 sps:$4 sm:$0xff]   ;;  %v2952_v40 = vld [vmem:[%s4054_s1 + $0x340] ss:$8 sps:$4 sm:$0xff]  }
  0x99   :  { %2087 = vmatprep.subr.bf16.mxu0 %v2869_v41  ;;  %v2955_v41 = vld [vmem:[%s4054_s1 + $0x740] ss:$8 sps:$4 sm:$0xff]  }
  0x9b   :  { %1924 = vmatpush1.bf16.msra.mxu1 %v2864_v42  ;;  %v2960_v42 = vld [vmem:[%s4054_s1 + $0x354] ss:$8 sps:$4 sm:$0xff]  }
  0x9c   :  { %2088 = vmatpush1.bf16.msra.mxu0 %v2867_v43  ;;  %1925 = vmatprep.subr.bf16.mxu1 %v2872_v44  ;;  %v2963_v43 = vld [vmem:[%s4054_s1 + $0x754] ss:$8 sps:$4 sm:$0xff]   ;;  %v2958_v44 = vld [vmem:[%s4054_s1 + $0x350] ss:$8 sps:$4 sm:$0xff]  }
  0x9d   :  { %2089 = vmatprep.subr.bf16.mxu0 %v2875_v45  ;;  %v2961_v45 = vld [vmem:[%s4054_s1 + $0x750] ss:$8 sps:$4 sm:$0xff]  }
  0x9f   :  { %1926 = vmatpush1.bf16.msra.mxu1 %v2870_v46  ;;  %v2966_v46 = vld [vmem:[%s4054_s1 + $0x364] ss:$8 sps:$4 sm:$0xff]  }
  0xa0   :  { %2090 = vmatpush1.bf16.msra.mxu0 %v2873_v47  ;;  %1927 = vmatprep.subr.bf16.mxu1 %v2878_v48  ;;  %v2969_v47 = vld [vmem:[%s4054_s1 + $0x764] ss:$8 sps:$4 sm:$0xff]   ;;  %v2964_v48 = vld [vmem:[%s4054_s1 + $0x360] ss:$8 sps:$4 sm:$0xff]  }
  0xa1   :  { %2091 = vmatprep.subr.bf16.mxu0 %v2881_v49  ;;  %v2967_v49 = vld [vmem:[%s4054_s1 + $0x760] ss:$8 sps:$4 sm:$0xff]  }
  0xa3   :  { %1928 = vmatpush1.bf16.msra.mxu1 %v2876_v50  ;;  %v2972_v50 = vld [vmem:[%s4054_s1 + $0x374] ss:$8 sps:$4 sm:$0xff]  }
  0xa4   :  { %2092 = vmatpush1.bf16.msra.mxu0 %v2879_v51  ;;  %1929 = vmatprep.subr.bf16.mxu1 %v2884_v52  ;;  %v2975_v51 = vld [vmem:[%s4054_s1 + $0x774] ss:$8 sps:$4 sm:$0xff]   ;;  %v2970_v52 = vld [vmem:[%s4054_s1 + $0x370] ss:$8 sps:$4 sm:$0xff]  }
  0xa5   :  { %2093 = vmatprep.subr.bf16.mxu0 %v2887_v53  ;;  %v2973_v53 = vld [vmem:[%s4054_s1 + $0x770] ss:$8 sps:$4 sm:$0xff]  }
  0xa7   :  { %1930 = vmatpush1.bf16.msra.mxu1 %v2882_v54  ;;  %v2978_v54 = vld [vmem:[%s4054_s1 + $0x384] ss:$8 sps:$4 sm:$0xff]  }
  0xa8   :  { %2094 = vmatpush1.bf16.msra.mxu0 %v2885_v55  ;;  %1931 = vmatprep.subr.bf16.mxu1 %v2890_v56  ;;  %v2981_v55 = vld [vmem:[%s4054_s1 + $0x784] ss:$8 sps:$4 sm:$0xff]   ;;  %v2976_v56 = vld [vmem:[%s4054_s1 + $0x380] ss:$8 sps:$4 sm:$0xff]  }
  0xa9   :  { %2095 = vmatprep.subr.bf16.mxu0 %v2893_v57  ;;  %v2979_v57 = vld [vmem:[%s4054_s1 + $0x780] ss:$8 sps:$4 sm:$0xff]  }
  0xab   :  { %1932 = vmatpush1.bf16.msra.mxu1 %v2888_v58  ;;  %v2984_v58 = vld [vmem:[%s4054_s1 + $0x394] ss:$8 sps:$4 sm:$0xff]  }
  0xac   :  { %2096 = vmatpush1.bf16.msra.mxu0 %v2891_v59  ;;  %1933 = vmatprep.subr.bf16.mxu1 %v2896_v60  ;;  %v2987_v59 = vld [vmem:[%s4054_s1 + $0x794] ss:$8 sps:$4 sm:$0xff]   ;;  %v2982_v60 = vld [vmem:[%s4054_s1 + $0x390] ss:$8 sps:$4 sm:$0xff]  }
  0xad   :  { %2097 = vmatprep.subr.bf16.mxu0 %v2899_v61  ;;  %v2985_v61 = vld [vmem:[%s4054_s1 + $0x790] ss:$8 sps:$4 sm:$0xff]  }
  0xaf   :  { %1934 = vmatpush1.bf16.msra.mxu1 %v2894_v62  ;;  %v2990_v62 = vld [vmem:[%s4054_s1 + $0x3a4] ss:$8 sps:$4 sm:$0xff]  }
  0xb0   :  { %2098 = vmatpush1.bf16.msra.mxu0 %v2897_v63  ;;  %1935 = vmatprep.subr.bf16.mxu1 %v2902_v0  ;;  %v2993_v63 = vld [vmem:[%s4054_s1 + $0x7a4] ss:$8 sps:$4 sm:$0xff]   ;;  %v2988_v0 = vld [vmem:[%s4054_s1 + $0x3a0] ss:$8 sps:$4 sm:$0xff]  }
  0xb1   :  { %2099 = vmatprep.subr.bf16.mxu0 %v2905_v1  ;;  %v2991_v1 = vld [vmem:[%s4054_s1 + $0x7a0] ss:$8 sps:$4 sm:$0xff]  }
  0xb3   :  { %1936 = vmatpush1.bf16.msra.mxu1 %v2900_v2  ;;  %v2996_v2 = vld [vmem:[%s4054_s1 + $0x3b4] ss:$8 sps:$4 sm:$0xff]  }
  0xb4   :  { %2100 = vmatpush1.bf16.msra.mxu0 %v2903_v3  ;;  %1937 = vmatprep.subr.bf16.mxu1 %v2908_v4  ;;  %v2999_v3 = vld [vmem:[%s4054_s1 + $0x7b4] ss:$8 sps:$4 sm:$0xff]   ;;  %v2994_v4 = vld [vmem:[%s4054_s1 + $0x3b0] ss:$8 sps:$4 sm:$0xff]  }
  0xb5   :  { %2101 = vmatprep.subr.bf16.mxu0 %v2911_v5  ;;  %v2997_v5 = vld [vmem:[%s4054_s1 + $0x7b0] ss:$8 sps:$4 sm:$0xff]  }
  0xb7   :  { %1938 = vmatpush1.bf16.msra.mxu1 %v2906_v6  ;;  %v3002_v6 = vld [vmem:[%s4054_s1 + $0x3c4] ss:$8 sps:$4 sm:$0xff]  }
  0xb8   :  { %2102 = vmatpush1.bf16.msra.mxu0 %v2909_v7  ;;  %1939 = vmatprep.subr.bf16.mxu1 %v2914_v8  ;;  %v3005_v7 = vld [vmem:[%s4054_s1 + $0x7c4] ss:$8 sps:$4 sm:$0xff]   ;;  %v3000_v8 = vld [vmem:[%s4054_s1 + $0x3c0] ss:$8 sps:$4 sm:$0xff]  }
  0xb9   :  { %2103 = vmatprep.subr.bf16.mxu0 %v2917_v9  ;;  %v3003_v9 = vld [vmem:[%s4054_s1 + $0x7c0] ss:$8 sps:$4 sm:$0xff]  }
  0xbb   :  { %1940 = vmatpush1.bf16.msra.mxu1 %v2912_v10  ;;  %v3008_v10 = vld [vmem:[%s4054_s1 + $0x3d4] ss:$8 sps:$4 sm:$0xff]  }
  0xbc   :  { %2104 = vmatpush1.bf16.msra.mxu0 %v2915_v11  ;;  %1941 = vmatprep.subr.bf16.mxu1 %v2920_v12  ;;  %v3011_v11 = vld [vmem:[%s4054_s1 + $0x7d4] ss:$8 sps:$4 sm:$0xff]   ;;  %v3006_v12 = vld [vmem:[%s4054_s1 + $0x3d0] ss:$8 sps:$4 sm:$0xff]  }
  0xbd   :  { %2105 = vmatprep.subr.bf16.mxu0 %v2923_v13  ;;  %v3009_v13 = vld [vmem:[%s4054_s1 + $0x7d0] ss:$8 sps:$4 sm:$0xff]  }
  0xbf   :  { %1942 = vmatpush1.bf16.msra.mxu1 %v2918_v14  ;;  %v3014_v14 = vld [vmem:[%s4054_s1 + $0x3e4] ss:$8 sps:$4 sm:$0xff]  }
  0xc0   :  { %2106 = vmatpush1.bf16.msra.mxu0 %v2921_v15  ;;  %1952 = vmatprep.subr.bf16.mxu1 %v2928_v16  ;;  %v3017_v15 = vld [vmem:[%s4054_s1 + $0x7e4] ss:$8 sps:$4 sm:$0xff]   ;;  %v3012_v16 = vld [vmem:[%s4054_s1 + $0x3e0] ss:$8 sps:$4 sm:$0xff]  }
  0xc1   :  { %2116 = vmatprep.subr.bf16.mxu0 %v2933_v17  ;;  %v3015_v17 = vld [vmem:[%s4054_s1 + $0x7e0] ss:$8 sps:$4 sm:$0xff]  }
  0xc2   :  { %1944 = vmatmul.mubr.bf16.vlgmr.msra.gmra.mrb[0].mxu1 %v2291_v22  ;;  %v3018_v22 = vld [vmem:[%s4054_s1 + $0x3f0] ss:$8 sps:$4 sm:$0xff]  }
  0xc3   :  { %2108 = vmatmul.mubr.bf16.vlgmr.msra.gmra.mrb[0].mxu0 %v2299_v23  ;;  %1953 = vmatpush1.bf16.msra.mxu1 %v2926_v19  ;;  %v3020_v19 = vld [vmem:[%s4054_s1 + $0x3f4] ss:$8 sps:$4 sm:$0xff]   ;;  %v3021_v23 = vld [vmem:[%s4054_s1 + $0x7f0] ss:$8 sps:$4 sm:$0xff]  }
  0xc4   :  { %2117 = vmatpush1.bf16.msra.mxu0 %v2931_v21  ;;  %1954 = vmatprep.subr.bf16.mxu1 %v2936_v26  ;;  %v3023_v21 = vld [vmem:[%s4054_s1 + $0x7f4] ss:$8 sps:$4 sm:$0xff]   ;;  %v3030_v26 = vld [vmem:[%s4054_s1 + $0x804] ss:$8 sps:$4 sm:$0xff]  }
  0xc5   :  { %2118 = vmatprep.subr.bf16.mxu0 %v2939_v18  ;;  %1984 = vmatprep.mubr.bf16.mxu1 %v2294_v20  ;;  %v3939_v18 = vld [vmem:[%s4055_s0 + $0x40] sm:$0xff]  ;;  %v2293_v20 = vcombine.low %v3742_v24, %v3742_v24  ;;  %v3031_v24 = vld [vmem:[%s4054_s1 + $0x810] ss:$8 sps:$4 sm:$0xff]  }
  0xc6   :  { %2148 = vmatprep.mubr.bf16.mxu0 %v2302_v27  ;;  %v2301_v27 = vcombine.low %v3747_v25, %v3747_v25  ;;  %v3036_v25 = vld [vmem:[%s4054_s1 + $0x824] ss:$8 sps:$4 sm:$0xff]  }
  0xc7   :  { %1955 = vmatpush1.bf16.msra.mxu1 %v2934_v28  ;;  %v3028_v28 = vld [vmem:[%s4054_s1 + $0x800] ss:$8 sps:$4 sm:$0xff]  }
  0xc8   :  { %2119 = vmatpush1.bf16.msra.mxu0 %v2937_v29  ;;  %1956 = vmatprep.subr.bf16.mxu1 %v2942_v30  ;;  %v2304_v29 = vcombine.high %v3939_v18, %v3939_v18  ;;  %v3033_v30 = vld [vmem:[%s4054_s1 + $0x814] ss:$8 sps:$4 sm:$0xff]  }
  0xc9   :  { %2120 = vmatprep.subr.bf16.mxu0 %v2945_v31  ;;  %v3034_v31 = vld [vmem:[%s4054_s1 + $0x820] ss:$8 sps:$4 sm:$0xff]  }
  0xcb   :  { %1957 = vmatpush1.bf16.msra.mxu1 %v2940_v32  ;;  %v3039_v32 = vld [vmem:[%s4054_s1 + $0x834] ss:$8 sps:$4 sm:$0xff]  }
  0xcc   :  { %2121 = vmatpush1.bf16.msra.mxu0 %v2943_v33  ;;  %1958 = vmatprep.subr.bf16.mxu1 %v2948_v34  ;;  %v3037_v33 = vld [vmem:[%s4054_s1 + $0x830] ss:$8 sps:$4 sm:$0xff]   ;;  %v3042_v34 = vld [vmem:[%s4054_s1 + $0x844] ss:$8 sps:$4 sm:$0xff]  }
  0xcd   :  { %2122 = vmatprep.subr.bf16.mxu0 %v2951_v35  ;;  %v3040_v35 = vld [vmem:[%s4054_s1 + $0x840] ss:$8 sps:$4 sm:$0xff]  }
  0xcf   :  { %1959 = vmatpush1.bf16.msra.mxu1 %v2946_v36  ;;  %v3045_v36 = vld [vmem:[%s4054_s1 + $0x854] ss:$8 sps:$4 sm:$0xff]  }
  0xd0   :  { %2123 = vmatpush1.bf16.msra.mxu0 %v2949_v37  ;;  %1960 = vmatprep.subr.bf16.mxu1 %v2954_v38  ;;  %v3043_v37 = vld [vmem:[%s4054_s1 + $0x850] ss:$8 sps:$4 sm:$0xff]   ;;  %v3048_v38 = vld [vmem:[%s4054_s1 + $0x864] ss:$8 sps:$4 sm:$0xff]  }
  0xd1   :  { %2124 = vmatprep.subr.bf16.mxu0 %v2957_v39  ;;  %v3046_v39 = vld [vmem:[%s4054_s1 + $0x860] ss:$8 sps:$4 sm:$0xff]  }
  0xd3   :  { %1961 = vmatpush1.bf16.msra.mxu1 %v2952_v40  ;;  %v3051_v40 = vld [vmem:[%s4054_s1 + $0x874] ss:$8 sps:$4 sm:$0xff]  }
  0xd4   :  { %2125 = vmatpush1.bf16.msra.mxu0 %v2955_v41  ;;  %1962 = vmatprep.subr.bf16.mxu1 %v2960_v42  ;;  %v3049_v41 = vld [vmem:[%s4054_s1 + $0x870] ss:$8 sps:$4 sm:$0xff]   ;;  %v3054_v42 = vld [vmem:[%s4054_s1 + $0x884] ss:$8 sps:$4 sm:$0xff]  }
  0xd5   :  { %2126 = vmatprep.subr.bf16.mxu0 %v2963_v43  ;;  %v3052_v43 = vld [vmem:[%s4054_s1 + $0x880] ss:$8 sps:$4 sm:$0xff]  }
  0xd7   :  { %1963 = vmatpush1.bf16.msra.mxu1 %v2958_v44  ;;  %v3057_v44 = vld [vmem:[%s4054_s1 + $0x894] ss:$8 sps:$4 sm:$0xff]  }
  0xd8   :  { %2127 = vmatpush1.bf16.msra.mxu0 %v2961_v45  ;;  %1964 = vmatprep.subr.bf16.mxu1 %v2966_v46  ;;  %v3055_v45 = vld [vmem:[%s4054_s1 + $0x890] ss:$8 sps:$4 sm:$0xff]   ;;  %v3060_v46 = vld [vmem:[%s4054_s1 + $0x8a4] ss:$8 sps:$4 sm:$0xff]  }
  0xd9   :  { %2128 = vmatprep.subr.bf16.mxu0 %v2969_v47  ;;  %v3058_v47 = vld [vmem:[%s4054_s1 + $0x8a0] ss:$8 sps:$4 sm:$0xff]  }
  0xdb   :  { %1965 = vmatpush1.bf16.msra.mxu1 %v2964_v48  ;;  %v3063_v48 = vld [vmem:[%s4054_s1 + $0x8b4] ss:$8 sps:$4 sm:$0xff]  }
  0xdc   :  { %2129 = vmatpush1.bf16.msra.mxu0 %v2967_v49  ;;  %1966 = vmatprep.subr.bf16.mxu1 %v2972_v50  ;;  %v3061_v49 = vld [vmem:[%s4054_s1 + $0x8b0] ss:$8 sps:$4 sm:$0xff]   ;;  %v3066_v50 = vld [vmem:[%s4054_s1 + $0x8c4] ss:$8 sps:$4 sm:$0xff]  }
  0xdd   :  { %2130 = vmatprep.subr.bf16.mxu0 %v2975_v51  ;;  %v3064_v51 = vld [vmem:[%s4054_s1 + $0x8c0] ss:$8 sps:$4 sm:$0xff]  }
  0xdf   :  { %1967 = vmatpush1.bf16.msra.mxu1 %v2970_v52  ;;  %v3069_v52 = vld [vmem:[%s4054_s1 + $0x8d4] ss:$8 sps:$4 sm:$0xff]  }
  0xe0   :  { %2131 = vmatpush1.bf16.msra.mxu0 %v2973_v53  ;;  %1968 = vmatprep.subr.bf16.mxu1 %v2978_v54  ;;  %v3067_v53 = vld [vmem:[%s4054_s1 + $0x8d0] ss:$8 sps:$4 sm:$0xff]   ;;  %v3072_v54 = vld [vmem:[%s4054_s1 + $0x8e4] ss:$8 sps:$4 sm:$0xff]  }
  0xe1   :  { %2132 = vmatprep.subr.bf16.mxu0 %v2981_v55  ;;  %v3070_v55 = vld [vmem:[%s4054_s1 + $0x8e0] ss:$8 sps:$4 sm:$0xff]  }
  0xe3   :  { %1969 = vmatpush1.bf16.msra.mxu1 %v2976_v56  ;;  %v3075_v56 = vld [vmem:[%s4054_s1 + $0x8f4] ss:$8 sps:$4 sm:$0xff]  }
  0xe4   :  { %2133 = vmatpush1.bf16.msra.mxu0 %v2979_v57  ;;  %1970 = vmatprep.subr.bf16.mxu1 %v2984_v58  ;;  %v3073_v57 = vld [vmem:[%s4054_s1 + $0x8f0] ss:$8 sps:$4 sm:$0xff]   ;;  %v2303_v58 = vcombine.low %v3939_v18, %v3939_v18 }
  0xe5   :  { %2134 = vmatprep.subr.bf16.mxu0 %v2987_v59 }
  0xe7   :  { %1971 = vmatpush1.bf16.msra.mxu1 %v2982_v60 }
  0xe8   :  { %2135 = vmatpush1.bf16.msra.mxu0 %v2985_v61  ;;  %1972 = vmatprep.subr.bf16.mxu1 %v2990_v62 }
  0xe9   :  { %2136 = vmatprep.subr.bf16.mxu0 %v2993_v63  ;;  %v316_v63 = vlaneseq }
  0xeb   :  { %1973 = vmatpush1.bf16.msra.mxu1 %v2988_v0  ;;  %v317_v0 = vshrl.u32 %v316_v63, 7  ;;  %vm2230_vm0 = vcmp.lt.s32.totalorder %v316_v63, 256 }
  0xec   :  { %2137 = vmatpush1.bf16.msra.mxu0 %v2991_v1  ;;  %1974 = vmatprep.subr.bf16.mxu1 %v2996_v2  ;;  %v314_v2 = vld [vmem:[%s4056_s2] sm:$0x3] }
  0xed   :  { %2138 = vmatprep.subr.bf16.mxu0 %v2999_v3  ;;  %v318_v1 = vsub.s32 0, %v317_v0  ;;  %v322_v3 = vsub.s32 1, %v317_v0 }
  0xef   :  { %1975 = vmatpush1.bf16.msra.mxu1 %v2994_v4  ;;  %v319_v4 = vrot.slane %v314_v2, %v318_v1 }
  0xf0   :  { %2139 = vmatpush1.bf16.msra.mxu0 %v2997_v5  ;;  %1976 = vmatprep.subr.bf16.mxu1 %v3002_v6  ;;  %v323_v5 = vrot.slane %v314_v2, %v322_v3 }
  0xf1   :  { %2140 = vmatprep.subr.bf16.mxu0 %v3005_v7 }
  0xf3   :  { %1977 = vmatpush1.bf16.msra.mxu1 %v3000_v8 }
  0xf4   :  { %2141 = vmatpush1.bf16.msra.mxu0 %v3003_v9  ;;  %1978 = vmatprep.subr.bf16.mxu1 %v3008_v10 }
  0xf5   :  { %2142 = vmatprep.subr.bf16.mxu0 %v3011_v11 }
  0xf7   :  { %1979 = vmatpush1.bf16.msra.mxu1 %v3006_v12 }
  0xf8   :  { %2143 = vmatpush1.bf16.msra.mxu0 %v3009_v13  ;;  %1980 = vmatprep.subr.bf16.mxu1 %v3014_v14 }
  0xf9   :  { %2144 = vmatprep.subr.bf16.mxu0 %v3017_v15 }
  0xfb   :  { %1981 = vmatpush1.bf16.msra.mxu1 %v3012_v16 }
  0xfc   :  { %2145 = vmatpush1.bf16.msra.mxu0 %v3015_v17  ;;  %1982 = vmatprep.subr.bf16.mxu1 %v3020_v19 }
  0xfd   :  { %2146 = vmatprep.subr.bf16.mxu0 %v3023_v21 }
  0xff   :  { %1983 = vmatpush1.bf16.msra.mxu1 %v3018_v22 }
 0x100   :  { %2147 = vmatpush1.bf16.msra.mxu0 %v3021_v23  ;;  %v3078_v23 = vmov 1966171168  }
 0x101   :  { %2157 = vmatprep.subr.bf16.mxu0 %v3030_v26  ;;  %v2214_v26 = vunpack.c.l.s4 %v3078_v23 }
 0x102   :  { %1985 = vmatmul.mubr.bf16.vlgmr.msra.gmra.mrb[0].mxu1 %v2293_v20 }
 0x103   :  { %2149 = vmatmul.mubr.bf16.vlgmr.msra.gmra.mrb[0].mxu0 %v2301_v27 }
 0x104   :  { %2158 = vmatpush1.bf16.msra.mxu0 %v3028_v28  ;;  %2189 = vmatprep.mubr.bf16.mxu0 %v2304_v29 }
 0x105   :  { %2159 = vmatprep.subr.bf16.mxu0 %v3033_v30 }
 0x108   :  { %2160 = vmatpush1.bf16.msra.mxu0 %v3031_v24 }
 0x109   :  { %2161 = vmatprep.subr.bf16.mxu0 %v3036_v25 }
 0x10c   :  { %2162 = vmatpush1.bf16.msra.mxu0 %v3034_v31  ;;  %v2215_v31 = vunpack.c.0.s8 %v2214_v26 }
 0x10d   :  { %2163 = vmatprep.subr.bf16.mxu0 %v3039_v32 }
 0x110   :  { %2164 = vmatpush1.bf16.msra.mxu0 %v3037_v33 }
 0x111   :  { %2165 = vmatprep.subr.bf16.mxu0 %v3042_v34 }
 0x114   :  { %2166 = vmatpush1.bf16.msra.mxu0 %v3040_v35 }
 0x115   :  { %2167 = vmatprep.subr.bf16.mxu0 %v3045_v36 }
 0x118   :  { %2168 = vmatpush1.bf16.msra.mxu0 %v3043_v37 }
 0x119   :  { %2169 = vmatprep.subr.bf16.mxu0 %v3048_v38 }
 0x11c   :  { %2170 = vmatpush1.bf16.msra.mxu0 %v3046_v39 }
 0x11d   :  { %2171 = vmatprep.subr.bf16.mxu0 %v3051_v40  ;;  %v2218_v40 = vsub.s32 %v2215_v31, %v317_v0 }
 0x120   :  { %2172 = vmatpush1.bf16.msra.mxu0 %v3049_v41 }
 0x121   :  { %2173 = vmatprep.subr.bf16.mxu0 %v3054_v42 }
 0x124   :  { %2174 = vmatpush1.bf16.msra.mxu0 %v3052_v43 }
 0x125   :  { %2175 = vmatprep.subr.bf16.mxu0 %v3057_v44 }
 0x128   :  { %2176 = vmatpush1.bf16.msra.mxu0 %v3055_v45 }
 0x129   :  { %2177 = vmatprep.subr.bf16.mxu0 %v3060_v46 }
 0x12c   :  { %2178 = vmatpush1.bf16.msra.mxu0 %v3058_v47 }
 0x12d   :  { %2179 = vmatprep.subr.bf16.mxu0 %v3063_v48 }
 0x130   :  { %2180 = vmatpush1.bf16.msra.mxu0 %v3061_v49 }
 0x131   :  { %2181 = vmatprep.subr.bf16.mxu0 %v3066_v50 }
 0x134   :  { %2182 = vmatpush1.bf16.msra.mxu0 %v3064_v51 }
 0x135   :  { %2183 = vmatprep.subr.bf16.mxu0 %v3069_v52 }
 0x138   :  { %2184 = vmatpush1.bf16.msra.mxu0 %v3067_v53 }
 0x139   :  { %2185 = vmatprep.subr.bf16.mxu0 %v3072_v54 }
 0x13c   :  { %2186 = vmatpush1.bf16.msra.mxu0 %v3070_v55 }
 0x13d   :  { %2187 = vmatprep.subr.bf16.mxu0 %v3075_v56 }
 0x140   :  { %2188 = vmatpush1.bf16.msra.mxu0 %v3073_v57 }
 0x143   :  { %2190 = vmatmul.mubr.bf16.vlgmr.msra.gmra.mrb[0].mxu0 %v2303_v58 }
 0x1d5   :  { %v1986_v59 = vpop.f32.mrb[0].mxu1 }
 0x1d6   :  { %v1988_v60 = vpop.f32.mrb[1].mxu1  ;;  %v2595_v6 = vadd.f32 %v1986_v59, %v319_v4 }
 0x1d7   :  { %v1990_v61 = vpop.f32.mrb[2].mxu1  ;;  %v2597_v7 = vadd.f32 %v1988_v60, %v323_v5 }
 0x1d8   :  { %v1991_v62 = vpop.f32.mrb[3].mxu1 }
 0x216   :  { %v2191_v8 = vpop.f32.mrb[0].mxu0 }
 0x217   :  { %v2596_v9 = vadd.f32 %v2595_v6, %v2191_v8  ;;  %v2193_v10 = vpop.f32.mrb[1].mxu0 }
 0x218   :  { %v2598_v11 = vadd.f32 %v2597_v7, %v2193_v10  ;;  %v2195_v12 = vpop.f32.mrb[2].mxu0 }
 0x219   :  { %v2198_v13 = vrot.slane %v2596_v9, 4  ;;  %v2233_v14 = vmul.f32 %v2596_v9, %v2596_v9  ;;  %v2196_v15 = vpop.f32.mrb[3].mxu0 }
 0x21a   :  { %v2204_v16 = vrot.slane %v2598_v11, 4  ;;  %v2234_v17 = vmul.f32 %v2598_v11, %v2598_v11  ;;  %v2594_v19 = vpack.c.bf16 %v2598_v11, %v2596_v9 }
 0x21b   :  { %v2199_v21 = vadd.f32 %v2596_v9, %v2198_v13  ;;  %v2235_v22 = vrot.slane %v2233_v14, 4 }
 0x21c   :  { %v2205_v18 = vadd.f32 %v2598_v11, %v2204_v16  ;;  %v2241_v20 = vrot.slane %v2234_v17, 4  ;;  %2274 = vst [vmem:[%s4057_s3] sm:$0xff] %v2594_v19 }
 0x21d   :  { %v2200_v27 = vrot.slane %v2199_v21, 2  ;;  %v2236_v28 = vadd.f32 %v2235_v22, %v2233_v14 }
 0x21e   :  { %v2206_v29 = vrot.slane %v2205_v18, 2  ;;  %v2242_v30 = vadd.f32 %v2241_v20, %v2234_v17 }
 0x21f   :  { %v2201_v24 = vadd.f32 %v2200_v27, %v2199_v21  ;;  %v2237_v25 = vrot.slane %v2236_v28, 2 }
 0x220   :  { %v2207_v32 = vadd.f32 %v2206_v29, %v2205_v18  ;;  %v2243_v33 = vrot.slane %v2242_v30, 2 }
 0x221   :  { %v2202_v34 = vrot.slane %v2201_v24, 1  ;;  %v2238_v35 = vadd.f32 %v2237_v25, %v2236_v28 }
 0x222   :  { %v2208_v36 = vrot.slane %v2207_v32, 1  ;;  %v2244_v37 = vadd.f32 %v2243_v33, %v2242_v30 }
 0x223   :  { %v2203_v38 = vadd.f32 %v2202_v34, %v2201_v24  ;;  %v2239_v39 = vrot.slane %v2238_v35, 1 }
 0x224   :  { %v2209_v41 = vadd.f32 %v2208_v36, %v2207_v32  ;;  %v2245_v42 = vrot.slane %v2244_v37, 1 }
 0x225   :  { %v2240_v43 = vadd.f32 %v2239_v39, %v2238_v35 }
 0x226   :  { %v2212_v44 = vcombine.low %v2203_v38, %v2209_v41  ;;  %v2246_v45 = vadd.f32 %v2245_v42, %v2244_v37 }
 0x228   :  { %v2219_v46 = vrot.slane %v2212_v44, %v2218_v40  ;;  %v2249_v47 = vcombine.low %v2240_v43, %v2246_v45 }
 0x22a   :  { %v2226_v48 = vrot.slane %v2219_v46, %v2218_v40  ;;  %v2256_v49 = vrot.slane %v2249_v47, %v2218_v40 }
 0x22c   :  { %2232 = vst.msk [vmem:[%s4058_s4] sm:$0x3] %vm2230_vm0, %v2226_v48  ;;  %v2263_v50 = vrot.slane %v2256_v49, %v2218_v40 }
 0x22e   :  { %2265 = vst.msk [vmem:[%s4059_s5] sm:$0x3] %vm2230_vm0, %v2263_v50 }

// kernel: tile.38
= control target key start
LH: loop header
LB: loop body
LE: loop exit
PB: predicated region body
PF: predicated region fallthrough
CT: control target
= control target key end

     0   :  { %s22_s0 = inlined_call_operand.vmem [shape: f32[32], index: 0, kind: input, shape index: {}]   ;;  %s23_s1 = inlined_call_operand.vmem [shape: f32[4,32], index: 1, kind: output, shape index: {}]  }
   0x1   :  { %v4_v0 = vld [vmem:[%s22_s0] ss:$0 sm:$0xff] }
   0x2   :  { %5 = vst [vmem:[%s23_s1] sm:$0xf] %v4_v0 }

// kernel: tile.39
= control target key start
LH: loop header
LB: loop body
LE: loop exit
PB: predicated region body
PF: predicated region fallthrough
CT: control target
= control target key end

     0   :  { %vm7_vm0 = vcmask 261120   ;;  %s37_s8 = smov 32   ;;  %s38_s9 = smov 64   ;;  %vm13_vm1 = vcmask 1048320   ;;  %vm19_vm2 = vcmask 785920   ;;  %vm25_vm3 = vcmask 523520   ;;  %s55_s0 = inlined_call_operand.vmem [shape: f32[4,32], index: 0, kind: input, shape index: {}]   ;;  %s56_s1 = inlined_call_operand.vmem [shape: f32[1,128], index: 1, kind: output, shape index: {}]  }
   0x1   :  { %v4_v0 = vld [vmem:[%s55_s0] sm:$0xf]  ;;  %s36_s0 = smov 96  }
   0x2   :  { %5 = vst [vmem:[#allocation1] sm:$0xf] %v4_v0 }
   0x9   :  { %v10_v1 = vld [vmem:[#allocation1 + $0x3] sm:$0x1]   ;;  %v22_v2 = vld [vmem:[#allocation1 + $0x1] sm:$0x1]   ;;  %v6_v3 = vld [vmem:[#allocation1] sm:$0x1]  }
   0xa   :  { %11 = vrot.lane.b32.xlu0 %v10_v1, %s36_s0  ;;  %23 = vrot.lane.b32.xlu1 %v22_v2, %s37_s8  ;;  %v16_v4 = vld [vmem:[#allocation1 + $0x2] sm:$0x1]   ;;  %8 = vst.msk [vmem:[#allocation0] sm:$0x1] %vm7_vm0, %v6_v3  }
   0xe   :  { %17 = vrot.lane.b32.xlu0 %v16_v4, %s38_s9 }
  0x7c   :  { %v12_v5 = vpop.permute.xlu0 %11   ;;  %v24_v6 = vpop.permute.xlu1 %23  }
  0x7d   :  { %14 = vst.msk [vmem:[#allocation0] sm:$0x1] %vm13_vm1, %v12_v5  }
  0x80   :  { %v18_v7 = vpop.permute.xlu0 %17  }
  0x81   :  { %20 = vst.msk [vmem:[#allocation0] sm:$0x1] %vm19_vm2, %v18_v7  }
  0x82   :  { %26 = vst.msk [vmem:[#allocation0] sm:$0x1] %vm25_vm3, %v24_v6  }
  0x89   :  { %v30_v8 = vld [vmem:[#allocation0] sm:$0x1] }
  0x8a   :  { %32 = vst [vmem:[%s56_s1] sm:$0x1] %v30_v8 }

// kernel: pix2pix_forward.17
= control target key start
LH: loop header
LB: loop body
LE: loop exit
PB: predicated region body
PF: predicated region fallthrough
CT: control target
= control target key end

     0   :  { %s1679_s1 = inlined_call_operand.vmem [shape: bf16[1152,128], index: 1, kind: input, shape index: {}]   ;;  %s1680_s0 = inlined_call_operand.vmem [shape: bf16[32,1152], index: 0, kind: input, shape index: {}]   ;;  %s1681_s2 = inlined_call_operand.vmem [shape: f32[1,128], index: 2, kind: input, shape index: {}]   ;;  %s1682_s3 = inlined_call_operand.vmem [shape: bf16[32,128], index: 3, kind: output, shape index: {0}]   ;;  %s1683_s4 = inlined_call_operand.vmem [shape: f32[1,128], index: 4, kind: output, shape index: {1}]   ;;  %s1684_s5 = inlined_call_operand.vmem [shape: f32[1,128], index: 5, kind: output, shape index: {2}]  }
   0x1   :  { %v1266_v0 = vld [vmem:[%s1679_s1 + $0x40] sm:$0xff]   ;;  %v1270_v4 = vld [vmem:[%s1679_s1 + $0x48] sm:$0xff]   ;;  %v1274_v8 = vld [vmem:[%s1679_s1 + $0x50] sm:$0xff]  }
   0x2   :  { %v1267_v1 = vld [vmem:[%s1679_s1] sm:$0xff]   ;;  %1124 = vmatprep.subr.bf16.mxu0 %v1266_v0  ;;  %v1271_v5 = vld [vmem:[%s1679_s1 + $0x8] sm:$0xff]   ;;  %v1275_v9 = vld [vmem:[%s1679_s1 + $0x10] sm:$0xff]  }
   0x3   :  { %v1268_v2 = vld [vmem:[%s1679_s1 + $0xc0] sm:$0xff]   ;;  %1125 = vmatpush3.bf16.msra.mxu0 %v1267_v1  ;;  %v1272_v6 = vld [vmem:[%s1679_s1 + $0xc8] sm:$0xff]   ;;  %v1276_v10 = vld [vmem:[%s1679_s1 + $0xd0] sm:$0xff]  }
   0x4   :  { %v1269_v3 = vld [vmem:[%s1679_s1 + $0x80] sm:$0xff]   ;;  %1152 = vmatprep.subr.bf16.mxu1 %v1268_v2  ;;  %1126 = vmatprep.subr.bf16.mxu0 %v1270_v4  ;;  %v1273_v7 = vld [vmem:[%s1679_s1 + $0x88] sm:$0xff]   ;;  %v1277_v11 = vld [vmem:[%s1679_s1 + $0x90] sm:$0xff]  }
   0x5   :  { %1153 = vmatpush3.bf16.msra.mxu1 %v1269_v3  ;;  %v1278_v12 = vld [vmem:[%s1679_s1 + $0x58] sm:$0xff]   ;;  %v1282_v16 = vld [vmem:[%s1679_s1 + $0x60] sm:$0xff]   ;;  %v1286_v20 = vld [vmem:[%s1679_s1 + $0x68] sm:$0xff]  }
   0x6   :  { %1154 = vmatprep.subr.bf16.mxu1 %v1272_v6  ;;  %v1279_v13 = vld [vmem:[%s1679_s1 + $0x18] sm:$0xff]   ;;  %v1283_v17 = vld [vmem:[%s1679_s1 + $0x20] sm:$0xff]   ;;  %v1287_v21 = vld [vmem:[%s1679_s1 + $0x28] sm:$0xff]  }
   0x7   :  { %1127 = vmatpush3.bf16.msra.mxu0 %v1271_v5  ;;  %v1280_v14 = vld [vmem:[%s1679_s1 + $0xd8] sm:$0xff]   ;;  %v1284_v18 = vld [vmem:[%s1679_s1 + $0xe0] sm:$0xff]   ;;  %v1288_v22 = vld [vmem:[%s1679_s1 + $0xe8] sm:$0xff]  }
   0x8   :  { %1128 = vmatprep.subr.bf16.mxu0 %v1274_v8  ;;  %v1281_v15 = vld [vmem:[%s1679_s1 + $0x98] sm:$0xff]   ;;  %v1285_v19 = vld [vmem:[%s1679_s1 + $0xa0] sm:$0xff]   ;;  %v1289_v23 = vld [vmem:[%s1679_s1 + $0xa8] sm:$0xff]  }
   0x9   :  { %1155 = vmatpush3.bf16.msra.mxu1 %v1273_v7  ;;  %v1290_v24 = vld [vmem:[%s1679_s1 + $0x70] sm:$0xff]   ;;  %v1294_v28 = vld [vmem:[%s1679_s1 + $0x78] sm:$0xff]   ;;  %v1297_v31 = vld [vmem:[%s1680_s0] ss:$36 sps:$4 sm:$0xff]  }
   0xa   :  { %1156 = vmatprep.subr.bf16.mxu1 %v1276_v10  ;;  %v1291_v25 = vld [vmem:[%s1679_s1 + $0x30] sm:$0xff]   ;;  %v1295_v29 = vld [vmem:[%s1679_s1 + $0x38] sm:$0xff]   ;;  %v1299_v32 = vld [vmem:[%s1680_s0 + $0x4] ss:$36 sps:$4 sm:$0xff]  }
   0xb   :  { %1129 = vmatpush3.bf16.msra.mxu0 %v1275_v9  ;;  %v1292_v26 = vld [vmem:[%s1679_s1 + $0xf0] sm:$0xff]   ;;  %v1296_v30 = vld [vmem:[%s1679_s1 + $0xf8] sm:$0xff]   ;;  %745 = vmatprep.mubr.bf16.mxu0 %v1299_v32  ;;  %v1301_v34 = vld [vmem:[%s1679_s1 + $0x140] sm:$0xff]  }
   0xc   :  { %1130 = vmatprep.subr.bf16.mxu0 %v1278_v12  ;;  %v1293_v27 = vld [vmem:[%s1679_s1 + $0xb0] sm:$0xff]   ;;  %v1300_v33 = vld [vmem:[%s1679_s1 + $0xb8] sm:$0xff]   ;;  %v1302_v35 = vld [vmem:[%s1680_s0 + $0x8] ss:$36 sps:$4 sm:$0xff]  }
   0xd   :  { %1157 = vmatpush3.bf16.msra.mxu1 %v1277_v11  ;;  %v1304_v36 = vld [vmem:[%s1680_s0 + $0xc] ss:$36 sps:$4 sm:$0xff]   ;;  %v1305_v37 = vld [vmem:[%s1679_s1 + $0x100] sm:$0xff]   ;;  %v1316_v48 = vld [vmem:[%s1679_s1 + $0x158] sm:$0xff]  }
   0xe   :  { %1158 = vmatprep.subr.bf16.mxu1 %v1280_v14  ;;  %794 = vmatprep.mubr.bf16.mxu1 %v1304_v36  ;;  %v1306_v38 = vld [vmem:[%s1679_s1 + $0x1c0] sm:$0xff]   ;;  %v1308_v40 = vld [vmem:[%s1679_s1 + $0x148] sm:$0xff]   ;;  %v1312_v44 = vld [vmem:[%s1679_s1 + $0x150] sm:$0xff]  }
   0xf   :  { %1131 = vmatpush3.bf16.msra.mxu0 %v1279_v13  ;;  %v1307_v39 = vld [vmem:[%s1679_s1 + $0x180] sm:$0xff]   ;;  %v1309_v41 = vld [vmem:[%s1679_s1 + $0x108] sm:$0xff]   ;;  %v1313_v45 = vld [vmem:[%s1679_s1 + $0x110] sm:$0xff]  }
  0x10   :  { %1132 = vmatprep.subr.bf16.mxu0 %v1282_v16  ;;  %v1310_v42 = vld [vmem:[%s1679_s1 + $0x1c8] sm:$0xff]   ;;  %v1314_v46 = vld [vmem:[%s1679_s1 + $0x1d0] sm:$0xff]   ;;  %v1317_v49 = vld [vmem:[%s1679_s1 + $0x118] sm:$0xff]  }
  0x11   :  { %1159 = vmatpush3.bf16.msra.mxu1 %v1281_v15  ;;  %v1311_v43 = vld [vmem:[%s1679_s1 + $0x188] sm:$0xff]   ;;  %v1315_v47 = vld [vmem:[%s1679_s1 + $0x190] sm:$0xff]   ;;  %v1318_v50 = vld [vmem:[%s1679_s1 + $0x1d8] sm:$0xff]  }
  0x12   :  { %1160 = vmatprep.subr.bf16.mxu1 %v1284_v18  ;;  %v1319_v51 = vld [vmem:[%s1679_s1 + $0x198] sm:$0xff]   ;;  %v1320_v52 = vld [vmem:[%s1679_s1 + $0x160] sm:$0xff]   ;;  %v1324_v56 = vld [vmem:[%s1679_s1 + $0x168] sm:$0xff]  }
  0x13   :  { %1133 = vmatpush3.bf16.msra.mxu0 %v1283_v17  ;;  %v1321_v53 = vld [vmem:[%s1679_s1 + $0x120] sm:$0xff]   ;;  %v1325_v57 = vld [vmem:[%s1680_s0 + $0x4c] ss:$36 sps:$4 sm:$0xff]   ;;  %v1330_v61 = vld [vmem:[%s1680_s0 + $0x54] ss:$36 sps:$4 sm:$0xff]  }
  0x14   :  { %1134 = vmatprep.subr.bf16.mxu0 %v1286_v20  ;;  %v1322_v54 = vld [vmem:[%s1679_s1 + $0x1e0] sm:$0xff]   ;;  %v1327_v58 = vld [vmem:[%s1679_s1 + $0x128] sm:$0xff]   ;;  %v1333_v63 = vld [vmem:[%s1680_s0 + $0x50] ss:$36 sps:$4 sm:$0xff]  }
  0x15   :  { %1161 = vmatpush3.bf16.msra.mxu1 %v1285_v19  ;;  %v1323_v55 = vld [vmem:[%s1679_s1 + $0x1a0] sm:$0xff]   ;;  %v1328_v59 = vld [vmem:[%s1680_s0 + $0x48] ss:$36 sps:$4 sm:$0xff]   ;;  %v1334_v0 = vld [vmem:[%s1679_s1 + $0x170] sm:$0xff]  }
  0x16   :  { %1162 = vmatprep.subr.bf16.mxu1 %v1288_v22  ;;  %v1329_v60 = vld [vmem:[%s1679_s1 + $0x1e8] sm:$0xff]   ;;  %v1335_v1 = vld [vmem:[%s1679_s1 + $0x130] sm:$0xff]   ;;  %v1338_v4 = vld [vmem:[%s1679_s1 + $0x178] sm:$0xff]  }
  0x17   :  { %1135 = vmatpush3.bf16.msra.mxu0 %v1287_v21  ;;  %v1332_v62 = vld [vmem:[%s1679_s1 + $0x1a8] sm:$0xff]   ;;  %v1336_v2 = vld [vmem:[%s1679_s1 + $0x1f0] sm:$0xff]   ;;  %v1339_v5 = vld [vmem:[%s1679_s1 + $0x138] sm:$0xff]  }
  0x18   :  { %1136 = vmatprep.subr.bf16.mxu0 %v1290_v24  ;;  %v1337_v3 = vld [vmem:[%s1679_s1 + $0x1b0] sm:$0xff]   ;;  %v1340_v6 = vld [vmem:[%s1679_s1 + $0x1f8] sm:$0xff]   ;;  %v1345_v10 = vld [vmem:[%s1679_s1 + $0x200] sm:$0xff]  }
  0x19   :  { %1163 = vmatpush3.bf16.msra.mxu1 %v1289_v23  ;;  %v1341_v7 = vld [vmem:[%s1680_s0 + $0x10] ss:$36 sps:$4 sm:$0xff]   ;;  %v1344_v9 = vld [vmem:[%s1679_s1 + $0x1b8] sm:$0xff]   ;;  %v1349_v13 = vld [vmem:[%s1679_s1 + $0x208] sm:$0xff]  }
  0x1a   :  { %1164 = vmatprep.subr.bf16.mxu1 %v1292_v26  ;;  %v1343_v8 = vld [vmem:[%s1680_s0 + $0x14] ss:$36 sps:$4 sm:$0xff]   ;;  %v1348_v12 = vld [vmem:[%s1680_s0 + $0x1c] ss:$36 sps:$4 sm:$0xff]   ;;  %v1354_v17 = vld [vmem:[%s1680_s0 + $0x64] ss:$36 sps:$4 sm:$0xff]  }
  0x1b   :  { %1137 = vmatpush3.bf16.msra.mxu0 %v1291_v25  ;;  %v1346_v11 = vld [vmem:[%s1680_s0 + $0x18] ss:$36 sps:$4 sm:$0xff]   ;;  %v1353_v16 = vld [vmem:[%s1679_s1 + $0x210] sm:$0xff]   ;;  %v1356_v18 = vld [vmem:[%s1680_s0 + $0x60] ss:$36 sps:$4 sm:$0xff]  }
  0x1c   :  { %1138 = vmatprep.subr.bf16.mxu0 %v1294_v28  ;;  %v1350_v14 = vld [vmem:[%s1680_s0 + $0x5c] ss:$36 sps:$4 sm:$0xff]   ;;  %v1359_v22 = vld [vmem:[%s1679_s1 + $0x228] sm:$0xff]   ;;  %v1360_v23 = vld [vmem:[%s1679_s1 + $0x230] sm:$0xff]  }
  0x1d   :  { %1165 = vmatpush3.bf16.msra.mxu1 %v1293_v27  ;;  %v1352_v15 = vld [vmem:[%s1680_s0 + $0x58] ss:$36 sps:$4 sm:$0xff]   ;;  %v1358_v20 = vld [vmem:[%s1679_s1 + $0x220] sm:$0xff]   ;;  %v1363_v25 = vld [vmem:[%s1680_s0 + $0x68] ss:$36 sps:$4 sm:$0xff]  }
  0x1e   :  { %1166 = vmatprep.subr.bf16.mxu1 %v1296_v30  ;;  %v1357_v19 = vld [vmem:[%s1679_s1 + $0x218] sm:$0xff]   ;;  %v1362_v21 = vld [vmem:[%s1680_s0 + $0x20] ss:$36 sps:$4 sm:$0xff]  }
  0x1f   :  { %1139 = vmatpush3.bf16.msra.mxu0 %v1295_v29  ;;  %v1361_v24 = vld [vmem:[%s1679_s1 + $0x238] sm:$0xff]   ;;  %v1014_v27 = vld [vmem:[%s1681_s2] ss:$0 sm:$0xff] }
  0x20   :  { %1180 = vmatprep.subr.bf16.mxu0 %v1301_v34 }
  0x21   :  { %1167 = vmatpush3.bf16.msra.mxu1 %v1300_v33 }
  0x22   :  { %746 = vmatmul.mubr.bf16.vlgmr.msra.gmra.mrb[0].mxu0 %v1297_v31  ;;  %1208 = vmatprep.subr.bf16.mxu1 %v1306_v38 }
  0x23   :  { %1181 = vmatpush3.bf16.msra.mxu0 %v1305_v37  ;;  %753 = vmatprep.mubr.bf16.mxu0 %v1325_v57 }
  0x24   :  { %795 = vmatmul.mubr.bf16.vlgmr.msra.gmra.mrb[0].mxu1 %v1302_v35  ;;  %1182 = vmatprep.subr.bf16.mxu0 %v1308_v40 }
  0x25   :  { %1209 = vmatpush3.bf16.msra.mxu1 %v1307_v39  ;;  %802 = vmatprep.mubr.bf16.mxu1 %v1330_v61 }
  0x26   :  { %1210 = vmatprep.subr.bf16.mxu1 %v1310_v42 }
  0x27   :  { %1183 = vmatpush3.bf16.msra.mxu0 %v1309_v41 }
  0x28   :  { %1184 = vmatprep.subr.bf16.mxu0 %v1312_v44 }
  0x29   :  { %1211 = vmatpush3.bf16.msra.mxu1 %v1311_v43 }
  0x2a   :  { %1212 = vmatprep.subr.bf16.mxu1 %v1314_v46  ;;  %754 = vmatmul.mubr.bf16.gmra.mrb[4].mxu0 %v1328_v59 }
  0x2b   :  { %1185 = vmatpush3.bf16.msra.mxu0 %v1313_v45  ;;  %843 = vmatprep.mubr.bf16.mxu0 %v1343_v8 }
  0x2c   :  { %1186 = vmatprep.subr.bf16.mxu0 %v1316_v48  ;;  %803 = vmatmul.mubr.bf16.gmra.mrb[4].mxu1 %v1333_v63 }
  0x2d   :  { %1213 = vmatpush3.bf16.msra.mxu1 %v1315_v47  ;;  %892 = vmatprep.mubr.bf16.mxu1 %v1348_v12 }
  0x2e   :  { %1214 = vmatprep.subr.bf16.mxu1 %v1318_v50 }
  0x2f   :  { %1187 = vmatpush3.bf16.msra.mxu0 %v1317_v49 }
  0x30   :  { %1188 = vmatprep.subr.bf16.mxu0 %v1320_v52 }
  0x31   :  { %1215 = vmatpush3.bf16.msra.mxu1 %v1319_v51 }
  0x32   :  { %1216 = vmatprep.subr.bf16.mxu1 %v1322_v54 }
  0x33   :  { %1189 = vmatpush3.bf16.msra.mxu0 %v1321_v53 }
  0x34   :  { %1190 = vmatprep.subr.bf16.mxu0 %v1324_v56 }
  0x35   :  { %1217 = vmatpush3.bf16.msra.mxu1 %v1323_v55 }
  0x36   :  { %1218 = vmatprep.subr.bf16.mxu1 %v1329_v60 }
  0x37   :  { %1191 = vmatpush3.bf16.msra.mxu0 %v1327_v58 }
  0x38   :  { %1192 = vmatprep.subr.bf16.mxu0 %v1334_v0 }
  0x39   :  { %1219 = vmatpush3.bf16.msra.mxu1 %v1332_v62 }
  0x3a   :  { %1220 = vmatprep.subr.bf16.mxu1 %v1336_v2 }
  0x3b   :  { %1193 = vmatpush3.bf16.msra.mxu0 %v1335_v1 }
  0x3c   :  { %1194 = vmatprep.subr.bf16.mxu0 %v1338_v4 }
  0x3d   :  { %1221 = vmatpush3.bf16.msra.mxu1 %v1337_v3 }
  0x3e   :  { %1222 = vmatprep.subr.bf16.mxu1 %v1340_v6 }
  0x3f   :  { %1195 = vmatpush3.bf16.msra.mxu0 %v1339_v5 }
  0x40   :  { %1246 = vmatprep.subr.bf16.mxu0 %v1345_v10 }
  0x41   :  { %1223 = vmatpush3.bf16.msra.mxu1 %v1344_v9 }
  0x42   :  { %844 = vmatmul.mubr.bf16.vlgmr.msra.gmra.mrb[8].mxu0 %v1341_v7 }
  0x43   :  { %1247 = vmatpush3.bf16.msra.mxu0 %v1345_v10  ;;  %851 = vmatprep.mubr.bf16.mxu0 %v1350_v14 }
  0x44   :  { %893 = vmatmul.mubr.bf16.vlgmr.msra.gmra.mrb[8].mxu1 %v1346_v11  ;;  %1248 = vmatprep.subr.bf16.mxu0 %v1349_v13 }
  0x45   :  { %900 = vmatprep.mubr.bf16.mxu1 %v1354_v17 }
  0x47   :  { %1249 = vmatpush3.bf16.msra.mxu0 %v1349_v13 }
  0x48   :  { %1250 = vmatprep.subr.bf16.mxu0 %v1353_v16 }
  0x4a   :  { %852 = vmatmul.mubr.bf16.gmra.mrb[12].mxu0 %v1352_v15 }
  0x4b   :  { %1251 = vmatpush3.bf16.msra.mxu0 %v1353_v16  ;;  %1262 = vmatprep.mubr.bf16.mxu0 %v1362_v21 }
  0x4c   :  { %901 = vmatmul.mubr.bf16.gmra.mrb[12].mxu1 %v1356_v18  ;;  %1252 = vmatprep.subr.bf16.mxu0 %v1357_v19 }
  0x4f   :  { %1253 = vmatpush3.bf16.msra.mxu0 %v1357_v19 }
  0x50   :  { %1254 = vmatprep.subr.bf16.mxu0 %v1358_v20 }
  0x53   :  { %1255 = vmatpush3.bf16.msra.mxu0 %v1358_v20 }
  0x54   :  { %1256 = vmatprep.subr.bf16.mxu0 %v1359_v22 }
  0x57   :  { %1257 = vmatpush3.bf16.msra.mxu0 %v1359_v22 }
  0x58   :  { %1258 = vmatprep.subr.bf16.mxu0 %v1360_v23 }
  0x5b   :  { %1259 = vmatpush3.bf16.msra.mxu0 %v1360_v23 }
  0x5c   :  { %1260 = vmatprep.subr.bf16.mxu0 %v1361_v24 }
  0x5f   :  { %1261 = vmatpush3.bf16.msra.mxu0 %v1361_v24 }
  0x62   :  { %1263 = vmatmul.mubr.bf16.vlgmr.msra.gmra.mrb[16].mxu0 %v1363_v25 }
  0xf5   :  { %v1140_v26 = vpop.f32.mrb[0].mxu0 }
  0xf6   :  { %v1141_v28 = vpop.f32.mrb[1].mxu0 }
  0xf7   :  { %v1142_v29 = vadd.f32 %v1141_v28, %v1140_v26  ;;  %v1143_v30 = vpop.f32.mrb[2].mxu0  ;;  %v1168_v31 = vpop.f32.mrb[0].mxu1 }
  0xf8   :  { %v1144_v32 = vpop.f32.mrb[3].mxu0  ;;  %v1169_v35 = vpop.f32.mrb[1].mxu1 }
  0xf9   :  { %v748_v33 = vadd.f32 %v1142_v29, %v1014_v27  ;;  %v1145_v34 = vadd.f32 %v1144_v32, %v1143_v30  ;;  %v1170_v36 = vadd.f32 %v1169_v35, %v1168_v31  ;;  %v1171_v37 = vpop.f32.mrb[2].mxu1 }
  0xfa   :  { %v1172_v39 = vpop.f32.mrb[3].mxu1 }
  0xfb   :  { %v751_v38 = vadd.f32 %v1145_v34, %v1014_v27  ;;  %v797_v40 = vadd.f32 %v1170_v36, %v748_v33  ;;  %v1173_v41 = vadd.f32 %v1172_v39, %v1171_v37 }
  0xfd   :  { %v800_v42 = vadd.f32 %v1173_v41, %v751_v38  ;;  %v1146_v43 = vpop.f32.mrb[4].mxu0 }
  0xfe   :  { %v1147_v44 = vpop.f32.mrb[5].mxu0 }
  0xff   :  { %v1148_v45 = vadd.f32 %v1147_v44, %v1146_v43  ;;  %v1149_v46 = vpop.f32.mrb[6].mxu0  ;;  %v1174_v47 = vpop.f32.mrb[4].mxu1 }
 0x100   :  { %v1150_v48 = vpop.f32.mrb[7].mxu0  ;;  %v1175_v51 = vpop.f32.mrb[5].mxu1 }
 0x101   :  { %v756_v49 = vadd.f32 %v1148_v45, %v1014_v27  ;;  %v1151_v50 = vadd.f32 %v1150_v48, %v1149_v46  ;;  %v1176_v52 = vadd.f32 %v1175_v51, %v1174_v47  ;;  %v1177_v53 = vpop.f32.mrb[6].mxu1 }
 0x102   :  { %v1178_v55 = vpop.f32.mrb[7].mxu1 }
 0x103   :  { %v759_v54 = vadd.f32 %v1151_v50, %v1014_v27  ;;  %v805_v56 = vadd.f32 %v1176_v52, %v756_v49  ;;  %v1179_v57 = vadd.f32 %v1178_v55, %v1177_v53 }
 0x105   :  { %v808_v58 = vadd.f32 %v1179_v57, %v759_v54 }
 0x115   :  { %v1196_v59 = vpop.f32.mrb[8].mxu0 }
 0x116   :  { %v1197_v60 = vpop.f32.mrb[9].mxu0 }
 0x117   :  { %v1198_v61 = vadd.f32 %v1197_v60, %v1196_v59  ;;  %v1199_v62 = vpop.f32.mrb[10].mxu0  ;;  %v1224_v63 = vpop.f32.mrb[8].mxu1 }
 0x118   :  { %v1200_v0 = vpop.f32.mrb[11].mxu0  ;;  %v1225_v3 = vpop.f32.mrb[9].mxu1 }
 0x119   :  { %v846_v1 = vadd.f32 %v1198_v61, %v797_v40  ;;  %v1201_v2 = vadd.f32 %v1200_v0, %v1199_v62  ;;  %v1226_v4 = vadd.f32 %v1225_v3, %v1224_v63  ;;  %v1227_v5 = vpop.f32.mrb[10].mxu1 }
 0x11a   :  { %v1228_v7 = vpop.f32.mrb[11].mxu1 }
 0x11b   :  { %v849_v6 = vadd.f32 %v1201_v2, %v800_v42  ;;  %v1229_v8 = vadd.f32 %v1228_v7, %v1227_v5  ;;  %v895_v9 = vadd.f32 %v1226_v4, %v846_v1 }
 0x11d   :  { %v1202_v10 = vpop.f32.mrb[12].mxu0  ;;  %v898_v12 = vadd.f32 %v1229_v8, %v849_v6 }
 0x11e   :  { %v1203_v11 = vpop.f32.mrb[13].mxu0 }
 0x11f   :  { %v1204_v13 = vadd.f32 %v1203_v11, %v1202_v10  ;;  %v1205_v14 = vpop.f32.mrb[14].mxu0  ;;  %v1230_v15 = vpop.f32.mrb[12].mxu1 }
 0x120   :  { %v1206_v16 = vpop.f32.mrb[15].mxu0  ;;  %v1231_v19 = vpop.f32.mrb[13].mxu1 }
 0x121   :  { %v854_v17 = vadd.f32 %v1204_v13, %v805_v56  ;;  %v1207_v18 = vadd.f32 %v1206_v16, %v1205_v14  ;;  %v1232_v20 = vadd.f32 %v1231_v19, %v1230_v15  ;;  %v1233_v21 = vpop.f32.mrb[14].mxu1 }
 0x122   :  { %v1234_v23 = vpop.f32.mrb[15].mxu1 }
 0x123   :  { %v857_v22 = vadd.f32 %v1207_v18, %v808_v58  ;;  %v1235_v24 = vadd.f32 %v1234_v23, %v1233_v21  ;;  %v903_v25 = vadd.f32 %v1232_v20, %v854_v17 }
 0x125   :  { %v906_v26 = vadd.f32 %v1235_v24, %v857_v22 }
 0x135   :  { %v1264_v27 = vpop.f32.mrb[16].mxu0 }
 0x136   :  { %v952_v28 = vadd.f32 %v1264_v27, %v903_v25  ;;  %v943_v29 = vpop.f32.mrb[17].mxu0 }
 0x137   :  { %v944_v30 = vadd.f32 %v943_v29, %v895_v9  ;;  %v1265_v31 = vpop.f32.mrb[18].mxu0 }
 0x138   :  { %v955_v32 = vadd.f32 %v1265_v31, %v906_v26  ;;  %v946_v33 = vpop.f32.mrb[19].mxu0  ;;  %v970_v40 = vmul.f32 %v952_v28, %v952_v28 }
 0x139   :  { %v947_v34 = vadd.f32 %v946_v33, %v898_v12  ;;  %v968_v36 = vmul.f32 %v944_v30, %v944_v30 }
 0x13a   :  { %v1121_v35 = vpack.c.bf16 %v955_v32, %v952_v28  ;;  %v971_v43 = vmul.f32 %v955_v32, %v955_v32 }
 0x13b   :  { %v958_v37 = vadd.f32 %v947_v34, %v944_v30  ;;  %v969_v38 = vmul.f32 %v947_v34, %v947_v34  ;;  %v1116_v39 = vpack.c.bf16 %v947_v34, %v944_v30 }
 0x13c   :  { %1123 = vst [vmem:[%s1682_s3 + $0x8] sm:$0xff] %v1121_v35  }
 0x13d   :  { %v959_v41 = vadd.f32 %v958_v37, %v952_v28  ;;  %v972_v42 = vadd.f32 %v969_v38, %v968_v36  ;;  %1117 = vst [vmem:[%s1682_s3] sm:$0xff] %v1116_v39  }
 0x13f   :  { %v960_v44 = vadd.f32 %v959_v41, %v955_v32  ;;  %v973_v45 = vadd.f32 %v972_v42, %v970_v40 }
 0x141   :  { %v961_v46 = vrot.slane %v960_v44, 4  ;;  %v974_v47 = vadd.f32 %v973_v45, %v971_v43 }
 0x143   :  { %v962_v48 = vadd.f32 %v961_v46, %v960_v44  ;;  %v975_v49 = vrot.slane %v974_v47, 4 }
 0x145   :  { %v963_v50 = vrot.slane %v962_v48, 2  ;;  %v976_v51 = vadd.f32 %v975_v49, %v974_v47 }
 0x147   :  { %v964_v52 = vadd.f32 %v963_v50, %v962_v48  ;;  %v977_v53 = vrot.slane %v976_v51, 2 }
 0x149   :  { %v965_v54 = vrot.slane %v964_v52, 1  ;;  %v978_v55 = vadd.f32 %v977_v53, %v976_v51 }
 0x14b   :  { %v966_v56 = vadd.f32 %v965_v54, %v964_v52  ;;  %v979_v57 = vrot.slane %v978_v55, 1 }
 0x14d   :  { %967 = vst [vmem:[%s1683_s4] sm:$0x1] %v966_v56  ;;  %v980_v58 = vadd.f32 %v979_v57, %v978_v55 }
 0x14f   :  { %981 = vst [vmem:[%s1684_s5] sm:$0x1] %v980_v58 }

// kernel: squeeze.140
= control target key start
LH: loop header
LB: loop body
LE: loop exit
PB: predicated region body
PF: predicated region fallthrough
CT: control target
= control target key end

     0   :  { %s37_s8 = smov 32   ;;  %vm7_vm0 = vcmask 261120   ;;  %s38_s9 = smov 64   ;;  %s55_s0 = inlined_call_operand.vmem [shape: f32[128], index: 0, kind: input, shape index: {}]   ;;  %s56_s1 = inlined_call_operand.vmem [shape: f32[4,32], index: 1, kind: output, shape index: {}]  }
   0x1   :  { %v4_v0 = vld [vmem:[%s55_s0] sm:$0x1]  ;;  %s36_s0 = smov 96  }
   0x2   :  { %5 = vst [vmem:[#allocation1] sm:$0x1] %v4_v0 }
   0x9   :  { %v9_v1 = vld [vmem:[#allocation1] sm:$0x1]  }
   0xa   :  { %v21_v2 = vld [vmem:[#allocation1] sm:$0x1]   ;;  %10 = vrot.lane.b32.xlu0 %v9_v1, %s36_s0 }
   0xb   :  { %22 = vrot.lane.b32.xlu1 %v21_v2, %s37_s8  ;;  %v6_v3 = vld [vmem:[#allocation1] sm:$0x1]  }
   0xc   :  { %v15_v4 = vld [vmem:[#allocation1] sm:$0x1]   ;;  %8 = vst.msk [vmem:[#allocation0] sm:$0x1] %vm7_vm0, %v6_v3  }
   0xe   :  { %16 = vrot.lane.b32.xlu0 %v15_v4, %s38_s9 }
  0x7c   :  { %v11_v5 = vpop.permute.xlu0 %10  }
  0x7d   :  { %v23_v6 = vpop.permute.xlu1 %22   ;;  %14 = vst.msk [vmem:[#allocation0 + $0x1] sm:$0x1] %vm7_vm0, %v11_v5  }
  0x7e   :  { %26 = vst.msk [vmem:[#allocation0 + $0x3] sm:$0x1] %vm7_vm0, %v23_v6  }
  0x80   :  { %v17_v7 = vpop.permute.xlu0 %16  }
  0x81   :  { %20 = vst.msk [vmem:[#allocation0 + $0x2] sm:$0x1] %vm7_vm0, %v17_v7  }
  0x88   :  { %v30_v8 = vld [vmem:[#allocation0] sm:$0xf] }
  0x89   :  { %32 = vst [vmem:[%s56_s1] sm:$0xf] %v30_v8 }

// kernel: tile.43
= control target key start
LH: loop header
LB: loop body
LE: loop exit
PB: predicated region body
PF: predicated region fallthrough
CT: control target
= control target key end

     0   :  { %s22_s0 = inlined_call_operand.vmem [shape: f32[16], index: 0, kind: input, shape index: {}]   ;;  %s23_s1 = inlined_call_operand.vmem [shape: f32[4,16], index: 1, kind: output, shape index: {}]  }
   0x1   :  { %v4_v0 = vld [vmem:[%s22_s0] ss:$0 sm:$0xff] }
   0x2   :  { %5 = vst [vmem:[%s23_s1] sm:$0xf] %v4_v0 }

// kernel: tile.44
= control target key start
LH: loop header
LB: loop body
LE: loop exit
PB: predicated region body
PF: predicated region fallthrough
CT: control target
= control target key end

     0   :  { %vm7_vm0 = vcmask 130048   ;;  %s37_s8 = smov 16   ;;  %s38_s9 = smov 32   ;;  %vm13_vm1 = vcmask 523648   ;;  %vm19_vm2 = vcmask 392448   ;;  %vm25_vm3 = vcmask 261248   ;;  %s55_s0 = inlined_call_operand.vmem [shape: f32[4,16], index: 0, kind: input, shape index: {}]   ;;  %s56_s1 = inlined_call_operand.vmem [shape: f32[1,64], index: 1, kind: output, shape index: {}]  }
   0x1   :  { %v4_v0 = vld [vmem:[%s55_s0] sm:$0xf]  ;;  %s36_s0 = smov 48  }
   0x2   :  { %5 = vst [vmem:[#allocation1] sm:$0xf] %v4_v0 }
   0x9   :  { %v10_v1 = vld [vmem:[#allocation1 + $0x3] sm:$0x1]   ;;  %v22_v2 = vld [vmem:[#allocation1 + $0x1] sm:$0x1]   ;;  %v6_v3 = vld [vmem:[#allocation1] sm:$0x1]  }
   0xa   :  { %11 = vrot.lane.b32.xlu0 %v10_v1, %s36_s0  ;;  %23 = vrot.lane.b32.xlu1 %v22_v2, %s37_s8  ;;  %v16_v4 = vld [vmem:[#allocation1 + $0x2] sm:$0x1]   ;;  %8 = vst.msk [vmem:[#allocation0] sm:$0x1] %vm7_vm0, %v6_v3  }
   0xe   :  { %17 = vrot.lane.b32.xlu0 %v16_v4, %s38_s9 }
  0x7c   :  { %v12_v5 = vpop.permute.xlu0 %11   ;;  %v24_v6 = vpop.permute.xlu1 %23  }
  0x7d   :  { %14 = vst.msk [vmem:[#allocation0] sm:$0x1] %vm13_vm1, %v12_v5  }
  0x80   :  { %v18_v7 = vpop.permute.xlu0 %17  }
  0x81   :  { %20 = vst.msk [vmem:[#allocation0] sm:$0x1] %vm19_vm2, %v18_v7  }
  0x82   :  { %26 = vst.msk [vmem:[#allocation0] sm:$0x1] %vm25_vm3, %v24_v6  }
  0x89   :  { %v30_v8 = vld [vmem:[#allocation0] sm:$0x1] }
  0x8a   :  { %32 = vst [vmem:[%s56_s1] sm:$0x1] %v30_v8 }

// kernel: pix2pix_forward.18
= control target key start
LH: loop header
LB: loop body
LE: loop exit
PB: predicated region body
PF: predicated region fallthrough
CT: control target
= control target key end

     0   :  { %s1861_s1 = inlined_call_operand.vmem [shape: bf16[640,128], index: 1, kind: input, shape index: {}]   ;;  %s1862_s0 = inlined_call_operand.vmem [shape: bf16[128,640], index: 0, kind: input, shape index: {}]   ;;  %s1863_s2 = inlined_call_operand.vmem [shape: f32[1,128], index: 2, kind: input, shape index: {}]   ;;  %s1864_s3 = inlined_call_operand.vmem [shape: bf16[128,128], index: 3, kind: output, shape index: {0}]   ;;  %s1865_s4 = inlined_call_operand.vmem [shape: f32[1,128], index: 4, kind: output, shape index: {1}]   ;;  %s1866_s5 = inlined_call_operand.vmem [shape: f32[1,128], index: 5, kind: output, shape index: {2}]  }
   0x1   :  { %v1396_v0 = vld [vmem:[%s1861_s1 + $0x40] sm:$0xff]   ;;  %v1400_v4 = vld [vmem:[%s1861_s1 + $0x48] sm:$0xff]   ;;  %v1404_v8 = vld [vmem:[%s1861_s1 + $0x50] sm:$0xff]  }
   0x2   :  { %v1397_v1 = vld [vmem:[%s1861_s1 + $0xc0] sm:$0xff]   ;;  %1204 = vmatprep.subr.bf16.mxu0 %v1396_v0  ;;  %v1401_v5 = vld [vmem:[%s1861_s1 + $0xc8] sm:$0xff]   ;;  %v1405_v9 = vld [vmem:[%s1861_s1 + $0xd0] sm:$0xff]  }
   0x3   :  { %v1398_v2 = vld [vmem:[%s1861_s1] sm:$0xff]   ;;  %1268 = vmatprep.subr.bf16.mxu1 %v1397_v1  ;;  %v1402_v6 = vld [vmem:[%s1861_s1 + $0x8] sm:$0xff]   ;;  %v1406_v10 = vld [vmem:[%s1861_s1 + $0x10] sm:$0xff]  }
   0x4   :  { %v1399_v3 = vld [vmem:[%s1861_s1 + $0x80] sm:$0xff]   ;;  %1205 = vmatpush3.bf16.msra.mxu0 %v1398_v2  ;;  %v1403_v7 = vld [vmem:[%s1861_s1 + $0x88] sm:$0xff]   ;;  %v1407_v11 = vld [vmem:[%s1861_s1 + $0x90] sm:$0xff]  }
   0x5   :  { %1269 = vmatpush3.bf16.msra.mxu1 %v1399_v3  ;;  %1206 = vmatprep.subr.bf16.mxu0 %v1400_v4  ;;  %v1408_v12 = vld [vmem:[%s1861_s1 + $0x58] sm:$0xff]   ;;  %v1412_v16 = vld [vmem:[%s1861_s1 + $0x60] sm:$0xff]   ;;  %v1416_v20 = vld [vmem:[%s1861_s1 + $0x68] sm:$0xff]  }
   0x6   :  { %1270 = vmatprep.subr.bf16.mxu1 %v1401_v5  ;;  %v1409_v13 = vld [vmem:[%s1861_s1 + $0xd8] sm:$0xff]   ;;  %v1413_v17 = vld [vmem:[%s1861_s1 + $0xe0] sm:$0xff]   ;;  %v1417_v21 = vld [vmem:[%s1861_s1 + $0xe8] sm:$0xff]  }
   0x7   :  { %v1410_v14 = vld [vmem:[%s1861_s1 + $0x18] sm:$0xff]   ;;  %v1414_v18 = vld [vmem:[%s1861_s1 + $0x20] sm:$0xff]   ;;  %v1418_v22 = vld [vmem:[%s1861_s1 + $0x28] sm:$0xff]  }
   0x8   :  { %1207 = vmatpush3.bf16.msra.mxu0 %v1402_v6  ;;  %v1411_v15 = vld [vmem:[%s1861_s1 + $0x98] sm:$0xff]   ;;  %v1415_v19 = vld [vmem:[%s1861_s1 + $0xa0] sm:$0xff]   ;;  %v1419_v23 = vld [vmem:[%s1861_s1 + $0xa8] sm:$0xff]  }
   0x9   :  { %1271 = vmatpush3.bf16.msra.mxu1 %v1403_v7  ;;  %1208 = vmatprep.subr.bf16.mxu0 %v1404_v8  ;;  %v1420_v24 = vld [vmem:[%s1861_s1 + $0x70] sm:$0xff]   ;;  %v1424_v28 = vld [vmem:[%s1861_s1 + $0x78] sm:$0xff]   ;;  %v1433_v35 = vld [vmem:[%s1862_s0 + $0xc] ss:$20 sps:$4 sm:$0xff]  }
   0xa   :  { %1272 = vmatprep.subr.bf16.mxu1 %v1405_v9  ;;  %v1421_v25 = vld [vmem:[%s1861_s1 + $0xf0] sm:$0xff]   ;;  %v1425_v29 = vld [vmem:[%s1861_s1 + $0xf8] sm:$0xff]   ;;  %v1434_v36 = vld [vmem:[%s1861_s1 + $0x100] sm:$0xff]   ;;  %730 = vmatprep.mubr.bf16.mxu1 %v1433_v35 }
   0xb   :  { %v1422_v26 = vld [vmem:[%s1861_s1 + $0x30] sm:$0xff]   ;;  %v1426_v30 = vld [vmem:[%s1861_s1 + $0x38] sm:$0xff]   ;;  %v1435_v37 = vld [vmem:[%s1862_s0 + $0x2c] ss:$20 sps:$4 sm:$0xff]  }
   0xc   :  { %1209 = vmatpush3.bf16.msra.mxu0 %v1406_v10  ;;  %v1423_v27 = vld [vmem:[%s1861_s1 + $0xb0] sm:$0xff]   ;;  %v1427_v31 = vld [vmem:[%s1861_s1 + $0xb8] sm:$0xff]   ;;  %v1441_v39 = vld [vmem:[%s1861_s1 + $0x108] sm:$0xff]  }
   0xd   :  { %1273 = vmatpush3.bf16.msra.mxu1 %v1407_v11  ;;  %1210 = vmatprep.subr.bf16.mxu0 %v1408_v12  ;;  %v1428_v32 = vld [vmem:[%s1862_s0] ss:$20 sps:$4 sm:$0xff]   ;;  %v1430_v33 = vld [vmem:[%s1862_s0 + $0x4] ss:$20 sps:$4 sm:$0xff]   ;;  %v1431_v34 = vld [vmem:[%s1862_s0 + $0x8] ss:$20 sps:$4 sm:$0xff]  }
   0xe   :  { %1274 = vmatprep.subr.bf16.mxu1 %v1409_v13  ;;  %633 = vmatprep.mubr.bf16.mxu0 %v1430_v33  ;;  %v1437_v38 = vld [vmem:[%s1862_s0 + $0x34] ss:$20 sps:$4 sm:$0xff]   ;;  %v1440_v41 = vld [vmem:[%s1862_s0 + $0x30] ss:$20 sps:$4 sm:$0xff]   ;;  %v1455_v45 = vld [vmem:[%s1861_s1 + $0x118] sm:$0xff]  }
   0xf   :  { %v1439_v40 = vld [vmem:[%s1862_s0 + $0x28] ss:$20 sps:$4 sm:$0xff]   ;;  %v1448_v44 = vld [vmem:[%s1861_s1 + $0x110] sm:$0xff]   ;;  %v1447_v47 = vld [vmem:[%s1862_s0 + $0x58] ss:$20 sps:$4 sm:$0xff]  }
  0x10   :  { %1211 = vmatpush3.bf16.msra.mxu0 %v1410_v14  ;;  %v1442_v42 = vld [vmem:[%s1862_s0 + $0x54] ss:$20 sps:$4 sm:$0xff]   ;;  %v1444_v43 = vld [vmem:[%s1862_s0 + $0x5c] ss:$20 sps:$4 sm:$0xff]   ;;  %v1451_v49 = vld [vmem:[%s1862_s0 + $0x84] ss:$20 sps:$4 sm:$0xff]  }
  0x11   :  { %1275 = vmatpush3.bf16.msra.mxu1 %v1411_v15  ;;  %1212 = vmatprep.subr.bf16.mxu0 %v1412_v16  ;;  %v1446_v46 = vld [vmem:[%s1862_s0 + $0x50] ss:$20 sps:$4 sm:$0xff]   ;;  %v1469_v51 = vld [vmem:[%s1861_s1 + $0x128] sm:$0xff]   ;;  %v1454_v53 = vld [vmem:[%s1862_s0 + $0x80] ss:$20 sps:$4 sm:$0xff]  }
  0x12   :  { %1276 = vmatprep.subr.bf16.mxu1 %v1413_v17  ;;  %v1449_v48 = vld [vmem:[%s1862_s0 + $0x7c] ss:$20 sps:$4 sm:$0xff]   ;;  %v1462_v50 = vld [vmem:[%s1861_s1 + $0x120] sm:$0xff]   ;;  %v1453_v52 = vld [vmem:[%s1862_s0 + $0x78] ss:$20 sps:$4 sm:$0xff]  }
  0x13   :  { %v1456_v54 = vld [vmem:[%s1862_s0 + $0xa4] ss:$20 sps:$4 sm:$0xff]   ;;  %v1476_v55 = vld [vmem:[%s1861_s1 + $0x130] sm:$0xff]   ;;  %v1458_v56 = vld [vmem:[%s1862_s0 + $0xac] ss:$20 sps:$4 sm:$0xff]  }
  0x14   :  { %1213 = vmatpush3.bf16.msra.mxu0 %v1414_v18  ;;  %v1483_v57 = vld [vmem:[%s1861_s1 + $0x138] sm:$0xff]   ;;  %v1460_v58 = vld [vmem:[%s1862_s0 + $0xa0] ss:$20 sps:$4 sm:$0xff]   ;;  %v1468_v63 = vld [vmem:[%s1862_s0 + $0xd0] ss:$20 sps:$4 sm:$0xff]  }
  0x15   :  { %1277 = vmatpush3.bf16.msra.mxu1 %v1415_v19  ;;  %1214 = vmatprep.subr.bf16.mxu0 %v1416_v20  ;;  %v1461_v59 = vld [vmem:[%s1862_s0 + $0xa8] ss:$20 sps:$4 sm:$0xff]   ;;  %v1463_v60 = vld [vmem:[%s1862_s0 + $0xcc] ss:$20 sps:$4 sm:$0xff]   ;;  %v1474_v2 = vld [vmem:[%s1862_s0 + $0xf0] ss:$20 sps:$4 sm:$0xff]  }
  0x16   :  { %1278 = vmatprep.subr.bf16.mxu1 %v1417_v21  ;;  %v1465_v61 = vld [vmem:[%s1862_s0 + $0xd4] ss:$20 sps:$4 sm:$0xff]   ;;  %v1472_v1 = vld [vmem:[%s1862_s0 + $0xfc] ss:$20 sps:$4 sm:$0xff]   ;;  %v1475_v3 = vld [vmem:[%s1862_s0 + $0xf8] ss:$20 sps:$4 sm:$0xff]  }
  0x17   :  { %v1467_v62 = vld [vmem:[%s1862_s0 + $0xc8] ss:$20 sps:$4 sm:$0xff]   ;;  %v1479_v5 = vld [vmem:[%s1862_s0 + $0x124] ss:$20 sps:$4 sm:$0xff]   ;;  %v1482_v7 = vld [vmem:[%s1862_s0 + $0x120] ss:$20 sps:$4 sm:$0xff]  }
  0x18   :  { %1215 = vmatpush3.bf16.msra.mxu0 %v1418_v22  ;;  %v1470_v0 = vld [vmem:[%s1862_s0 + $0xf4] ss:$20 sps:$4 sm:$0xff]   ;;  %v1477_v4 = vld [vmem:[%s1862_s0 + $0x11c] ss:$20 sps:$4 sm:$0xff]   ;;  %v1481_v6 = vld [vmem:[%s1862_s0 + $0x118] ss:$20 sps:$4 sm:$0xff]  }
  0x19   :  { %1279 = vmatpush3.bf16.msra.mxu1 %v1419_v23  ;;  %1216 = vmatprep.subr.bf16.mxu0 %v1420_v24  ;;  %v1484_v8 = vld [vmem:[%s1862_s0 + $0x10] ss:$20 sps:$4 sm:$0xff]   ;;  %v1486_v10 = vld [vmem:[%s1862_s0 + $0x38] ss:$20 sps:$4 sm:$0xff]   ;;  %v1488_v12 = vld [vmem:[%s1862_s0 + $0x60] ss:$20 sps:$4 sm:$0xff]  }
  0x1a   :  { %1280 = vmatprep.subr.bf16.mxu1 %v1421_v25  ;;  %v1485_v9 = vld [vmem:[%s1862_s0 + $0xb0] ss:$20 sps:$4 sm:$0xff]   ;;  %v1487_v11 = vld [vmem:[%s1862_s0 + $0xd8] ss:$20 sps:$4 sm:$0xff]   ;;  %v1489_v13 = vld [vmem:[%s1862_s0 + $0x100] ss:$20 sps:$4 sm:$0xff]  }
  0x1b   :  { %v1490_v14 = vld [vmem:[%s1862_s0 + $0x88] ss:$20 sps:$4 sm:$0xff]   ;;  %v1765_v17 = vld [vmem:[%s1863_s2] ss:$0 sm:$0xff] }
  0x1c   :  { %1217 = vmatpush3.bf16.msra.mxu0 %v1422_v26  ;;  %v1491_v15 = vld [vmem:[%s1862_s0 + $0x128] ss:$20 sps:$4 sm:$0xff]  }
  0x1d   :  { %1281 = vmatpush3.bf16.msra.mxu1 %v1423_v27  ;;  %1218 = vmatprep.subr.bf16.mxu0 %v1424_v28 }
  0x1e   :  { %1282 = vmatprep.subr.bf16.mxu1 %v1425_v29 }
  0x20   :  { %1219 = vmatpush3.bf16.msra.mxu0 %v1426_v30 }
  0x21   :  { %1283 = vmatpush3.bf16.msra.mxu1 %v1427_v31  ;;  %1348 = vmatprep.subr.bf16.mxu0 %v1434_v36 }
  0x22   :  { %1380 = vmatprep.subr.bf16.mxu1 %v1434_v36 }
  0x23   :  { %634 = vmatmul.mubr.bf16.vlgmr.msra.gmra.mrb[0].mxu0 %v1428_v32 }
  0x24   :  { %731 = vmatmul.mubr.bf16.vlgmr.msra.gmra.mrb[0].mxu1 %v1431_v34  ;;  %1349 = vmatpush3.bf16.msra.mxu0 %v1434_v36 }
  0x25   :  { %641 = vmatprep.mubr.bf16.mxu0 %v1435_v37  ;;  %738 = vmatprep.mubr.bf16.mxu1 %v1437_v38 }
  0x26   :  { %1388 = vmatpush3.bf16.msra.mxu1 %v1434_v36  ;;  %1350 = vmatprep.subr.bf16.mxu0 %v1441_v39 }
  0x27   :  { %1381 = vmatprep.subr.bf16.mxu1 %v1441_v39 }
  0x28   :  { %1351 = vmatpush3.bf16.msra.mxu0 %v1441_v39 }
  0x29   :  { %1352 = vmatprep.subr.bf16.mxu0 %v1448_v44 }
  0x2a   :  { %1389 = vmatpush3.bf16.msra.mxu1 %v1441_v39 }
  0x2b   :  { %642 = vmatmul.mubr.bf16.gmra.mrb[4].mxu0 %v1439_v40  ;;  %1382 = vmatprep.subr.bf16.mxu1 %v1448_v44 }
  0x2c   :  { %739 = vmatmul.mubr.bf16.gmra.mrb[4].mxu1 %v1440_v41  ;;  %649 = vmatprep.mubr.bf16.mxu0 %v1442_v42 }
  0x2d   :  { %746 = vmatprep.mubr.bf16.mxu1 %v1444_v43  ;;  %1353 = vmatpush3.bf16.msra.mxu0 %v1448_v44 }
  0x2e   :  { %1354 = vmatprep.subr.bf16.mxu0 %v1455_v45  ;;  %1390 = vmatpush3.bf16.msra.mxu1 %v1448_v44 }
  0x2f   :  { %1383 = vmatprep.subr.bf16.mxu1 %v1455_v45 }
  0x31   :  { %1355 = vmatpush3.bf16.msra.mxu0 %v1455_v45 }
  0x32   :  { %1356 = vmatprep.subr.bf16.mxu0 %v1462_v50  ;;  %1391 = vmatpush3.bf16.msra.mxu1 %v1455_v45 }
  0x33   :  { %650 = vmatmul.mubr.bf16.gmra.mrb[8].mxu0 %v1446_v46  ;;  %1384 = vmatprep.subr.bf16.mxu1 %v1462_v50 }
  0x34   :  { %747 = vmatmul.mubr.bf16.gmra.mrb[8].mxu1 %v1447_v47  ;;  %657 = vmatprep.mubr.bf16.mxu0 %v1449_v48 }
  0x35   :  { %754 = vmatprep.mubr.bf16.mxu1 %v1451_v49  ;;  %1357 = vmatpush3.bf16.msra.mxu0 %v1462_v50 }
  0x36   :  { %1358 = vmatprep.subr.bf16.mxu0 %v1469_v51  ;;  %1392 = vmatpush3.bf16.msra.mxu1 %v1462_v50 }
  0x37   :  { %1385 = vmatprep.subr.bf16.mxu1 %v1469_v51 }
  0x39   :  { %1359 = vmatpush3.bf16.msra.mxu0 %v1469_v51 }
  0x3a   :  { %1360 = vmatprep.subr.bf16.mxu0 %v1476_v55  ;;  %1393 = vmatpush3.bf16.msra.mxu1 %v1469_v51 }
  0x3b   :  { %658 = vmatmul.mubr.bf16.gmra.mrb[12].mxu0 %v1453_v52  ;;  %1386 = vmatprep.subr.bf16.mxu1 %v1476_v55 }
  0x3c   :  { %755 = vmatmul.mubr.bf16.gmra.mrb[12].mxu1 %v1454_v53  ;;  %665 = vmatprep.mubr.bf16.mxu0 %v1456_v54 }
  0x3d   :  { %762 = vmatprep.mubr.bf16.mxu1 %v1458_v56  ;;  %1361 = vmatpush3.bf16.msra.mxu0 %v1476_v55 }
  0x3e   :  { %1362 = vmatprep.subr.bf16.mxu0 %v1483_v57  ;;  %1394 = vmatpush3.bf16.msra.mxu1 %v1476_v55 }
  0x3f   :  { %1387 = vmatprep.subr.bf16.mxu1 %v1483_v57 }
  0x41   :  { %1363 = vmatpush3.bf16.msra.mxu0 %v1483_v57 }
  0x42   :  { %1395 = vmatpush3.bf16.msra.mxu1 %v1483_v57 }
  0x43   :  { %666 = vmatmul.mubr.bf16.gmra.mrb[16].mxu0 %v1460_v58 }
  0x44   :  { %763 = vmatmul.mubr.bf16.gmra.mrb[16].mxu1 %v1461_v59  ;;  %673 = vmatprep.mubr.bf16.mxu0 %v1463_v60 }
  0x45   :  { %770 = vmatprep.mubr.bf16.mxu1 %v1465_v61 }
  0x4b   :  { %674 = vmatmul.mubr.bf16.gmra.mrb[20].mxu0 %v1467_v62 }
  0x4c   :  { %771 = vmatmul.mubr.bf16.gmra.mrb[20].mxu1 %v1468_v63  ;;  %681 = vmatprep.mubr.bf16.mxu0 %v1470_v0 }
  0x4d   :  { %778 = vmatprep.mubr.bf16.mxu1 %v1472_v1 }
  0x53   :  { %682 = vmatmul.mubr.bf16.gmra.mrb[24].mxu0 %v1474_v2 }
  0x54   :  { %779 = vmatmul.mubr.bf16.gmra.mrb[24].mxu1 %v1475_v3  ;;  %689 = vmatprep.mubr.bf16.mxu0 %v1477_v4 }
  0x55   :  { %786 = vmatprep.mubr.bf16.mxu1 %v1479_v5 }
  0x5b   :  { %690 = vmatmul.mubr.bf16.gmra.mrb[28].mxu0 %v1481_v6 }
  0x5c   :  { %787 = vmatmul.mubr.bf16.gmra.mrb[28].mxu1 %v1482_v7  ;;  %1364 = vmatprep.mubr.bf16.mxu0 %v1484_v8 }
  0x5d   :  { %1372 = vmatprep.mubr.bf16.mxu1 %v1485_v9 }
  0x63   :  { %1365 = vmatmul.mubr.bf16.vlgmr.msra.gmra.mrb[32].mxu0 %v1486_v10 }
  0x64   :  { %1373 = vmatmul.mubr.bf16.vlgmr.msra.gmra.mrb[32].mxu1 %v1487_v11  ;;  %1368 = vmatprep.mubr.bf16.mxu0 %v1488_v12 }
  0x65   :  { %1376 = vmatprep.mubr.bf16.mxu1 %v1489_v13 }
  0x6b   :  { %1369 = vmatmul.mubr.bf16.gmra.mrb[36].mxu0 %v1490_v14 }
  0x6c   :  { %1377 = vmatmul.mubr.bf16.gmra.mrb[36].mxu1 %v1491_v15 }
  0xf6   :  { %v1220_v16 = vpop.f32.mrb[0].mxu0 }
  0xf7   :  { %v1221_v18 = vpop.f32.mrb[1].mxu0  ;;  %v1284_v19 = vpop.f32.mrb[0].mxu1 }
  0xf8   :  { %v1222_v20 = vadd.f32 %v1221_v18, %v1220_v16  ;;  %v1223_v21 = vpop.f32.mrb[2].mxu0  ;;  %v1285_v22 = vpop.f32.mrb[1].mxu1 }
  0xf9   :  { %v1224_v23 = vpop.f32.mrb[3].mxu0  ;;  %v1286_v24 = vadd.f32 %v1285_v22, %v1284_v19  ;;  %v1287_v25 = vpop.f32.mrb[2].mxu1 }
  0xfa   :  { %v636_v26 = vadd.f32 %v1222_v20, %v1765_v17  ;;  %v1225_v27 = vadd.f32 %v1224_v23, %v1223_v21  ;;  %v1288_v28 = vpop.f32.mrb[3].mxu1 }
  0xfb   :  { %v1289_v29 = vadd.f32 %v1288_v28, %v1287_v25 }
  0xfc   :  { %v639_v30 = vadd.f32 %v1225_v27, %v1765_v17  ;;  %v1769_v31 = vadd.f32 %v1286_v24, %v636_v26 }
  0xfe   :  { %v1226_v32 = vpop.f32.mrb[4].mxu0  ;;  %v1771_v33 = vadd.f32 %v1289_v29, %v639_v30 }
  0xff   :  { %v1227_v34 = vpop.f32.mrb[5].mxu0  ;;  %v1290_v35 = vpop.f32.mrb[4].mxu1 }
 0x100   :  { %v1228_v36 = vadd.f32 %v1227_v34, %v1226_v32  ;;  %v1229_v37 = vpop.f32.mrb[6].mxu0  ;;  %v1291_v38 = vpop.f32.mrb[5].mxu1 }
 0x101   :  { %v1230_v39 = vpop.f32.mrb[7].mxu0  ;;  %v1292_v40 = vadd.f32 %v1291_v38, %v1290_v35  ;;  %v1293_v41 = vpop.f32.mrb[6].mxu1 }
 0x102   :  { %v644_v42 = vadd.f32 %v1228_v36, %v1765_v17  ;;  %v1231_v43 = vadd.f32 %v1230_v39, %v1229_v37  ;;  %v1294_v44 = vpop.f32.mrb[7].mxu1 }
 0x103   :  { %v1295_v45 = vadd.f32 %v1294_v44, %v1293_v41 }
 0x104   :  { %v647_v46 = vadd.f32 %v1231_v43, %v1765_v17  ;;  %v1775_v47 = vadd.f32 %v1292_v40, %v644_v42 }
 0x106   :  { %v1232_v48 = vpop.f32.mrb[8].mxu0  ;;  %v1777_v49 = vadd.f32 %v1295_v45, %v647_v46 }
 0x107   :  { %v1233_v50 = vpop.f32.mrb[9].mxu0  ;;  %v1296_v51 = vpop.f32.mrb[8].mxu1 }
 0x108   :  { %v1234_v52 = vadd.f32 %v1233_v50, %v1232_v48  ;;  %v1235_v53 = vpop.f32.mrb[10].mxu0  ;;  %v1297_v54 = vpop.f32.mrb[9].mxu1 }
 0x109   :  { %v1236_v55 = vpop.f32.mrb[11].mxu0  ;;  %v1298_v56 = vadd.f32 %v1297_v54, %v1296_v51  ;;  %v1299_v57 = vpop.f32.mrb[10].mxu1 }
 0x10a   :  { %v652_v58 = vadd.f32 %v1234_v52, %v1765_v17  ;;  %v1237_v59 = vadd.f32 %v1236_v55, %v1235_v53  ;;  %v1300_v60 = vpop.f32.mrb[11].mxu1 }
 0x10b   :  { %v1301_v61 = vadd.f32 %v1300_v60, %v1299_v57 }
 0x10c   :  { %v655_v62 = vadd.f32 %v1237_v59, %v1765_v17  ;;  %v1781_v63 = vadd.f32 %v1298_v56, %v652_v58 }
 0x10e   :  { %v1238_v0 = vpop.f32.mrb[12].mxu0  ;;  %v1783_v1 = vadd.f32 %v1301_v61, %v655_v62 }
 0x10f   :  { %v1239_v2 = vpop.f32.mrb[13].mxu0  ;;  %v1302_v3 = vpop.f32.mrb[12].mxu1 }
 0x110   :  { %v1240_v4 = vadd.f32 %v1239_v2, %v1238_v0  ;;  %v1241_v5 = vpop.f32.mrb[14].mxu0  ;;  %v1303_v6 = vpop.f32.mrb[13].mxu1 }
 0x111   :  { %v1242_v7 = vpop.f32.mrb[15].mxu0  ;;  %v1304_v8 = vadd.f32 %v1303_v6, %v1302_v3  ;;  %v1305_v9 = vpop.f32.mrb[14].mxu1 }
 0x112   :  { %v660_v10 = vadd.f32 %v1240_v4, %v1765_v17  ;;  %v1243_v11 = vadd.f32 %v1242_v7, %v1241_v5  ;;  %v1306_v12 = vpop.f32.mrb[15].mxu1 }
 0x113   :  { %v1307_v13 = vadd.f32 %v1306_v12, %v1305_v9 }
 0x114   :  { %v663_v14 = vadd.f32 %v1243_v11, %v1765_v17  ;;  %v1787_v15 = vadd.f32 %v1304_v8, %v660_v10 }
 0x116   :  { %v1244_v16 = vpop.f32.mrb[16].mxu0  ;;  %v1789_v18 = vadd.f32 %v1307_v13, %v663_v14 }
 0x117   :  { %v1245_v19 = vpop.f32.mrb[17].mxu0  ;;  %v1308_v20 = vpop.f32.mrb[16].mxu1 }
 0x118   :  { %v1246_v21 = vadd.f32 %v1245_v19, %v1244_v16  ;;  %v1247_v22 = vpop.f32.mrb[18].mxu0  ;;  %v1309_v23 = vpop.f32.mrb[17].mxu1 }
 0x119   :  { %v1248_v24 = vpop.f32.mrb[19].mxu0  ;;  %v1310_v25 = vadd.f32 %v1309_v23, %v1308_v20  ;;  %v1311_v26 = vpop.f32.mrb[18].mxu1 }
 0x11a   :  { %v668_v27 = vadd.f32 %v1246_v21, %v1765_v17  ;;  %v1249_v28 = vadd.f32 %v1248_v24, %v1247_v22  ;;  %v1312_v29 = vpop.f32.mrb[19].mxu1 }
 0x11b   :  { %v1313_v30 = vadd.f32 %v1312_v29, %v1311_v26 }
 0x11c   :  { %v671_v32 = vadd.f32 %v1249_v28, %v1765_v17  ;;  %v765_v34 = vadd.f32 %v1310_v25, %v668_v27 }
 0x11e   :  { %v1250_v35 = vpop.f32.mrb[20].mxu0  ;;  %v1793_v36 = vadd.f32 %v1313_v30, %v671_v32 }
 0x11f   :  { %v1251_v37 = vpop.f32.mrb[21].mxu0  ;;  %v1314_v38 = vpop.f32.mrb[20].mxu1 }
 0x120   :  { %v1252_v39 = vadd.f32 %v1251_v37, %v1250_v35  ;;  %v1253_v40 = vpop.f32.mrb[22].mxu0  ;;  %v1315_v41 = vpop.f32.mrb[21].mxu1 }
 0x121   :  { %v1254_v42 = vpop.f32.mrb[23].mxu0  ;;  %v1316_v43 = vadd.f32 %v1315_v41, %v1314_v38  ;;  %v1317_v44 = vpop.f32.mrb[22].mxu1 }
 0x122   :  { %v676_v45 = vadd.f32 %v1252_v39, %v1765_v17  ;;  %v1255_v46 = vadd.f32 %v1254_v42, %v1253_v40  ;;  %v1318_v48 = vpop.f32.mrb[23].mxu1 }
 0x123   :  { %v1319_v50 = vadd.f32 %v1318_v48, %v1317_v44 }
 0x124   :  { %v679_v51 = vadd.f32 %v1255_v46, %v1765_v17  ;;  %v773_v52 = vadd.f32 %v1316_v43, %v676_v45 }
 0x126   :  { %v1256_v53 = vpop.f32.mrb[24].mxu0  ;;  %v776_v54 = vadd.f32 %v1319_v50, %v679_v51 }
 0x127   :  { %v1257_v55 = vpop.f32.mrb[25].mxu0  ;;  %v1320_v56 = vpop.f32.mrb[24].mxu1 }
 0x128   :  { %v1258_v57 = vadd.f32 %v1257_v55, %v1256_v53  ;;  %v1259_v58 = vpop.f32.mrb[26].mxu0  ;;  %v1321_v59 = vpop.f32.mrb[25].mxu1 }
 0x129   :  { %v1260_v60 = vpop.f32.mrb[27].mxu0  ;;  %v1322_v61 = vadd.f32 %v1321_v59, %v1320_v56  ;;  %v1323_v62 = vpop.f32.mrb[26].mxu1 }
 0x12a   :  { %v684_v0 = vadd.f32 %v1258_v57, %v1765_v17  ;;  %v1261_v2 = vadd.f32 %v1260_v60, %v1259_v58  ;;  %v1324_v3 = vpop.f32.mrb[27].mxu1 }
 0x12b   :  { %v1325_v4 = vadd.f32 %v1324_v3, %v1323_v62 }
 0x12c   :  { %v687_v5 = vadd.f32 %v1261_v2, %v1765_v17  ;;  %v781_v6 = vadd.f32 %v1322_v61, %v684_v0 }
 0x12e   :  { %v1262_v7 = vpop.f32.mrb[28].mxu0  ;;  %v1799_v8 = vadd.f32 %v1325_v4, %v687_v5 }
 0x12f   :  { %v1263_v9 = vpop.f32.mrb[29].mxu0  ;;  %v1326_v10 = vpop.f32.mrb[28].mxu1 }
 0x130   :  { %v1264_v11 = vadd.f32 %v1263_v9, %v1262_v7  ;;  %v1265_v12 = vpop.f32.mrb[30].mxu0  ;;  %v1327_v13 = vpop.f32.mrb[29].mxu1 }
 0x131   :  { %v1266_v14 = vpop.f32.mrb[31].mxu0  ;;  %v1328_v16 = vadd.f32 %v1327_v13, %v1326_v10  ;;  %v1329_v19 = vpop.f32.mrb[30].mxu1 }
 0x132   :  { %v692_v20 = vadd.f32 %v1264_v11, %v1765_v17  ;;  %v1267_v21 = vadd.f32 %v1266_v14, %v1265_v12  ;;  %v1330_v22 = vpop.f32.mrb[31].mxu1 }
 0x133   :  { %v1331_v23 = vadd.f32 %v1330_v22, %v1329_v19 }
 0x134   :  { %v695_v24 = vadd.f32 %v1267_v21, %v1765_v17  ;;  %v789_v25 = vadd.f32 %v1328_v16, %v692_v20 }
 0x136   :  { %v1366_v26 = vpop.f32.mrb[32].mxu0  ;;  %v792_v27 = vadd.f32 %v1331_v23, %v695_v24 }
 0x137   :  { %v838_v28 = vadd.f32 %v1366_v26, %v1775_v47  ;;  %v1374_v29 = vpop.f32.mrb[32].mxu1  ;;  %v829_v30 = vpop.f32.mrb[33].mxu0 }
 0x138   :  { %v1804_v32 = vadd.f32 %v1374_v29, %v773_v52  ;;  %v830_v35 = vadd.f32 %v829_v30, %v1769_v31  ;;  %v861_v37 = vpop.f32.mrb[33].mxu1  ;;  %v1367_v38 = vpop.f32.mrb[34].mxu0 }
 0x139   :  { %v1807_v39 = vadd.f32 %v861_v37, %v765_v34  ;;  %v841_v40 = vadd.f32 %v1367_v38, %v1777_v49  ;;  %v1375_v41 = vpop.f32.mrb[34].mxu1  ;;  %v832_v42 = vpop.f32.mrb[35].mxu0  ;;  %v916_v51 = vmul.f32 %v838_v28, %v838_v28 }
 0x13a   :  { %v1810_v17 = vadd.f32 %v1375_v41, %v776_v54  ;;  %v833_v43 = vadd.f32 %v832_v42, %v1771_v33  ;;  %v864_v44 = vpop.f32.mrb[35].mxu1  ;;  %v914_v46 = vmul.f32 %v830_v35, %v830_v35  ;;  %v924_v30 = vmul.f32 %v1804_v32, %v1804_v32 }
 0x13b   :  { %v1165_v47 = vpack.c.bf16 %v841_v40, %v838_v28  ;;  %v865_v45 = vadd.f32 %v864_v44, %v1793_v36  ;;  %v917_v53 = vmul.f32 %v841_v40, %v841_v40  ;;  %v922_v24 = vmul.f32 %v1807_v39, %v1807_v39 }
 0x13c   :  { %v1185_v31 = vpack.c.bf16 %v1810_v17, %v1804_v32  ;;  %v892_v48 = vadd.f32 %v833_v43, %v830_v35  ;;  %v915_v50 = vmul.f32 %v833_v43, %v833_v43  ;;  %v1160_v49 = vpack.c.bf16 %v833_v43, %v830_v35 }
 0x13d   :  { %1197 = vst [vmem:[%s1864_s3 + $0x8] sm:$0xff] %v1165_v47   ;;  %v1180_v34 = vpack.c.bf16 %v865_v45, %v1807_v39  ;;  %v925_v38 = vmul.f32 %v1810_v17, %v1810_v17 }
 0x13e   :  { %1201 = vst [vmem:[%s1864_s3 + $0x28] sm:$0xff] %v1185_v31   ;;  %v893_v33 = vadd.f32 %v892_v48, %v838_v28  ;;  %v930_v36 = vadd.f32 %v915_v50, %v914_v46  ;;  %v1370_v52 = vpop.f32.mrb[36].mxu0  ;;  %1161 = vst [vmem:[%s1864_s3] sm:$0xff] %v1160_v49  }
 0x13f   :  { %1200 = vst [vmem:[%s1864_s3 + $0x20] sm:$0xff] %v1180_v34   ;;  %v854_v54 = vadd.f32 %v1370_v52, %v1787_v15  ;;  %v1378_v55 = vpop.f32.mrb[36].mxu1  ;;  %v845_v56 = vpop.f32.mrb[37].mxu0 }
 0x140   :  { %v931_v57 = vadd.f32 %v930_v36, %v916_v51  ;;  %v886_v58 = vadd.f32 %v1378_v55, %v789_v25  ;;  %v846_v59 = vadd.f32 %v845_v56, %v1781_v63  ;;  %v894_v60 = vadd.f32 %v893_v33, %v841_v40  ;;  %v877_v61 = vpop.f32.mrb[37].mxu1  ;;  %v1371_v62 = vpop.f32.mrb[38].mxu0 }
 0x141   :  { %v878_v0 = vadd.f32 %v877_v61, %v781_v6  ;;  %v857_v2 = vadd.f32 %v1371_v62, %v1789_v18  ;;  %v1379_v3 = vpop.f32.mrb[38].mxu1  ;;  %v848_v4 = vpop.f32.mrb[39].mxu0  ;;  %v920_v20 = vmul.f32 %v854_v54, %v854_v54 }
 0x142   :  { %v895_v5 = vadd.f32 %v894_v60, %v846_v59  ;;  %v918_v7 = vmul.f32 %v846_v59, %v846_v59  ;;  %v932_v9 = vadd.f32 %v931_v57, %v917_v53  ;;  %v880_v10 = vpop.f32.mrb[39].mxu1  ;;  %v889_v15 = vadd.f32 %v1379_v3, %v792_v27 }
 0x143   :  { %v1175_v11 = vpack.c.bf16 %v857_v2, %v854_v54  ;;  %v849_v13 = vadd.f32 %v848_v4, %v1783_v1  ;;  %v881_v14 = vadd.f32 %v880_v10, %v1799_v8  ;;  %v921_v1 = vmul.f32 %v857_v2, %v857_v2 }
 0x144   :  { %v933_v12 = vadd.f32 %v932_v9, %v918_v7  ;;  %v1195_v63 = vpack.c.bf16 %v889_v15, %v886_v58  ;;  %v923_v27 = vmul.f32 %v865_v45, %v865_v45  ;;  %v926_v42 = vmul.f32 %v878_v0, %v878_v0 }
 0x145   :  { %1199 = vst [vmem:[%s1864_s3 + $0x18] sm:$0xff] %v1175_v11   ;;  %v896_v6 = vadd.f32 %v895_v5, %v849_v13  ;;  %v919_v18 = vmul.f32 %v849_v13, %v849_v13  ;;  %v1170_v16 = vpack.c.bf16 %v849_v13, %v846_v59  ;;  %v1190_v19 = vpack.c.bf16 %v881_v14, %v878_v0 }
 0x146   :  { %1203 = vst [vmem:[%s1864_s3 + $0x38] sm:$0xff] %v1195_v63   ;;  %v927_v47 = vmul.f32 %v881_v14, %v881_v14  ;;  %v928_v31 = vmul.f32 %v886_v58, %v886_v58  ;;  %v929_v50 = vmul.f32 %v889_v15, %v889_v15 }
 0x147   :  { %v897_v21 = vadd.f32 %v896_v6, %v854_v54  ;;  %v934_v22 = vadd.f32 %v933_v12, %v919_v18  ;;  %1198 = vst [vmem:[%s1864_s3 + $0x10] sm:$0xff] %v1170_v16   ;;  %1202 = vst [vmem:[%s1864_s3 + $0x30] sm:$0xff] %v1190_v19  }
 0x149   :  { %v898_v8 = vadd.f32 %v897_v21, %v857_v2  ;;  %v935_v23 = vadd.f32 %v934_v22, %v920_v20 }
 0x14b   :  { %v899_v25 = vadd.f32 %v898_v8, %v1807_v39  ;;  %v936_v26 = vadd.f32 %v935_v23, %v921_v1 }
 0x14d   :  { %v937_v28 = vadd.f32 %v936_v26, %v922_v24  ;;  %v900_v29 = vadd.f32 %v899_v25, %v865_v45 }
 0x14f   :  { %v901_v35 = vadd.f32 %v900_v29, %v1804_v32  ;;  %v938_v37 = vadd.f32 %v937_v28, %v923_v27 }
 0x151   :  { %v902_v40 = vadd.f32 %v901_v35, %v1810_v17  ;;  %v939_v41 = vadd.f32 %v938_v37, %v924_v30 }
 0x153   :  { %v903_v43 = vadd.f32 %v902_v40, %v878_v0  ;;  %v940_v44 = vadd.f32 %v939_v41, %v925_v38 }
 0x155   :  { %v904_v39 = vadd.f32 %v903_v43, %v881_v14  ;;  %v941_v46 = vadd.f32 %v940_v44, %v926_v42 }
 0x157   :  { %v905_v45 = vadd.f32 %v904_v39, %v886_v58  ;;  %v942_v48 = vadd.f32 %v941_v46, %v927_v47 }
 0x159   :  { %v906_v49 = vadd.f32 %v905_v45, %v889_v15  ;;  %v943_v34 = vadd.f32 %v942_v48, %v928_v31 }
 0x15b   :  { %v907_v32 = vrot.slane %v906_v49, 4  ;;  %v944_v51 = vadd.f32 %v943_v34, %v929_v50 }
 0x15d   :  { %v908_v33 = vadd.f32 %v907_v32, %v906_v49  ;;  %v945_v36 = vrot.slane %v944_v51, 4 }
 0x15f   :  { %v909_v52 = vrot.slane %v908_v33, 2  ;;  %v946_v53 = vadd.f32 %v945_v36, %v944_v51 }
 0x161   :  { %v910_v17 = vadd.f32 %v909_v52, %v908_v33  ;;  %v947_v54 = vrot.slane %v946_v53, 2 }
 0x163   :  { %v911_v55 = vrot.slane %v910_v17, 1  ;;  %v948_v56 = vadd.f32 %v947_v54, %v946_v53 }
 0x165   :  { %v912_v57 = vadd.f32 %v911_v55, %v910_v17  ;;  %v949_v59 = vrot.slane %v948_v56, 1 }
 0x167   :  { %913 = vst [vmem:[%s1865_s4] sm:$0x1] %v912_v57  ;;  %v950_v58 = vadd.f32 %v949_v59, %v948_v56 }
 0x169   :  { %951 = vst [vmem:[%s1866_s5] sm:$0x1] %v950_v58 }

// kernel: squeeze.158
= control target key start
LH: loop header
LB: loop body
LE: loop exit
PB: predicated region body
PF: predicated region fallthrough
CT: control target
= control target key end

     0   :  { %s37_s8 = smov 80   ;;  %vm7_vm0 = vcmask 130048   ;;  %s38_s9 = smov 96   ;;  %s55_s0 = inlined_call_operand.vmem [shape: f32[64], index: 0, kind: input, shape index: {}]   ;;  %s56_s1 = inlined_call_operand.vmem [shape: f32[4,16], index: 1, kind: output, shape index: {}]  }
   0x1   :  { %v4_v0 = vld [vmem:[%s55_s0] sm:$0x1]  ;;  %s36_s0 = smov 112  }
   0x2   :  { %5 = vst [vmem:[#allocation1] sm:$0x1] %v4_v0 }
   0x9   :  { %v9_v1 = vld [vmem:[#allocation1] sm:$0x1]  }
   0xa   :  { %v21_v2 = vld [vmem:[#allocation1] sm:$0x1]   ;;  %10 = vrot.lane.b32.xlu0 %v9_v1, %s36_s0 }
   0xb   :  { %22 = vrot.lane.b32.xlu1 %v21_v2, %s37_s8  ;;  %v6_v3 = vld [vmem:[#allocation1] sm:$0x1]  }
   0xc   :  { %v15_v4 = vld [vmem:[#allocation1] sm:$0x1]   ;;  %8 = vst.msk [vmem:[#allocation0] sm:$0x1] %vm7_vm0, %v6_v3  }
   0xe   :  { %16 = vrot.lane.b32.xlu0 %v15_v4, %s38_s9 }
  0x7c   :  { %v11_v5 = vpop.permute.xlu0 %10  }
  0x7d   :  { %v23_v6 = vpop.permute.xlu1 %22   ;;  %14 = vst.msk [vmem:[#allocation0 + $0x1] sm:$0x1] %vm7_vm0, %v11_v5  }
  0x7e   :  { %26 = vst.msk [vmem:[#allocation0 + $0x3] sm:$0x1] %vm7_vm0, %v23_v6  }
  0x80   :  { %v17_v7 = vpop.permute.xlu0 %16  }
  0x81   :  { %20 = vst.msk [vmem:[#allocation0 + $0x2] sm:$0x1] %vm7_vm0, %v17_v7  }
  0x88   :  { %v30_v8 = vld [vmem:[#allocation0] sm:$0xf] }
  0x89   :  { %32 = vst [vmem:[%s56_s1] sm:$0xf] %v30_v8 }

// kernel: tile.48
= control target key start
LH: loop header
LB: loop body
LE: loop exit
PB: predicated region body
PF: predicated region fallthrough
CT: control target
= control target key end

     0   :  { %s22_s0 = inlined_call_operand.vmem [shape: f32[3], index: 0, kind: input, shape index: {}]   ;;  %s23_s1 = inlined_call_operand.vmem [shape: f32[4,3], index: 1, kind: output, shape index: {}]  }
   0x1   :  { %v4_v0 = vld [vmem:[%s22_s0] ss:$0 sm:$0xff] }
   0x2   :  { %5 = vst [vmem:[%s23_s1] sm:$0xf] %v4_v0 }

// kernel: tile.49
= control target key start
LH: loop header
LB: loop body
LE: loop exit
PB: predicated region body
PF: predicated region fallthrough
CT: control target
= control target key end

     0   :  { %vm7_vm0 = vcmask 23552   ;;  %s37_s8 = smov 3   ;;  %s38_s9 = smov 6   ;;  %vm13_vm1 = vcmask 97352   ;;  %vm19_vm2 = vcmask 72752   ;;  %vm25_vm3 = vcmask 48152   ;;  %s55_s0 = inlined_call_operand.vmem [shape: f32[4,3], index: 0, kind: input, shape index: {}]   ;;  %s56_s1 = inlined_call_operand.vmem [shape: f32[1,12], index: 1, kind: output, shape index: {}]  }
   0x1   :  { %v4_v0 = vld [vmem:[%s55_s0] sm:$0xf]  ;;  %s36_s0 = smov 9  }
   0x2   :  { %5 = vst [vmem:[#allocation1] sm:$0xf] %v4_v0 }
   0x9   :  { %v10_v1 = vld [vmem:[#allocation1 + $0x3] sm:$0x1]   ;;  %v22_v2 = vld [vmem:[#allocation1 + $0x1] sm:$0x1]   ;;  %v6_v3 = vld [vmem:[#allocation1] sm:$0x1]  }
   0xa   :  { %11 = vrot.lane.b32.xlu0 %v10_v1, %s36_s0  ;;  %23 = vrot.lane.b32.xlu1 %v22_v2, %s37_s8  ;;  %v16_v4 = vld [vmem:[#allocation1 + $0x2] sm:$0x1]   ;;  %8 = vst.msk [vmem:[#allocation0] sm:$0x1] %vm7_vm0, %v6_v3  }
   0xe   :  { %17 = vrot.lane.b32.xlu0 %v16_v4, %s38_s9 }
  0x7c   :  { %v12_v5 = vpop.permute.xlu0 %11   ;;  %v24_v6 = vpop.permute.xlu1 %23  }
  0x7d   :  { %14 = vst.msk [vmem:[#allocation0] sm:$0x1] %vm13_vm1, %v12_v5  }
  0x80   :  { %v18_v7 = vpop.permute.xlu0 %17  }
  0x81   :  { %20 = vst.msk [vmem:[#allocation0] sm:$0x1] %vm19_vm2, %v18_v7  }
  0x82   :  { %26 = vst.msk [vmem:[#allocation0] sm:$0x1] %vm25_vm3, %v24_v6  }
  0x89   :  { %v30_v8 = vld [vmem:[#allocation0] sm:$0x1] }
  0x8a   :  { %32 = vst [vmem:[%s56_s1] sm:$0x1] %v30_v8 }

// kernel: pix2pix_forward.19
= control target key start
LH: loop header
LB: loop body
LE: loop exit
PB: predicated region body
PF: predicated region fallthrough
CT: control target
= control target key end

     0   :  { %s1509_s1 = inlined_call_operand.vmem [shape: bf16[128,128], index: 1, kind: input, shape index: {}]   ;;  %s1510_s0 = inlined_call_operand.vmem [shape: bf16[512,128], index: 0, kind: input, shape index: {}]   ;;  %s1511_s2 = inlined_call_operand.vmem [shape: f32[1,128], index: 2, kind: input, shape index: {}]   ;;  %s1512_s3 = inlined_call_operand.vmem [shape: f32[512,128], index: 3, kind: output, shape index: {}]  }
   0x1   :  { %v940_v0 = vld [vmem:[%s1509_s1] sm:$0xff]   ;;  %v941_v1 = vld [vmem:[%s1509_s1 + $0x8] sm:$0xff]   ;;  %v942_v2 = vld [vmem:[%s1509_s1 + $0x10] sm:$0xff]  }
   0x2   :  { %844 = vmatprep.subr.bf16.mxu0 %v940_v0  ;;  %924 = vmatprep.subr.bf16.mxu1 %v940_v0  ;;  %v943_v3 = vld [vmem:[%s1509_s1 + $0x18] sm:$0xff]   ;;  %v948_v4 = vld [vmem:[%s1510_s0] sm:$0xff]   ;;  %v945_v7 = vld [vmem:[%s1509_s1 + $0x28] sm:$0xff]  }
   0x3   :  { %845 = vmatpush3.bf16.msra.mxu0 %v940_v0  ;;  %932 = vmatpush3.bf16.msra.mxu1 %v940_v0  ;;  %v949_v5 = vld [vmem:[%s1510_s0 + $0x80] sm:$0xff]   ;;  %v946_v8 = vld [vmem:[%s1509_s1 + $0x30] sm:$0xff]   ;;  %v947_v9 = vld [vmem:[%s1509_s1 + $0x38] sm:$0xff]  }
   0x4   :  { %846 = vmatprep.subr.bf16.mxu0 %v941_v1  ;;  %925 = vmatprep.subr.bf16.mxu1 %v941_v1  ;;  %v944_v6 = vld [vmem:[%s1509_s1 + $0x20] sm:$0xff]   ;;  %v950_v10 = vld [vmem:[%s1510_s0 + $0x8] sm:$0xff]   ;;  %v952_v12 = vld [vmem:[%s1510_s0 + $0x10] sm:$0xff]  }
   0x5   :  { %860 = vmatprep.mubr.bf16.mxu0 %v948_v4  ;;  %892 = vmatprep.mubr.bf16.mxu1 %v949_v5  ;;  %v951_v11 = vld [vmem:[%s1510_s0 + $0x88] sm:$0xff]   ;;  %v953_v13 = vld [vmem:[%s1510_s0 + $0x90] sm:$0xff]   ;;  %v954_v14 = vld [vmem:[%s1510_s0 + $0x18] sm:$0xff]  }
   0x6   :  { %v955_v15 = vld [vmem:[%s1510_s0 + $0x98] sm:$0xff]   ;;  %v956_v16 = vld [vmem:[%s1510_s0 + $0x20] sm:$0xff]   ;;  %v958_v18 = vld [vmem:[%s1510_s0 + $0x28] sm:$0xff]  }
   0x7   :  { %847 = vmatpush3.bf16.msra.mxu0 %v941_v1  ;;  %933 = vmatpush3.bf16.msra.mxu1 %v941_v1  ;;  %v957_v17 = vld [vmem:[%s1510_s0 + $0xa0] sm:$0xff]   ;;  %v959_v19 = vld [vmem:[%s1510_s0 + $0xa8] sm:$0xff]   ;;  %v960_v20 = vld [vmem:[%s1510_s0 + $0x30] sm:$0xff]  }
   0x8   :  { %848 = vmatprep.subr.bf16.mxu0 %v942_v2  ;;  %926 = vmatprep.subr.bf16.mxu1 %v942_v2  ;;  %v961_v21 = vld [vmem:[%s1510_s0 + $0xb0] sm:$0xff]   ;;  %v962_v22 = vld [vmem:[%s1510_s0 + $0x38] sm:$0xff]   ;;  %v964_v24 = vld [vmem:[%s1510_s0 + $0x40] sm:$0xff]  }
   0x9   :  { %v963_v23 = vld [vmem:[%s1510_s0 + $0xb8] sm:$0xff]   ;;  %v965_v25 = vld [vmem:[%s1510_s0 + $0xc0] sm:$0xff]   ;;  %v966_v26 = vld [vmem:[%s1510_s0 + $0x48] sm:$0xff]  }
   0xa   :  { %v967_v27 = vld [vmem:[%s1510_s0 + $0xc8] sm:$0xff]   ;;  %v968_v28 = vld [vmem:[%s1510_s0 + $0x50] sm:$0xff]   ;;  %v970_v30 = vld [vmem:[%s1510_s0 + $0x58] sm:$0xff]  }
   0xb   :  { %849 = vmatpush3.bf16.msra.mxu0 %v942_v2  ;;  %934 = vmatpush3.bf16.msra.mxu1 %v942_v2  ;;  %v969_v29 = vld [vmem:[%s1510_s0 + $0xd0] sm:$0xff]   ;;  %v971_v31 = vld [vmem:[%s1510_s0 + $0xd8] sm:$0xff]   ;;  %v972_v32 = vld [vmem:[%s1510_s0 + $0x60] sm:$0xff]  }
   0xc   :  { %850 = vmatprep.subr.bf16.mxu0 %v943_v3  ;;  %927 = vmatprep.subr.bf16.mxu1 %v943_v3  ;;  %v973_v33 = vld [vmem:[%s1510_s0 + $0xe0] sm:$0xff]   ;;  %v974_v34 = vld [vmem:[%s1510_s0 + $0x68] sm:$0xff]   ;;  %v976_v36 = vld [vmem:[%s1510_s0 + $0x70] sm:$0xff]  }
   0xd   :  { %v975_v35 = vld [vmem:[%s1510_s0 + $0xe8] sm:$0xff]   ;;  %v977_v37 = vld [vmem:[%s1510_s0 + $0xf0] sm:$0xff]   ;;  %v978_v38 = vld [vmem:[%s1510_s0 + $0x78] sm:$0xff]  }
   0xe   :  { %v979_v39 = vld [vmem:[%s1510_s0 + $0xf8] sm:$0xff]   ;;  %v1251_v40 = vld [vmem:[%s1511_s2] ss:$0 sm:$0xff] }
   0xf   :  { %851 = vmatpush3.bf16.msra.mxu0 %v943_v3  ;;  %935 = vmatpush3.bf16.msra.mxu1 %v943_v3 }
  0x10   :  { %852 = vmatprep.subr.bf16.mxu0 %v944_v6  ;;  %928 = vmatprep.subr.bf16.mxu1 %v944_v6 }
  0x13   :  { %853 = vmatpush3.bf16.msra.mxu0 %v944_v6  ;;  %936 = vmatpush3.bf16.msra.mxu1 %v944_v6 }
  0x14   :  { %854 = vmatprep.subr.bf16.mxu0 %v945_v7  ;;  %929 = vmatprep.subr.bf16.mxu1 %v945_v7 }
  0x17   :  { %855 = vmatpush3.bf16.msra.mxu0 %v945_v7  ;;  %937 = vmatpush3.bf16.msra.mxu1 %v945_v7 }
  0x18   :  { %856 = vmatprep.subr.bf16.mxu0 %v946_v8  ;;  %930 = vmatprep.subr.bf16.mxu1 %v946_v8 }
  0x1b   :  { %857 = vmatpush3.bf16.msra.mxu0 %v946_v8  ;;  %938 = vmatpush3.bf16.msra.mxu1 %v946_v8 }
  0x1c   :  { %858 = vmatprep.subr.bf16.mxu0 %v947_v9  ;;  %931 = vmatprep.subr.bf16.mxu1 %v947_v9 }
  0x1f   :  { %859 = vmatpush3.bf16.msra.mxu0 %v947_v9  ;;  %939 = vmatpush3.bf16.msra.mxu1 %v947_v9 }
  0x22   :  { %861 = vmatmul.mubr.bf16.vlgmr.msra.gmra.mrb[0].mxu0 %v950_v10  ;;  %893 = vmatmul.mubr.bf16.vlgmr.msra.gmra.mrb[0].mxu1 %v951_v11 }
  0x23   :  { %864 = vmatprep.mubr.bf16.mxu0 %v952_v12  ;;  %896 = vmatprep.mubr.bf16.mxu1 %v953_v13 }
  0x2a   :  { %865 = vmatmul.mubr.bf16.gmra.mrb[4].mxu0 %v954_v14  ;;  %897 = vmatmul.mubr.bf16.gmra.mrb[4].mxu1 %v955_v15 }
  0x2b   :  { %868 = vmatprep.mubr.bf16.mxu0 %v956_v16  ;;  %900 = vmatprep.mubr.bf16.mxu1 %v957_v17 }
  0x32   :  { %869 = vmatmul.mubr.bf16.gmra.mrb[8].mxu0 %v958_v18  ;;  %901 = vmatmul.mubr.bf16.gmra.mrb[8].mxu1 %v959_v19 }
  0x33   :  { %872 = vmatprep.mubr.bf16.mxu0 %v960_v20  ;;  %904 = vmatprep.mubr.bf16.mxu1 %v961_v21 }
  0x3a   :  { %873 = vmatmul.mubr.bf16.gmra.mrb[12].mxu0 %v962_v22  ;;  %905 = vmatmul.mubr.bf16.gmra.mrb[12].mxu1 %v963_v23 }
  0x3b   :  { %876 = vmatprep.mubr.bf16.mxu0 %v964_v24  ;;  %908 = vmatprep.mubr.bf16.mxu1 %v965_v25 }
  0x42   :  { %877 = vmatmul.mubr.bf16.gmra.mrb[16].mxu0 %v966_v26  ;;  %909 = vmatmul.mubr.bf16.gmra.mrb[16].mxu1 %v967_v27 }
  0x43   :  { %880 = vmatprep.mubr.bf16.mxu0 %v968_v28  ;;  %912 = vmatprep.mubr.bf16.mxu1 %v969_v29 }
  0x4a   :  { %881 = vmatmul.mubr.bf16.gmra.mrb[20].mxu0 %v970_v30  ;;  %913 = vmatmul.mubr.bf16.gmra.mrb[20].mxu1 %v971_v31 }
  0x4b   :  { %884 = vmatprep.mubr.bf16.mxu0 %v972_v32  ;;  %916 = vmatprep.mubr.bf16.mxu1 %v973_v33 }
  0x52   :  { %885 = vmatmul.mubr.bf16.gmra.mrb[24].mxu0 %v974_v34  ;;  %917 = vmatmul.mubr.bf16.gmra.mrb[24].mxu1 %v975_v35 }
  0x53   :  { %888 = vmatprep.mubr.bf16.mxu0 %v976_v36  ;;  %920 = vmatprep.mubr.bf16.mxu1 %v977_v37 }
  0x5a   :  { %889 = vmatmul.mubr.bf16.gmra.mrb[28].mxu0 %v978_v38  ;;  %921 = vmatmul.mubr.bf16.gmra.mrb[28].mxu1 %v979_v39 }
  0xf5   :  { %v862_v41 = vpop.f32.mrb[0].mxu0  ;;  %v894_v42 = vpop.f32.mrb[0].mxu1 }
  0xf6   :  { %v385_v43 = vadd.f32 %v862_v41, %v1251_v40  ;;  %v513_v44 = vadd.f32 %v894_v42, %v1251_v40  ;;  %v376_v45 = vpop.f32.mrb[1].mxu0  ;;  %v504_v46 = vpop.f32.mrb[1].mxu1 }
  0xf7   :  { %v377_v47 = vadd.f32 %v1251_v40, %v376_v45  ;;  %v505_v48 = vadd.f32 %v1251_v40, %v504_v46  ;;  %v863_v49 = vpop.f32.mrb[2].mxu0  ;;  %v895_v50 = vpop.f32.mrb[2].mxu1 }
  0xf8   :  { %980 = vtanh.f32 %v385_v43  ;;  %v388_v51 = vadd.f32 %v863_v49, %v1251_v40  ;;  %v379_v52 = vpop.f32.mrb[3].mxu0  ;;  %v507_v53 = vpop.f32.mrb[3].mxu1  ;;  %v516_v54 = vadd.f32 %v895_v50, %v1251_v40 }
  0xf9   :  { %982 = vtanh.f32 %v513_v44  ;;  %v380_v55 = vadd.f32 %v1251_v40, %v379_v52  ;;  %v508_v56 = vadd.f32 %v1251_v40, %v507_v53 }
  0xfa   :  { %984 = vtanh.f32 %v377_v47 }
  0xfb   :  { %986 = vtanh.f32 %v505_v48 }
  0xfc   :  { %988 = vtanh.f32 %v388_v51 }
  0xfd   :  { %990 = vtanh.f32 %v516_v54  ;;  %v866_v57 = vpop.f32.mrb[4].mxu0  ;;  %v898_v58 = vpop.f32.mrb[4].mxu1 }
  0xfe   :  { %992 = vtanh.f32 %v380_v55  ;;  %v401_v59 = vadd.f32 %v866_v57, %v1251_v40  ;;  %v529_v60 = vadd.f32 %v898_v58, %v1251_v40  ;;  %v392_v61 = vpop.f32.mrb[5].mxu0  ;;  %v520_v62 = vpop.f32.mrb[5].mxu1 }
  0xff   :  { %994 = vtanh.f32 %v508_v56  ;;  %v393_v63 = vadd.f32 %v1251_v40, %v392_v61  ;;  %v521_v0 = vadd.f32 %v1251_v40, %v520_v62  ;;  %v867_v1 = vpop.f32.mrb[6].mxu0  ;;  %v899_v2 = vpop.f32.mrb[6].mxu1 }
 0x100   :  { %996 = vtanh.f32 %v401_v59  ;;  %v404_v3 = vadd.f32 %v867_v1, %v1251_v40  ;;  %v395_v4 = vpop.f32.mrb[7].mxu0  ;;  %v523_v5 = vpop.f32.mrb[7].mxu1  ;;  %v532_v6 = vadd.f32 %v899_v2, %v1251_v40 }
 0x101   :  { %998 = vtanh.f32 %v529_v60  ;;  %v396_v8 = vadd.f32 %v1251_v40, %v395_v4  ;;  %v524_v10 = vadd.f32 %v1251_v40, %v523_v5 }
 0x102   :  { %v981_v7 = vpop.eup %980  ;;  %1000 = vtanh.f32 %v393_v63 }
 0x103   :  { %v983_v9 = vpop.eup %982  ;;  %697 = vst [vmem:[%s1512_s3 + $0x10] sm:$0xff] %v981_v7  ;;  %1002 = vtanh.f32 %v521_v0 }
 0x104   :  { %v985_v11 = vpop.eup %984  ;;  %729 = vst [vmem:[%s1512_s3 + $0x110] sm:$0xff] %v983_v9  ;;  %1004 = vtanh.f32 %v404_v3 }
 0x105   :  { %v987_v12 = vpop.eup %986  ;;  %695 = vst [vmem:[%s1512_s3] sm:$0xff] %v985_v11  ;;  %1006 = vtanh.f32 %v532_v6  ;;  %v870_v13 = vpop.f32.mrb[8].mxu0 }
 0x106   :  { %v902_v14 = vpop.f32.mrb[8].mxu1  ;;  %v989_v15 = vpop.eup %988  ;;  %727 = vst [vmem:[%s1512_s3 + $0x100] sm:$0xff] %v987_v12  ;;  %1008 = vtanh.f32 %v396_v8  ;;  %v417_v16 = vadd.f32 %v870_v13, %v1251_v40 }
 0x107   :  { %v545_v17 = vadd.f32 %v902_v14, %v1251_v40  ;;  %v408_v18 = vpop.f32.mrb[9].mxu0  ;;  %v536_v19 = vpop.f32.mrb[9].mxu1  ;;  %698 = vst [vmem:[%s1512_s3 + $0x18] sm:$0xff] %v989_v15  ;;  %1010 = vtanh.f32 %v524_v10 }
 0x108   :  { %v991_v20 = vpop.eup %990  ;;  %v409_v21 = vadd.f32 %v1251_v40, %v408_v18  ;;  %v537_v22 = vadd.f32 %v1251_v40, %v536_v19  ;;  %v871_v23 = vpop.f32.mrb[10].mxu0  ;;  %1012 = vtanh.f32 %v417_v16 }
 0x109   :  { %v903_v24 = vpop.f32.mrb[10].mxu1  ;;  %v993_v25 = vpop.eup %992  ;;  %730 = vst [vmem:[%s1512_s3 + $0x118] sm:$0xff] %v991_v20  ;;  %v420_v26 = vadd.f32 %v871_v23, %v1251_v40  ;;  %1014 = vtanh.f32 %v545_v17 }
 0x10a   :  { %v411_v27 = vpop.f32.mrb[11].mxu0  ;;  %v539_v28 = vpop.f32.mrb[11].mxu1  ;;  %696 = vst [vmem:[%s1512_s3 + $0x8] sm:$0xff] %v993_v25  ;;  %v548_v30 = vadd.f32 %v903_v24, %v1251_v40  ;;  %1016 = vtanh.f32 %v409_v21 }
 0x10b   :  { %v995_v29 = vpop.eup %994  ;;  %v412_v32 = vadd.f32 %v1251_v40, %v411_v27  ;;  %1018 = vtanh.f32 %v537_v22  ;;  %v540_v34 = vadd.f32 %v1251_v40, %v539_v28 }
 0x10c   :  { %v997_v31 = vpop.eup %996  ;;  %728 = vst [vmem:[%s1512_s3 + $0x108] sm:$0xff] %v995_v29  ;;  %1020 = vtanh.f32 %v420_v26 }
 0x10d   :  { %v999_v33 = vpop.eup %998  ;;  %701 = vst [vmem:[%s1512_s3 + $0x30] sm:$0xff] %v997_v31  ;;  %1022 = vtanh.f32 %v548_v30  ;;  %v874_v37 = vpop.f32.mrb[12].mxu0 }
 0x10e   :  { %v1001_v35 = vpop.eup %1000  ;;  %733 = vst [vmem:[%s1512_s3 + $0x130] sm:$0xff] %v999_v33  ;;  %v906_v38 = vpop.f32.mrb[12].mxu1  ;;  %1024 = vtanh.f32 %v412_v32  ;;  %v433_v41 = vadd.f32 %v874_v37, %v1251_v40 }
 0x10f   :  { %v1003_v36 = vpop.eup %1002  ;;  %699 = vst [vmem:[%s1512_s3 + $0x20] sm:$0xff] %v1001_v35  ;;  %v561_v42 = vadd.f32 %v906_v38, %v1251_v40  ;;  %v424_v43 = vpop.f32.mrb[13].mxu0  ;;  %1026 = vtanh.f32 %v540_v34 }
 0x110   :  { %v1005_v39 = vpop.eup %1004  ;;  %731 = vst [vmem:[%s1512_s3 + $0x120] sm:$0xff] %v1003_v36  ;;  %v552_v44 = vpop.f32.mrb[13].mxu1  ;;  %v425_v46 = vadd.f32 %v1251_v40, %v424_v43  ;;  %1028 = vtanh.f32 %v433_v41 }
 0x111   :  { %v1007_v45 = vpop.eup %1006  ;;  %702 = vst [vmem:[%s1512_s3 + $0x38] sm:$0xff] %v1005_v39  ;;  %v553_v47 = vadd.f32 %v1251_v40, %v552_v44  ;;  %v875_v48 = vpop.f32.mrb[14].mxu0  ;;  %1030 = vtanh.f32 %v561_v42 }
 0x112   :  { %v907_v49 = vpop.f32.mrb[14].mxu1  ;;  %v1009_v50 = vpop.eup %1008  ;;  %734 = vst [vmem:[%s1512_s3 + $0x138] sm:$0xff] %v1007_v45  ;;  %v436_v51 = vadd.f32 %v875_v48, %v1251_v40  ;;  %1032 = vtanh.f32 %v425_v46 }
 0x113   :  { %v427_v52 = vpop.f32.mrb[15].mxu0  ;;  %v555_v53 = vpop.f32.mrb[15].mxu1  ;;  %700 = vst [vmem:[%s1512_s3 + $0x28] sm:$0xff] %v1009_v50  ;;  %v564_v55 = vadd.f32 %v907_v49, %v1251_v40  ;;  %1034 = vtanh.f32 %v553_v47 }
 0x114   :  { %v1011_v54 = vpop.eup %1010  ;;  %v428_v57 = vadd.f32 %v1251_v40, %v427_v52  ;;  %v556_v59 = vadd.f32 %v1251_v40, %v555_v53  ;;  %1036 = vtanh.f32 %v436_v51 }
 0x115   :  { %v1013_v56 = vpop.eup %1012  ;;  %732 = vst [vmem:[%s1512_s3 + $0x128] sm:$0xff] %v1011_v54  ;;  %1038 = vtanh.f32 %v564_v55  ;;  %v878_v62 = vpop.f32.mrb[16].mxu0 }
 0x116   :  { %v1015_v58 = vpop.eup %1014  ;;  %705 = vst [vmem:[%s1512_s3 + $0x50] sm:$0xff] %v1013_v56  ;;  %v910_v63 = vpop.f32.mrb[16].mxu1  ;;  %1040 = vtanh.f32 %v428_v57  ;;  %v449_v1 = vadd.f32 %v878_v62, %v1251_v40 }
 0x117   :  { %v1017_v60 = vpop.eup %1016  ;;  %737 = vst [vmem:[%s1512_s3 + $0x150] sm:$0xff] %v1015_v58  ;;  %v577_v2 = vadd.f32 %v910_v63, %v1251_v40  ;;  %v440_v3 = vpop.f32.mrb[17].mxu0  ;;  %1042 = vtanh.f32 %v556_v59 }
 0x118   :  { %v1019_v61 = vpop.eup %1018  ;;  %703 = vst [vmem:[%s1512_s3 + $0x40] sm:$0xff] %v1017_v60  ;;  %v568_v4 = vpop.f32.mrb[17].mxu1  ;;  %v441_v6 = vadd.f32 %v1251_v40, %v440_v3  ;;  %1044 = vtanh.f32 %v449_v1 }
 0x119   :  { %v1021_v0 = vpop.eup %1020  ;;  %735 = vst [vmem:[%s1512_s3 + $0x140] sm:$0xff] %v1019_v61  ;;  %v569_v7 = vadd.f32 %v1251_v40, %v568_v4  ;;  %v879_v8 = vpop.f32.mrb[18].mxu0  ;;  %1046 = vtanh.f32 %v577_v2 }
 0x11a   :  { %v1023_v5 = vpop.eup %1022  ;;  %706 = vst [vmem:[%s1512_s3 + $0x58] sm:$0xff] %v1021_v0  ;;  %v911_v9 = vpop.f32.mrb[18].mxu1  ;;  %v452_v11 = vadd.f32 %v879_v8, %v1251_v40  ;;  %1048 = vtanh.f32 %v441_v6 }
 0x11b   :  { %v1025_v10 = vpop.eup %1024  ;;  %738 = vst [vmem:[%s1512_s3 + $0x158] sm:$0xff] %v1023_v5  ;;  %v443_v12 = vpop.f32.mrb[19].mxu0  ;;  %v580_v15 = vadd.f32 %v911_v9, %v1251_v40  ;;  %1050 = vtanh.f32 %v569_v7 }
 0x11c   :  { %v571_v13 = vpop.f32.mrb[19].mxu1  ;;  %v1027_v14 = vpop.eup %1026  ;;  %704 = vst [vmem:[%s1512_s3 + $0x48] sm:$0xff] %v1025_v10  ;;  %v444_v17 = vadd.f32 %v1251_v40, %v443_v12  ;;  %1052 = vtanh.f32 %v452_v11 }
 0x11d   :  { %v1029_v16 = vpop.eup %1028  ;;  %736 = vst [vmem:[%s1512_s3 + $0x148] sm:$0xff] %v1027_v14  ;;  %v572_v19 = vadd.f32 %v1251_v40, %v571_v13  ;;  %1054 = vtanh.f32 %v580_v15  ;;  %v882_v22 = vpop.f32.mrb[20].mxu0 }
 0x11e   :  { %v1031_v18 = vpop.eup %1030  ;;  %709 = vst [vmem:[%s1512_s3 + $0x70] sm:$0xff] %v1029_v16  ;;  %v914_v23 = vpop.f32.mrb[20].mxu1  ;;  %1056 = vtanh.f32 %v444_v17  ;;  %v465_v25 = vadd.f32 %v882_v22, %v1251_v40 }
 0x11f   :  { %v1033_v20 = vpop.eup %1032  ;;  %741 = vst [vmem:[%s1512_s3 + $0x170] sm:$0xff] %v1031_v18  ;;  %v593_v26 = vadd.f32 %v914_v23, %v1251_v40  ;;  %v456_v27 = vpop.f32.mrb[21].mxu0  ;;  %1058 = vtanh.f32 %v572_v19 }
 0x120   :  { %v1035_v21 = vpop.eup %1034  ;;  %707 = vst [vmem:[%s1512_s3 + $0x60] sm:$0xff] %v1033_v20  ;;  %v584_v28 = vpop.f32.mrb[21].mxu1  ;;  %v457_v30 = vadd.f32 %v1251_v40, %v456_v27  ;;  %1060 = vtanh.f32 %v465_v25 }
 0x121   :  { %v1037_v24 = vpop.eup %1036  ;;  %739 = vst [vmem:[%s1512_s3 + $0x160] sm:$0xff] %v1035_v21  ;;  %v585_v31 = vadd.f32 %v1251_v40, %v584_v28  ;;  %v883_v32 = vpop.f32.mrb[22].mxu0  ;;  %1062 = vtanh.f32 %v593_v26 }
 0x122   :  { %v1039_v29 = vpop.eup %1038  ;;  %710 = vst [vmem:[%s1512_s3 + $0x78] sm:$0xff] %v1037_v24  ;;  %v915_v33 = vpop.f32.mrb[22].mxu1  ;;  %v468_v35 = vadd.f32 %v883_v32, %v1251_v40  ;;  %1064 = vtanh.f32 %v457_v30 }
 0x123   :  { %v1041_v34 = vpop.eup %1040  ;;  %742 = vst [vmem:[%s1512_s3 + $0x178] sm:$0xff] %v1039_v29  ;;  %v459_v36 = vpop.f32.mrb[23].mxu0  ;;  %v596_v39 = vadd.f32 %v915_v33, %v1251_v40  ;;  %1066 = vtanh.f32 %v585_v31 }
 0x124   :  { %v587_v37 = vpop.f32.mrb[23].mxu1  ;;  %v1043_v38 = vpop.eup %1042  ;;  %708 = vst [vmem:[%s1512_s3 + $0x68] sm:$0xff] %v1041_v34  ;;  %v460_v42 = vadd.f32 %v1251_v40, %v459_v36  ;;  %1068 = vtanh.f32 %v468_v35 }
 0x125   :  { %v1045_v41 = vpop.eup %1044  ;;  %740 = vst [vmem:[%s1512_s3 + $0x168] sm:$0xff] %v1043_v38  ;;  %v588_v44 = vadd.f32 %v1251_v40, %v587_v37  ;;  %1070 = vtanh.f32 %v596_v39  ;;  %v886_v47 = vpop.f32.mrb[24].mxu0 }
 0x126   :  { %v1047_v43 = vpop.eup %1046  ;;  %713 = vst [vmem:[%s1512_s3 + $0x90] sm:$0xff] %v1045_v41  ;;  %v918_v48 = vpop.f32.mrb[24].mxu1  ;;  %1072 = vtanh.f32 %v460_v42  ;;  %v481_v50 = vadd.f32 %v886_v47, %v1251_v40 }
 0x127   :  { %v1049_v45 = vpop.eup %1048  ;;  %745 = vst [vmem:[%s1512_s3 + $0x190] sm:$0xff] %v1047_v43  ;;  %v609_v51 = vadd.f32 %v918_v48, %v1251_v40  ;;  %v472_v52 = vpop.f32.mrb[25].mxu0  ;;  %1074 = vtanh.f32 %v588_v44 }
 0x128   :  { %v1051_v46 = vpop.eup %1050  ;;  %711 = vst [vmem:[%s1512_s3 + $0x80] sm:$0xff] %v1049_v45  ;;  %v600_v53 = vpop.f32.mrb[25].mxu1  ;;  %v473_v55 = vadd.f32 %v1251_v40, %v472_v52  ;;  %1076 = vtanh.f32 %v481_v50 }
 0x129   :  { %v1053_v49 = vpop.eup %1052  ;;  %743 = vst [vmem:[%s1512_s3 + $0x180] sm:$0xff] %v1051_v46  ;;  %v601_v56 = vadd.f32 %v1251_v40, %v600_v53  ;;  %v887_v57 = vpop.f32.mrb[26].mxu0  ;;  %1078 = vtanh.f32 %v609_v51 }
 0x12a   :  { %v1055_v54 = vpop.eup %1054  ;;  %714 = vst [vmem:[%s1512_s3 + $0x98] sm:$0xff] %v1053_v49  ;;  %v919_v58 = vpop.f32.mrb[26].mxu1  ;;  %v484_v60 = vadd.f32 %v887_v57, %v1251_v40  ;;  %1080 = vtanh.f32 %v473_v55 }
 0x12b   :  { %v1057_v59 = vpop.eup %1056  ;;  %746 = vst [vmem:[%s1512_s3 + $0x198] sm:$0xff] %v1055_v54  ;;  %v475_v61 = vpop.f32.mrb[27].mxu0  ;;  %v612_v0 = vadd.f32 %v919_v58, %v1251_v40  ;;  %1082 = vtanh.f32 %v601_v56 }
 0x12c   :  { %v603_v62 = vpop.f32.mrb[27].mxu1  ;;  %v1059_v63 = vpop.eup %1058  ;;  %712 = vst [vmem:[%s1512_s3 + $0x88] sm:$0xff] %v1057_v59  ;;  %v476_v2 = vadd.f32 %v1251_v40, %v475_v61  ;;  %1084 = vtanh.f32 %v484_v60 }
 0x12d   :  { %v1061_v1 = vpop.eup %1060  ;;  %744 = vst [vmem:[%s1512_s3 + $0x188] sm:$0xff] %v1059_v63  ;;  %v604_v4 = vadd.f32 %v1251_v40, %v603_v62  ;;  %1086 = vtanh.f32 %v612_v0  ;;  %v890_v7 = vpop.f32.mrb[28].mxu0 }
 0x12e   :  { %v1063_v3 = vpop.eup %1062  ;;  %717 = vst [vmem:[%s1512_s3 + $0xb0] sm:$0xff] %v1061_v1  ;;  %v922_v8 = vpop.f32.mrb[28].mxu1  ;;  %1088 = vtanh.f32 %v476_v2  ;;  %v497_v10 = vadd.f32 %v890_v7, %v1251_v40 }
 0x12f   :  { %v1065_v5 = vpop.eup %1064  ;;  %749 = vst [vmem:[%s1512_s3 + $0x1b0] sm:$0xff] %v1063_v3  ;;  %v625_v11 = vadd.f32 %v922_v8, %v1251_v40  ;;  %v488_v12 = vpop.f32.mrb[29].mxu0  ;;  %1090 = vtanh.f32 %v604_v4 }
 0x130   :  { %v1067_v6 = vpop.eup %1066  ;;  %715 = vst [vmem:[%s1512_s3 + $0xa0] sm:$0xff] %v1065_v5  ;;  %v616_v13 = vpop.f32.mrb[29].mxu1  ;;  %v489_v15 = vadd.f32 %v1251_v40, %v488_v12  ;;  %1092 = vtanh.f32 %v497_v10 }
 0x131   :  { %v1069_v9 = vpop.eup %1068  ;;  %747 = vst [vmem:[%s1512_s3 + $0x1a0] sm:$0xff] %v1067_v6  ;;  %v617_v16 = vadd.f32 %v1251_v40, %v616_v13  ;;  %v891_v17 = vpop.f32.mrb[30].mxu0  ;;  %1094 = vtanh.f32 %v625_v11 }
 0x132   :  { %v1071_v14 = vpop.eup %1070  ;;  %718 = vst [vmem:[%s1512_s3 + $0xb8] sm:$0xff] %v1069_v9  ;;  %v923_v18 = vpop.f32.mrb[30].mxu1  ;;  %v500_v20 = vadd.f32 %v891_v17, %v1251_v40  ;;  %1096 = vtanh.f32 %v489_v15 }
 0x133   :  { %v1073_v19 = vpop.eup %1072  ;;  %750 = vst [vmem:[%s1512_s3 + $0x1b8] sm:$0xff] %v1071_v14  ;;  %v491_v21 = vpop.f32.mrb[31].mxu0  ;;  %v628_v24 = vadd.f32 %v923_v18, %v1251_v40  ;;  %1098 = vtanh.f32 %v617_v16 }
 0x134   :  { %v619_v22 = vpop.f32.mrb[31].mxu1  ;;  %v1075_v23 = vpop.eup %1074  ;;  %716 = vst [vmem:[%s1512_s3 + $0xa8] sm:$0xff] %v1073_v19  ;;  %v492_v26 = vadd.f32 %v1251_v40, %v491_v21  ;;  %1100 = vtanh.f32 %v500_v20 }
 0x135   :  { %v1077_v25 = vpop.eup %1076  ;;  %748 = vst [vmem:[%s1512_s3 + $0x1a8] sm:$0xff] %v1075_v23  ;;  %v620_v28 = vadd.f32 %v1251_v40, %v619_v22  ;;  %1102 = vtanh.f32 %v628_v24 }
 0x136   :  { %v1079_v27 = vpop.eup %1078  ;;  %721 = vst [vmem:[%s1512_s3 + $0xd0] sm:$0xff] %v1077_v25  ;;  %1104 = vtanh.f32 %v492_v26 }
 0x137   :  { %v1081_v29 = vpop.eup %1080  ;;  %753 = vst [vmem:[%s1512_s3 + $0x1d0] sm:$0xff] %v1079_v27  ;;  %1106 = vtanh.f32 %v620_v28 }
 0x138   :  { %v1083_v30 = vpop.eup %1082  ;;  %719 = vst [vmem:[%s1512_s3 + $0xc0] sm:$0xff] %v1081_v29 }
 0x139   :  { %v1085_v31 = vpop.eup %1084  ;;  %751 = vst [vmem:[%s1512_s3 + $0x1c0] sm:$0xff] %v1083_v30 }
 0x13a   :  { %v1087_v32 = vpop.eup %1086  ;;  %722 = vst [vmem:[%s1512_s3 + $0xd8] sm:$0xff] %v1085_v31 }
 0x13b   :  { %v1089_v40 = vpop.eup %1088  ;;  %754 = vst [vmem:[%s1512_s3 + $0x1d8] sm:$0xff] %v1087_v32 }
 0x13c   :  { %v1091_v33 = vpop.eup %1090  ;;  %720 = vst [vmem:[%s1512_s3 + $0xc8] sm:$0xff] %v1089_v40 }
 0x13d   :  { %v1093_v34 = vpop.eup %1092  ;;  %752 = vst [vmem:[%s1512_s3 + $0x1c8] sm:$0xff] %v1091_v33 }
 0x13e   :  { %v1095_v35 = vpop.eup %1094  ;;  %725 = vst [vmem:[%s1512_s3 + $0xf0] sm:$0xff] %v1093_v34 }
 0x13f   :  { %v1097_v36 = vpop.eup %1096  ;;  %757 = vst [vmem:[%s1512_s3 + $0x1f0] sm:$0xff] %v1095_v35 }
 0x140   :  { %v1099_v37 = vpop.eup %1098  ;;  %723 = vst [vmem:[%s1512_s3 + $0xe0] sm:$0xff] %v1097_v36 }
 0x141   :  { %v1101_v38 = vpop.eup %1100  ;;  %755 = vst [vmem:[%s1512_s3 + $0x1e0] sm:$0xff] %v1099_v37 }
 0x142   :  { %v1103_v39 = vpop.eup %1102  ;;  %726 = vst [vmem:[%s1512_s3 + $0xf8] sm:$0xff] %v1101_v38 }
 0x143   :  { %v1105_v41 = vpop.eup %1104  ;;  %758 = vst [vmem:[%s1512_s3 + $0x1f8] sm:$0xff] %v1103_v39 }
 0x144   :  { %v1107_v42 = vpop.eup %1106  ;;  %724 = vst [vmem:[%s1512_s3 + $0xe8] sm:$0xff] %v1105_v41 }
 0x145   :  { %756 = vst [vmem:[%s1512_s3 + $0x1e8] sm:$0xff] %v1107_v42 }

</bundles_post_ra>
